<compile_context>
chip_gen: v6e
topology: v6e:2x2x1
jax: 0.10.0
libtpu: 0.0.40
codegen_flags: <defaults>
</compile_context>

<pallas_src>
import functools

import jax
import jax.numpy as jnp
import numpy as np
from jax.experimental import pallas as pl
from jax.experimental.pallas import tpu as pltpu


# --------------------------------------------------------------------------
# Chip / tiling budgets
# --------------------------------------------------------------------------
def _detect_vmem_bytes():
    try:
        info = pltpu.get_tpu_info()
        for attr in ("vmem_capacity_bytes", "vmem_bytes", "vmem_size_bytes"):
            v = getattr(info, attr, None)
            if isinstance(v, int) and v > 0:
                return v
    except Exception:
        pass
    return 64 * 1024 * 1024          # conservative: assume v7x-sized VMEM


def _chip_budget():
    vmem = _detect_vmem_bytes()
    if vmem >= 100 * 1024 * 1024:    # v5e / v6e: 128 MiB physical VMEM
        return dict(max_tp_pool=2048, max_tp_asm=2048,
                    vmem_limit=64 * 1024 * 1024)
    # v7x: 64 MiB physical VMEM -> smaller output block, tighter scoped limit
    return dict(max_tp_pool=1024, max_tp_asm=1024,
                vmem_limit=44 * 1024 * 1024)


def _choose_point_tiling(n_pts, max_tp_pool, max_tp_asm):
    """Returns (tp_pool, tp_asm, padded_n_pts); avoids padding when it can."""
    def exact(max_tp):
        if n_pts <= max_tp:
            return n_pts                       # single full-extent tile
        start = max_tp - (max_tp % 128)
        for d in range(start, 127, -128):      # multiples of 128 dividing n_pts
            if n_pts % d == 0:
                return d
        return None

    tp_p, tp_a = exact(max_tp_pool), exact(max_tp_asm)
    if tp_p is not None and tp_a is not None:
        return tp_p, tp_a, n_pts
    # Rare fallback: one shared tile + padding (mask keeps the mean exact).
    tp = min(max_tp_pool, max_tp_asm)
    n_pad = pl.cdiv(n_pts, tp) * tp
    return tp, tp, n_pad


# --------------------------------------------------------------------------
# Pass 1: pooled 1024-d feature.  grid = (bs, n_split, tiles_per_split);
# the local-tile axis is a reduction; (bs, n_split) are parallel.
# --------------------------------------------------------------------------
def _pool_kernel(rgb_ref, cld_ref, w3r_ref, w3c_ref, b3_ref, w4_ref, b4_ref,
                 ap_ref, acc_ref, *, inv_n, n_valid_last):
    s_id = pl.program_id(1)
    t_id = pl.program_id(2)
    tp = rgb_ref.shape[-1]
    L = acc_ref.shape[-1]            # 128, or tp when tp is a single ragged tile

    @pl.when(t_id == 0)
    def _():
        acc_ref[...] = jnp.zeros_like(acc_ref)

    # conv3 on feat_1 = cat(rgb, cld): split-K, no in-kernel concat.
    h = (jnp.dot(w3r_ref[...], rgb_ref[0].astype(jnp.bfloat16),
                 preferred_element_type=jnp.float32)
         + jnp.dot(w3c_ref[...], cld_ref[0].astype(jnp.bfloat16),
                   preferred_element_type=jnp.float32)
         + b3_ref[...])
    h = jnp.maximum(h, 0.0)
    h = jnp.dot(w4_ref[...], h.astype(jnp.bfloat16),
                preferred_element_type=jnp.float32) + b4_ref[...]
    h = jnp.maximum(h, 0.0)                                   # (1024, tp) f32

    def _accum(hv):
        # Lane-dense accumulation: pure VPU adds of 128-lane slices.
        partial = hv[:, 0:L]
        for i in range(1, tp // L):
            partial = partial + hv[:, i * L:(i + 1) * L]
        acc_ref[...] += partial

    if n_valid_last is None:
        _accum(h)
    else:
        # Padded fallback: mask only the globally last tile.
        is_last = jnp.logical_and(s_id == pl.num_programs(1) - 1,
                                  t_id == pl.num_programs(2) - 1)

        @pl.when(is_last)
        def _():
            col = jax.lax.broadcasted_iota(jnp.int32, (1, tp), 1)
            _accum(jnp.where(col < n_valid_last, h, 0.0))

        @pl.when(jnp.logical_not(is_last))
        def _():
            _accum(h)

    @pl.when(t_id == pl.num_programs(2) - 1)
    def _():
        # One cross-lane reduce per (batch, split); emit lane-replicated.
        total = jnp.sum(acc_ref[...], axis=-1, keepdims=True) * inv_n
        ap_ref[0, 0] = jnp.broadcast_to(total, ap_ref.shape[2:])


# --------------------------------------------------------------------------
# Pass 2: assemble the 1792 output channels of one (batch, point-tile) block.
# Fully parallel grid; HBM-write-bound.  No concat temporaries.
# --------------------------------------------------------------------------
def _assemble_kernel(rgb_ref, cld_ref, ap_ref,
                     w2r_ref, b2r_ref, w2c_ref, b2c_ref, out_ref):
    rgb = rgb_ref[0]                                          # (128, tp) f32
    cld = cld_ref[0]
    tp = out_ref.shape[-1]

    # feat_1: raw input copies -> channels [0, 256)  (bit-exact f32)
    out_ref[0, 0:128, :] = rgb
    out_ref[0, 128:256, :] = cld

    # feat_2: relu(conv2_rgb), relu(conv2_cld) -> channels [256, 768)
    r = jnp.dot(w2r_ref[...], rgb.astype(jnp.bfloat16),
                preferred_element_type=jnp.float32) + b2r_ref[...]
    out_ref[0, 256:512, :] = jnp.maximum(r, 0.0)
    c = jnp.dot(w2c_ref[...], cld.astype(jnp.bfloat16),
                preferred_element_type=jnp.float32) + b2c_ref[...]
    out_ref[0, 512:768, :] = jnp.maximum(c, 0.0)

    # pooled global feature (sum of split partial means), lane-replicated.
    ap = ap_ref[0, 0]
    for s in range(1, ap_ref.shape[1]):
        ap = ap + ap_ref[0, s]
    aw = ap.shape[-1]                                         # 128
    if tp <= aw:
        out_ref[0, 768:1792, :] = ap[:, :tp]
    else:
        n_full = tp // aw
        for i in range(n_full):
            out_ref[0, 768:1792, i * aw:(i + 1) * aw] = ap
        rem = tp - n_full * aw
        if rem:
            out_ref[0, 768:1792, n_full * aw:] = ap[:, :rem]


# --------------------------------------------------------------------------
# Wrapper
# --------------------------------------------------------------------------
def rgbd_feat_pallas(rgb_emb, cld_emb, params):
    """rgb_emb, cld_emb: (bs, 128, n_pts) float32 (PyTorch NCL layout).

    Returns (bs, 1792, n_pts) float32 matching RGBDFeat.forward.
    """
    bs, c_in, n_pts = rgb_emb.shape
    assert c_in == 128 and cld_emb.shape == rgb_emb.shape
    w2r, b2r, w2c, b2c, w3, b3, w4, b4 = params   # PyTorch-native (Cout, Cin)

    budget = _chip_budget()
    tp_p, tp_a, n_pad = _choose_point_tiling(
        n_pts, budget["max_tp_pool"], budget["max_tp_asm"])
    vmem_limit = budget["vmem_limit"]

    if n_pad != n_pts:   # rare fallback (non-128-friendly huge n_pts)
        pad = ((0, 0), (0, 0), (0, n_pad - n_pts))
        rgb_emb = jnp.pad(rgb_emb, pad)
        cld_emb = jnp.pad(cld_emb, pad)

    n_tiles_p = n_pad // tp_p
    n_tiles_a = n_pad // tp_a
    # Split the pool reduction across 2 TCs when batch alone can't (v7x).
    n_split = 2 if (bs % 2 == 1 and n_tiles_p % 2 == 0) else 1
    tiles_per_split = n_tiles_p // n_split

    # Lane width of the pool accumulator scratch.
    L = 128 if tp_p % 128 == 0 else tp_p

    n_valid_last = None
    if n_pad != n_pts:
        n_valid_last = n_pts - (n_tiles_p - 1) * tp_p

    bf = lambda w: w.astype(jnp.bfloat16)
    col = lambda b: b.reshape(-1, 1).astype(jnp.float32)
    w3r, w3c = w3[:, :128], w3[:, 128:]           # split-K, no in-kernel concat

    # ---- pass 1: pooled 1024-d global feature per (batch, split) -----------
    pool = functools.partial(_pool_kernel, inv_n=1.0 / n_pts,
                             n_valid_last=n_valid_last)
    pin = lambda shp: pl.BlockSpec(shp, lambda b, s, t: (0,) * len(shp))
    inp_spec_p = pl.BlockSpec(
        (1, 128, tp_p), lambda b, s, t: (b, 0, s * tiles_per_split + t))

    ap = pl.pallas_call(
        pool,
        out_shape=jax.ShapeDtypeStruct((bs, n_split, 1024, 128), jnp.float32),
        grid_spec=pltpu.PrefetchScalarGridSpec(
            num_scalar_prefetch=0,
            grid=(bs, n_split, tiles_per_split),
            in_specs=[
                inp_spec_p, inp_spec_p,
                pin((512, 128)), pin((512, 128)), pin((512, 1)),   # conv3
                pin((1024, 512)), pin((1024, 1)),                  # conv4
            ],
            out_specs=pl.BlockSpec((1, 1, 1024, 128),
                                   lambda b, s, t: (b, s, 0, 0)),
            scratch_shapes=[pltpu.VMEM((1024, L), jnp.float32)],
        ),
        compiler_params=pltpu.CompilerParams(
            dimension_semantics=("parallel", "parallel", "arbitrary"),
            vmem_limit_bytes=vmem_limit),
    )(rgb_emb, cld_emb, bf(w3r), bf(w3c), col(b3), bf(w4), col(b4))

    # ---- pass 2: write all 1792 output channels, fully parallel -------------
    ain = lambda shp: pl.BlockSpec(shp, lambda b, t: (0,) * len(shp))
    inp_spec_a = pl.BlockSpec((1, 128, tp_a), lambda b, t: (b, 0, t))

    out = pl.pallas_call(
        _assemble_kernel,
        out_shape=jax.ShapeDtypeStruct((bs, 1792, n_pad), jnp.float32),
        grid_spec=pltpu.PrefetchScalarGridSpec(
            num_scalar_prefetch=0,
            grid=(bs, n_tiles_a),
            in_specs=[
                inp_spec_a, inp_spec_a,
                pl.BlockSpec((1, n_split, 1024, 128),
                             lambda b, t: (b, 0, 0, 0)),            # pooled
                ain((256, 128)), ain((256, 1)),                     # conv2_rgb
                ain((256, 128)), ain((256, 1)),                     # conv2_cld
            ],
            out_specs=pl.BlockSpec((1, 1792, tp_a), lambda b, t: (b, 0, t)),
        ),
        compiler_params=pltpu.CompilerParams(
            dimension_semantics=("parallel", "parallel"),
            vmem_limit_bytes=vmem_limit),
    )(rgb_emb, cld_emb, ap, bf(w2r), col(b2r), bf(w2c), col(b2c))

    if n_pad != n_pts:
        out = out[:, :, :n_pts]
    return out


# --------------------------------------------------------------------------
# Parameters + pure-JAX reference
# --------------------------------------------------------------------------
def init_params(key):
    """Deterministic synthetic parameters in PyTorch-native layout:
    weights (Cout, Cin), biases (Cout,)."""
    ks = jax.random.split(key, 8)
    w = lambda k, cout, cin: jax.random.normal(k, (cout, cin), jnp.float32) * 0.02
    b = lambda k, cout: jax.random.normal(k, (cout,), jnp.float32) * 0.01
    return (
        w(ks[0], 256, 128), b(ks[1], 256),      # conv2_rgb
        w(ks[2], 256, 128), b(ks[3], 256),      # conv2_cld
        w(ks[4], 512, 256), b(ks[5], 512),      # conv3
        w(ks[6], 1024, 512), b(ks[7], 1024),    # conv4
    )


def rgbd_feat_ref(rgb_emb, cld_emb, params):
    """Pure-JAX f32 reference mirroring the PyTorch forward (NCL layout)."""
    w2r, b2r, w2c, b2c, w3, b3, w4, b4 = params
    conv = lambda x, w, b: jnp.einsum("bcn,oc->bon", x, w) + b.reshape(1, -1, 1)
    feat_1 = jnp.concatenate([rgb_emb, cld_emb], axis=1)
    r = jax.nn.relu(conv(rgb_emb, w2r, b2r))
    c = jax.nn.relu(conv(cld_emb, w2c, b2c))
    feat_2 = jnp.concatenate([r, c], axis=1)
    h = jax.nn.relu(conv(feat_1, w3, b3))
    h = jax.nn.relu(conv(h, w4, b4))
    ap = jnp.mean(h, axis=2, keepdims=True)
    ap = jnp.broadcast_to(ap, h.shape)
    return jnp.concatenate([feat_1, feat_2, ap], axis=1)


if __name__ == "__main__":
    key = jax.random.PRNGKey(0)
    k_rgb, k_cld, k_params = jax.random.split(key, 3)

    bs, c_in, n_pts = 2, 128, 16  # num_points = 16 (small test shape)
    rgb_emb = jax.random.normal(k_rgb, (bs, c_in, n_pts), jnp.float32)
    cld_emb = jax.random.normal(k_cld, (bs, c_in, n_pts), jnp.float32)
    params = init_params(k_params)

    out = jax.block_until_ready(rgbd_feat_pallas(rgb_emb, cld_emb, params))
    assert out.shape == (bs, 256 + 512 + 1024, n_pts), out.shape

    ref = jax.block_until_ready(rgbd_feat_ref(rgb_emb, cld_emb, params))
    # bf16 MXU operands (f32 accumulation) -> compare at bf16-level tolerance.
    np.testing.assert_allclose(np.asarray(out), np.asarray(ref),
                               rtol=2e-2, atol=2e-2)
    # feat_1 channels are raw copies of the inputs -> bit-exact.
    np.testing.assert_array_equal(
        np.asarray(out[:, :256]),
        np.asarray(jnp.concatenate([rgb_emb, cld_emb], axis=1)))

    print("KERNEL_OK")
</pallas_src>

<mosaic_0001>
module attributes {stable_mosaic.version = 11 : i64} {
  func.func @_pool_kernel(%arg0: i32, %arg1: i32, %arg2: i32, %arg3: memref<1x128x16xf32, #tpu.memory_space<vmem>>, %arg4: memref<1x128x16xf32, #tpu.memory_space<vmem>>, %arg5: memref<512x128xbf16, #tpu.memory_space<vmem>>, %arg6: memref<512x128xbf16, #tpu.memory_space<vmem>>, %arg7: memref<512x1xf32, #tpu.memory_space<vmem>>, %arg8: memref<1024x512xbf16, #tpu.memory_space<vmem>>, %arg9: memref<1024x1xf32, #tpu.memory_space<vmem>>, %arg10: memref<1x1x1024x128xf32, #tpu.memory_space<vmem>>, %arg11: memref<1024x16xf32, #tpu.memory_space<vmem>>) attributes {dimension_semantics = [#tpu.dimension_semantics<parallel>, #tpu.dimension_semantics<parallel>, #tpu.dimension_semantics<arbitrary>], iteration_bounds = array<i64: 2, 1, 1>, scalar_prefetch = 0 : i64, scratch_operands = 1 : i64, tpu.core_type = #tpu.core_type<tc>, window_params = [{transform_indices = @transform_0, window_bounds = array<i64: 1, 128, 16>}, {transform_indices = @transform_1, window_bounds = array<i64: 1, 128, 16>}, {pipeline_mode = #tpu.pipeline_mode<synchronous>, transform_indices = @transform_2, window_bounds = array<i64: 512, 128>}, {pipeline_mode = #tpu.pipeline_mode<synchronous>, transform_indices = @transform_3, window_bounds = array<i64: 512, 128>}, {pipeline_mode = #tpu.pipeline_mode<synchronous>, transform_indices = @transform_4, window_bounds = array<i64: 512, 1>}, {pipeline_mode = #tpu.pipeline_mode<synchronous>, transform_indices = @transform_5, window_bounds = array<i64: 1024, 512>}, {pipeline_mode = #tpu.pipeline_mode<synchronous>, transform_indices = @transform_6, window_bounds = array<i64: 1024, 1>}, {transform_indices = @transform_7, window_bounds = array<i64: 1, 1, 1024, 128>}]} {
    %c0_i32 = arith.constant 0 : i32
    %0 = arith.cmpi eq, %arg2, %c0_i32 : i32
    %1 = arith.extui %0 : i1 to i32
    %c0_i32_0 = arith.constant 0 : i32
    %2 = arith.cmpi ne, %1, %c0_i32_0 : i32
    scf.if %2 {
      %cst_26 = arith.constant 0.000000e+00 : f32
      %33 = vector.broadcast %cst_26 : f32 to vector<1024x16xf32>
      %c0_27 = arith.constant 0 : index
      %c0_28 = arith.constant 0 : index
      %34 = vector.load %arg11[%c0_27, %c0_28] : memref<1024x16xf32, #tpu.memory_space<vmem>>, vector<1024x16xf32>
      tpu.vector_store %arg11[%c0_27, %c0_28], %33 {strides = array<i32>} : memref<1024x16xf32, #tpu.memory_space<vmem>>, vector<1024x16xf32>,
    } else {
    }
    %c0 = arith.constant 0 : index
    %c0_1 = arith.constant 0 : index
    %3 = vector.load %arg5[%c0, %c0_1] : memref<512x128xbf16, #tpu.memory_space<vmem>>, vector<512x128xbf16>
    %c0_2 = arith.constant 0 : index
    %c0_3 = arith.constant 0 : index
    %c0_4 = arith.constant 0 : index
    %4 = vector.load %arg3[%c0_2, %c0_3, %c0_4] : memref<1x128x16xf32, #tpu.memory_space<vmem>>, vector<1x128x16xf32>
    %5 = vector.shape_cast %4 : vector<1x128x16xf32> to vector<128x16xf32>
    %6 = arith.truncf %5 : vector<128x16xf32> to vector<128x16xbf16>
    %cst = arith.constant dense<0.000000e+00> : vector<512x16xf32>
    %7 = tpu.matmul %3, %6, %cst {dimension_numbers = #tpu.dot_dimension_numbers<[1], [0], [0], [1], [0, 0, 1, 1], [], []>} : vector<512x128xbf16>, vector<128x16xbf16>, vector<512x16xf32> -> vector<512x16xf32>
    %c0_5 = arith.constant 0 : index
    %c0_6 = arith.constant 0 : index
    %8 = vector.load %arg6[%c0_5, %c0_6] : memref<512x128xbf16, #tpu.memory_space<vmem>>, vector<512x128xbf16>
    %c0_7 = arith.constant 0 : index
    %c0_8 = arith.constant 0 : index
    %c0_9 = arith.constant 0 : index
    %9 = vector.load %arg4[%c0_7, %c0_8, %c0_9] : memref<1x128x16xf32, #tpu.memory_space<vmem>>, vector<1x128x16xf32>
    %10 = vector.shape_cast %9 : vector<1x128x16xf32> to vector<128x16xf32>
    %11 = arith.truncf %10 : vector<128x16xf32> to vector<128x16xbf16>
    %cst_10 = arith.constant dense<0.000000e+00> : vector<512x16xf32>
    %12 = tpu.matmul %8, %11, %cst_10 {dimension_numbers = #tpu.dot_dimension_numbers<[1], [0], [0], [1], [0, 0, 1, 1], [], []>} : vector<512x128xbf16>, vector<128x16xbf16>, vector<512x16xf32> -> vector<512x16xf32>
    %13 = arith.addf %7, %12 : vector<512x16xf32>
    %c0_11 = arith.constant 0 : index
    %c0_12 = arith.constant 0 : index
    %14 = vector.load %arg7[%c0_11, %c0_12] : memref<512x1xf32, #tpu.memory_space<vmem>>, vector<512x1xf32>
    %15 = vector.broadcast %14 : vector<512x1xf32> to vector<512x16xf32>
    %16 = arith.addf %13, %15 : vector<512x16xf32>
    %cst_13 = arith.constant 0.000000e+00 : f32
    %17 = vector.broadcast %cst_13 : f32 to vector<512x16xf32>
    %18 = arith.maximumf %16, %17 : vector<512x16xf32>
    %c0_14 = arith.constant 0 : index
    %c0_15 = arith.constant 0 : index
    %19 = vector.load %arg8[%c0_14, %c0_15] : memref<1024x512xbf16, #tpu.memory_space<vmem>>, vector<1024x512xbf16>
    %20 = arith.truncf %18 : vector<512x16xf32> to vector<512x16xbf16>
    %cst_16 = arith.constant dense<0.000000e+00> : vector<1024x16xf32>
    %21 = tpu.matmul %19, %20, %cst_16 {dimension_numbers = #tpu.dot_dimension_numbers<[1], [0], [0], [1], [0, 0, 1, 1], [], []>} : vector<1024x512xbf16>, vector<512x16xbf16>, vector<1024x16xf32> -> vector<1024x16xf32>
    %c0_17 = arith.constant 0 : index
    %c0_18 = arith.constant 0 : index
    %22 = vector.load %arg9[%c0_17, %c0_18] : memref<1024x1xf32, #tpu.memory_space<vmem>>, vector<1024x1xf32>
    %23 = vector.broadcast %22 : vector<1024x1xf32> to vector<1024x16xf32>
    %24 = arith.addf %21, %23 : vector<1024x16xf32>
    %cst_19 = arith.constant 0.000000e+00 : f32
    %25 = vector.broadcast %cst_19 : f32 to vector<1024x16xf32>
    %26 = arith.maximumf %24, %25 : vector<1024x16xf32>
    %c0_20 = arith.constant 0 : index
    %c0_21 = arith.constant 0 : index
    %27 = vector.load %arg11[%c0_20, %c0_21] : memref<1024x16xf32, #tpu.memory_space<vmem>>, vector<1024x16xf32>
    %28 = arith.addf %27, %26 : vector<1024x16xf32>
    %c0_22 = arith.constant 0 : index
    %c0_23 = arith.constant 0 : index
    %29 = vector.load %arg11[%c0_22, %c0_23] : memref<1024x16xf32, #tpu.memory_space<vmem>>, vector<1024x16xf32>
    tpu.vector_store %arg11[%c0_22, %c0_23], %28 {strides = array<i32>} : memref<1024x16xf32, #tpu.memory_space<vmem>>, vector<1024x16xf32>,
    %c0_i32_24 = arith.constant 0 : i32
    %30 = arith.cmpi eq, %arg2, %c0_i32_24 : i32
    %31 = arith.extui %30 : i1 to i32
    %c0_i32_25 = arith.constant 0 : i32
    %32 = arith.cmpi ne, %31, %c0_i32_25 : i32
    scf.if %32 {
      %c0_26 = arith.constant 0 : index
      %c0_27 = arith.constant 0 : index
      %33 = vector.load %arg11[%c0_26, %c0_27] : memref<1024x16xf32, #tpu.memory_space<vmem>>, vector<1024x16xf32>
      %cst_28 = arith.constant dense<0.000000e+00> : vector<1024xf32>
      %34 = vector.multi_reduction <add>, %33, %cst_28 [1] : vector<1024x16xf32> to vector<1024xf32>
      %35 = vector.shape_cast %34 : vector<1024xf32> to vector<1024x1xf32>
      %cst_29 = arith.constant 6.250000e-02 : f32
      %36 = vector.broadcast %cst_29 : f32 to vector<1024x1xf32>
      %37 = arith.mulf %35, %36 : vector<1024x1xf32>
      %38 = vector.shape_cast %37 : vector<1024x1xf32> to vector<1024x1xf32>
      %39 = vector.broadcast %38 : vector<1024x1xf32> to vector<1024x128xf32>
      %c0_30 = arith.constant 0 : index
      %c0_31 = arith.constant 0 : index
      %c0_32 = arith.constant 0 : index
      %c0_33 = arith.constant 0 : index
      %40 = vector.load %arg10[%c0_30, %c0_31, %c0_32, %c0_33] : memref<1x1x1024x128xf32, #tpu.memory_space<vmem>>, vector<1x1x1024x128xf32>
      %41 = vector.shape_cast %40 : vector<1x1x1024x128xf32> to vector<1024x128xf32>
      %42 = vector.shape_cast %39 : vector<1024x128xf32> to vector<1x1x1024x128xf32>
      tpu.vector_store %arg10[%c0_30, %c0_31, %c0_32, %c0_33], %42 {strides = array<i32>} : memref<1x1x1024x128xf32, #tpu.memory_space<vmem>>, vector<1x1x1024x128xf32>,
    } else {
    }
    return
  }
  func.func @transform_0(%arg0: i32, %arg1: i32, %arg2: i32) -> (i32, i32, i32) {
    %c1_i32 = arith.constant 1 : i32
    %0 = arith.muli %arg1, %c1_i32 : i32
    %1 = arith.addi %0, %arg2 : i32
    %c0_i32 = arith.constant 0 : i32
    %c0_i32_0 = arith.constant 0 : i32
    return %arg0, %c0_i32, %1 : i32, i32, i32
  }
  func.func @transform_1(%arg0: i32, %arg1: i32, %arg2: i32) -> (i32, i32, i32) {
    %c1_i32 = arith.constant 1 : i32
    %0 = arith.muli %arg1, %c1_i32 : i32
    %1 = arith.addi %0, %arg2 : i32
    %c0_i32 = arith.constant 0 : i32
    %c0_i32_0 = arith.constant 0 : i32
    return %arg0, %c0_i32, %1 : i32, i32, i32
  }
  func.func @transform_2(%arg0: i32, %arg1: i32, %arg2: i32) -> (i32, i32) {
    %c0_i32 = arith.constant 0 : i32
    %c0_i32_0 = arith.constant 0 : i32
    %c0_i32_1 = arith.constant 0 : i32
    return %c0_i32, %c0_i32_0 : i32, i32
  }
  func.func @transform_3(%arg0: i32, %arg1: i32, %arg2: i32) -> (i32, i32) {
    %c0_i32 = arith.constant 0 : i32
    %c0_i32_0 = arith.constant 0 : i32
    %c0_i32_1 = arith.constant 0 : i32
    return %c0_i32, %c0_i32_0 : i32, i32
  }
  func.func @transform_4(%arg0: i32, %arg1: i32, %arg2: i32) -> (i32, i32) {
    %c0_i32 = arith.constant 0 : i32
    %c0_i32_0 = arith.constant 0 : i32
    %c0_i32_1 = arith.constant 0 : i32
    return %c0_i32, %c0_i32_0 : i32, i32
  }
  func.func @transform_5(%arg0: i32, %arg1: i32, %arg2: i32) -> (i32, i32) {
    %c0_i32 = arith.constant 0 : i32
    %c0_i32_0 = arith.constant 0 : i32
    %c0_i32_1 = arith.constant 0 : i32
    return %c0_i32, %c0_i32_0 : i32, i32
  }
  func.func @transform_6(%arg0: i32, %arg1: i32, %arg2: i32) -> (i32, i32) {
    %c0_i32 = arith.constant 0 : i32
    %c0_i32_0 = arith.constant 0 : i32
    %c0_i32_1 = arith.constant 0 : i32
    return %c0_i32, %c0_i32_0 : i32, i32
  }
  func.func @transform_7(%arg0: i32, %arg1: i32, %arg2: i32) -> (i32, i32, i32, i32) {
    %c0_i32 = arith.constant 0 : i32
    %c0_i32_0 = arith.constant 0 : i32
    %c0_i32_1 = arith.constant 0 : i32
    return %arg0, %arg1, %c0_i32, %c0_i32_0 : i32, i32, i32, i32
  }
}

</mosaic_0001>

<bundles_post_ra>
// kernel: tpu_custom_call.1
= control target key start
LH: loop header
LB: loop body
LE: loop exit
PB: predicated region body
PF: predicated region fallthrough
CT: control target
= control target key end

     0   :  { %12 = vsyncpa [#allocation4], 0  ;;  %s11742_s0 = inlined_call_operand.vmem [shape: f32[2,128,16], index: 0, kind: input, shape index: {}]   ;;  %s11743_s1 = inlined_call_operand.vmem [shape: f32[2,128,16], index: 1, kind: input, shape index: {}]   ;;  %s11744_s2 = inlined_call_operand.hbm [shape: bf16[512,128], index: 2, kind: input, shape index: {}]   ;;  %s11745_s3 = inlined_call_operand.hbm [shape: bf16[512,128], index: 3, kind: input, shape index: {}]   ;;  %s11746_s4 = inlined_call_operand.vmem [shape: f32[512,1], index: 4, kind: input, shape index: {}]   ;;  %s11747_s5 = inlined_call_operand.vmem [shape: bf16[1024,512], index: 5, kind: input, shape index: {}]   ;;  %s11748_s6 = inlined_call_operand.vmem [shape: f32[1024,1], index: 6, kind: input, shape index: {}]   ;;  %s11749_s7 = inlined_call_operand.hbm [shape: f32[2,1,1024,128], index: 7, kind: output, shape index: {}]  }
   0x1   :  { %13 = vsyncpa [#allocation7], 0 }
   0x2   :  { %14 = vsyncpa [#allocation5], 0 }
   0x3   :  { %16 = vsyncpa [#allocation5 + $0x1], 0  ;;  %s8317_s24 = smov 0   ;;  %s8319_s25 = smov 0  }
   0x4   :  { %s8321_s26 = smov 0   ;;  %s8323_s27 = smov 0  }
   0x5   :  { %s8325_s28 = smov 0   ;;  %s8327_s29 = smov 0  }
   0x6 LB: > { %s7016_s30 = sadd.s32 4294967295, %s8266_s29   ;;  %s7017_s8 = sadd.s32 4294967294, %s8266_s29   ;;  %s8266_s29 = sphi %s8327_s29, %s22_s29   ;;  %s8262_s28 = sphi %s8325_s28, %s11979_s28   ;;  %s8258_s27 = sphi %s8323_s27, %s11978_s27   ;;  %s8254_s26 = sphi %s8321_s26, %s11977_s26   ;;  %s8250_s25 = sphi %s8319_s25, %s11976_s25   ;;  %s8246_s24 = sphi %s8317_s24, %s11975_s24  }
   0x7   : > { %s41_s9 = sadd.s32 1, %s8262_s28  ;;  %s215_s10 = sadd.s32 1, %s8254_s26 }
   0x8   : > { %p43_p0 = scmp.ge.s32.totalorder %s41_s9, 2  ;;  %p225_p1 = scmp.ne.s32.totalorder %s8254_s26, %s8250_s25 }
   0x9   : > { %p226_p2 = scmp.eq.s32.totalorder %s7016_s30, 1  ;;  %p231_p3 = scmp.ne.s32.totalorder %s8250_s25, %s8246_s24 }
   0xa   : > { %s11981_s9 = smov (%p43_p0, %s41_s9), 0  ;;  %p232_p5 = scmp.eq.s32.totalorder %s7017_s8, 1 }
   0xb   : > { %p8357_p4 = por %p226_p2, %p225_p1  ;;  %s210_s12 = ssub.s32 %s8262_s28, %s11981_s9 }
   0xc   : > { %p7018_p6 = scmp.ge.s32.totalorder %s8266_s29, 1  ;;  %p213_p7 = scmp.eq.s32.totalorder %s210_s12, 0 }
   0xd   : > { %s11753_s11 = scalar_select %p8357_p4, 1, 0 }
   0xe   : > { %p8364_p8 = por %p232_p5, %p231_p3  ;;  %p239_p9 = scmp.lt.s32.totalorder %s8266_s29, 3 }
   0xf   : > { %s8370_s14 = scalar_select %p213_p7, %s8254_s26, %s215_s10  }
  0x10   : > { %s11754_s13 = scalar_select %p8364_p8, 1, 0 }
  0x11   : > { %p8372_p10 = pnand %p7018_p6, %p239_p9  ;;  %p8376_p11 = scmp.eq.s32.totalorder %s7016_s30, 0 }
  0x12   : > { %s8268_s17 = smov [#allocation3]   ;;  %s8269_s20 = smov [#allocation6]  }
  0x13   : > { %p7608_p12 = pneg %p8372_p10  ;;  %s251_s18 = sshll.u32 %s8268_s17, 4  ;;  %s252_s18 = int_to_ptr.vmem [resolvable:$true] %s251_s18 }
  0x14   : > { %s264_s21 = sshll.u32 %s8269_s20, 4  ;;  %s8141_s22 = scalar_lea.vmem %s252_s18, 4096  ;;  %s265_s21 = int_to_ptr.vmem [resolvable:$true] %s264_s21 }
  0x15   : > { %p8384_p13 = pnand %p8376_p11, %p7608_p12  ;;  %p8142_p1 = scmp.ne.s32.totalorder %s252_s18, %s8141_s22 }
  0x16   : > { %p8149_p5 = scmp.lt.s32.totalorder %s252_s18, %s252_s18  ;;  %p8150_p6 = scmp.lt.s32.totalorder %s8141_s22, %s8141_s22 }
  0x17   : > { %p8132_p0 = pneg %p8384_p13 }
  0x18   : > { %p8151_p7 = por %p8150_p6, %p8149_p5 }
  0x19   : > { %p8144_p2 = pnand %p8142_p1, %p8132_p0 }
  0x1b   : > { %p8145_p3 = pneg %p8144_p2 }
  0x1d   : > { %p8152_p9 = pnand %p8151_p7, %p8145_p3 }
  0x1f   : > { %8155 = shalt.err (!%p8152_p9)
}
  0x20   : > { %s8270_s23 = smov 64   ;;  %s8271_s30 = smov 4  }
  0x21   : > { %7611 = dma.hbm_to_vmem [thread:$0]  (!%p8384_p13), %s11744_s2, 4096, %s252_s18, [#allocation4], %s8270_s23, %s8270_s23, %s8271_s30  }
  0x22   : > { %s8167_s12 = scalar_lea.vmem %s265_s21, 4096  ;;  %p8175_p8 = scmp.lt.s32.totalorder %s265_s21, %s265_s21 }
  0x23   : > { %p8168_p12 = scmp.ne.s32.totalorder %s265_s21, %s8167_s12  ;;  %p8176_p4 = scmp.lt.s32.totalorder %s8167_s12, %s8167_s12 }
  0x25   : > { %p8170_p1 = pnand %p8168_p12, %p8132_p0  ;;  %p8177_p5 = por %p8176_p4, %p8175_p8 }
  0x27   : > { %p8171_p2 = pneg %p8170_p1 }
  0x29   : > { %p8178_p3 = pnand %p8177_p5, %p8171_p2 }
  0x2b   : > { %8181 = shalt.err (!%p8178_p3)
}
  0x2c   : > { %7614 = dma.hbm_to_vmem [thread:$0]  (!%p8384_p13), %s11745_s3, 4096, %s265_s21, [#allocation7], %s8270_s23, %s8270_s23, %s8271_s30  }
  0x2d   : > { %315 = sbr.rel (%p8372_p10) target bundleno = 1322 (0x52a), region = 48 }
  0x32   : > { %8233 = dma.done.wait (%p8376_p11), [#allocation4], 4096  }
  0x33   : > { %8235 = vsyncadd (%p8376_p11), [#allocation4], 4294963200 }
  0x34   : > { %8237 = dma.done.wait (%p8376_p11), [#allocation7], 4096  }
  0x35   : > { %8239 = vsyncadd (%p8376_p11), [#allocation7], 4294963200  ;;  %p365_p4 = scmp.lt.s32.totalorder %s8258_s27, 1  ;;  %v11751_v0 = vmov 0   ;;  %v1658_v1 = vld [vmem:[%s11746_s4 + $0x10] sm:$0xff]  ;;  %v1656_v2 = vld [vmem:[%s11746_s4] sm:$0xff] }
  0x36   : > { %7681 = vset.pattern.permute.xlu1 %v11751_v0  ;;  %7680 = vset.pattern.permute.xlu0 %v11751_v0  ;;  %v1659_v9 = vld [vmem:[%s11746_s4 + $0x18] sm:$0xff]  ;;  %v1657_v10 = vld [vmem:[%s11746_s4 + $0x8] sm:$0xff]  ;;  %v1660_v22 = vld [vmem:[%s11746_s4 + $0x20] sm:$0xff]  ;;  %vm389_vm0 = vcmask 130048   ;;  %s7357_s10 = sshll.u32 %s8258_s27, 14  ;;  %p11973_p10 = scmp.ne.s32.totalorder %s11753_s11, 0 }
  0x37   : > { %s366_s15 = scalar_select %p365_p4, %s8258_s27, 1  ;;  %1732 = vperm.xlu1 %7681, %v1658_v1   ;;  %1722 = vperm.xlu0 %7680, %v1656_v2   ;;  %v1661_v21 = vld [vmem:[%s11746_s4 + $0x28] sm:$0xff]  ;;  %v1663_v29 = vld [vmem:[%s11746_s4 + $0x38] sm:$0xff]  ;;  %v1662_v30 = vld [vmem:[%s11746_s4 + $0x30] sm:$0xff] }
  0x38   : > { %v1665_v37 = vld [vmem:[%s11746_s4 + $0x48] sm:$0xff]  ;;  %v1664_v38 = vld [vmem:[%s11746_s4 + $0x40] sm:$0xff]  ;;  %v1667_v45 = vld [vmem:[%s11746_s4 + $0x58] sm:$0xff]  ;;  %s11690_s19 = scalar_lea.hbm %s11749_s7, %s7357_s10  ;;  %s8274_s27 = smov [#allocation8]  }
  0x39   : > { %s7355_s18 = sshll.u32 %s366_s15, 7  ;;  %v1666_v46 = vld [vmem:[%s11746_s4 + $0x50] sm:$0xff]  ;;  %v7682_v47 = vld [vmem:[#allocation6] sm:$0xff]   ;;  %v1669_v55 = vld [vmem:[%s11746_s4 + $0x68] sm:$0xff]  ;;  %s361_s15 = sand.u32 1, %s8250_s25  }
  0x3a   : > { %s8423_s22 = scalar_lea.vmem %s11743_s1, %s7355_s18  ;;  %s8428_s16 = scalar_lea.vmem %s11742_s0, %s7355_s18  ;;  %v7683_v49 = vld [vmem:[#allocation3] sm:$0xff]   ;;  %7454 = vmatprep.mubr.bf16.mxu0 %v7682_v47  ;;  %v1671_v63 = vld [vmem:[%s11746_s4 + $0x78] sm:$0xff]  ;;  %v1670_v1 = vld [vmem:[%s11746_s4 + $0x70] sm:$0xff] }
  0x3b   : > { %v684_v3 = vld [vmem:[%s8423_s22 + $0x70] sm:$0xff]  ;;  %v685_v4 = vld [vmem:[%s8423_s22 + $0x78] sm:$0xff]  ;;  %v682_v11 = vld [vmem:[%s8423_s22 + $0x60] sm:$0xff]  ;;  %1737 = vperm.xlu1 %7681, %v1659_v9   ;;  %1727 = vperm.xlu0 %7680, %v1657_v10   ;;  %s11697_s21 = scalar_lea.sflag [#allocation5], %s361_s15 }
  0x3c   : > { %v596_v5 = vld [vmem:[%s8428_s16 + $0x70] sm:$0xff]  ;;  %v597_v6 = vld [vmem:[%s8428_s16 + $0x78] sm:$0xff]  ;;  %v693_v7 = vpack.c.bf16 %v685_v4, %v684_v3  ;;  %v683_v12 = vld [vmem:[%s8423_s22 + $0x68] sm:$0xff]  ;;  %7534 = vmatprep.mubr.bf16.mxu1 %v7683_v49 }
  0x3d   : > { %v605_v8 = vpack.c.bf16 %v597_v6, %v596_v5  ;;  %v594_v13 = vld [vmem:[%s8428_s16 + $0x60] sm:$0xff]  ;;  %v595_v14 = vld [vmem:[%s8428_s16 + $0x68] sm:$0xff]  ;;  %v692_v15 = vpack.c.bf16 %v683_v12, %v682_v11  ;;  %v680_v17 = vld [vmem:[%s8423_s22 + $0x50] sm:$0xff] }
  0x3e   : > { %7438 = vmatprep.subr.bf16.mxu0 %v693_v7  ;;  %v604_v16 = vpack.c.bf16 %v595_v14, %v594_v13  ;;  %v681_v18 = vld [vmem:[%s8423_s22 + $0x58] sm:$0xff]  ;;  %v592_v19 = vld [vmem:[%s8428_s16 + $0x50] sm:$0xff]  ;;  %v678_v25 = vld [vmem:[%s8423_s22 + $0x40] sm:$0xff] }
  0x3f   : > { %7518 = vmatprep.subr.bf16.mxu1 %v605_v8  ;;  %7439 = vmatpush3.bf16.msra.mxu0 %v693_v7  ;;  %v593_v20 = vld [vmem:[%s8428_s16 + $0x58] sm:$0xff]  ;;  %v691_v23 = vpack.c.bf16 %v681_v18, %v680_v17  ;;  %v679_v26 = vld [vmem:[%s8423_s22 + $0x48] sm:$0xff]  ;;  %v590_v27 = vld [vmem:[%s8428_s16 + $0x40] sm:$0xff] }
  0x40   : > { %7519 = vmatpush3.bf16.msra.mxu1 %v605_v8  ;;  %7440 = vmatprep.subr.bf16.mxu0 %v692_v15  ;;  %v603_v24 = vpack.c.bf16 %v593_v20, %v592_v19  ;;  %v591_v28 = vld [vmem:[%s8428_s16 + $0x48] sm:$0xff]  ;;  %v690_v31 = vpack.c.bf16 %v679_v26, %v678_v25  ;;  %v676_v33 = vld [vmem:[%s8423_s22 + $0x30] sm:$0xff]  ;;  %v677_v34 = vld [vmem:[%s8423_s22 + $0x38] sm:$0xff] }
  0x41   : > { %7520 = vmatprep.subr.bf16.mxu1 %v604_v16  ;;  %1747 = vperm.xlu1 %7681, %v1661_v21   ;;  %v602_v32 = vpack.c.bf16 %v591_v28, %v590_v27  ;;  %v588_v35 = vld [vmem:[%s8428_s16 + $0x30] sm:$0xff]  ;;  %v589_v36 = vld [vmem:[%s8428_s16 + $0x38] sm:$0xff]  ;;  %v689_v39 = vpack.c.bf16 %v677_v34, %v676_v33  ;;  %v674_v41 = vld [vmem:[%s8423_s22 + $0x20] sm:$0xff] }
  0x42   : > { %1742 = vperm.xlu0 %7680, %v1660_v22   ;;  %v601_v40 = vpack.c.bf16 %v589_v36, %v588_v35  ;;  %v675_v42 = vld [vmem:[%s8423_s22 + $0x28] sm:$0xff]  ;;  %v586_v43 = vld [vmem:[%s8428_s16 + $0x20] sm:$0xff]  ;;  %v672_v48 = vld [vmem:[%s8423_s22 + $0x10] sm:$0xff] }
  0x43   : > { %7441 = vmatpush3.bf16.msra.mxu0 %v692_v15  ;;  %v587_v44 = vld [vmem:[%s8428_s16 + $0x28] sm:$0xff]  ;;  %v688_v50 = vpack.c.bf16 %v675_v42, %v674_v41  ;;  %v673_v52 = vld [vmem:[%s8423_s22 + $0x18] sm:$0xff]  ;;  %v584_v53 = vld [vmem:[%s8428_s16 + $0x10] sm:$0xff] }
  0x44   : > { %7521 = vmatpush3.bf16.msra.mxu1 %v604_v16  ;;  %7442 = vmatprep.subr.bf16.mxu0 %v691_v23  ;;  %v600_v51 = vpack.c.bf16 %v587_v44, %v586_v43  ;;  %v585_v54 = vld [vmem:[%s8428_s16 + $0x18] sm:$0xff]  ;;  %v1668_v56 = vld [vmem:[%s11746_s4 + $0x60] sm:$0xff]  ;;  %v671_v58 = vld [vmem:[%s8423_s22 + $0x8] sm:$0xff]  ;;  %v687_v59 = vpack.c.bf16 %v673_v52, %v672_v48 }
  0x45   : > { %7522 = vmatprep.subr.bf16.mxu1 %v603_v24  ;;  %1757 = vperm.xlu1 %7681, %v1663_v29   ;;  %v670_v57 = vld [vmem:[%s8423_s22] sm:$0xff]  ;;  %v599_v60 = vpack.c.bf16 %v585_v54, %v584_v53  ;;  %v583_v62 = vld [vmem:[%s8428_s16 + $0x8] sm:$0xff]  ;;  %v7686_v8 = vld [vmem:[#allocation6 + $0x10] sm:$0xff]   ;;  %s7025_s22 = sshll.u32 %s361_s15, 10 }
  0x46   : > { %1752 = vperm.xlu0 %7680, %v1662_v30   ;;  %v582_v61 = vld [vmem:[%s8428_s16] sm:$0xff]  ;;  %v686_v2 = vpack.c.bf16 %v671_v58, %v670_v57  ;;  %v1673_v4 = vld [vmem:[%s11746_s4 + $0x88] sm:$0xff]  ;;  %v7687_v9 = vld [vmem:[#allocation3 + $0x10] sm:$0xff]   ;;  %s10874_s12 = scalar_lea.vmem [#allocation8], %s7025_s22  ;;  %s8186_s22 = sshll.u32 %s8274_s27, 4  ;;  %s8187_s22 = int_to_ptr.vmem [resolvable:$false] %s8186_s22 }
  0x47   : > { %7443 = vmatpush3.bf16.msra.mxu0 %v691_v23  ;;  %v598_v3 = vpack.c.bf16 %v583_v62, %v582_v61  ;;  %v1672_v5 = vld [vmem:[%s11746_s4 + $0x80] sm:$0xff]  ;;  %v7684_v6 = vld [vmem:[#allocation6 + $0x8] sm:$0xff]   ;;  %v1675_v10 = vld [vmem:[%s11746_s4 + $0x98] sm:$0xff]  ;;  %s6894_s17 = sshll.u32 %s10874_s12, 4  ;;  %s8188_s16 = scalar_lea.vmem %s8187_s22, 32768  ;;  %s11692_s17 = int_to_ptr.vmem [resolvable:$true] %s6894_s17 }
  0x48   : > { %7523 = vmatpush3.bf16.msra.mxu1 %v603_v24  ;;  %7444 = vmatprep.subr.bf16.mxu0 %v690_v31  ;;  %v7685_v7 = vld [vmem:[#allocation3 + $0x8] sm:$0xff]   ;;  %v1674_v11 = vld [vmem:[%s11746_s4 + $0x90] sm:$0xff]  ;;  %v1676_v13 = vld [vmem:[%s11746_s4 + $0xa0] sm:$0xff]  ;;  %s8182_s23 = scalar_lea.vmem %s11692_s17, 16384  ;;  %p8189_p0 = scmp.lt.s32.totalorder %s11692_s17, %s8187_s22 }
  0x49   : > { %7524 = vmatprep.subr.bf16.mxu1 %v602_v32  ;;  %1767 = vperm.xlu1 %7681, %v1665_v37   ;;  %v1677_v12 = vld [vmem:[%s11746_s4 + $0xa8] sm:$0xff]  ;;  %v7688_v14 = vld [vmem:[#allocation6 + $0x18] sm:$0xff]   ;;  %v7690_v16 = vld [vmem:[#allocation6 + $0x20] sm:$0xff]   ;;  %p8183_p8 = scmp.ne.s32.totalorder %s11692_s17, %s8182_s23  ;;  %p8190_p6 = scmp.lt.s32.totalorder %s8188_s16, %s8182_s23 }
  0x4a   : > { %1762 = vperm.xlu0 %7680, %v1664_v38   ;;  %v7689_v15 = vld [vmem:[#allocation3 + $0x18] sm:$0xff]   ;;  %v7691_v17 = vld [vmem:[#allocation3 + $0x20] sm:$0xff]   ;;  %v1678_v19 = vld [vmem:[%s11746_s4 + $0xb0] sm:$0xff] }
  0x4b   : > { %7445 = vmatpush3.bf16.msra.mxu0 %v690_v31  ;;  %v1679_v18 = vld [vmem:[%s11746_s4 + $0xb8] sm:$0xff]  ;;  %v1681_v20 = vld [vmem:[%s11746_s4 + $0xc8] sm:$0xff]  ;;  %v1680_v21 = vld [vmem:[%s11746_s4 + $0xc0] sm:$0xff]  ;;  %p8184_p11 = pnand %p8183_p8, %p11973_p10  ;;  %p8191_p7 = por %p8190_p6, %p8189_p0 }
  0x4c   : > { %7525 = vmatpush3.bf16.msra.mxu1 %v602_v32  ;;  %7446 = vmatprep.subr.bf16.mxu0 %v689_v39  ;;  %v7692_v22 = vld [vmem:[#allocation6 + $0x28] sm:$0xff]   ;;  %v7694_v24 = vld [vmem:[#allocation6 + $0x30] sm:$0xff]   ;;  %v1683_v26 = vld [vmem:[%s11746_s4 + $0xd8] sm:$0xff] }
  0x4d   : > { %7526 = vmatprep.subr.bf16.mxu1 %v601_v40  ;;  %1777 = vperm.xlu1 %7681, %v1667_v45   ;;  %v7693_v23 = vld [vmem:[#allocation3 + $0x28] sm:$0xff]   ;;  %v7695_v25 = vld [vmem:[#allocation3 + $0x30] sm:$0xff]   ;;  %v1684_v29 = vld [vmem:[%s11746_s4 + $0xe0] sm:$0xff]  ;;  %p8185_p13 = pneg %p8184_p11 }
  0x4e   : > { %1772 = vperm.xlu0 %7680, %v1666_v46   ;;  %v1682_v27 = vld [vmem:[%s11746_s4 + $0xd0] sm:$0xff]  ;;  %v1685_v28 = vld [vmem:[%s11746_s4 + $0xe8] sm:$0xff]  ;;  %v7696_v30 = vld [vmem:[#allocation6 + $0x38] sm:$0xff]  }
  0x4f   : > { %7447 = vmatpush3.bf16.msra.mxu0 %v689_v39  ;;  %v7697_v31 = vld [vmem:[#allocation3 + $0x38] sm:$0xff]   ;;  %v7698_v32 = vld [vmem:[#allocation6 + $0x40] sm:$0xff]   ;;  %v1702_v35 = vld [vmem:[%s11746_s4 + $0x170] sm:$0xff]  ;;  %p8192_p9 = pnand %p8191_p7, %p8185_p13 }
  0x50   : > { %7527 = vmatpush3.bf16.msra.mxu1 %v601_v40  ;;  %7448 = vmatprep.subr.bf16.mxu0 %v688_v50  ;;  %v7699_v33 = vld [vmem:[#allocation3 + $0x40] sm:$0xff]   ;;  %v1703_v34 = vld [vmem:[%s11746_s4 + $0x178] sm:$0xff]  ;;  %v1701_v36 = vld [vmem:[%s11746_s4 + $0x168] sm:$0xff] }
  0x51   : > { %7528 = vmatprep.subr.bf16.mxu1 %v600_v51  ;;  %1787 = vperm.xlu1 %7681, %v1669_v55   ;;  %v1700_v37 = vld [vmem:[%s11746_s4 + $0x160] sm:$0xff]  ;;  %v7700_v38 = vld [vmem:[#allocation6 + $0x48] sm:$0xff]   ;;  %v7702_v40 = vld [vmem:[#allocation6 + $0x50] sm:$0xff]  }
  0x52   : > { %1782 = vperm.xlu0 %7680, %v1668_v56   ;;  %v7701_v39 = vld [vmem:[#allocation3 + $0x48] sm:$0xff]   ;;  %v7703_v41 = vld [vmem:[#allocation3 + $0x50] sm:$0xff]   ;;  %v1699_v42 = vld [vmem:[%s11746_s4 + $0x158] sm:$0xff] }
  0x53   : > { %7449 = vmatpush3.bf16.msra.mxu0 %v688_v50  ;;  %v1698_v43 = vld [vmem:[%s11746_s4 + $0x150] sm:$0xff]  ;;  %v1697_v44 = vld [vmem:[%s11746_s4 + $0x148] sm:$0xff]  ;;  %v1696_v45 = vld [vmem:[%s11746_s4 + $0x140] sm:$0xff] }
  0x54   : > { %7529 = vmatpush3.bf16.msra.mxu1 %v600_v51  ;;  %7450 = vmatprep.subr.bf16.mxu0 %v687_v59  ;;  %v7704_v46 = vld [vmem:[#allocation6 + $0x58] sm:$0xff]   ;;  %v7706_v48 = vld [vmem:[#allocation6 + $0x60] sm:$0xff]   ;;  %v1694_v51 = vld [vmem:[%s11746_s4 + $0x130] sm:$0xff] }
  0x55   : > { %7530 = vmatprep.subr.bf16.mxu1 %v599_v60  ;;  %1797 = vperm.xlu1 %7681, %v1671_v63   ;;  %v7705_v47 = vld [vmem:[#allocation3 + $0x58] sm:$0xff]   ;;  %v7707_v49 = vld [vmem:[#allocation3 + $0x60] sm:$0xff]   ;;  %v1693_v52 = vld [vmem:[%s11746_s4 + $0x128] sm:$0xff] }
  0x56   : > { %1792 = vperm.xlu0 %7680, %v1670_v1   ;;  %v1695_v50 = vld [vmem:[%s11746_s4 + $0x138] sm:$0xff]  ;;  %v1692_v53 = vld [vmem:[%s11746_s4 + $0x120] sm:$0xff]  ;;  %v7708_v54 = vld [vmem:[#allocation6 + $0x68] sm:$0xff]  }
  0x57   : > { %7451 = vmatpush3.bf16.msra.mxu0 %v687_v59  ;;  %v7709_v55 = vld [vmem:[#allocation3 + $0x68] sm:$0xff]   ;;  %v7710_v56 = vld [vmem:[#allocation6 + $0x70] sm:$0xff]   ;;  %v1691_v58 = vld [vmem:[%s11746_s4 + $0x118] sm:$0xff] }
  0x58   : > { %7531 = vmatpush3.bf16.msra.mxu1 %v599_v60  ;;  %7452 = vmatprep.subr.bf16.mxu0 %v686_v2  ;;  %v7711_v57 = vld [vmem:[#allocation3 + $0x70] sm:$0xff]   ;;  %v1689_v60 = vld [vmem:[%s11746_s4 + $0x108] sm:$0xff]  ;;  %v1688_v61 = vld [vmem:[%s11746_s4 + $0x100] sm:$0xff] }
  0x59   : > { %7532 = vmatprep.subr.bf16.mxu1 %v598_v3  ;;  %1807 = vperm.xlu1 %7681, %v1673_v4   ;;  %v1690_v59 = vld [vmem:[%s11746_s4 + $0x110] sm:$0xff]  ;;  %v7712_v62 = vld [vmem:[#allocation6 + $0x78] sm:$0xff]   ;;  %v7714_v1 = vld [vmem:[#allocation6 + $0x80] sm:$0xff]  }
  0x5a   : > { %1802 = vperm.xlu0 %7680, %v1672_v5   ;;  %v7713_v63 = vld [vmem:[#allocation3 + $0x78] sm:$0xff]   ;;  %v1686_v4 = vld [vmem:[%s11746_s4 + $0xf0] sm:$0xff] }
  0x5b   : > { %7453 = vmatpush3.bf16.msra.mxu0 %v686_v2  ;;  %v7715_v2 = vld [vmem:[#allocation3 + $0x80] sm:$0xff]   ;;  %v1719_v5 = vld [vmem:[%s11746_s4 + $0x1f8] sm:$0xff] }
  0x5c   : > { %7533 = vmatpush3.bf16.msra.mxu1 %v598_v3  ;;  %4504 = vmatprep.subr.bf16.mxu0 %v11751_v0  ;;  %v1687_v3 = vld [vmem:[%s11746_s4 + $0xf8] sm:$0xff] }
  0x5d   : > { %5049 = vmatprep.subr.bf16.mxu1 %v11751_v0  ;;  %1817 = vperm.xlu1 %7681, %v1675_v10   ;;  %v7719_v10 = vld [vmem:[#allocation3 + $0x90] sm:$0xff]  }
  0x5e   : > { %7455 = vmatmul.mubr.bf16.vlgmr.msra.gmra.mxu0 %v7684_v6  ;;  %1812 = vperm.xlu0 %7680, %v1674_v11   ;;  %v1718_v6 = vld [vmem:[%s11746_s4 + $0x1f0] sm:$0xff]  ;;  %v1717_v11 = vld [vmem:[%s11746_s4 + $0x1e8] sm:$0xff] }
  0x5f   : > { %7535 = vmatmul.mubr.bf16.vlgmr.msra.gmra.mxu1 %v7685_v7  ;;  %7458 = vmatprep.mubr.bf16.mxu0 %v7686_v8  ;;  %v7716_v7 = vld [vmem:[#allocation6 + $0x88] sm:$0xff]  }
  0x60   : > { %7538 = vmatprep.mubr.bf16.mxu1 %v7687_v9  ;;  %v7717_v8 = vld [vmem:[#allocation3 + $0x88] sm:$0xff]   ;;  %v7718_v9 = vld [vmem:[#allocation6 + $0x90] sm:$0xff]  }
  0x61   : > { %1827 = vperm.xlu1 %7681, %v1677_v12   ;;  %v1716_v12 = vld [vmem:[%s11746_s4 + $0x1e0] sm:$0xff] }
  0x62   : > { %1822 = vperm.xlu0 %7680, %v1676_v13   ;;  %v1715_v13 = vld [vmem:[%s11746_s4 + $0x1d8] sm:$0xff] }
  0x65   : > { %1837 = vperm.xlu1 %7681, %v1679_v18   ;;  %v7723_v18 = vld [vmem:[#allocation3 + $0xa0] sm:$0xff]  }
  0x66   : > { %7459 = vmatmul.mubr.bf16.gmra.mxu0 %v7688_v14  ;;  %1832 = vperm.xlu0 %7680, %v1678_v19   ;;  %v1714_v14 = vld [vmem:[%s11746_s4 + $0x1d0] sm:$0xff]  ;;  %v1713_v19 = vld [vmem:[%s11746_s4 + $0x1c8] sm:$0xff] }
  0x67   : > { %7539 = vmatmul.mubr.bf16.gmra.mxu1 %v7689_v15  ;;  %7462 = vmatprep.mubr.bf16.mxu0 %v7690_v16  ;;  %v7720_v15 = vld [vmem:[#allocation6 + $0x98] sm:$0xff]  }
  0x68   : > { %7542 = vmatprep.mubr.bf16.mxu1 %v7691_v17  ;;  %v7721_v16 = vld [vmem:[#allocation3 + $0x98] sm:$0xff]   ;;  %v7722_v17 = vld [vmem:[#allocation6 + $0xa0] sm:$0xff]  }
  0x69   : > { %1847 = vperm.xlu1 %7681, %v1681_v20   ;;  %v1712_v20 = vld [vmem:[%s11746_s4 + $0x1c0] sm:$0xff] }
  0x6a   : > { %1842 = vperm.xlu0 %7680, %v1680_v21   ;;  %v1711_v21 = vld [vmem:[%s11746_s4 + $0x1b8] sm:$0xff] }
  0x6d   : > { %1857 = vperm.xlu1 %7681, %v1683_v26   ;;  %v7727_v26 = vld [vmem:[#allocation3 + $0xb0] sm:$0xff]  }
  0x6e   : > { %7463 = vmatmul.mubr.bf16.gmra.mxu0 %v7692_v22  ;;  %1852 = vperm.xlu0 %7680, %v1682_v27   ;;  %v1710_v22 = vld [vmem:[%s11746_s4 + $0x1b0] sm:$0xff]  ;;  %v1709_v27 = vld [vmem:[%s11746_s4 + $0x1a8] sm:$0xff] }
  0x6f   : > { %7543 = vmatmul.mubr.bf16.gmra.mxu1 %v7693_v23  ;;  %7466 = vmatprep.mubr.bf16.mxu0 %v7694_v24  ;;  %v7724_v23 = vld [vmem:[#allocation6 + $0xa8] sm:$0xff]  }
  0x70   : > { %7546 = vmatprep.mubr.bf16.mxu1 %v7695_v25  ;;  %v7725_v24 = vld [vmem:[#allocation3 + $0xa8] sm:$0xff]   ;;  %v7726_v25 = vld [vmem:[#allocation6 + $0xb0] sm:$0xff]  }
  0x71   : > { %1867 = vperm.xlu1 %7681, %v1685_v28   ;;  %v1708_v28 = vld [vmem:[%s11746_s4 + $0x1a0] sm:$0xff] }
  0x72   : > { %1862 = vperm.xlu0 %7680, %v1684_v29   ;;  %v1707_v29 = vld [vmem:[%s11746_s4 + $0x198] sm:$0xff] }
  0x75   : > { %1957 = vperm.xlu1 %7681, %v1703_v34   ;;  %v1704_v34 = vld [vmem:[%s11746_s4 + $0x180] sm:$0xff] }
  0x76   : > { %7467 = vmatmul.mubr.bf16.gmra.mxu0 %v7696_v30  ;;  %1952 = vperm.xlu0 %7680, %v1702_v35   ;;  %v1706_v30 = vld [vmem:[%s11746_s4 + $0x190] sm:$0xff]  ;;  %v7730_v35 = vld [vmem:[#allocation6 + $0xc0] sm:$0xff]  }
  0x77   : > { %7547 = vmatmul.mubr.bf16.gmra.mxu1 %v7697_v31  ;;  %7470 = vmatprep.mubr.bf16.mxu0 %v7698_v32  ;;  %v7728_v31 = vld [vmem:[#allocation6 + $0xb8] sm:$0xff]  }
  0x78   : > { %7550 = vmatprep.mubr.bf16.mxu1 %v7699_v33  ;;  %v7729_v32 = vld [vmem:[#allocation3 + $0xb8] sm:$0xff]   ;;  %v1705_v33 = vld [vmem:[%s11746_s4 + $0x188] sm:$0xff] }
  0x79   : > { %1947 = vperm.xlu1 %7681, %v1701_v36   ;;  %v7731_v36 = vld [vmem:[#allocation3 + $0xc0] sm:$0xff]  }
  0x7a   : > { %1942 = vperm.xlu0 %7680, %v1700_v37  }
  0x7d   : > { %1937 = vperm.xlu1 %7681, %v1699_v42   ;;  %v7733_v42 = vld [vmem:[#allocation3 + $0xc8] sm:$0xff]  }
  0x7e   : > { %7471 = vmatmul.mubr.bf16.gmra.mxu0 %v7700_v38  ;;  %1932 = vperm.xlu0 %7680, %v1698_v43  }
  0x7f   : > { %7551 = vmatmul.mubr.bf16.gmra.mxu1 %v7701_v39  ;;  %7474 = vmatprep.mubr.bf16.mxu0 %v7702_v40  ;;  %v2457_v39 = vld [vmem:[%s11748_s6 + $0x8] sm:$0xff]  ;;  %v2456_v40 = vld [vmem:[%s11748_s6] sm:$0xff] }
  0x80   : > { %7554 = vmatprep.mubr.bf16.mxu1 %v7703_v41  ;;  %v7732_v41 = vld [vmem:[#allocation6 + $0xc8] sm:$0xff]  }
  0x81   : > { %1927 = vperm.xlu1 %7681, %v1697_v44  }
  0x82   : > { %1922 = vperm.xlu0 %7680, %v1696_v45   ;;  %v2459_v45 = vld [vmem:[%s11748_s6 + $0x18] sm:$0xff] }
  0x85   : > { %1917 = vperm.xlu1 %7681, %v1695_v50  }
  0x86   : > { %7475 = vmatmul.mubr.bf16.gmra.mxu0 %v7704_v46  ;;  %1912 = vperm.xlu0 %7680, %v1694_v51   ;;  %v2458_v46 = vld [vmem:[%s11748_s6 + $0x10] sm:$0xff]  ;;  %v2461_v51 = vld [vmem:[%s11748_s6 + $0x28] sm:$0xff] }
  0x87   : > { %7555 = vmatmul.mubr.bf16.gmra.mxu1 %v7705_v47  ;;  %7478 = vmatprep.mubr.bf16.mxu0 %v7706_v48  ;;  %v7734_v47 = vld [vmem:[#allocation6 + $0xd0] sm:$0xff]  }
  0x88   : > { %7558 = vmatprep.mubr.bf16.mxu1 %v7707_v49  ;;  %v7735_v48 = vld [vmem:[#allocation3 + $0xd0] sm:$0xff]  }
  0x89   : > { %1907 = vperm.xlu1 %7681, %v1693_v52   ;;  %v2460_v52 = vld [vmem:[%s11748_s6 + $0x20] sm:$0xff] }
  0x8a   : > { %1902 = vperm.xlu0 %7680, %v1692_v53   ;;  %v7736_v53 = vld [vmem:[#allocation6 + $0xd8] sm:$0xff]  }
  0x8d   : > { %1897 = vperm.xlu1 %7681, %v1691_v58   ;;  %v2462_v58 = vld [vmem:[%s11748_s6 + $0x30] sm:$0xff] }
  0x8e   : > { %7479 = vmatmul.mubr.bf16.gmra.mxu0 %v7708_v54  ;;  %1892 = vperm.xlu0 %7680, %v1690_v59   ;;  %v7737_v54 = vld [vmem:[#allocation3 + $0xd8] sm:$0xff]   ;;  %v7738_v59 = vld [vmem:[#allocation6 + $0xe0] sm:$0xff]  }
  0x8f   : > { %7559 = vmatmul.mubr.bf16.gmra.mxu1 %v7709_v55  ;;  %7482 = vmatprep.mubr.bf16.mxu0 %v7710_v56 }
  0x90   : > { %7562 = vmatprep.mubr.bf16.mxu1 %v7711_v57  ;;  %v2463_v57 = vld [vmem:[%s11748_s6 + $0x38] sm:$0xff] }
  0x91   : > { %1887 = vperm.xlu1 %7681, %v1689_v60   ;;  %v7739_v60 = vld [vmem:[#allocation3 + $0xe0] sm:$0xff]  }
  0x92   : > { %1882 = vperm.xlu0 %7680, %v1688_v61  }
  0x95   : > { %1877 = vperm.xlu1 %7681, %v1687_v3   ;;  %v7741_v3 = vld [vmem:[#allocation3 + $0xe8] sm:$0xff]  }
  0x96   : > { %7483 = vmatmul.mubr.bf16.gmra.mxu0 %v7712_v62  ;;  %1872 = vperm.xlu0 %7680, %v1686_v4  }
  0x97   : > { %7563 = vmatmul.mubr.bf16.gmra.mxu1 %v7713_v63  ;;  %7486 = vmatprep.mubr.bf16.mxu0 %v7714_v1  ;;  %v2465_v63 = vld [vmem:[%s11748_s6 + $0x48] sm:$0xff]  ;;  %v2464_v1 = vld [vmem:[%s11748_s6 + $0x40] sm:$0xff] }
  0x98   : > { %7566 = vmatprep.mubr.bf16.mxu1 %v7715_v2  ;;  %v7740_v2 = vld [vmem:[#allocation6 + $0xe8] sm:$0xff]  }
  0x99   : > { %2037 = vperm.xlu1 %7681, %v1719_v5  }
  0x9a   : > { %2032 = vperm.xlu0 %7680, %v1718_v6   ;;  %v2467_v6 = vld [vmem:[%s11748_s6 + $0x58] sm:$0xff] }
  0x9d   : > { %2027 = vperm.xlu1 %7681, %v1717_v11  }
  0x9e   : > { %7487 = vmatmul.mubr.bf16.gmra.mxu0 %v7716_v7  ;;  %2022 = vperm.xlu0 %7680, %v1716_v12   ;;  %v2466_v7 = vld [vmem:[%s11748_s6 + $0x50] sm:$0xff]  ;;  %v2469_v12 = vld [vmem:[%s11748_s6 + $0x68] sm:$0xff] }
  0x9f   : > { %7567 = vmatmul.mubr.bf16.gmra.mxu1 %v7717_v8  ;;  %7490 = vmatprep.mubr.bf16.mxu0 %v7718_v9  ;;  %v7742_v8 = vld [vmem:[#allocation6 + $0xf0] sm:$0xff]  }
  0xa0   : > { %7570 = vmatprep.mubr.bf16.mxu1 %v7719_v10  ;;  %v7743_v9 = vld [vmem:[#allocation3 + $0xf0] sm:$0xff]  }
  0xa1   : > { %2017 = vperm.xlu1 %7681, %v1715_v13   ;;  %v2468_v13 = vld [vmem:[%s11748_s6 + $0x60] sm:$0xff] }
  0xa2   : > { %2012 = vperm.xlu0 %7680, %v1714_v14   ;;  %v7744_v14 = vld [vmem:[#allocation6 + $0xf8] sm:$0xff]  }
  0xa5   : > { %2007 = vperm.xlu1 %7681, %v1713_v19   ;;  %v2470_v19 = vld [vmem:[%s11748_s6 + $0x70] sm:$0xff] }
  0xa6   : > { %7491 = vmatmul.mubr.bf16.gmra.mxu0 %v7720_v15  ;;  %2002 = vperm.xlu0 %7680, %v1712_v20   ;;  %v7745_v15 = vld [vmem:[#allocation3 + $0xf8] sm:$0xff]  }
  0xa7   : > { %7571 = vmatmul.mubr.bf16.gmra.mxu1 %v7721_v16  ;;  %7494 = vmatprep.mubr.bf16.mxu0 %v7722_v17 }
  0xa8   : > { %7574 = vmatprep.mubr.bf16.mxu1 %v7723_v18  ;;  %v2471_v18 = vld [vmem:[%s11748_s6 + $0x78] sm:$0xff] }
  0xa9   : > { %1997 = vperm.xlu1 %7681, %v1711_v21  }
  0xaa   : > { %1992 = vperm.xlu0 %7680, %v1710_v22   ;;  %v2473_v22 = vld [vmem:[%s11748_s6 + $0x88] sm:$0xff] }
  0xad   : > { %1987 = vperm.xlu1 %7681, %v1709_v27   ;;  %v2474_v27 = vld [vmem:[%s11748_s6 + $0x90] sm:$0xff] }
  0xae   : > { %7495 = vmatmul.mubr.bf16.gmra.mxu0 %v7724_v23  ;;  %1982 = vperm.xlu0 %7680, %v1708_v28   ;;  %v2472_v23 = vld [vmem:[%s11748_s6 + $0x80] sm:$0xff] }
  0xaf   : > { %7575 = vmatmul.mubr.bf16.gmra.mxu1 %v7725_v24  ;;  %7498 = vmatprep.mubr.bf16.mxu0 %v7726_v25 }
  0xb0   : > { %7578 = vmatprep.mubr.bf16.mxu1 %v7727_v26  ;;  %v2475_v26 = vld [vmem:[%s11748_s6 + $0x98] sm:$0xff] }
  0xb1   : > { %1977 = vperm.xlu1 %7681, %v1707_v29  }
  0xb2   : > { %1972 = vperm.xlu0 %7680, %v1706_v30   ;;  %v8656_v37 = vpop.permute.xlu1 %1732  ;;  %v8658_v38 = vpop.permute.xlu0 %1722  ;;  %v2477_v30 = vld [vmem:[%s11748_s6 + $0xa8] sm:$0xff] }
  0xb5   : > { %1967 = vperm.xlu1 %7681, %v1705_v33   ;;  %v2478_v33 = vld [vmem:[%s11748_s6 + $0xb0] sm:$0xff] }
  0xb6   : > { %7499 = vmatmul.mubr.bf16.gmra.mxu0 %v7728_v31  ;;  %1962 = vperm.xlu0 %7680, %v1704_v34   ;;  %v8666_v43 = vpop.permute.xlu1 %1737  ;;  %v8668_v44 = vpop.permute.xlu0 %1727  ;;  %v2476_v31 = vld [vmem:[%s11748_s6 + $0xa0] sm:$0xff] }
  0xb7   : > { %7579 = vmatmul.mubr.bf16.gmra.mxu1 %v7729_v32  ;;  %7502 = vmatprep.mubr.bf16.mxu0 %v7730_v35  ;;  %v2479_v32 = vld [vmem:[%s11748_s6 + $0xb8] sm:$0xff] }
  0xb8   : > { %7582 = vmatprep.mubr.bf16.mxu1 %v7731_v36  ;;  %v2481_v36 = vld [vmem:[%s11748_s6 + $0xc8] sm:$0xff] }
  0xb9   : > { %2591 = vperm.xlu1 %7681, %v2457_v39   ;;  %v2480_v39 = vld [vmem:[%s11748_s6 + $0xc0] sm:$0xff] }
  0xba   : > { %2586 = vperm.xlu0 %7680, %v2456_v40  }
  0xbc   : > { %v8676_v49 = vpop.permute.xlu1 %1747 }
  0xbd   : > { %v8678_v50 = vpop.permute.xlu0 %1742  ;;  %2601 = vperm.xlu1 %7681, %v2459_v45   ;;  %v2482_v45 = vld [vmem:[%s11748_s6 + $0xd0] sm:$0xff] }
  0xbe   : > { %7503 = vmatmul.mubr.bf16.gmra.mxu0 %v7732_v41  ;;  %2596 = vperm.xlu0 %7680, %v2458_v46   ;;  %v2485_v46 = vld [vmem:[%s11748_s6 + $0xe8] sm:$0xff] }
  0xbf   : > { %7583 = vmatmul.mubr.bf16.gmra.mxu1 %v7733_v42  ;;  %7506 = vmatprep.mubr.bf16.mxu0 %v7734_v47  ;;  %v2483_v42 = vld [vmem:[%s11748_s6 + $0xd8] sm:$0xff]  ;;  %v2484_v47 = vld [vmem:[%s11748_s6 + $0xe0] sm:$0xff] }
  0xc0   : > { %7586 = vmatprep.mubr.bf16.mxu1 %v7735_v48  ;;  %v8686_v55 = vpop.permute.xlu1 %1757 }
  0xc1   : > { %v8688_v56 = vpop.permute.xlu0 %1752  ;;  %2611 = vperm.xlu1 %7681, %v2461_v51  }
  0xc2   : > { %2606 = vperm.xlu0 %7680, %v2460_v52   ;;  %v2487_v52 = vld [vmem:[%s11748_s6 + $0xf8] sm:$0xff] }
  0xc4   : > { %v8696_v61 = vpop.permute.xlu1 %1767 }
  0xc5   : > { %v8698_v62 = vpop.permute.xlu0 %1762  ;;  %2621 = vperm.xlu1 %7681, %v2463_v57  }
  0xc6   : > { %7507 = vmatmul.mubr.bf16.gmra.mxu0 %v7736_v53  ;;  %2616 = vperm.xlu0 %7680, %v2462_v58   ;;  %v2486_v53 = vld [vmem:[%s11748_s6 + $0xf0] sm:$0xff]  ;;  %v2489_v58 = vld [vmem:[%s11748_s6 + $0x108] sm:$0xff] }
  0xc7   : > { %7587 = vmatmul.mubr.bf16.gmra.mxu1 %v7737_v54  ;;  %7510 = vmatprep.mubr.bf16.mxu0 %v7738_v59  ;;  %v2488_v59 = vld [vmem:[%s11748_s6 + $0x100] sm:$0xff] }
  0xc8   : > { %7590 = vmatprep.mubr.bf16.mxu1 %v7739_v60  ;;  %v8706_v4 = vpop.permute.xlu1 %1777  ;;  %v2491_v60 = vld [vmem:[%s11748_s6 + $0x118] sm:$0xff] }
  0xc9   : > { %v8708_v5 = vpop.permute.xlu0 %1772  ;;  %2631 = vperm.xlu1 %7681, %v2465_v63   ;;  %v2490_v63 = vld [vmem:[%s11748_s6 + $0x110] sm:$0xff] }
  0xca   : > { %2626 = vperm.xlu0 %7680, %v2464_v1  }
  0xcc   : > { %v8716_v10 = vpop.permute.xlu1 %1787 }
  0xcd   : > { %v8718_v11 = vpop.permute.xlu0 %1782  ;;  %2641 = vperm.xlu1 %7681, %v2467_v6   ;;  %v7748_v6 = vld [vmem:[%s11747_s5 + $0x4] ss:$16 sps:$4 sm:$0xff]  }
  0xce   : > { %7511 = vmatmul.mubr.bf16.gmra.mxu0 %v7740_v2  ;;  %2636 = vperm.xlu0 %7680, %v2466_v7   ;;  %v2492_v7 = vld [vmem:[%s11748_s6 + $0x120] sm:$0xff] }
  0xcf   : > { %7591 = vmatmul.mubr.bf16.gmra.mxu1 %v7741_v3  ;;  %7514 = vmatprep.mubr.bf16.mxu0 %v7742_v8  ;;  %v2493_v3 = vld [vmem:[%s11748_s6 + $0x128] sm:$0xff] }
  0xd0   : > { %7594 = vmatprep.mubr.bf16.mxu1 %v7743_v9  ;;  %v8726_v16 = vpop.permute.xlu1 %1797 }
  0xd1   : > { %v8728_v17 = vpop.permute.xlu0 %1792  ;;  %2651 = vperm.xlu1 %7681, %v2469_v12   ;;  %v2495_v12 = vld [vmem:[%s11748_s6 + $0x138] sm:$0xff] }
  0xd2   : > { %2646 = vperm.xlu0 %7680, %v2468_v13   ;;  %v2494_v13 = vld [vmem:[%s11748_s6 + $0x130] sm:$0xff] }
  0xd4   : > { %v8736_v20 = vpop.permute.xlu1 %1807 }
  0xd5   : > { %11758 = vst [vmem:[#allocation12_spill] sm:$0xff] %v8736_v20  ;;  %v8738_v21 = vpop.permute.xlu0 %1802  ;;  %2661 = vperm.xlu1 %7681, %v2471_v18  }
  0xd6   : > { %7515 = vmatmul.mubr.bf16.gmra.mxu0 %v7744_v14  ;;  %11759 = vst [vmem:[#allocation13_spill] sm:$0xff] %v8738_v21  ;;  %2656 = vperm.xlu0 %7680, %v2470_v19   ;;  %v2497_v14 = vld [vmem:[%s11748_s6 + $0x148] sm:$0xff] }
  0xd7   : > { %7595 = vmatmul.mubr.bf16.gmra.mxu1 %v7745_v15  ;;  %4536 = vmatprep.mubr.bf16.mxu0 %v7748_v6  ;;  %v2496_v15 = vld [vmem:[%s11748_s6 + $0x140] sm:$0xff] }
  0xd8   : > { %v8746_v24 = vpop.permute.xlu1 %1817 }
  0xd9   : > { %11760 = vst [vmem:[#allocation14_spill] sm:$0xff] %v8746_v24  ;;  %v8748_v25 = vpop.permute.xlu0 %1812  ;;  %2671 = vperm.xlu1 %7681, %v2473_v22   ;;  %v2499_v22 = vld [vmem:[%s11748_s6 + $0x158] sm:$0xff] }
  0xda   : > { %11761 = vst [vmem:[#allocation15_spill] sm:$0xff] %v8748_v25  ;;  %2666 = vperm.xlu0 %7680, %v2472_v23   ;;  %v2498_v23 = vld [vmem:[%s11748_s6 + $0x150] sm:$0xff]  ;;  %v2520_v25 = vld [vmem:[%s11748_s6 + $0x200] sm:$0xff] }
  0xdc   : > { %v8756_v28 = vpop.permute.xlu1 %1827 }
  0xdd   : > { %11762 = vst [vmem:[#allocation16_spill] sm:$0xff] %v8756_v28  ;;  %v8758_v29 = vpop.permute.xlu0 %1822  ;;  %2681 = vperm.xlu1 %7681, %v2475_v26  }
  0xde   : > { %11763 = vst [vmem:[#allocation17_spill] sm:$0xff] %v8758_v29  ;;  %2676 = vperm.xlu0 %7680, %v2474_v27  }
  0xe0   : > { %v8772_v34 = vpop.permute.xlu1 %1837 }
  0xe1   : > { %2691 = vperm.xlu1 %7681, %v2477_v30   ;;  %11764 = vst [vmem:[#allocation18_spill] sm:$0xff] %v8772_v34  ;;  %v8774_v35 = vpop.permute.xlu0 %1832  ;;  %v2501_v30 = vld [vmem:[%s11748_s6 + $0x168] sm:$0xff]  ;;  %v2523_v34 = vld [vmem:[%s11748_s6 + $0x218] sm:$0xff] }
  0xe2   : > { %2686 = vperm.xlu0 %7680, %v2476_v31   ;;  %11765 = vst [vmem:[#allocation19_spill] sm:$0xff] %v8774_v35  ;;  %v2500_v31 = vld [vmem:[%s11748_s6 + $0x160] sm:$0xff] }
  0xe4   : > { %v8782_v40 = vpop.permute.xlu1 %1847 }
  0xe5   : > { %2701 = vperm.xlu1 %7681, %v2479_v32   ;;  %11766 = vst [vmem:[#allocation20_spill] sm:$0xff] %v8782_v40  ;;  %v8784_v41 = vpop.permute.xlu0 %1842  ;;  %v2503_v32 = vld [vmem:[%s11748_s6 + $0x178] sm:$0xff] }
  0xe6   : > { %2696 = vperm.xlu0 %7680, %v2478_v33   ;;  %11767 = vst [vmem:[#allocation21_spill] sm:$0xff] %v8784_v41  ;;  %v2502_v33 = vld [vmem:[%s11748_s6 + $0x170] sm:$0xff] }
  0xe7   : > { %v2522_v41 = vld [vmem:[%s11748_s6 + $0x210] sm:$0xff] }
  0xe8   : > { %v8798_v48 = vpop.permute.xlu1 %1857 }
  0xe9   : > { %2711 = vperm.xlu1 %7681, %v2481_v36   ;;  %v8800_v51 = vpop.permute.xlu0 %1852 }
  0xea   : > { %2706 = vperm.xlu0 %7680, %v2480_v39  }
  0xec   : > { %v8808_v54 = vpop.permute.xlu1 %1867 }
  0xed   : > { %2721 = vperm.xlu1 %7681, %v2483_v42   ;;  %v8810_v57 = vpop.permute.xlu0 %1862  ;;  %v2505_v42 = vld [vmem:[%s11748_s6 + $0x188] sm:$0xff] }
  0xee   : > { %2716 = vperm.xlu0 %7680, %v2482_v45   ;;  %v2504_v45 = vld [vmem:[%s11748_s6 + $0x180] sm:$0xff] }
  0xf0   : > { %v8824_v1 = vpop.permute.xlu1 %1957 }
  0xf1   : > { %2731 = vperm.xlu1 %7681, %v2485_v46   ;;  %11768 = vst [vmem:[#allocation22_spill] sm:$0xff] %v8824_v1  ;;  %v8826_v2 = vpop.permute.xlu0 %1952 }
  0xf2   : > { %2726 = vperm.xlu0 %7680, %v2484_v47   ;;  %11769 = vst [vmem:[#allocation23_spill] sm:$0xff] %v8826_v2 }
  0xf4   : > { %v8837_v8 = vpop.permute.xlu1 %1947 }
  0xf5   : > { %2741 = vperm.xlu1 %7681, %v2487_v52   ;;  %11770 = vst [vmem:[#allocation24_spill] sm:$0xff] %v8837_v8  ;;  %v8839_v9 = vpop.permute.xlu0 %1942  ;;  %v2507_v52 = vld [vmem:[%s11748_s6 + $0x198] sm:$0xff] }
  0xf6   : > { %2736 = vperm.xlu0 %7680, %v2486_v53   ;;  %11771 = vst [vmem:[#allocation25_spill] sm:$0xff] %v8839_v9  ;;  %v2506_v53 = vld [vmem:[%s11748_s6 + $0x190] sm:$0xff]  ;;  %v2519_v8 = vld [vmem:[%s11748_s6 + $0x1f8] sm:$0xff] }
  0xf7   : > { %v2518_v9 = vld [vmem:[%s11748_s6 + $0x1f0] sm:$0xff] }
  0xf8   : > { %v8853_v18 = vpop.permute.xlu1 %1937 }
  0xf9   : > { %2751 = vperm.xlu1 %7681, %v2489_v58   ;;  %11772 = vst [vmem:[#allocation26_spill] sm:$0xff] %v8853_v18  ;;  %v8855_v19 = vpop.permute.xlu0 %1932 }
  0xfa   : > { %2746 = vperm.xlu0 %7680, %v2488_v59   ;;  %11773 = vst [vmem:[#allocation27_spill] sm:$0xff] %v8855_v19 }
  0xfc   : > { %v8863_v26 = vpop.permute.xlu1 %1927 }
  0xfd   : > { %2761 = vperm.xlu1 %7681, %v2491_v60   ;;  %11774 = vst [vmem:[#allocation28_spill] sm:$0xff] %v8863_v26  ;;  %v8865_v27 = vpop.permute.xlu0 %1922 }
  0xfe   : > { %2756 = vperm.xlu0 %7680, %v2490_v63   ;;  %11775 = vst [vmem:[#allocation29_spill] sm:$0xff] %v8865_v27 }
 0x100   : > { %v8879_v36 = vpop.permute.xlu1 %1917 }
 0x101   : > { %2771 = vperm.xlu1 %7681, %v2493_v3   ;;  %11776 = vst [vmem:[#allocation30_spill] sm:$0xff] %v8879_v36  ;;  %v8881_v39 = vpop.permute.xlu0 %1912  ;;  %v2516_v36 = vld [vmem:[%s11748_s6 + $0x1e0] sm:$0xff] }
 0x102   : > { %2766 = vperm.xlu0 %7680, %v2492_v7   ;;  %11777 = vst [vmem:[#allocation31_spill] sm:$0xff] %v8881_v39  ;;  %v2509_v7 = vld [vmem:[%s11748_s6 + $0x1a8] sm:$0xff] }
 0x103   : > { %v2517_v39 = vld [vmem:[%s11748_s6 + $0x1e8] sm:$0xff] }
 0x104   : > { %v8889_v46 = vpop.permute.xlu1 %1907 }
 0x105   : > { %2781 = vperm.xlu1 %7681, %v2495_v12   ;;  %11778 = vst [vmem:[#allocation32_spill] sm:$0xff] %v8889_v46  ;;  %v8891_v47 = vpop.permute.xlu0 %1902  ;;  %v2508_v12 = vld [vmem:[%s11748_s6 + $0x1a0] sm:$0xff] }
 0x106   : > { %2776 = vperm.xlu0 %7680, %v2494_v13   ;;  %11779 = vst [vmem:[#allocation33_spill] sm:$0xff] %v8891_v47 }
 0x108   : > { %v8907_v3 = vpop.permute.xlu1 %1897 }
 0x109   : > { %2791 = vperm.xlu1 %7681, %v2497_v14   ;;  %11780 = vst [vmem:[#allocation34_spill] sm:$0xff] %v8907_v3  ;;  %v8909_v6 = vpop.permute.xlu0 %1892  ;;  %v2514_v3 = vld [vmem:[%s11748_s6 + $0x1d0] sm:$0xff] }
 0x10a   : > { %2786 = vperm.xlu0 %7680, %v2496_v15   ;;  %11781 = vst [vmem:[#allocation35_spill] sm:$0xff] %v8909_v6  ;;  %v2515_v6 = vld [vmem:[%s11748_s6 + $0x1d8] sm:$0xff] }
 0x10d   : > { %2801 = vperm.xlu1 %7681, %v2499_v22  }
 0x10e   : > { %2796 = vperm.xlu0 %7680, %v2498_v23   ;;  %v2511_v23 = vld [vmem:[%s11748_s6 + $0x1b8] sm:$0xff] }
 0x111   : > { %2811 = vperm.xlu1 %7681, %v2501_v30   ;;  %v2510_v30 = vld [vmem:[%s11748_s6 + $0x1b0] sm:$0xff] }
 0x112   : > { %2806 = vperm.xlu0 %7680, %v2500_v31  }
 0x115   : > { %2821 = vperm.xlu1 %7681, %v2503_v32  }
 0x116   : > { %2816 = vperm.xlu0 %7680, %v2502_v33   ;;  %v8935_v33 = vpop.permute.xlu1 %1887 }
 0x117   : > { %11782 = vst [vmem:[#allocation36_spill] sm:$0xff] %v8935_v33 }
 0x119   : > { %2831 = vperm.xlu1 %7681, %v2505_v42   ;;  %v8937_v42 = vpop.permute.xlu0 %1882 }
 0x11a   : > { %2826 = vperm.xlu0 %7680, %v2504_v45   ;;  %11783 = vst [vmem:[#allocation37_spill] sm:$0xff] %v8937_v42  ;;  %v8957_v42 = vpop.permute.xlu1 %1877 }
 0x11d   : > { %2841 = vperm.xlu1 %7681, %v2507_v52   ;;  %v8959_v33 = vpop.permute.xlu0 %1872 }
 0x11e   : > { %v8899_v58 = vpop.f32.mrf.mxu0  ;;  %2836 = vperm.xlu0 %7680, %v2506_v53   ;;  %v2513_v53 = vld [vmem:[%s11748_s6 + $0x1c8] sm:$0xff]  ;;  %v8975_v19 = vpop.permute.xlu1 %2037 }
 0x11f   : > { %v8901_v59 = vpop.f32.mrf.mxu1  ;;  %11784 = vst [vmem:[#allocation38_spill] sm:$0xff] %v8975_v19 }
 0x120   : > { %v8903_v60 = vpop.f32.mrf.mxu0 }
 0x121   : > { %v8905_v63 = vpop.f32.mrf.mxu1  ;;  %2851 = vperm.xlu1 %7681, %v2509_v7   ;;  %v2512_v7 = vld [vmem:[%s11748_s6 + $0x1c0] sm:$0xff]  ;;  %v8977_v18 = vpop.permute.xlu0 %2032 }
 0x122   : > { %v8917_v13 = vpop.f32.mrf.mxu0  ;;  %2846 = vperm.xlu0 %7680, %v2508_v12   ;;  %11785 = vst [vmem:[#allocation39_spill] sm:$0xff] %v8977_v18  ;;  %v8985_v18 = vpop.permute.xlu1 %2027 }
 0x123   : > { %v8919_v14 = vpop.f32.mrf.mxu1  ;;  %11786 = vst [vmem:[#allocation40_spill] sm:$0xff] %v8985_v18 }
 0x124   : > { %v8921_v15 = vpop.f32.mrf.mxu0 }
 0x125   : > { %v8923_v22 = vpop.f32.mrf.mxu1  ;;  %2861 = vperm.xlu1 %7681, %v2511_v23  }
 0x126   : > { %v8931_v31 = vpop.f32.mrf.mxu0  ;;  %2856 = vperm.xlu0 %7680, %v2510_v30  }
 0x127   : > { %v8933_v32 = vpop.f32.mrf.mxu1 }
 0x128   : > { %v8939_v45 = vpop.f32.mrf.mxu0 }
 0x129   : > { %v8941_v52 = vpop.f32.mrf.mxu1  ;;  %2871 = vperm.xlu1 %7681, %v2513_v53  }
 0x12a   : > { %v8949_v12 = vpop.f32.mrf.mxu0  ;;  %2866 = vperm.xlu0 %7680, %v2512_v7  }
 0x12b   : > { %v8951_v0 = vpop.f32.mrf.mxu1 }
 0x12c   : > { %v8953_v23 = vpop.f32.mrf.mxu0 }
 0x12d   : > { %v8955_v30 = vpop.f32.mrf.mxu1  ;;  %2881 = vperm.xlu1 %7681, %v2515_v6  }
 0x12e   : > { %v7464_v47 = vpop.f32.mrf.mxu0  ;;  %2876 = vperm.xlu0 %7680, %v2514_v3  }
 0x12f   : > { %v7544_v46 = vpop.f32.mrf.mxu1 }
 0x130   : > { %v8967_v53 = vpop.f32.mrf.mxu0  ;;  %v1442_v40 = vadd.f32 %v7544_v46, %v7464_v47 }
 0x131   : > { %v1433_v7 = vpop.f32.mrf.mxu1  ;;  %2891 = vperm.xlu1 %7681, %v2517_v39   ;;  %v2521_v39 = vld [vmem:[%s11748_s6 + $0x208] sm:$0xff] }
 0x132   : > { %v7465_v27 = vpop.f32.mrf.mxu0  ;;  %2886 = vperm.xlu0 %7680, %v2516_v36   ;;  %v8987_v36 = vpop.permute.xlu0 %2022 }
 0x133   : > { %v7545_v26 = vpop.f32.mrf.mxu1  ;;  %11787 = vst [vmem:[#allocation41_spill] sm:$0xff] %v8987_v36 }
 0x134   : > { %v955_v3 = vpop.f32.mrf.mxu0  ;;  %v1445_v28 = vadd.f32 %v7545_v26, %v7465_v27  ;;  %v7774_v27 = vld [vmem:[%s11747_s5 + $0xc] ss:$16 sps:$4 sm:$0xff]  }
 0x135   : > { %v1436_v6 = vpop.f32.mrf.mxu1  ;;  %2901 = vperm.xlu1 %7681, %v2519_v8   ;;  %5081 = vmatprep.mubr.bf16.mxu1 %v7774_v27 }
 0x136   : > { %v7468_v1 = vpop.f32.mrf.mxu0  ;;  %2896 = vperm.xlu0 %7680, %v2518_v9   ;;  %v2051_v46 = vadd.f32 %v8706_v4, %v1445_v28  ;;  %v1437_v47 = vadd.f32 %v1436_v6, %v955_v3  ;;  %v1434_v4 = vadd.f32 %v1433_v7, %v8967_v53  ;;  %v11788_v53 = vmov 0   ;;  %v2527_v7 = vld [vmem:[%s11748_s6 + $0x238] sm:$0xff] }
 0x137   : > { %v7548_v2 = vpop.f32.mrf.mxu1 }
 0x138   : > { %v1458_v21 = vadd.f32 %v7548_v2, %v7468_v1  ;;  %v968_v19 = vpop.f32.mrf.mxu0 }
 0x139   : > { %v1449_v20 = vpop.f32.mrf.mxu1  ;;  %2911 = vperm.xlu1 %7681, %v2521_v39  }
 0x13a   : > { %v7469_v24 = vpop.f32.mrf.mxu0  ;;  %v2054_v1 = vadd.f32 %v8728_v17, %v1458_v21  ;;  %v1450_v2 = vadd.f32 %v1449_v20, %v968_v19  ;;  %2906 = vperm.xlu0 %7680, %v2520_v25   ;;  %v9007_v21 = vpop.permute.xlu1 %2017 }
 0x13b   : > { %v7549_v29 = vpop.f32.mrf.mxu1 }
 0x13c   : > { %v1461_v8 = vadd.f32 %v7549_v29, %v7469_v24  ;;  %v971_v9 = vpop.f32.mrf.mxu0  ;;  %v9009_v24 = vpop.permute.xlu0 %2012  ;;  %v2118_v25 = vmax.f32 %v2054_v1, 0.0 }
 0x13d   : > { %v1452_v18 = vpop.f32.mrf.mxu1  ;;  %2921 = vperm.xlu1 %7681, %v2523_v34  }
 0x13e   : > { %v2055_v36 = vadd.f32 %v8726_v16, %v1461_v8  ;;  %v1453_v35 = vadd.f32 %v1452_v18, %v971_v9  ;;  %v9003_v17 = vpop.f32.mrf.mxu0  ;;  %v2052_v16 = vadd.f32 %v8718_v11, %v1450_v2  ;;  %2916 = vperm.xlu0 %7680, %v2522_v41   ;;  %v2525_v11 = vld [vmem:[%s11748_s6 + $0x228] sm:$0xff]  ;;  %v2050_v41 = vadd.f32 %v8708_v5, %v1442_v40 }
 0x13f   : > { %v9005_v20 = vpop.f32.mrf.mxu1  ;;  %v1429_v8 = vadd.f32 %v8951_v0, %v8949_v12  ;;  %v2115_v9 = vmax.f32 %v2051_v46, 0.0  ;;  %v2049_v5 = vadd.f32 %v8696_v61, %v1437_v47  ;;  %v1426_v0 = vadd.f32 %v8933_v32, %v8931_v31  ;;  %v2528_v31 = vld [vmem:[%s11748_s6 + $0x240] sm:$0xff] }
 0x140   : > { %v2119_v29 = vmax.f32 %v2055_v36, 0.0  ;;  %v2053_v18 = vadd.f32 %v8716_v10, %v1453_v35  ;;  %v9013_v19 = vpop.f32.mrf.mxu0  ;;  %v2524_v10 = vld [vmem:[%s11748_s6 + $0x220] sm:$0xff]  ;;  %v2116_v28 = vmax.f32 %v2052_v16, 0.0  ;;  %v9037_v36 = vpop.permute.xlu1 %2007  ;;  %v2114_v12 = vmax.f32 %v2050_v41, 0.0 }
 0x141   : > { %v9015_v26 = vpop.f32.mrf.mxu1  ;;  %2931 = vperm.xlu1 %7681, %v2525_v11   ;;  %v9039_v2 = vpop.permute.xlu0 %2002  ;;  %v2048_v61 = vadd.f32 %v8698_v62, %v1434_v4  ;;  %v2047_v46 = vadd.f32 %v8686_v55, %v1429_v8  ;;  %v1421_v47 = vadd.f32 %v8955_v30, %v8953_v23  ;;  %v2529_v62 = vld [vmem:[%s11748_s6 + $0x248] sm:$0xff]  ;;  %v2046_v55 = vadd.f32 %v8688_v56, %v1426_v0 }
 0x142   : > { %v2431_v39 = vpack.c.bf16 %v2119_v29, %v2118_v25  ;;  %v2117_v1 = vmax.f32 %v2053_v18, 0.0  ;;  %v9027_v34 = vpop.f32.mrf.mxu0  ;;  %2926 = vperm.xlu0 %7680, %v2524_v10   ;;  %v2526_v25 = vld [vmem:[%s11748_s6 + $0x230] sm:$0xff]  ;;  %v1418_v30 = vadd.f32 %v8941_v52, %v8939_v45  ;;  %v1413_v8 = vadd.f32 %v8919_v14, %v8917_v13  ;;  %v2531_v45 = vld [vmem:[%s11748_s6 + $0x258] sm:$0xff] }
 0x143   : > { %v9029_v35 = vpop.f32.mrf.mxu1  ;;  %v2112_v41 = vmax.f32 %v2048_v61, 0.0  ;;  %v2045_v56 = vadd.f32 %v8676_v49, %v1421_v47  ;;  %v2530_v52 = vld [vmem:[%s11748_s6 + $0x250] sm:$0xff]  ;;  %v1410_v13 = vadd.f32 %v8901_v59, %v8899_v58  ;;  %v2110_v14 = vmax.f32 %v2046_v55, 0.0  ;;  %v2532_v59 = vld [vmem:[%s11748_s6 + $0x260] sm:$0xff] }
 0x144   : > { %4505 = vmatpush1.bf16.msra.mxu0 %v2431_v39  ;;  %v9033_v3 = vpop.f32.mrf.mxu0  ;;  %v2430_v40 = vpack.c.bf16 %v2117_v1, %v2116_v28  ;;  %v2429_v39 = vpack.c.bf16 %v2115_v9, %v2114_v12  ;;  %v2113_v1 = vmax.f32 %v2049_v5, 0.0  ;;  %v9077_v10 = vpop.permute.xlu1 %1997  ;;  %v2111_v9 = vmax.f32 %v2047_v46, 0.0 }
 0x145   : > { %v9035_v6 = vpop.f32.mrf.mxu1  ;;  %4506 = vmatprep.subr.bf16.mxu0 %v11788_v53  ;;  %2941 = vperm.xlu1 %7681, %v2527_v7   ;;  %v9079_v23 = vpop.permute.xlu0 %1992  ;;  %v2044_v49 = vadd.f32 %v8678_v50, %v1418_v30  ;;  %v2043_v12 = vadd.f32 %v8666_v43, %v1413_v8  ;;  %v1405_v61 = vadd.f32 %v8923_v22, %v8921_v15  ;;  %v2109_v58 = vmax.f32 %v2045_v56, 0.0  ;;  %v2533_v50 = vld [vmem:[%s11748_s6 + $0x268] sm:$0xff] }
 0x146   : > { %v9051_v16 = vpop.f32.mrf.mxu0  ;;  %2936 = vperm.xlu0 %7680, %v2526_v25   ;;  %v2428_v5 = vpack.c.bf16 %v2113_v1, %v2112_v41  ;;  %v2427_v46 = vpack.c.bf16 %v2111_v9, %v2110_v14  ;;  %v2042_v15 = vadd.f32 %v8656_v37, %v1410_v13  ;;  %v1402_v22 = vadd.f32 %v8905_v63, %v8903_v60  ;;  %v2535_v9 = vld [vmem:[%s11748_s6 + $0x278] sm:$0xff]  ;;  %v2534_v37 = vld [vmem:[%s11748_s6 + $0x270] sm:$0xff] }
 0x147   : > { %v9053_v29 = vpop.f32.mrf.mxu1  ;;  %v2107_v30 = vmax.f32 %v2043_v12, 0.0  ;;  %v2041_v41 = vadd.f32 %v8668_v44, %v1405_v61  ;;  %v2537_v61 = vld [vmem:[%s11748_s6 + $0x288] sm:$0xff] }
 0x148   : > { %4507 = vmatpush1.bf16.msra.mxu0 %v2430_v40  ;;  %v9058_v18 = vpop.f32.mrf.mxu0  ;;  %v9111_v47 = vpop.permute.xlu1 %1987  ;;  %v2106_v56 = vmax.f32 %v2042_v15, 0.0 }
 0x149   : > { %v9060_v27 = vpop.f32.mrf.mxu1  ;;  %4508 = vmatprep.subr.bf16.mxu0 %v11788_v53  ;;  %2951 = vperm.xlu1 %7681, %v2529_v62   ;;  %v2108_v62 = vmax.f32 %v2044_v49, 0.0  ;;  %v2105_v12 = vmax.f32 %v2041_v41, 0.0 }
 0x14a   : > { %v9072_v32 = vpop.f32.mrf.mxu0  ;;  %2946 = vperm.xlu0 %7680, %v2528_v31   ;;  %v2425_v49 = vpack.c.bf16 %v2107_v30, %v2106_v56  ;;  %v2538_v56 = vld [vmem:[%s11748_s6 + $0x290] sm:$0xff] }
 0x14b   : > { %v9074_v11 = vpop.f32.mrf.mxu1  ;;  %v2426_v8 = vpack.c.bf16 %v2109_v58, %v2108_v62 }
 0x14c   : > { %4509 = vmatpush1.bf16.msra.mxu0 %v2429_v39  ;;  %v9083_v4 = vpop.f32.mrf.mxu0  ;;  %v9113_v39 = vpop.permute.xlu0 %1982 }
 0x14d   : > { %v9085_v28 = vpop.f32.mrf.mxu1  ;;  %4510 = vmatprep.subr.bf16.mxu0 %v11788_v53  ;;  %2961 = vperm.xlu1 %7681, %v2531_v45   ;;  %v9134_v45 = vpop.permute.xlu1 %1977 }
 0x14e   : > { %v9097_v40 = vpop.f32.mrf.mxu0  ;;  %2956 = vperm.xlu0 %7680, %v2530_v52  }
 0x14f   : > { %v9099_v7 = vpop.f32.mrf.mxu1 }
 0x150   : > { %4511 = vmatpush1.bf16.msra.mxu0 %v2428_v5  ;;  %v9104_v25 = vpop.f32.mrf.mxu0  ;;  %v2040_v5 = vadd.f32 %v8658_v38, %v1402_v22  ;;  %v9136_v52 = vpop.permute.xlu0 %1972  ;;  %v2536_v38 = vld [vmem:[%s11748_s6 + $0x280] sm:$0xff] }
 0x151   : > { %v9106_v0 = vpop.f32.mrf.mxu1  ;;  %4512 = vmatprep.subr.bf16.mxu0 %v11788_v53  ;;  %2971 = vperm.xlu1 %7681, %v2533_v50  }
 0x152   : > { %v7481_v43 = vpop.f32.mrf.mxu0  ;;  %2966 = vperm.xlu0 %7680, %v2532_v59   ;;  %v2104_v50 = vmax.f32 %v2040_v5, 0.0  ;;  %v1506_v5 = vadd.f32 %v9099_v7, %v9097_v40 }
 0x153   : > { %v7561_v1 = vpop.f32.mrf.mxu1 }
 0x154   : > { %4513 = vmatpush1.bf16.msra.mxu0 %v2427_v46  ;;  %v1019_v31 = vpop.f32.mrf.mxu0  ;;  %v2424_v41 = vpack.c.bf16 %v2105_v12, %v2104_v50 }
 0x155   : > { %v1500_v55 = vpop.f32.mrf.mxu1  ;;  %4514 = vmatprep.subr.bf16.mxu0 %v11788_v53  ;;  %2981 = vperm.xlu1 %7681, %v2535_v9   ;;  %v9148_v9 = vpop.permute.xlu0 %1962 }
 0x156   : > { %v7484_v60 = vpop.f32.mrf.mxu0  ;;  %2976 = vperm.xlu0 %7680, %v2534_v37   ;;  %v1509_v37 = vadd.f32 %v7561_v1, %v7481_v43  ;;  %v1501_v40 = vadd.f32 %v1500_v55, %v1019_v31  ;;  %v2066_v31 = vadd.f32 %v8800_v51, %v1506_v5  ;;  %v1498_v55 = vadd.f32 %v9106_v0, %v9104_v25  ;;  %v2543_v51 = vld [vmem:[%s11748_s6 + $0x2b8] sm:$0xff]  ;;  %v2542_v25 = vld [vmem:[%s11748_s6 + $0x2b0] sm:$0xff] }
 0x157   : > { %v7564_v63 = vpop.f32.mrf.mxu1 }
 0x158   : > { %v1522_v44 = vadd.f32 %v7564_v63, %v7484_v60  ;;  %4515 = vmatpush1.bf16.msra.mxu0 %v2426_v8  ;;  %v1032_v13 = vpop.f32.mrf.mxu0  ;;  %v9146_v8 = vpop.permute.xlu1 %1967 }
 0x159   : > { %v1513_v14 = vpop.f32.mrf.mxu1  ;;  %4516 = vmatprep.subr.bf16.mxu0 %v11788_v53  ;;  %2991 = vperm.xlu1 %7681, %v2537_v61   ;;  %v2067_v61 = vadd.f32 %v8798_v48, %v1509_v37  ;;  %v9184_v48 = vpop.permute.xlu0 %2586 }
 0x15a   : > { %v7485_v46 = vpop.f32.mrf.mxu0  ;;  %v2070_v59 = vadd.f32 %v8959_v33, %v1522_v44  ;;  %v1514_v15 = vadd.f32 %v1513_v14, %v1032_v13  ;;  %2986 = vperm.xlu0 %7680, %v2536_v38   ;;  %v2539_v33 = vld [vmem:[%s11748_s6 + $0x298] sm:$0xff] }
 0x15b   : > { %v7565_v58 = vpop.f32.mrf.mxu1 }
 0x15c   : > { %v1525_v22 = vadd.f32 %v7565_v58, %v7485_v46  ;;  %4517 = vmatpush1.bf16.msra.mxu0 %v2425_v49  ;;  %v1035_v62 = vpop.f32.mrf.mxu0  ;;  %v2134_v43 = vmax.f32 %v2070_v59, 0.0  ;;  %v9182_v50 = vpop.permute.xlu1 %2591 }
 0x15d   : > { %v1516_v30 = vpop.f32.mrf.mxu1  ;;  %4518 = vmatprep.subr.bf16.mxu0 %v11788_v53  ;;  %3001 = vperm.xlu1 %7681, %v2539_v33   ;;  %v11790_v33 = vld [vmem:[#allocation21_spill] sm:$0xff] }
 0x15e   : > { %v2071_v60 = vadd.f32 %v8957_v42, %v1525_v22  ;;  %v1517_v63 = vadd.f32 %v1516_v30, %v1035_v62  ;;  %v9160_v44 = vpop.f32.mrf.mxu0  ;;  %v2068_v42 = vadd.f32 %v8810_v57, %v1514_v15  ;;  %2996 = vperm.xlu0 %7680, %v2538_v56   ;;  %v2541_v57 = vld [vmem:[%s11748_s6 + $0x2a8] sm:$0xff]  ;;  %v1493_v62 = vadd.f32 %v9074_v11, %v9072_v32 }
 0x15f   : > { %v9162_v13 = vpop.f32.mrf.mxu1  ;;  %v2131_v30 = vmax.f32 %v2067_v61, 0.0  ;;  %v1490_v32 = vadd.f32 %v9053_v29, %v9051_v16  ;;  %v2130_v11 = vmax.f32 %v2066_v31, 0.0  ;;  %v2064_v56 = vadd.f32 %v11790_v33, %v1498_v55  ;;  %v11793_v31 = vld [vmem:[#allocation19_spill] sm:$0xff] }
 0x160   : > { %v2135_v1 = vmax.f32 %v2071_v60, 0.0  ;;  %v2069_v14 = vadd.f32 %v8808_v54, %v1517_v63  ;;  %4519 = vmatpush1.bf16.msra.mxu0 %v2424_v41  ;;  %v9166_v49 = vpop.f32.mrf.mxu0  ;;  %v2540_v54 = vld [vmem:[%s11748_s6 + $0x2a0] sm:$0xff]  ;;  %v2132_v59 = vmax.f32 %v2068_v42, 0.0  ;;  %v9214_v42 = vpop.permute.xlu1 %2601 }
 0x161   : > { %v9168_v12 = vpop.f32.mrf.mxu1  ;;  %4520 = vmatprep.subr.bf16.mxu0 %v11788_v53  ;;  %3011 = vperm.xlu1 %7681, %v2541_v57   ;;  %v11789_v41 = vld [vmem:[#allocation20_spill] sm:$0xff]  ;;  %v2437_v16 = vpack.c.bf16 %v2131_v30, %v2130_v11  ;;  %v2062_v55 = vadd.f32 %v11793_v31, %v1490_v32  ;;  %v1477_v30 = vadd.f32 %v9029_v35, %v9027_v34 }
 0x162   : > { %v2439_v7 = vpack.c.bf16 %v2135_v1, %v2134_v43  ;;  %v2133_v38 = vmax.f32 %v2069_v14, 0.0  ;;  %v9178_v46 = vpop.f32.mrf.mxu0  ;;  %3006 = vperm.xlu0 %7680, %v2540_v54   ;;  %v2065_v37 = vadd.f32 %v11789_v41, %v1501_v40  ;;  %11791 = vst [vmem:[#allocation20_spill] sm:$0xff] %v9214_v42  ;;  %v9216_v1 = vpop.permute.xlu0 %2596  ;;  %v11792_v14 = vld [vmem:[#allocation18_spill] sm:$0xff]  ;;  %v1485_v40 = vadd.f32 %v9085_v28, %v9083_v4  ;;  %v2548_v31 = vld [vmem:[%s11748_s6 + $0x2e0] sm:$0xff] }
 0x163   : > { %v9180_v58 = vpop.f32.mrf.mxu1  ;;  %v2063_v61 = vadd.f32 %v11792_v14, %v1493_v62  ;;  %v1482_v4 = vadd.f32 %v9060_v27, %v9058_v18  ;;  %v2128_v28 = vmax.f32 %v2064_v56, 0.0  ;;  %v2547_v18 = vld [vmem:[%s11748_s6 + $0x2d8] sm:$0xff]  ;;  %v2546_v27 = vld [vmem:[%s11748_s6 + $0x2d0] sm:$0xff]  ;;  %v1474_v34 = vadd.f32 %v9005_v20, %v9003_v17  ;;  %v11797_v56 = vld [vmem:[#allocation17_spill] sm:$0xff] }
 0x164   : > { %4521 = vmatpush2.bf16.msra.mxu0 %v2439_v7  ;;  %v9189_v15 = vpop.f32.mrf.mxu0  ;;  %v2438_v60 = vpack.c.bf16 %v2133_v38, %v2132_v59  ;;  %v2129_v29 = vmax.f32 %v2065_v37, 0.0  ;;  %v2545_v7 = vld [vmem:[%s11748_s6 + $0x2c8] sm:$0xff]  ;;  %v2544_v38 = vld [vmem:[%s11748_s6 + $0x2c0] sm:$0xff]  ;;  %v9255_v35 = vpop.permute.xlu1 %2611  ;;  %v2126_v33 = vmax.f32 %v2062_v55, 0.0 }
 0x165   : > { %v9191_v22 = vpop.f32.mrf.mxu1  ;;  %4522 = vmatprep.subr.bf16.mxu0 %v11788_v53  ;;  %3021 = vperm.xlu1 %7681, %v2543_v51   ;;  %v2127_v41 = vmax.f32 %v2063_v61, 0.0  ;;  %v11794_v37 = vld [vmem:[#allocation16_spill] sm:$0xff]  ;;  %11795 = vst [vmem:[#allocation21_spill] sm:$0xff] %v9255_v35  ;;  %v2060_v14 = vadd.f32 %v11797_v56, %v1482_v4  ;;  %v11807_v35 = vld [vmem:[#allocation22_spill] sm:$0xff] }
 0x166   : > { %v9203_v0 = vpop.f32.mrf.mxu0  ;;  %3016 = vperm.xlu0 %7680, %v2542_v25   ;;  %v2436_v51 = vpack.c.bf16 %v2129_v29, %v2128_v28  ;;  %v9257_v11 = vpop.permute.xlu0 %2606  ;;  %v11799_v28 = vld [vmem:[#allocation15_spill] sm:$0xff] }
 0x167   : > { %v9205_v63 = vpop.f32.mrf.mxu1  ;;  %11796 = vst [vmem:[#allocation18_spill] sm:$0xff] %v9257_v11  ;;  %v2435_v17 = vpack.c.bf16 %v2127_v41, %v2126_v33 }
 0x168   : > { %4523 = vmatpush2.bf16.msra.mxu0 %v2438_v60  ;;  %v9210_v5 = vpop.f32.mrf.mxu0  ;;  %v2061_v60 = vadd.f32 %v11794_v37, %v1485_v40  ;;  %v2058_v37 = vadd.f32 %v11799_v28, %v1474_v34 }
 0x169   : > { %v9212_v43 = vpop.f32.mrf.mxu1  ;;  %4524 = vmatprep.subr.bf16.mxu0 %v11788_v53  ;;  %3031 = vperm.xlu1 %7681, %v2545_v7   ;;  %v1469_v7 = vadd.f32 %v9035_v6, %v9033_v3  ;;  %v2124_v3 = vmax.f32 %v2060_v14, 0.0 }
 0x16a   : > { %v9228_v57 = vpop.f32.mrf.mxu0  ;;  %3026 = vperm.xlu0 %7680, %v2544_v38   ;;  %v2125_v20 = vmax.f32 %v2061_v60, 0.0  ;;  %v2549_v38 = vld [vmem:[%s11748_s6 + $0x2e8] sm:$0xff] }
 0x16b   : > { %v9230_v54 = vpop.f32.mrf.mxu1 }
 0x16c   : > { %4525 = vmatpush2.bf16.msra.mxu0 %v2437_v16  ;;  %v9235_v59 = vpop.f32.mrf.mxu0  ;;  %v11798_v16 = vld [vmem:[#allocation14_spill] sm:$0xff]  ;;  %v2434_v56 = vpack.c.bf16 %v2125_v20, %v2124_v3  ;;  %v2553_v3 = vld [vmem:[%s11748_s6 + $0x308] sm:$0xff] }
 0x16d   : > { %v9237_v62 = vpop.f32.mrf.mxu1  ;;  %4526 = vmatprep.subr.bf16.mxu0 %v11788_v53  ;;  %3041 = vperm.xlu1 %7681, %v2547_v18   ;;  %v2059_v29 = vadd.f32 %v11798_v16, %v1477_v30  ;;  %v1466_v30 = vadd.f32 %v9015_v26, %v9013_v19  ;;  %v9279_v18 = vpop.permute.xlu0 %2616  ;;  %v2551_v19 = vld [vmem:[%s11748_s6 + $0x2f8] sm:$0xff]  ;;  %v2550_v26 = vld [vmem:[%s11748_s6 + $0x2f0] sm:$0xff]  ;;  %v2122_v16 = vmax.f32 %v2058_v37, 0.0  ;;  %v2552_v37 = vld [vmem:[%s11748_s6 + $0x300] sm:$0xff] }
 0x16e   : > { %v9249_v25 = vpop.f32.mrf.mxu0  ;;  %3036 = vperm.xlu0 %7680, %v2546_v27   ;;  %11801 = vst [vmem:[#allocation16_spill] sm:$0xff] %v9279_v18  ;;  %v11802_v27 = vld [vmem:[#allocation12_spill] sm:$0xff] }
 0x16f   : > { %v9251_v32 = vpop.f32.mrf.mxu1  ;;  %v2123_v60 = vmax.f32 %v2059_v29, 0.0  ;;  %v2057_v33 = vadd.f32 %v11802_v27, %v1469_v7  ;;  %v11803_v29 = vld [vmem:[#allocation13_spill] sm:$0xff] }
 0x170   : > { %4527 = vmatpush2.bf16.msra.mxu0 %v2436_v51  ;;  %v9260_v61 = vpop.f32.mrf.mxu0  ;;  %v9277_v51 = vpop.permute.xlu1 %2621 }
 0x171   : > { %v9262_v40 = vpop.f32.mrf.mxu1  ;;  %4528 = vmatprep.subr.bf16.mxu0 %v11788_v53  ;;  %3051 = vperm.xlu1 %7681, %v2549_v38   ;;  %11800 = vst [vmem:[#allocation19_spill] sm:$0xff] %v9277_v51  ;;  %v2121_v28 = vmax.f32 %v2057_v33, 0.0 }
 0x172   : > { %v7497_v55 = vpop.f32.mrf.mxu0  ;;  %3046 = vperm.xlu0 %7680, %v2548_v31   ;;  %v2433_v31 = vpack.c.bf16 %v2123_v60, %v2122_v16 }
 0x173   : > { %v7577_v4 = vpop.f32.mrf.mxu1 }
 0x174   : > { %4529 = vmatpush2.bf16.msra.mxu0 %v2435_v17  ;;  %v1083_v6 = vpop.f32.mrf.mxu0  ;;  %v2056_v17 = vadd.f32 %v11803_v29, %v1466_v30  ;;  %v1573_v18 = vadd.f32 %v7577_v4, %v7497_v55  ;;  %v11808_v4 = vld [vmem:[#allocation25_spill] sm:$0xff] }
 0x175   : > { %v1564_v41 = vpop.f32.mrf.mxu1  ;;  %4530 = vmatprep.subr.bf16.mxu0 %v11788_v53  ;;  %3061 = vperm.xlu1 %7681, %v2551_v19   ;;  %v9299_v19 = vpop.permute.xlu0 %2626 }
 0x176   : > { %v7500_v34 = vpop.f32.mrf.mxu0  ;;  %3056 = vperm.xlu0 %7680, %v2550_v26   ;;  %11805 = vst [vmem:[#allocation14_spill] sm:$0xff] %v9299_v19  ;;  %v11806_v26 = vld [vmem:[#allocation23_spill] sm:$0xff] }
 0x177   : > { %v7580_v14 = vpop.f32.mrf.mxu1 }
 0x178   : > { %v1586_v38 = vadd.f32 %v7580_v14, %v7500_v34  ;;  %4531 = vmatpush2.bf16.msra.mxu0 %v2434_v56  ;;  %v1096_v7 = vpop.f32.mrf.mxu0  ;;  %v2120_v34 = vmax.f32 %v2056_v17, 0.0  ;;  %v9297_v56 = vpop.permute.xlu1 %2631  ;;  %v2555_v17 = vld [vmem:[%s11748_s6 + $0x318] sm:$0xff] }
 0x179   : > { %v1577_v20 = vpop.f32.mrf.mxu1  ;;  %4532 = vmatprep.subr.bf16.mxu0 %v11788_v53  ;;  %11804 = vst [vmem:[#allocation17_spill] sm:$0xff] %v9297_v56  ;;  %3071 = vperm.xlu1 %7681, %v2553_v3  }
 0x17a   : > { %v7501_v27 = vpop.f32.mrf.mxu0  ;;  %v2086_v60 = vadd.f32 %v11806_v26, %v1586_v38  ;;  %v1578_v33 = vadd.f32 %v1577_v20, %v1096_v7  ;;  %3066 = vperm.xlu0 %7680, %v2552_v37   ;;  %v2432_v51 = vpack.c.bf16 %v2121_v28, %v2120_v34  ;;  %v2554_v38 = vld [vmem:[%s11748_s6 + $0x310] sm:$0xff]  ;;  %v1570_v7 = vadd.f32 %v9251_v32, %v9249_v25  ;;  %v11809_v37 = vld [vmem:[#allocation24_spill] sm:$0xff]  ;;  %v9330_v26 = vpop.permute.xlu0 %2636 }
 0x17b   : > { %v7581_v30 = vpop.f32.mrf.mxu1  ;;  %11811 = vst [vmem:[#allocation12_spill] sm:$0xff] %v9330_v26  ;;  %v11833_v26 = vld [vmem:[#allocation38_spill] sm:$0xff] }
 0x17c   : > { %v1589_v14 = vadd.f32 %v7581_v30, %v7501_v27  ;;  %4533 = vmatpush2.bf16.msra.mxu0 %v2433_v31  ;;  %v1099_v16 = vpop.f32.mrf.mxu0  ;;  %v2150_v55 = vmax.f32 %v2086_v60, 0.0  ;;  %v2084_v28 = vadd.f32 %v11808_v4, %v1578_v33  ;;  %v7749_v30 = vld [vmem:[%s11747_s5 + $0x24] ss:$16 sps:$4 sm:$0xff]   ;;  %v9328_v34 = vpop.permute.xlu1 %2641 }
 0x17d   : > { %v1580_v29 = vpop.f32.mrf.mxu1  ;;  %4534 = vmatprep.subr.bf16.mxu0 %v11788_v53  ;;  %3081 = vperm.xlu1 %7681, %v2555_v17   ;;  %11810 = vst [vmem:[#allocation15_spill] sm:$0xff] %v9328_v34  ;;  %v11812_v60 = vld [vmem:[#allocation26_spill] sm:$0xff] }
 0x17e   : > { %v2087_v11 = vadd.f32 %v11807_v35, %v1589_v14  ;;  %v1581_v42 = vadd.f32 %v1580_v29, %v1099_v16  ;;  %v9312_v20 = vpop.f32.mrf.mxu0  ;;  %v7746_v35 = vld [vmem:[%s11747_s5] ss:$16 sps:$4 sm:$0xff]   ;;  %3076 = vperm.xlu0 %7680, %v2554_v38   ;;  %v2083_v33 = vadd.f32 %v11812_v60, %v1573_v18  ;;  %v11813_v38 = vld [vmem:[#allocation27_spill] sm:$0xff] }
 0x17f   : > { %v9314_v31 = vpop.f32.mrf.mxu1  ;;  %v2556_v16 = vld [vmem:[%s11748_s6 + $0x320] sm:$0xff]  ;;  %v2082_v4 = vadd.f32 %v11813_v38, %v1570_v7 }
 0x180   : > { %v2151_v3 = vmax.f32 %v2087_v11, 0.0  ;;  %v2085_v27 = vadd.f32 %v11809_v37, %v1581_v42  ;;  %4535 = vmatpush2.bf16.msra.mxu0 %v2432_v51  ;;  %v9324_v25 = vpop.f32.mrf.mxu0  ;;  %v1565_v11 = vadd.f32 %v1564_v41, %v1083_v6  ;;  %v2557_v51 = vld [vmem:[%s11748_s6 + $0x328] sm:$0xff]  ;;  %v1562_v6 = vadd.f32 %v9262_v40, %v9260_v61  ;;  %v2559_v61 = vld [vmem:[%s11748_s6 + $0x338] sm:$0xff]  ;;  %v2558_v40 = vld [vmem:[%s11748_s6 + $0x330] sm:$0xff] }
 0x181   : > { %v9326_v32 = vpop.f32.mrf.mxu1  ;;  %v2148_v41 = vmax.f32 %v2084_v28, 0.0  ;;  %3091 = vperm.xlu1 %7681, %v2557_v51   ;;  %v2147_v37 = vmax.f32 %v2083_v33, 0.0  ;;  %v1554_v33 = vadd.f32 %v9205_v63, %v9203_v0  ;;  %v7752_v51 = vld [vmem:[%s11747_s5 + $0x44] ss:$16 sps:$4 sm:$0xff]  }
 0x182   : > { %v2447_v14 = vpack.c.bf16 %v2151_v3, %v2150_v55  ;;  %v2149_v42 = vmax.f32 %v2085_v27, 0.0  ;;  %v9339_v29 = vpop.f32.mrf.mxu0  ;;  %3086 = vperm.xlu0 %7680, %v2556_v16   ;;  %v1557_v3 = vadd.f32 %v9230_v54, %v9228_v57  ;;  %v11814_v27 = vld [vmem:[#allocation28_spill] sm:$0xff]  ;;  %v9367_v54 = vpop.permute.xlu1 %2651 }
 0x183   : > { %v9341_v17 = vpop.f32.mrf.mxu1  ;;  %4537 = vmatmul.mubr.bf16.vlgmr.msra.gmra.mxu0 %v7746_v35  ;;  %v2081_v35 = vadd.f32 %v11814_v27, %v1565_v11  ;;  %v7751_v57 = vld [vmem:[%s11747_s5 + $0x20] ss:$16 sps:$4 sm:$0xff]   ;;  %11815 = vst [vmem:[#allocation13_spill] sm:$0xff] %v9367_v54  ;;  %v2146_v11 = vmax.f32 %v2082_v4, 0.0  ;;  %v1549_v54 = vadd.f32 %v9237_v62, %v9235_v59  ;;  %v2561_v4 = vld [vmem:[%s11748_s6 + $0x348] sm:$0xff]  ;;  %v1546_v59 = vadd.f32 %v9212_v43, %v9210_v5  ;;  %v2563_v43 = vld [vmem:[%s11748_s6 + $0x358] sm:$0xff] }
 0x184   : > { %5050 = vmatpush1.bf16.msra.mxu1 %v2447_v14  ;;  %4544 = vmatprep.mubr.bf16.mxu0 %v7749_v30  ;;  %v9346_v18 = vpop.f32.mrf.mxu0  ;;  %v2446_v60 = vpack.c.bf16 %v2149_v42, %v2148_v41  ;;  %v9369_v30 = vpop.permute.xlu0 %2646  ;;  %v11817_v14 = vld [vmem:[#allocation29_spill] sm:$0xff]  ;;  %v11818_v41 = vld [vmem:[#allocation30_spill] sm:$0xff] }
 0x185   : > { %v9348_v55 = vpop.f32.mrf.mxu1  ;;  %5051 = vmatprep.subr.bf16.mxu1 %v11788_v53  ;;  %11816 = vst [vmem:[#allocation23_spill] sm:$0xff] %v9369_v30  ;;  %v2080_v42 = vadd.f32 %v11817_v14, %v1562_v6  ;;  %3101 = vperm.xlu1 %7681, %v2559_v61   ;;  %v2079_v27 = vadd.f32 %v11818_v41, %v1557_v3  ;;  %v2145_v63 = vmax.f32 %v2081_v35, 0.0  ;;  %v2560_v6 = vld [vmem:[%s11748_s6 + $0x340] sm:$0xff]  ;;  %v11819_v3 = vld [vmem:[#allocation31_spill] sm:$0xff] }
 0x186   : > { %v9360_v7 = vpop.f32.mrf.mxu0  ;;  %3096 = vperm.xlu0 %7680, %v2558_v40   ;;  %v2445_v0 = vpack.c.bf16 %v2147_v37, %v2146_v11  ;;  %v2078_v40 = vadd.f32 %v11819_v3, %v1554_v33  ;;  %v9402_v11 = vpop.permute.xlu1 %2661  ;;  %v11822_v41 = vld [vmem:[#allocation32_spill] sm:$0xff] }
 0x187   : > { %v9362_v28 = vpop.f32.mrf.mxu1  ;;  %v2144_v62 = vmax.f32 %v2080_v42, 0.0  ;;  %11820 = vst [vmem:[#allocation22_spill] sm:$0xff] %v9402_v11  ;;  %v2143_v33 = vmax.f32 %v2079_v27, 0.0  ;;  %v2077_v3 = vadd.f32 %v11822_v41, %v1549_v54  ;;  %v2562_v42 = vld [vmem:[%s11748_s6 + $0x350] sm:$0xff]  ;;  %v11823_v27 = vld [vmem:[#allocation33_spill] sm:$0xff]  ;;  %v11828_v30 = vld [vmem:[#allocation36_spill] sm:$0xff] }
 0x188   : > { %5052 = vmatpush1.bf16.msra.mxu1 %v2446_v60  ;;  %v9377_v16 = vpop.f32.mrf.mxu0  ;;  %v9404_v14 = vpop.permute.xlu0 %2656  ;;  %v2142_v54 = vmax.f32 %v2078_v40, 0.0  ;;  %v11824_v41 = vld [vmem:[#allocation34_spill] sm:$0xff]  ;;  %v2565_v40 = vld [vmem:[%s11748_s6 + $0x368] sm:$0xff] }
 0x189   : > { %v9379_v38 = vpop.f32.mrf.mxu1  ;;  %5053 = vmatprep.subr.bf16.mxu1 %v11788_v53  ;;  %3111 = vperm.xlu1 %7681, %v2561_v4   ;;  %11821 = vst [vmem:[#allocation25_spill] sm:$0xff] %v9404_v14  ;;  %v2444_v5 = vpack.c.bf16 %v2145_v63, %v2144_v62  ;;  %v2076_v63 = vadd.f32 %v11823_v27, %v1546_v59  ;;  %v7755_v4 = vld [vmem:[%s11747_s5 + $0x64] ss:$16 sps:$4 sm:$0xff]  }
 0x18a   : > { %v9391_v60 = vpop.f32.mrf.mxu0  ;;  %3106 = vperm.xlu0 %7680, %v2560_v6   ;;  %v1533_v14 = vadd.f32 %v9191_v22, %v9189_v15  ;;  %v2564_v59 = vld [vmem:[%s11748_s6 + $0x360] sm:$0xff]  ;;  %v11827_v15 = vld [vmem:[#allocation35_spill] sm:$0xff] }
 0x18b   : > { %v9393_v61 = vpop.f32.mrf.mxu1  ;;  %4545 = vmatmul.mubr.bf16.gmra.mxu0 %v7751_v57  ;;  %v1541_v57 = vadd.f32 %v9180_v58, %v9178_v46  ;;  %v7754_v46 = vld [vmem:[%s11747_s5 + $0x40] ss:$16 sps:$4 sm:$0xff]   ;;  %v1538_v58 = vadd.f32 %v9162_v13, %v9160_v44  ;;  %v2443_v44 = vpack.c.bf16 %v2143_v33, %v2142_v54  ;;  %v2141_v13 = vmax.f32 %v2077_v3, 0.0 }
 0x18c   : > { %5054 = vmatpush1.bf16.msra.mxu1 %v2445_v0  ;;  %4552 = vmatprep.mubr.bf16.mxu0 %v7752_v51  ;;  %v9398_v37 = vpop.f32.mrf.mxu0  ;;  %v1530_v33 = vadd.f32 %v9168_v12, %v9166_v49  ;;  %v2140_v3 = vmax.f32 %v2076_v63, 0.0  ;;  %v2073_v34 = vadd.f32 %v11828_v30, %v1533_v14  ;;  %v2566_v49 = vld [vmem:[%s11748_s6 + $0x370] sm:$0xff] }
 0x18d   : > { %v9400_v35 = vpop.f32.mrf.mxu1  ;;  %5055 = vmatprep.subr.bf16.mxu1 %v11788_v53  ;;  %3121 = vperm.xlu1 %7681, %v2563_v43   ;;  %v2075_v11 = vadd.f32 %v11824_v41, %v1541_v57  ;;  %v9445_v57 = vpop.permute.xlu0 %2666  ;;  %v2074_v22 = vadd.f32 %v11827_v15, %v1538_v58  ;;  %v2567_v58 = vld [vmem:[%s11748_s6 + $0x378] sm:$0xff] }
 0x18e   : > { %v9416_v51 = vpop.f32.mrf.mxu0  ;;  %3116 = vperm.xlu0 %7680, %v2562_v42   ;;  %v9443_v42 = vpop.permute.xlu1 %2671  ;;  %11826 = vst [vmem:[#allocation26_spill] sm:$0xff] %v9445_v57  ;;  %v2137_v57 = vmax.f32 %v2073_v34, 0.0 }
 0x18f   : > { %v9418_v0 = vpop.f32.mrf.mxu1  ;;  %11825 = vst [vmem:[#allocation24_spill] sm:$0xff] %v9443_v42  ;;  %v2139_v41 = vmax.f32 %v2075_v11, 0.0  ;;  %v2138_v11 = vmax.f32 %v2074_v22, 0.0  ;;  %v2569_v22 = vld [vmem:[%s11748_s6 + $0x388] sm:$0xff] }
 0x190   : > { %5056 = vmatpush1.bf16.msra.mxu1 %v2444_v5  ;;  %v9429_v6 = vpop.f32.mrf.mxu0 }
 0x191   : > { %v9431_v62 = vpop.f32.mrf.mxu1  ;;  %5057 = vmatprep.subr.bf16.mxu1 %v11788_v53  ;;  %3131 = vperm.xlu1 %7681, %v2565_v40   ;;  %v2441_v42 = vpack.c.bf16 %v2139_v41, %v2138_v11 }
 0x192   : > { %v7513_v5 = vpop.f32.mrf.mxu0  ;;  %3126 = vperm.xlu0 %7680, %v2564_v59   ;;  %v9465_v15 = vpop.permute.xlu1 %2681 }
 0x193   : > { %v7593_v43 = vpop.f32.mrf.mxu1  ;;  %4553 = vmatmul.mubr.bf16.gmra.mxu0 %v7754_v46  ;;  %v2442_v46 = vpack.c.bf16 %v2141_v13, %v2140_v3  ;;  %v7758_v13 = vld [vmem:[%s11747_s5 + $0x84] ss:$16 sps:$4 sm:$0xff]   ;;  %11830 = vst [vmem:[#allocation27_spill] sm:$0xff] %v9465_v15  ;;  %v9467_v3 = vpop.permute.xlu0 %2676 }
 0x194   : > { %5058 = vmatpush1.bf16.msra.mxu1 %v2443_v44  ;;  %4560 = vmatprep.mubr.bf16.mxu0 %v7755_v4  ;;  %v1147_v54 = vpop.f32.mrf.mxu0  ;;  %v7757_v4 = vld [vmem:[%s11747_s5 + $0x60] ss:$16 sps:$4 sm:$0xff]   ;;  %v11829_v44 = vld [vmem:[#allocation37_spill] sm:$0xff]  ;;  %11831 = vst [vmem:[#allocation28_spill] sm:$0xff] %v9467_v3  ;;  %v1637_v3 = vadd.f32 %v7593_v43, %v7513_v5 }
 0x195   : > { %v1628_v27 = vpop.f32.mrf.mxu1  ;;  %5059 = vmatprep.subr.bf16.mxu1 %v11788_v53  ;;  %v2072_v30 = vadd.f32 %v11829_v44, %v1530_v33  ;;  %3141 = vperm.xlu1 %7681, %v2567_v58   ;;  %v2568_v33 = vld [vmem:[%s11748_s6 + $0x380] sm:$0xff] }
 0x196   : > { %v7516_v12 = vpop.f32.mrf.mxu0  ;;  %3136 = vperm.xlu0 %7680, %v2566_v49   ;;  %v7760_v5 = vld [vmem:[%s11747_s5 + $0x80] ss:$16 sps:$4 sm:$0xff]  }
 0x197   : > { %v7596_v63 = vpop.f32.mrf.mxu1  ;;  %v2136_v49 = vmax.f32 %v2072_v30, 0.0  ;;  %v1634_v30 = vadd.f32 %v9418_v0, %v9416_v51  ;;  %v2099_v51 = vadd.f32 %v9007_v21, %v1637_v3  ;;  %v1629_v0 = vadd.f32 %v1628_v27, %v1147_v54 }
 0x198   : > { %v1650_v14 = vadd.f32 %v7596_v63, %v7516_v12  ;;  %5060 = vmatpush1.bf16.msra.mxu1 %v2442_v46  ;;  %v1160_v40 = vpop.f32.mrf.mxu0  ;;  %v11832_v12 = vld [vmem:[#allocation39_spill] sm:$0xff]  ;;  %v1621_v54 = vadd.f32 %v9393_v61, %v9391_v60  ;;  %v7763_v60 = vld [vmem:[%s11747_s5 + $0xa0] ss:$16 sps:$4 sm:$0xff]  }
 0x199   : > { %v1641_v59 = vpop.f32.mrf.mxu1  ;;  %5061 = vmatprep.subr.bf16.mxu1 %v11788_v53  ;;  %3151 = vperm.xlu1 %7681, %v2569_v22   ;;  %v2440_v11 = vpack.c.bf16 %v2137_v57, %v2136_v49  ;;  %v9497_v22 = vpop.permute.xlu0 %2686  ;;  %v1626_v49 = vadd.f32 %v9431_v62, %v9429_v6  ;;  %v2163_v27 = vmax.f32 %v2099_v51, 0.0  ;;  %v2097_v3 = vadd.f32 %v9037_v36, %v1629_v0  ;;  %v2574_v6 = vld [vmem:[%s11748_s6 + $0x3b0] sm:$0xff] }
 0x19a   : > { %v7517_v46 = vpop.f32.mrf.mxu0  ;;  %v2102_v63 = vadd.f32 %v11832_v12, %v1650_v14  ;;  %v1642_v44 = vadd.f32 %v1641_v59, %v1160_v40  ;;  %3146 = vperm.xlu0 %7680, %v2568_v33   ;;  %v7761_v59 = vld [vmem:[%s11747_s5 + $0xa4] ss:$16 sps:$4 sm:$0xff]   ;;  %v1618_v36 = vadd.f32 %v9362_v28, %v9360_v7 }
 0x19b   : > { %v7597_v58 = vpop.f32.mrf.mxu1  ;;  %4561 = vmatmul.mubr.bf16.gmra.mxu0 %v7757_v4  ;;  %v2571_v4 = vld [vmem:[%s11748_s6 + $0x398] sm:$0xff]  ;;  %v2576_v7 = vld [vmem:[%s11748_s6 + $0x3c0] sm:$0xff] }
 0x19c   : > { %v1653_v15 = vadd.f32 %v7597_v58, %v7517_v46  ;;  %5062 = vmatpush1.bf16.msra.mxu1 %v2441_v42  ;;  %4568 = vmatprep.mubr.bf16.mxu0 %v7758_v13  ;;  %v1163_v34 = vpop.f32.mrf.mxu0  ;;  %v2570_v42 = vld [vmem:[%s11748_s6 + $0x390] sm:$0xff]  ;;  %v2166_v43 = vmax.f32 %v2102_v63, 0.0  ;;  %v11835_v13 = vld [vmem:[#allocation40_spill] sm:$0xff]  ;;  %v2098_v58 = vadd.f32 %v9009_v24, %v1634_v30  ;;  %v2575_v24 = vld [vmem:[%s11748_s6 + $0x3b8] sm:$0xff]  ;;  %v2094_v28 = vadd.f32 %v9079_v23, %v1618_v36 }
 0x19d   : > { %v1644_v41 = vpop.f32.mrf.mxu1  ;;  %5063 = vmatprep.subr.bf16.mxu1 %v11788_v53  ;;  %3161 = vperm.xlu1 %7681, %v2571_v4   ;;  %v9522_v63 = vpop.permute.xlu0 %2696  ;;  %v2579_v23 = vld [vmem:[%s11748_s6 + $0x3d8] sm:$0xff] }
 0x19e   : > { %v2103_v56 = vadd.f32 %v11833_v26, %v1653_v15  ;;  %v1645_v19 = vadd.f32 %v1644_v41, %v1163_v34  ;;  %v11834_v26 = vld [vmem:[#allocation41_spill] sm:$0xff]  ;;  %v9495_v15 = vpop.permute.xlu1 %2691  ;;  %3156 = vperm.xlu0 %7680, %v2570_v42   ;;  %v2162_v61 = vmax.f32 %v2098_v58, 0.0  ;;  %v7764_v34 = vld [vmem:[%s11747_s5 + $0xc4] ss:$16 sps:$4 sm:$0xff]   ;;  %v2095_v41 = vadd.f32 %v9077_v10, %v1621_v54 }
 0x19f   : > { %v2100_v57 = vadd.f32 %v11834_v26, %v1642_v44  ;;  %v2096_v44 = vadd.f32 %v9039_v2, %v1626_v49  ;;  %v2161_v42 = vmax.f32 %v2097_v3, 0.0  ;;  %v2577_v2 = vld [vmem:[%s11748_s6 + $0x3c8] sm:$0xff]  ;;  %v1610_v10 = vadd.f32 %v9379_v38, %v9377_v16  ;;  %v2578_v16 = vld [vmem:[%s11748_s6 + $0x3d0] sm:$0xff] }
 0x1a0   : > { %v2167_v14 = vmax.f32 %v2103_v56, 0.0  ;;  %v2101_v40 = vadd.f32 %v11835_v13, %v1645_v19  ;;  %5064 = vmatpush1.bf16.msra.mxu1 %v2440_v11  ;;  %v2573_v56 = vld [vmem:[%s11748_s6 + $0x3a8] sm:$0xff]  ;;  %v2572_v19 = vld [vmem:[%s11748_s6 + $0x3a0] sm:$0xff]  ;;  %v1613_v11 = vadd.f32 %v9400_v35, %v9398_v37  ;;  %v2453_v4 = vpack.c.bf16 %v2163_v27, %v2162_v61 }
 0x1a1   : > { %5065 = vmatprep.subr.bf16.mxu1 %v11788_v53  ;;  %v2164_v21 = vmax.f32 %v2100_v57, 0.0  ;;  %3171 = vperm.xlu1 %7681, %v2573_v56   ;;  %v2160_v30 = vmax.f32 %v2096_v44, 0.0  ;;  %v9548_v35 = vpop.permute.xlu0 %2706  ;;  %v7766_v38 = vld [vmem:[%s11747_s5 + $0xc0] ss:$16 sps:$4 sm:$0xff]   ;;  %v7781_v36 = vld [vmem:[%s11747_s5 + $0x28] ss:$16 sps:$4 sm:$0xff]  }
 0x1a2   : > { %v2455_v33 = vpack.c.bf16 %v2167_v14, %v2166_v43  ;;  %v2165_v46 = vmax.f32 %v2101_v40, 0.0  ;;  %3166 = vperm.xlu0 %7680, %v2572_v19   ;;  %v9520_v62 = vpop.permute.xlu1 %2701  ;;  %v2159_v43 = vmax.f32 %v2095_v41, 0.0  ;;  %v2093_v26 = vadd.f32 %v9111_v47, %v1613_v11  ;;  %v7767_v14 = vld [vmem:[%s11747_s5 + $0xe4] ss:$16 sps:$4 sm:$0xff]   ;;  %v2583_v19 = vld [vmem:[%s11748_s6 + $0x3f8] sm:$0xff] }
 0x1a3   : > { %4569 = vmatmul.mubr.bf16.gmra.mxu0 %v7760_v5  ;;  %v1605_v5 = vadd.f32 %v9341_v17, %v9339_v29  ;;  %v2452_v57 = vpack.c.bf16 %v2161_v42, %v2160_v30  ;;  %v1602_v29 = vadd.f32 %v9314_v31, %v9312_v20  ;;  %v2158_v17 = vmax.f32 %v2094_v28, 0.0  ;;  %v2580_v20 = vld [vmem:[%s11748_s6 + $0x3e0] sm:$0xff]  ;;  %v7784_v44 = vld [vmem:[%s11747_s5 + $0x4c] ss:$16 sps:$4 sm:$0xff]   ;;  %v7787_v41 = vld [vmem:[%s11747_s5 + $0x48] ss:$16 sps:$4 sm:$0xff]  }
 0x1a4   : > { %5066 = vmatpush2.bf16.msra.mxu1 %v2455_v33  ;;  %4576 = vmatprep.mubr.bf16.mxu0 %v7761_v59  ;;  %v2454_v12 = vpack.c.bf16 %v2165_v46, %v2164_v21  ;;  %v2092_v47 = vadd.f32 %v9113_v39, %v1610_v10  ;;  %v1597_v40 = vadd.f32 %v9348_v55, %v9346_v18  ;;  %v2157_v51 = vmax.f32 %v2093_v26, 0.0  ;;  %v2581_v39 = vld [vmem:[%s11748_s6 + $0x3e8] sm:$0xff]  ;;  %v7782_v61 = vld [vmem:[%s11747_s5 + $0x144] ss:$16 sps:$4 sm:$0xff]   ;;  %v7792_v42 = vld [vmem:[%s11747_s5 + $0x160] ss:$16 sps:$4 sm:$0xff]  }
 0x1a5   : > { %5067 = vmatprep.subr.bf16.mxu1 %v11788_v53  ;;  %3181 = vperm.xlu1 %7681, %v2575_v24   ;;  %v2091_v13 = vadd.f32 %v9134_v45, %v1605_v5  ;;  %v2451_v59 = vpack.c.bf16 %v2159_v43, %v2158_v17  ;;  %v9581_v0 = vpop.permute.xlu0 %2716  ;;  %v2090_v45 = vadd.f32 %v9136_v52, %v1602_v29  ;;  %v2582_v52 = vld [vmem:[%s11748_s6 + $0x3f0] sm:$0xff]  ;;  %v7797_v28 = vld [vmem:[%s11747_s5 + $0x8c] ss:$16 sps:$4 sm:$0xff]   ;;  %v7799_v30 = vld [vmem:[%s11747_s5 + $0x88] ss:$16 sps:$4 sm:$0xff]  }
 0x1a6   : > { %3176 = vperm.xlu0 %7680, %v2574_v6   ;;  %v9546_v37 = vpop.permute.xlu1 %2711  ;;  %v1594_v18 = vadd.f32 %v9326_v32, %v9324_v25  ;;  %v2156_v55 = vmax.f32 %v2092_v47, 0.0  ;;  %v2089_v46 = vadd.f32 %v9146_v8, %v1597_v40  ;;  %v7769_v25 = vld [vmem:[%s11747_s5 + $0xe0] ss:$16 sps:$4 sm:$0xff]   ;;  %v7770_v8 = vld [vmem:[%s11747_s5 + $0x104] ss:$16 sps:$4 sm:$0xff]  }
 0x1a7   : > { %v2155_v33 = vmax.f32 %v2091_v13, 0.0  ;;  %v2154_v32 = vmax.f32 %v2090_v45, 0.0  ;;  %v7775_v24 = vld [vmem:[%s11747_s5 + $0x100] ss:$16 sps:$4 sm:$0xff]   ;;  %v7776_v6 = vld [vmem:[%s11747_s5 + $0x124] ss:$16 sps:$4 sm:$0xff]  }
 0x1a8   : > { %5068 = vmatpush2.bf16.msra.mxu1 %v2454_v12  ;;  %v2450_v56 = vpack.c.bf16 %v2157_v51, %v2156_v55  ;;  %v2088_v58 = vadd.f32 %v9148_v9, %v1594_v18  ;;  %v2153_v27 = vmax.f32 %v2089_v46, 0.0  ;;  %v7772_v12 = vld [vmem:[%s11747_s5 + $0x8] ss:$16 sps:$4 sm:$0xff]   ;;  %v7788_v11 = vld [vmem:[%s11747_s5 + $0x164] ss:$16 sps:$4 sm:$0xff]   ;;  %v8273_v46 = vmov 0.0  }
 0x1a9   : > { %5069 = vmatprep.subr.bf16.mxu1 %v11788_v53  ;;  %3191 = vperm.xlu1 %7681, %v2577_v2   ;;  %v9603_v21 = vpop.permute.xlu0 %2726  ;;  %v2449_v54 = vpack.c.bf16 %v2155_v33, %v2154_v32  ;;  %v7793_v2 = vld [vmem:[%s11747_s5 + $0x68] ss:$16 sps:$4 sm:$0xff]   ;;  %v7794_v10 = vld [vmem:[%s11747_s5 + $0x180] ss:$16 sps:$4 sm:$0xff]   ;;  %v7802_v5 = vld [vmem:[%s11747_s5 + $0x1a4] ss:$16 sps:$4 sm:$0xff]  }
 0x1aa   : > { %3186 = vperm.xlu0 %7680, %v2576_v7   ;;  %v9579_v31 = vpop.permute.xlu1 %2721  ;;  %v2152_v3 = vmax.f32 %v2088_v58, 0.0  ;;  %v7796_v7 = vld [vmem:[%s11747_s5 + $0x184] ss:$16 sps:$4 sm:$0xff]   ;;  %v7803_v43 = vld [vmem:[%s11747_s5 + $0xac] ss:$16 sps:$4 sm:$0xff]   ;;  %390 = vst.msk [vmem:[#allocation2] sm:$0xff] %vm389_vm0, %v8273_v46 }
 0x1ab   : > { %4577 = vmatmul.mubr.bf16.gmra.mxu0 %v7763_v60  ;;  %v7778_v60 = vld [vmem:[%s11747_s5 + $0x2c] ss:$16 sps:$4 sm:$0xff]   ;;  %v7800_v26 = vld [vmem:[%s11747_s5 + $0x1a0] ss:$16 sps:$4 sm:$0xff]   ;;  %v7811_v29 = vld [vmem:[%s11747_s5 + $0xc8] ss:$16 sps:$4 sm:$0xff]  }
 0x1ac   : > { %5070 = vmatpush2.bf16.msra.mxu1 %v2453_v4  ;;  %4584 = vmatprep.mubr.bf16.mxu0 %v7764_v34  ;;  %v2448_v9 = vpack.c.bf16 %v2153_v27, %v2152_v3  ;;  %v7786_v34 = vld [vmem:[%s11747_s5 + $0x140] ss:$16 sps:$4 sm:$0xff]   ;;  %v7790_v4 = vld [vmem:[%s11747_s5 + $0x6c] ss:$16 sps:$4 sm:$0xff]   ;;  %v7814_v17 = vld [vmem:[%s11747_s5 + $0x1e4] ss:$16 sps:$4 sm:$0xff]  }
 0x1ad   : > { %5071 = vmatprep.subr.bf16.mxu1 %v11788_v53  ;;  %3201 = vperm.xlu1 %7681, %v2579_v23   ;;  %v7808_v23 = vld [vmem:[%s11747_s5 + $0x1c4] ss:$16 sps:$4 sm:$0xff]   ;;  %v7815_v47 = vld [vmem:[%s11747_s5 + $0xec] ss:$16 sps:$4 sm:$0xff]   ;;  %v7817_v13 = vld [vmem:[%s11747_s5 + $0xe8] ss:$16 sps:$4 sm:$0xff]   ;;  %v9697_v40 = vpop.permute.xlu0 %2736 }
 0x1ae   : > { %3196 = vperm.xlu0 %7680, %v2578_v16   ;;  %v9601_v49 = vpop.permute.xlu1 %2731  ;;  %v7809_v16 = vld [vmem:[%s11747_s5 + $0xcc] ss:$16 sps:$4 sm:$0xff]   ;;  %v9712_v45 = vld [vmem:[%s11747_s5 + $0x200] ss:$16 sps:$4 sm:$0xff]   ;;  %v9717_v18 = vld [vmem:[%s11747_s5 + $0x108] ss:$16 sps:$4 sm:$0xff]  }
 0x1af   : > { %v7821_v51 = vld [vmem:[%s11747_s5 + $0x10c] ss:$16 sps:$4 sm:$0xff]   ;;  %v9722_v55 = vld [vmem:[%s11747_s5 + $0x224] ss:$16 sps:$4 sm:$0xff]   ;;  %391 = vst.msk [vmem:[#allocation2 + $0x8] sm:$0xff] %vm389_vm0, %v8273_v46  ;;  %392 = vst.msk [vmem:[#allocation2 + $0x10] sm:$0xff] %vm389_vm0, %v8273_v46 }
 0x1b0   : > { %5072 = vmatpush2.bf16.msra.mxu1 %v2452_v57  ;;  %v7805_v57 = vld [vmem:[%s11747_s5 + $0xa8] ss:$16 sps:$4 sm:$0xff]   ;;  %v9727_v33 = vld [vmem:[%s11747_s5 + $0x12c] ss:$16 sps:$4 sm:$0xff]   ;;  %393 = vst.msk [vmem:[#allocation2 + $0x18] sm:$0xff] %vm389_vm0, %v8273_v46  ;;  %394 = vst.msk [vmem:[#allocation2 + $0x20] sm:$0xff] %vm389_vm0, %v8273_v46 }
 0x1b1   : > { %5073 = vmatprep.subr.bf16.mxu1 %v11788_v53  ;;  %3211 = vperm.xlu1 %7681, %v2581_v39   ;;  %395 = vst.msk [vmem:[#allocation2 + $0x28] sm:$0xff] %vm389_vm0, %v8273_v46  ;;  %396 = vst.msk [vmem:[#allocation2 + $0x30] sm:$0xff] %vm389_vm0, %v8273_v46  ;;  %v7832_v58 = vld [vmem:[%s11747_s5 + $0x244] ss:$16 sps:$4 sm:$0xff]   ;;  %v7830_v3 = vld [vmem:[%s11747_s5 + $0x240] ss:$16 sps:$4 sm:$0xff]  }
 0x1b2   : > { %3206 = vperm.xlu0 %7680, %v2580_v20   ;;  %v9705_v39 = vpop.permute.xlu1 %2741  ;;  %v9707_v20 = vpop.permute.xlu0 %2746  ;;  %397 = vst.msk [vmem:[#allocation2 + $0x38] sm:$0xff] %vm389_vm0, %v8273_v46  ;;  %398 = vst.msk [vmem:[#allocation2 + $0x40] sm:$0xff] %vm389_vm0, %v8273_v46 }
 0x1b3   : > { %4585 = vmatmul.mubr.bf16.gmra.mxu0 %v7766_v38  ;;  %v7806_v38 = vld [vmem:[%s11747_s5 + $0x1c0] ss:$16 sps:$4 sm:$0xff]   ;;  %399 = vst.msk [vmem:[#allocation2 + $0x48] sm:$0xff] %vm389_vm0, %v8273_v46  ;;  %400 = vst.msk [vmem:[#allocation2 + $0x50] sm:$0xff] %vm389_vm0, %v8273_v46 }
 0x1b4   : > { %5074 = vmatpush2.bf16.msra.mxu1 %v2451_v59  ;;  %4592 = vmatprep.mubr.bf16.mxu0 %v7767_v14  ;;  %v7812_v14 = vld [vmem:[%s11747_s5 + $0x1e0] ss:$16 sps:$4 sm:$0xff]   ;;  %v7820_v59 = vld [vmem:[%s11747_s5 + $0x204] ss:$16 sps:$4 sm:$0xff]   ;;  %401 = vst.msk [vmem:[#allocation2 + $0x58] sm:$0xff] %vm389_vm0, %v8273_v46  ;;  %402 = vst.msk [vmem:[#allocation2 + $0x60] sm:$0xff] %vm389_vm0, %v8273_v46 }
 0x1b5   : > { %5075 = vmatprep.subr.bf16.mxu1 %v11788_v53  ;;  %3221 = vperm.xlu1 %7681, %v2583_v19   ;;  %403 = vst.msk [vmem:[#allocation2 + $0x68] sm:$0xff] %vm389_vm0, %v8273_v46  ;;  %404 = vst.msk [vmem:[#allocation2 + $0x70] sm:$0xff] %vm389_vm0, %v8273_v46 }
 0x1b6   : > { %3216 = vperm.xlu0 %7680, %v2582_v52   ;;  %405 = vst.msk [vmem:[#allocation2 + $0x78] sm:$0xff] %vm389_vm0, %v8273_v46  ;;  %406 = vst.msk [vmem:[#allocation2 + $0x80] sm:$0xff] %vm389_vm0, %v8273_v46  ;;  %v9989_v19 = vpop.permute.xlu0 %2756  ;;  %v7824_v52 = vld [vmem:[%s11747_s5 + $0x220] ss:$16 sps:$4 sm:$0xff]  }
 0x1b7   : > { %407 = vst.msk [vmem:[#allocation2 + $0x88] sm:$0xff] %vm389_vm0, %v8273_v46  ;;  %408 = vst.msk [vmem:[#allocation2 + $0x90] sm:$0xff] %vm389_vm0, %v8273_v46 }
 0x1b8   : > { %5076 = vmatpush2.bf16.msra.mxu1 %v2450_v56  ;;  %409 = vst.msk [vmem:[#allocation2 + $0x98] sm:$0xff] %vm389_vm0, %v8273_v46  ;;  %410 = vst.msk [vmem:[#allocation2 + $0xa0] sm:$0xff] %vm389_vm0, %v8273_v46  ;;  %v9985_v56 = vpop.permute.xlu1 %2751 }
 0x1b9   : > { %5077 = vmatprep.subr.bf16.mxu1 %v11788_v53  ;;  %411 = vst.msk [vmem:[#allocation2 + $0xa8] sm:$0xff] %vm389_vm0, %v8273_v46  ;;  %412 = vst.msk [vmem:[#allocation2 + $0xb0] sm:$0xff] %vm389_vm0, %v8273_v46 }
 0x1ba   : > { %413 = vst.msk [vmem:[#allocation2 + $0xb8] sm:$0xff] %vm389_vm0, %v8273_v46  ;;  %414 = vst.msk [vmem:[#allocation2 + $0xc0] sm:$0xff] %vm389_vm0, %v8273_v46 }
 0x1bb   : > { %4593 = vmatmul.mubr.bf16.gmra.mxu0 %v7769_v25  ;;  %415 = vst.msk [vmem:[#allocation2 + $0xc8] sm:$0xff] %vm389_vm0, %v8273_v46  ;;  %416 = vst.msk [vmem:[#allocation2 + $0xd0] sm:$0xff] %vm389_vm0, %v8273_v46  ;;  %v7829_v25 = vld [vmem:[%s11747_s5 + $0x128] ss:$16 sps:$4 sm:$0xff]  }
 0x1bc   : > { %5078 = vmatpush2.bf16.msra.mxu1 %v2449_v54  ;;  %4600 = vmatprep.mubr.bf16.mxu0 %v7770_v8  ;;  %417 = vst.msk [vmem:[#allocation2 + $0xd8] sm:$0xff] %vm389_vm0, %v8273_v46  ;;  %418 = vst.msk [vmem:[#allocation2 + $0xe0] sm:$0xff] %vm389_vm0, %v8273_v46  ;;  %v9999_v32 = vpop.permute.xlu1 %2761  ;;  %v7833_v8 = vld [vmem:[%s11747_s5 + $0x14c] ss:$16 sps:$4 sm:$0xff]   ;;  %v10007_v54 = vpop.permute.xlu0 %2766 }
 0x1bd   : > { %5079 = vmatprep.subr.bf16.mxu1 %v11788_v53  ;;  %v7780_v53 = vld [vmem:[%s11747_s5 + $0x120] ss:$16 sps:$4 sm:$0xff]   ;;  %419 = vst.msk [vmem:[#allocation2 + $0xe8] sm:$0xff] %vm389_vm0, %v8273_v46  ;;  %420 = vst.msk [vmem:[#allocation2 + $0xf0] sm:$0xff] %vm389_vm0, %v8273_v46 }
 0x1be   : > { %421 = vst.msk [vmem:[#allocation2 + $0xf8] sm:$0xff] %vm389_vm0, %v8273_v46  ;;  %422 = vst.msk [vmem:[#allocation2 + $0x100] sm:$0xff] %vm389_vm0, %v8273_v46 }
 0x1bf   : > { %423 = vst.msk [vmem:[#allocation2 + $0x108] sm:$0xff] %vm389_vm0, %v8273_v46  ;;  %424 = vst.msk [vmem:[#allocation2 + $0x110] sm:$0xff] %vm389_vm0, %v8273_v46 }
 0x1c0   : > { %5080 = vmatpush2.bf16.msra.mxu1 %v2448_v9  ;;  %425 = vst.msk [vmem:[#allocation2 + $0x118] sm:$0xff] %vm389_vm0, %v8273_v46  ;;  %426 = vst.msk [vmem:[#allocation2 + $0x120] sm:$0xff] %vm389_vm0, %v8273_v46  ;;  %v10009_v27 = vpop.permute.xlu1 %2771  ;;  %v7835_v9 = vld [vmem:[%s11747_s5 + $0x148] ss:$16 sps:$4 sm:$0xff]  }
 0x1c1   : > { %427 = vst.msk [vmem:[#allocation2 + $0x128] sm:$0xff] %vm389_vm0, %v8273_v46  ;;  %428 = vst.msk [vmem:[#allocation2 + $0x130] sm:$0xff] %vm389_vm0, %v8273_v46 }
 0x1c2   : > { %429 = vst.msk [vmem:[#allocation2 + $0x138] sm:$0xff] %vm389_vm0, %v8273_v46  ;;  %430 = vst.msk [vmem:[#allocation2 + $0x140] sm:$0xff] %vm389_vm0, %v8273_v46 }
 0x1c3   : > { %4601 = vmatmul.mubr.bf16.gmra.mxu0 %v7775_v24  ;;  %5082 = vmatmul.mubr.bf16.vlgmr.msra.gmra.mxu1 %v7772_v12  ;;  %431 = vst.msk [vmem:[#allocation2 + $0x148] sm:$0xff] %vm389_vm0, %v8273_v46  ;;  %432 = vst.msk [vmem:[#allocation2 + $0x150] sm:$0xff] %vm389_vm0, %v8273_v46  ;;  %v10017_v12 = vpop.permute.xlu0 %2776  ;;  %v7838_v24 = vld [vmem:[%s11747_s5 + $0x264] ss:$16 sps:$4 sm:$0xff]  }
 0x1c4   : > { %4608 = vmatprep.mubr.bf16.mxu0 %v7776_v6  ;;  %5089 = vmatprep.mubr.bf16.mxu1 %v7778_v60  ;;  %433 = vst.msk [vmem:[#allocation2 + $0x158] sm:$0xff] %vm389_vm0, %v8273_v46  ;;  %434 = vst.msk [vmem:[#allocation2 + $0x160] sm:$0xff] %vm389_vm0, %v8273_v46  ;;  %v7839_v6 = vld [vmem:[%s11747_s5 + $0x16c] ss:$16 sps:$4 sm:$0xff]   ;;  %v10025_v60 = vpop.permute.xlu1 %2781 }
 0x1c5   : > { %435 = vst.msk [vmem:[#allocation2 + $0x168] sm:$0xff] %vm389_vm0, %v8273_v46  ;;  %436 = vst.msk [vmem:[#allocation2 + $0x170] sm:$0xff] %vm389_vm0, %v8273_v46 }
 0x1c6   : > { %437 = vst.msk [vmem:[#allocation2 + $0x178] sm:$0xff] %vm389_vm0, %v8273_v46  ;;  %438 = vst.msk [vmem:[#allocation2 + $0x180] sm:$0xff] %vm389_vm0, %v8273_v46 }
 0x1c7   : > { %439 = vst.msk [vmem:[#allocation2 + $0x188] sm:$0xff] %vm389_vm0, %v8273_v46  ;;  %440 = vst.msk [vmem:[#allocation2 + $0x190] sm:$0xff] %vm389_vm0, %v8273_v46 }
 0x1c8   : > { %441 = vst.msk [vmem:[#allocation2 + $0x198] sm:$0xff] %vm389_vm0, %v8273_v46  ;;  %442 = vst.msk [vmem:[#allocation2 + $0x1a0] sm:$0xff] %vm389_vm0, %v8273_v46 }
 0x1c9   : > { %443 = vst.msk [vmem:[#allocation2 + $0x1a8] sm:$0xff] %vm389_vm0, %v8273_v46  ;;  %444 = vst.msk [vmem:[#allocation2 + $0x1b0] sm:$0xff] %vm389_vm0, %v8273_v46 }
 0x1ca   : > { %445 = vst.msk [vmem:[#allocation2 + $0x1b8] sm:$0xff] %vm389_vm0, %v8273_v46  ;;  %446 = vst.msk [vmem:[#allocation2 + $0x1c0] sm:$0xff] %vm389_vm0, %v8273_v46 }
 0x1cb   : > { %4609 = vmatmul.mubr.bf16.gmra.mxu0 %v7780_v53  ;;  %5090 = vmatmul.mubr.bf16.gmra.mxu1 %v7781_v36  ;;  %447 = vst.msk [vmem:[#allocation2 + $0x1c8] sm:$0xff] %vm389_vm0, %v8273_v46  ;;  %448 = vst.msk [vmem:[#allocation2 + $0x1d0] sm:$0xff] %vm389_vm0, %v8273_v46  ;;  %v10027_v53 = vpop.permute.xlu0 %2786  ;;  %v7836_v36 = vld [vmem:[%s11747_s5 + $0x260] ss:$16 sps:$4 sm:$0xff]  }
 0x1cc   : > { %4616 = vmatprep.mubr.bf16.mxu0 %v7782_v61  ;;  %5097 = vmatprep.mubr.bf16.mxu1 %v7784_v44  ;;  %449 = vst.msk [vmem:[#allocation2 + $0x1d8] sm:$0xff] %vm389_vm0, %v8273_v46  ;;  %450 = vst.msk [vmem:[#allocation2 + $0x1e0] sm:$0xff] %vm389_vm0, %v8273_v46  ;;  %v7841_v61 = vld [vmem:[%s11747_s5 + $0x168] ss:$16 sps:$4 sm:$0xff]   ;;  %v7844_v44 = vld [vmem:[%s11747_s5 + $0x284] ss:$16 sps:$4 sm:$0xff]  }
 0x1cd   : > { %451 = vst.msk [vmem:[#allocation2 + $0x1e8] sm:$0xff] %vm389_vm0, %v8273_v46  ;;  %452 = vst.msk [vmem:[#allocation2 + $0x1f0] sm:$0xff] %vm389_vm0, %v8273_v46 }
 0x1ce   : > { %453 = vst.msk [vmem:[#allocation2 + $0x1f8] sm:$0xff] %vm389_vm0, %v8273_v46  ;;  %454 = vst.msk [vmem:[#allocation2 + $0x200] sm:$0xff] %vm389_vm0, %v8273_v46 }
 0x1cf   : > { %455 = vst.msk [vmem:[#allocation2 + $0x208] sm:$0xff] %vm389_vm0, %v8273_v46  ;;  %456 = vst.msk [vmem:[#allocation2 + $0x210] sm:$0xff] %vm389_vm0, %v8273_v46 }
 0x1d0   : > { %457 = vst.msk [vmem:[#allocation2 + $0x218] sm:$0xff] %vm389_vm0, %v8273_v46  ;;  %458 = vst.msk [vmem:[#allocation2 + $0x220] sm:$0xff] %vm389_vm0, %v8273_v46 }
 0x1d1   : > { %459 = vst.msk [vmem:[#allocation2 + $0x228] sm:$0xff] %vm389_vm0, %v8273_v46  ;;  %460 = vst.msk [vmem:[#allocation2 + $0x230] sm:$0xff] %vm389_vm0, %v8273_v46 }
 0x1d2   : > { %461 = vst.msk [vmem:[#allocation2 + $0x238] sm:$0xff] %vm389_vm0, %v8273_v46  ;;  %462 = vst.msk [vmem:[#allocation2 + $0x240] sm:$0xff] %vm389_vm0, %v8273_v46 }
 0x1d3   : > { %4617 = vmatmul.mubr.bf16.gmra.mxu0 %v7786_v34  ;;  %5098 = vmatmul.mubr.bf16.gmra.mxu1 %v7787_v41  ;;  %463 = vst.msk [vmem:[#allocation2 + $0x248] sm:$0xff] %vm389_vm0, %v8273_v46  ;;  %464 = vst.msk [vmem:[#allocation2 + $0x250] sm:$0xff] %vm389_vm0, %v8273_v46  ;;  %v7847_v34 = vld [vmem:[%s11747_s5 + $0x18c] ss:$16 sps:$4 sm:$0xff]   ;;  %v10041_v41 = vpop.permute.xlu1 %2791 }
 0x1d4   : > { %4624 = vmatprep.mubr.bf16.mxu0 %v7788_v11  ;;  %5105 = vmatprep.mubr.bf16.mxu1 %v7790_v4  ;;  %465 = vst.msk [vmem:[#allocation2 + $0x258] sm:$0xff] %vm389_vm0, %v8273_v46  ;;  %466 = vst.msk [vmem:[#allocation2 + $0x260] sm:$0xff] %vm389_vm0, %v8273_v46  ;;  %v10043_v11 = vpop.permute.xlu0 %2796  ;;  %v7842_v4 = vld [vmem:[%s11747_s5 + $0x280] ss:$16 sps:$4 sm:$0xff]  }
 0x1d5   : > { %467 = vst.msk [vmem:[#allocation2 + $0x268] sm:$0xff] %vm389_vm0, %v8273_v46  ;;  %468 = vst.msk [vmem:[#allocation2 + $0x270] sm:$0xff] %vm389_vm0, %v8273_v46 }
 0x1d6   : > { %469 = vst.msk [vmem:[#allocation2 + $0x278] sm:$0xff] %vm389_vm0, %v8273_v46  ;;  %470 = vst.msk [vmem:[#allocation2 + $0x280] sm:$0xff] %vm389_vm0, %v8273_v46 }
 0x1d7   : > { %471 = vst.msk [vmem:[#allocation2 + $0x288] sm:$0xff] %vm389_vm0, %v8273_v46  ;;  %472 = vst.msk [vmem:[#allocation2 + $0x290] sm:$0xff] %vm389_vm0, %v8273_v46 }
 0x1d8   : > { %473 = vst.msk [vmem:[#allocation2 + $0x298] sm:$0xff] %vm389_vm0, %v8273_v46  ;;  %474 = vst.msk [vmem:[#allocation2 + $0x2a0] sm:$0xff] %vm389_vm0, %v8273_v46 }
 0x1d9   : > { %475 = vst.msk [vmem:[#allocation2 + $0x2a8] sm:$0xff] %vm389_vm0, %v8273_v46  ;;  %476 = vst.msk [vmem:[#allocation2 + $0x2b0] sm:$0xff] %vm389_vm0, %v8273_v46 }
 0x1da   : > { %477 = vst.msk [vmem:[#allocation2 + $0x2b8] sm:$0xff] %vm389_vm0, %v8273_v46  ;;  %478 = vst.msk [vmem:[#allocation2 + $0x2c0] sm:$0xff] %vm389_vm0, %v8273_v46 }
 0x1db   : > { %4625 = vmatmul.mubr.bf16.gmra.mxu0 %v7792_v42  ;;  %5106 = vmatmul.mubr.bf16.gmra.mxu1 %v7793_v2  ;;  %479 = vst.msk [vmem:[#allocation2 + $0x2c8] sm:$0xff] %vm389_vm0, %v8273_v46  ;;  %480 = vst.msk [vmem:[#allocation2 + $0x2d0] sm:$0xff] %vm389_vm0, %v8273_v46  ;;  %v7845_v42 = vld [vmem:[%s11747_s5 + $0x188] ss:$16 sps:$4 sm:$0xff]   ;;  %v10051_v2 = vpop.permute.xlu1 %2801 }
 0x1dc   : > { %4632 = vmatprep.mubr.bf16.mxu0 %v7796_v7  ;;  %5113 = vmatprep.mubr.bf16.mxu1 %v7797_v28  ;;  %481 = vst.msk [vmem:[#allocation2 + $0x2d8] sm:$0xff] %vm389_vm0, %v8273_v46  ;;  %482 = vst.msk [vmem:[#allocation2 + $0x2e0] sm:$0xff] %vm389_vm0, %v8273_v46  ;;  %v7850_v7 = vld [vmem:[%s11747_s5 + $0x2a4] ss:$16 sps:$4 sm:$0xff]   ;;  %v7853_v28 = vld [vmem:[%s11747_s5 + $0x1ac] ss:$16 sps:$4 sm:$0xff]  }
 0x1dd   : > { %483 = vst.msk [vmem:[#allocation2 + $0x2e8] sm:$0xff] %vm389_vm0, %v8273_v46  ;;  %484 = vst.msk [vmem:[#allocation2 + $0x2f0] sm:$0xff] %vm389_vm0, %v8273_v46 }
 0x1de   : > { %485 = vst.msk [vmem:[#allocation2 + $0x2f8] sm:$0xff] %vm389_vm0, %v8273_v46  ;;  %486 = vst.msk [vmem:[#allocation2 + $0x300] sm:$0xff] %vm389_vm0, %v8273_v46 }
 0x1df   : > { %487 = vst.msk [vmem:[#allocation2 + $0x308] sm:$0xff] %vm389_vm0, %v8273_v46  ;;  %488 = vst.msk [vmem:[#allocation2 + $0x310] sm:$0xff] %vm389_vm0, %v8273_v46 }
 0x1e0   : > { %489 = vst.msk [vmem:[#allocation2 + $0x318] sm:$0xff] %vm389_vm0, %v8273_v46  ;;  %490 = vst.msk [vmem:[#allocation2 + $0x320] sm:$0xff] %vm389_vm0, %v8273_v46 }
 0x1e1   : > { %491 = vst.msk [vmem:[#allocation2 + $0x328] sm:$0xff] %vm389_vm0, %v8273_v46  ;;  %492 = vst.msk [vmem:[#allocation2 + $0x330] sm:$0xff] %vm389_vm0, %v8273_v46 }
 0x1e2   : > { %493 = vst.msk [vmem:[#allocation2 + $0x338] sm:$0xff] %vm389_vm0, %v8273_v46  ;;  %494 = vst.msk [vmem:[#allocation2 + $0x340] sm:$0xff] %vm389_vm0, %v8273_v46 }
 0x1e3   : > { %4633 = vmatmul.mubr.bf16.gmra.mxu0 %v7794_v10  ;;  %5114 = vmatmul.mubr.bf16.gmra.mxu1 %v7799_v30  ;;  %495 = vst.msk [vmem:[#allocation2 + $0x348] sm:$0xff] %vm389_vm0, %v8273_v46  ;;  %496 = vst.msk [vmem:[#allocation2 + $0x350] sm:$0xff] %vm389_vm0, %v8273_v46  ;;  %v10059_v10 = vpop.permute.xlu0 %2806  ;;  %v10061_v30 = vpop.permute.xlu1 %2811 }
 0x1e4   : > { %4640 = vmatprep.mubr.bf16.mxu0 %v7802_v5  ;;  %5121 = vmatprep.mubr.bf16.mxu1 %v7803_v43  ;;  %497 = vst.msk [vmem:[#allocation2 + $0x358] sm:$0xff] %vm389_vm0, %v8273_v46  ;;  %498 = vst.msk [vmem:[#allocation2 + $0x360] sm:$0xff] %vm389_vm0, %v8273_v46  ;;  %v7848_v5 = vld [vmem:[%s11747_s5 + $0x2a0] ss:$16 sps:$4 sm:$0xff]   ;;  %v7851_v43 = vld [vmem:[%s11747_s5 + $0x1a8] ss:$16 sps:$4 sm:$0xff]  }
 0x1e5   : > { %499 = vst.msk [vmem:[#allocation2 + $0x368] sm:$0xff] %vm389_vm0, %v8273_v46  ;;  %500 = vst.msk [vmem:[#allocation2 + $0x370] sm:$0xff] %vm389_vm0, %v8273_v46 }
 0x1e6   : > { %501 = vst.msk [vmem:[#allocation2 + $0x378] sm:$0xff] %vm389_vm0, %v8273_v46  ;;  %502 = vst.msk [vmem:[#allocation2 + $0x380] sm:$0xff] %vm389_vm0, %v8273_v46 }
 0x1e7   : > { %503 = vst.msk [vmem:[#allocation2 + $0x388] sm:$0xff] %vm389_vm0, %v8273_v46  ;;  %504 = vst.msk [vmem:[#allocation2 + $0x390] sm:$0xff] %vm389_vm0, %v8273_v46 }
 0x1e8   : > { %505 = vst.msk [vmem:[#allocation2 + $0x398] sm:$0xff] %vm389_vm0, %v8273_v46  ;;  %506 = vst.msk [vmem:[#allocation2 + $0x3a0] sm:$0xff] %vm389_vm0, %v8273_v46 }
 0x1e9   : > { %507 = vst.msk [vmem:[#allocation2 + $0x3a8] sm:$0xff] %vm389_vm0, %v8273_v46  ;;  %508 = vst.msk [vmem:[#allocation2 + $0x3b0] sm:$0xff] %vm389_vm0, %v8273_v46 }
 0x1ea   : > { %509 = vst.msk [vmem:[#allocation2 + $0x3b8] sm:$0xff] %vm389_vm0, %v8273_v46  ;;  %510 = vst.msk [vmem:[#allocation2 + $0x3c0] sm:$0xff] %vm389_vm0, %v8273_v46 }
 0x1eb   : > { %4641 = vmatmul.mubr.bf16.gmra.mxu0 %v7800_v26  ;;  %5122 = vmatmul.mubr.bf16.gmra.mxu1 %v7805_v57  ;;  %511 = vst.msk [vmem:[#allocation2 + $0x3c8] sm:$0xff] %vm389_vm0, %v8273_v46  ;;  %512 = vst.msk [vmem:[#allocation2 + $0x3d0] sm:$0xff] %vm389_vm0, %v8273_v46  ;;  %v10069_v26 = vpop.permute.xlu0 %2816  ;;  %v7856_v57 = vld [vmem:[%s11747_s5 + $0x2c4] ss:$16 sps:$4 sm:$0xff]  }
 0x1ec   : > { %4648 = vmatprep.mubr.bf16.mxu0 %v7808_v23  ;;  %5129 = vmatprep.mubr.bf16.mxu1 %v7809_v16  ;;  %513 = vst.msk [vmem:[#allocation2 + $0x3d8] sm:$0xff] %vm389_vm0, %v8273_v46  ;;  %514 = vst.msk [vmem:[#allocation2 + $0x3e0] sm:$0xff] %vm389_vm0, %v8273_v46  ;;  %v7859_v23 = vld [vmem:[%s11747_s5 + $0x1cc] ss:$16 sps:$4 sm:$0xff]   ;;  %v10077_v16 = vpop.permute.xlu1 %2821 }
 0x1ed   : > { %515 = vst.msk [vmem:[#allocation2 + $0x3e8] sm:$0xff] %vm389_vm0, %v8273_v46  ;;  %516 = vst.msk [vmem:[#allocation2 + $0x3f0] sm:$0xff] %vm389_vm0, %v8273_v46 }
 0x1ee   : > { %517 = vst.msk [vmem:[#allocation2 + $0x3f8] sm:$0xff] %vm389_vm0, %v8273_v46 }
 0x1f3   : > { %4649 = vmatmul.mubr.bf16.gmra.mxu0 %v7806_v38  ;;  %5130 = vmatmul.mubr.bf16.gmra.mxu1 %v7811_v29  ;;  %v10079_v38 = vpop.permute.xlu0 %2826  ;;  %v7854_v29 = vld [vmem:[%s11747_s5 + $0x2c0] ss:$16 sps:$4 sm:$0xff]  }
 0x1f4   : > { %4656 = vmatprep.mubr.bf16.mxu0 %v7814_v17  ;;  %5137 = vmatprep.mubr.bf16.mxu1 %v7815_v47  ;;  %11836 = vst [vmem:[#allocation29_spill] sm:$0xff] %v10079_v38  ;;  %v7857_v17 = vld [vmem:[%s11747_s5 + $0x1c8] ss:$16 sps:$4 sm:$0xff]   ;;  %v7862_v47 = vld [vmem:[%s11747_s5 + $0x2e4] ss:$16 sps:$4 sm:$0xff]  }
 0x1fb   : > { %4657 = vmatmul.mubr.bf16.gmra.mxu0 %v7812_v14  ;;  %5138 = vmatmul.mubr.bf16.gmra.mxu1 %v7817_v13  ;;  %v7865_v14 = vld [vmem:[%s11747_s5 + $0x1ec] ss:$16 sps:$4 sm:$0xff]   ;;  %v10093_v13 = vpop.permute.xlu1 %2831 }
 0x1fc   : > { %4664 = vmatprep.mubr.bf16.mxu0 %v7820_v59  ;;  %5145 = vmatprep.mubr.bf16.mxu1 %v7821_v51  ;;  %11837 = vst [vmem:[#allocation30_spill] sm:$0xff] %v10093_v13  ;;  %v10095_v59 = vpop.permute.xlu0 %2836  ;;  %v7860_v51 = vld [vmem:[%s11747_s5 + $0x2e0] ss:$16 sps:$4 sm:$0xff]  }
 0x1fd   : > { %11838 = vst [vmem:[#allocation31_spill] sm:$0xff] %v10095_v59 }
 0x200   : > { %v10111_v46 = vpop.permute.xlu0 %2846 }
 0x201   : > { %11840 = vst [vmem:[#allocation33_spill] sm:$0xff] %v10111_v46 }
 0x203   : > { %4665 = vmatmul.mubr.bf16.gmra.mxu0 %v9712_v45  ;;  %5146 = vmatmul.mubr.bf16.gmra.mxu1 %v9717_v18  ;;  %v7863_v45 = vld [vmem:[%s11747_s5 + $0x1e8] ss:$16 sps:$4 sm:$0xff]   ;;  %v10103_v18 = vpop.permute.xlu1 %2841 }
 0x204   : > { %4672 = vmatprep.mubr.bf16.mxu0 %v9722_v55  ;;  %5153 = vmatprep.mubr.bf16.mxu1 %v9727_v33  ;;  %11839 = vst [vmem:[#allocation32_spill] sm:$0xff] %v10103_v18  ;;  %v7868_v55 = vld [vmem:[%s11747_s5 + $0x304] ss:$16 sps:$4 sm:$0xff]   ;;  %v7871_v33 = vld [vmem:[%s11747_s5 + $0x20c] ss:$16 sps:$4 sm:$0xff]  }
 0x20b   : > { %4673 = vmatmul.mubr.bf16.gmra.mxu0 %v7824_v52  ;;  %5154 = vmatmul.mubr.bf16.gmra.mxu1 %v7829_v25  ;;  %v10113_v52 = vpop.permute.xlu1 %2851  ;;  %v7866_v25 = vld [vmem:[%s11747_s5 + $0x300] ss:$16 sps:$4 sm:$0xff]  }
 0x20c   : > { %4680 = vmatprep.mubr.bf16.mxu0 %v7832_v58  ;;  %5161 = vmatprep.mubr.bf16.mxu1 %v7833_v8  ;;  %11841 = vst [vmem:[#allocation34_spill] sm:$0xff] %v10113_v52  ;;  %v7869_v58 = vld [vmem:[%s11747_s5 + $0x208] ss:$16 sps:$4 sm:$0xff]   ;;  %v10121_v8 = vpop.permute.xlu0 %2856 }
 0x20d   : > { %11842 = vst [vmem:[#allocation35_spill] sm:$0xff] %v10121_v8  ;;  %v5722_v8 = vld [vmem:[#allocation2] sm:$0xff] }
 0x213   : > { %4681 = vmatmul.mubr.bf16.gmra.mxu0 %v7830_v3  ;;  %5162 = vmatmul.mubr.bf16.gmra.mxu1 %v7835_v9  ;;  %v7874_v3 = vld [vmem:[%s11747_s5 + $0x324] ss:$16 sps:$4 sm:$0xff]   ;;  %v7877_v9 = vld [vmem:[%s11747_s5 + $0x22c] ss:$16 sps:$4 sm:$0xff]  }
 0x214   : > { %4688 = vmatprep.mubr.bf16.mxu0 %v7838_v24  ;;  %5169 = vmatprep.mubr.bf16.mxu1 %v7839_v6  ;;  %v10131_v6 = vpop.permute.xlu1 %2861 }
 0x215   : > { %11843 = vst [vmem:[#allocation36_spill] sm:$0xff] %v10131_v6 }
 0x21b   : > { %4689 = vmatmul.mubr.bf16.gmra.mxu0 %v7836_v36  ;;  %5170 = vmatmul.mubr.bf16.gmra.mxu1 %v7841_v61  ;;  %v10133_v61 = vpop.permute.xlu0 %2866 }
 0x21c   : > { %4696 = vmatprep.mubr.bf16.mxu0 %v7844_v44  ;;  %5177 = vmatprep.mubr.bf16.mxu1 %v7847_v34  ;;  %11844 = vst [vmem:[#allocation37_spill] sm:$0xff] %v10133_v61  ;;  %v7872_v34 = vld [vmem:[%s11747_s5 + $0x320] ss:$16 sps:$4 sm:$0xff]  }
 0x21d   : > { %v7914_v61 = vld [vmem:[%s11747_s5 + $0x400] ss:$16 sps:$4 sm:$0xff]  }
 0x223   : > { %4697 = vmatmul.mubr.bf16.gmra.mxu0 %v7842_v4  ;;  %5178 = vmatmul.mubr.bf16.gmra.mxu1 %v7845_v42  ;;  %v7875_v4 = vld [vmem:[%s11747_s5 + $0x228] ss:$16 sps:$4 sm:$0xff]   ;;  %v7880_v42 = vld [vmem:[%s11747_s5 + $0x344] ss:$16 sps:$4 sm:$0xff]  }
 0x224   : > { %4704 = vmatprep.mubr.bf16.mxu0 %v7850_v7  ;;  %5185 = vmatprep.mubr.bf16.mxu1 %v7853_v28  ;;  %v7883_v7 = vld [vmem:[%s11747_s5 + $0x24c] ss:$16 sps:$4 sm:$0xff]  }
 0x22b   : > { %4705 = vmatmul.mubr.bf16.gmra.mxu0 %v7848_v5  ;;  %5186 = vmatmul.mubr.bf16.gmra.mxu1 %v7851_v43  ;;  %v10149_v5 = vpop.permute.xlu1 %2871 }
 0x22c   : > { %4712 = vmatprep.mubr.bf16.mxu0 %v7856_v57  ;;  %5193 = vmatprep.mubr.bf16.mxu1 %v7859_v23  ;;  %11845 = vst [vmem:[#allocation39_spill] sm:$0xff] %v10149_v5  ;;  %v10153_v57 = vpop.permute.xlu0 %2876 }
 0x22d   : > { %11846 = vst [vmem:[#allocation38_spill] sm:$0xff] %v10153_v57  ;;  %v7908_v57 = vld [vmem:[%s11747_s5 + $0x3e0] ss:$16 sps:$4 sm:$0xff]  }
 0x233   : > { %4713 = vmatmul.mubr.bf16.gmra.mxu0 %v7854_v29  ;;  %5194 = vmatmul.mubr.bf16.gmra.mxu1 %v7857_v17  ;;  %v7878_v17 = vld [vmem:[%s11747_s5 + $0x340] ss:$16 sps:$4 sm:$0xff]  }
 0x234   : > { %4720 = vmatprep.mubr.bf16.mxu0 %v7862_v47  ;;  %5201 = vmatprep.mubr.bf16.mxu1 %v7865_v14  ;;  %v7881_v47 = vld [vmem:[%s11747_s5 + $0x248] ss:$16 sps:$4 sm:$0xff]   ;;  %v10163_v14 = vpop.permute.xlu1 %2881 }
 0x235   : > { %11847 = vst [vmem:[#allocation41_spill] sm:$0xff] %v10163_v14 }
 0x23b   : > { %4721 = vmatmul.mubr.bf16.gmra.mxu0 %v7860_v51  ;;  %5202 = vmatmul.mubr.bf16.gmra.mxu1 %v7863_v45  ;;  %v7886_v51 = vld [vmem:[%s11747_s5 + $0x364] ss:$16 sps:$4 sm:$0xff]   ;;  %v7889_v45 = vld [vmem:[%s11747_s5 + $0x26c] ss:$16 sps:$4 sm:$0xff]  }
 0x23c   : > { %4728 = vmatprep.mubr.bf16.mxu0 %v7868_v55  ;;  %5209 = vmatprep.mubr.bf16.mxu1 %v7871_v33  ;;  %v10171_v33 = vpop.permute.xlu0 %2886 }
 0x23d   : > { %11848 = vst [vmem:[#allocation40_spill] sm:$0xff] %v10171_v33  ;;  %v7902_v33 = vld [vmem:[%s11747_s5 + $0x3c0] ss:$16 sps:$4 sm:$0xff]  }
 0x243   : > { %v10129_v24 = vpop.f32.mrf.mxu0  ;;  %4729 = vmatmul.mubr.bf16.gmra.mxu0 %v7866_v25  ;;  %5210 = vmatmul.mubr.bf16.gmra.mxu1 %v7869_v58 }
 0x244   : > { %4736 = vmatprep.mubr.bf16.mxu0 %v7874_v3  ;;  %5217 = vmatprep.mubr.bf16.mxu1 %v7877_v9  ;;  %v10175_v3 = vpop.permute.xlu1 %2891 }
 0x245   : > { %v4540_v36 = vpop.f32.mrf.mxu0  ;;  %11849 = vst [vmem:[#allocation42_spill] sm:$0xff] %v10175_v3 }
 0x246   : > { %v7884_v36 = vld [vmem:[%s11747_s5 + $0x360] ss:$16 sps:$4 sm:$0xff]  }
 0x247   : > { %v10135_v44 = vpop.f32.mrf.mxu0 }
 0x249   : > { %v4543_v28 = vpop.f32.mrf.mxu0 }
 0x24b   : > { %v10151_v43 = vpop.f32.mrf.mxu0  ;;  %4737 = vmatmul.mubr.bf16.gmra.mxu0 %v7872_v34  ;;  %5218 = vmatmul.mubr.bf16.gmra.mxu1 %v7875_v4  ;;  %v7887_v34 = vld [vmem:[%s11747_s5 + $0x268] ss:$16 sps:$4 sm:$0xff]   ;;  %v10185_v4 = vpop.permute.xlu0 %2896 }
 0x24c   : > { %4744 = vmatprep.mubr.bf16.mxu0 %v7880_v42  ;;  %5225 = vmatprep.mubr.bf16.mxu1 %v7883_v7  ;;  %11850 = vst [vmem:[#allocation43_spill] sm:$0xff] %v10185_v4  ;;  %v7892_v42 = vld [vmem:[%s11747_s5 + $0x384] ss:$16 sps:$4 sm:$0xff]   ;;  %v7895_v7 = vld [vmem:[%s11747_s5 + $0x28c] ss:$16 sps:$4 sm:$0xff]  }
 0x24d   : > { %v4548_v23 = vpop.f32.mrf.mxu0  ;;  %v7896_v4 = vld [vmem:[%s11747_s5 + $0x3a0] ss:$16 sps:$4 sm:$0xff]  }
 0x24f   : > { %v10155_v29 = vpop.f32.mrf.mxu0 }
 0x251   : > { %v4551_v55 = vpop.f32.mrf.mxu0 }
 0x252   : > { %v7890_v55 = vld [vmem:[%s11747_s5 + $0x380] ss:$16 sps:$4 sm:$0xff]  }
 0x253   : > { %v10173_v25 = vpop.f32.mrf.mxu0  ;;  %4745 = vmatmul.mubr.bf16.gmra.mxu0 %v7878_v17  ;;  %5226 = vmatmul.mubr.bf16.gmra.mxu1 %v7881_v47  ;;  %v10195_v17 = vpop.permute.xlu1 %2901 }
 0x254   : > { %4752 = vmatprep.mubr.bf16.mxu0 %v7886_v51  ;;  %5233 = vmatprep.mubr.bf16.mxu1 %v7889_v45  ;;  %11851 = vst [vmem:[#allocation44_spill] sm:$0xff] %v10195_v17  ;;  %v10197_v51 = vpop.permute.xlu0 %2906 }
 0x255   : > { %v4556_v58 = vpop.f32.mrf.mxu0  ;;  %11852 = vst [vmem:[#allocation45_spill] sm:$0xff] %v10197_v51 }
 0x256   : > { %v7893_v58 = vld [vmem:[%s11747_s5 + $0x288] ss:$16 sps:$4 sm:$0xff]  }
 0x257   : > { %v10177_v9 = vpop.f32.mrf.mxu0 }
 0x259   : > { %v4559_v28 = vpop.f32.mrf.mxu0 }
 0x25b   : > { %v10193_v23 = vpop.f32.mrf.mxu0  ;;  %4753 = vmatmul.mubr.bf16.gmra.mxu0 %v7884_v36  ;;  %5234 = vmatmul.mubr.bf16.gmra.mxu1 %v7887_v34  ;;  %v7898_v36 = vld [vmem:[%s11747_s5 + $0x3a4] ss:$16 sps:$4 sm:$0xff]   ;;  %v7901_v34 = vld [vmem:[%s11747_s5 + $0x2ac] ss:$16 sps:$4 sm:$0xff]  }
 0x25c   : > { %4760 = vmatprep.mubr.bf16.mxu0 %v7892_v42  ;;  %5241 = vmatprep.mubr.bf16.mxu1 %v7895_v7  ;;  %v10213_v7 = vpop.permute.xlu1 %2911 }
 0x25d   : > { %v4564_v47 = vpop.f32.mrf.mxu0  ;;  %11853 = vst [vmem:[#allocation46_spill] sm:$0xff] %v10213_v7 }
 0x25e   : > { %v10217_v47 = vpop.permute.xlu0 %2916 }
 0x25f   : > { %v10199_v45 = vpop.f32.mrf.mxu0  ;;  %11854 = vst [vmem:[#allocation47_spill] sm:$0xff] %v10217_v47 }
 0x260   : > { %v10227_v7 = vpop.permute.xlu1 %2921 }
 0x261   : > { %v4567_v42 = vpop.f32.mrf.mxu0  ;;  %11855 = vst [vmem:[#allocation48_spill] sm:$0xff] %v10227_v7 }
 0x262   : > { %v7899_v42 = vld [vmem:[%s11747_s5 + $0x2a8] ss:$16 sps:$4 sm:$0xff]  }
 0x263   : > { %v10215_v28 = vpop.f32.mrf.mxu0  ;;  %4761 = vmatmul.mubr.bf16.gmra.mxu0 %v7890_v55  ;;  %5242 = vmatmul.mubr.bf16.gmra.mxu1 %v7893_v58  ;;  %v7904_v55 = vld [vmem:[%s11747_s5 + $0x3c4] ss:$16 sps:$4 sm:$0xff]  }
 0x264   : > { %4768 = vmatprep.mubr.bf16.mxu0 %v7898_v36  ;;  %5249 = vmatprep.mubr.bf16.mxu1 %v7901_v34  ;;  %v10235_v36 = vpop.permute.xlu0 %2926  ;;  %v10239_v3 = vpop.permute.xlu1 %2931 }
 0x265   : > { %v4572_v51 = vpop.f32.mrf.mxu0  ;;  %11856 = vst [vmem:[#allocation49_spill] sm:$0xff] %v10235_v36  ;;  %11857 = vst [vmem:[#allocation50_spill] sm:$0xff] %v10239_v3 }
 0x266   : > { %v7907_v51 = vld [vmem:[%s11747_s5 + $0x2cc] ss:$16 sps:$4 sm:$0xff]  }
 0x267   : > { %v10219_v17 = vpop.f32.mrf.mxu0 }
 0x268   : > { %v10249_v36 = vpop.permute.xlu0 %2936 }
 0x269   : > { %v4575_v58 = vpop.f32.mrf.mxu0  ;;  %11858 = vst [vmem:[#allocation51_spill] sm:$0xff] %v10249_v36 }
 0x26a   : > { %v7905_v58 = vld [vmem:[%s11747_s5 + $0x2c8] ss:$16 sps:$4 sm:$0xff]  }
 0x26b   : > { %v10237_v34 = vpop.f32.mrf.mxu0  ;;  %4769 = vmatmul.mubr.bf16.gmra.mxu0 %v7896_v4  ;;  %5250 = vmatmul.mubr.bf16.gmra.mxu1 %v7899_v42  ;;  %v7910_v4 = vld [vmem:[%s11747_s5 + $0x3e4] ss:$16 sps:$4 sm:$0xff]  }
 0x26c   : > { %4776 = vmatprep.mubr.bf16.mxu0 %v7904_v55  ;;  %5257 = vmatprep.mubr.bf16.mxu1 %v7907_v51  ;;  %v10259_v51 = vpop.permute.xlu1 %2941  ;;  %v10261_v14 = vpop.permute.xlu0 %2946 }
 0x26d   : > { %v4580_v47 = vpop.f32.mrf.mxu0  ;;  %11859 = vst [vmem:[#allocation52_spill] sm:$0xff] %v10259_v51  ;;  %11860 = vst [vmem:[#allocation53_spill] sm:$0xff] %v10261_v14 }
 0x26e   : > { %v7913_v47 = vld [vmem:[%s11747_s5 + $0x2ec] ss:$16 sps:$4 sm:$0xff]  }
 0x26f   : > { %v10241_v7 = vpop.f32.mrf.mxu0 }
 0x270   : > { %v10281_v14 = vpop.permute.xlu0 %2956 }
 0x271   : > { %v4583_v42 = vpop.f32.mrf.mxu0  ;;  %11862 = vst [vmem:[#allocation55_spill] sm:$0xff] %v10281_v14 }
 0x272   : > { %v7911_v42 = vld [vmem:[%s11747_s5 + $0x2e8] ss:$16 sps:$4 sm:$0xff]  }
 0x273   : > { %v10257_v55 = vpop.f32.mrf.mxu0  ;;  %4777 = vmatmul.mubr.bf16.gmra.mxu0 %v7902_v33  ;;  %5258 = vmatmul.mubr.bf16.gmra.mxu1 %v7905_v58  ;;  %v7916_v33 = vld [vmem:[%s11747_s5 + $0x404] ss:$16 sps:$4 sm:$0xff]  }
 0x274   : > { %4784 = vmatprep.mubr.bf16.mxu0 %v7910_v4  ;;  %5265 = vmatprep.mubr.bf16.mxu1 %v7913_v47  ;;  %v10277_v4 = vpop.permute.xlu1 %2951 }
 0x275   : > { %v4588_v3 = vpop.f32.mrf.mxu0  ;;  %11861 = vst [vmem:[#allocation54_spill] sm:$0xff] %v10277_v4 }
 0x276   : > { %v7919_v3 = vld [vmem:[%s11747_s5 + $0x30c] ss:$16 sps:$4 sm:$0xff]  }
 0x277   : > { %v10263_v36 = vpop.f32.mrf.mxu0 }
 0x278   : > { %v10291_v4 = vpop.permute.xlu1 %2961 }
 0x279   : > { %v4591_v58 = vpop.f32.mrf.mxu0  ;;  %11863 = vst [vmem:[#allocation56_spill] sm:$0xff] %v10291_v4 }
 0x27a   : > { %v7917_v58 = vld [vmem:[%s11747_s5 + $0x308] ss:$16 sps:$4 sm:$0xff]  }
 0x27b   : > { %v10279_v47 = vpop.f32.mrf.mxu0  ;;  %4785 = vmatmul.mubr.bf16.gmra.mxu0 %v7908_v57  ;;  %5266 = vmatmul.mubr.bf16.gmra.mxu1 %v7911_v42  ;;  %v7922_v57 = vld [vmem:[%s11747_s5 + $0x424] ss:$16 sps:$4 sm:$0xff]  }
 0x27c   : > { %4792 = vmatprep.mubr.bf16.mxu0 %v7916_v33  ;;  %5273 = vmatprep.mubr.bf16.mxu1 %v7919_v3  ;;  %v10299_v33 = vpop.permute.xlu0 %2966  ;;  %v4539_v3 = vadd.f32 %v10129_v24, %v9184_v48  ;;  %v10305_v18 = vpop.permute.xlu1 %2971  ;;  %v7920_v24 = vld [vmem:[%s11747_s5 + $0x420] ss:$16 sps:$4 sm:$0xff]  }
 0x27d   : > { %v4596_v51 = vpop.f32.mrf.mxu0  ;;  %11864 = vst [vmem:[#allocation57_spill] sm:$0xff] %v10299_v33  ;;  %11865 = vst [vmem:[#allocation58_spill] sm:$0xff] %v10305_v18  ;;  %v5724_v18 = vld [vmem:[#allocation2 + $0x10] sm:$0xff] }
 0x27e   : > { %v7925_v51 = vld [vmem:[%s11747_s5 + $0x32c] ss:$16 sps:$4 sm:$0xff]  }
 0x27f   : > { %v10283_v5 = vpop.f32.mrf.mxu0 }
 0x281   : > { %v4599_v42 = vpop.f32.mrf.mxu0 }
 0x282   : > { %v4542_v42 = vadd.f32 %v10135_v44, %v9182_v50  ;;  %v7928_v50 = vld [vmem:[%s11747_s5 + $0x444] ss:$16 sps:$4 sm:$0xff]   ;;  %v7931_v44 = vld [vmem:[%s11747_s5 + $0x34c] ss:$16 sps:$4 sm:$0xff]  }
 0x283   : > { %v10303_v14 = vpop.f32.mrf.mxu0  ;;  %4793 = vmatmul.mubr.bf16.gmra.mxu0 %v7914_v61  ;;  %v5083_v6 = vpop.f32.mrf.mxu1  ;;  %5274 = vmatmul.mubr.bf16.gmra.mxu1 %v7917_v58 }
 0x284   : > { %v5084_v4 = vadd.f32 %v5083_v6, %v4539_v3  ;;  %4800 = vmatprep.mubr.bf16.mxu0 %v7922_v57  ;;  %5281 = vmatprep.mubr.bf16.mxu1 %v7925_v51  ;;  %v7923_v6 = vld [vmem:[%s11747_s5 + $0x328] ss:$16 sps:$4 sm:$0xff]   ;;  %v10317_v61 = vpop.permute.xlu0 %2976  ;;  %v4547_v51 = vadd.f32 %v10151_v43, %v9216_v1  ;;  %v11869_v1 = vld [vmem:[#allocation20_spill] sm:$0xff] }
 0x285   : > { %v4604_v52 = vpop.f32.mrf.mxu0  ;;  %v5085_v46 = vpop.f32.mrf.mxu1  ;;  %11866 = vst [vmem:[#allocation59_spill] sm:$0xff] %v10317_v61  ;;  %v4550_v43 = vadd.f32 %v10155_v29, %v11869_v1  ;;  %v7934_v29 = vld [vmem:[%s11747_s5 + $0x464] ss:$16 sps:$4 sm:$0xff]  }
 0x286   : > { %v5594_v33 = vmax.f32 %v5084_v4, 0.0  ;;  %v5723_v4 = vld [vmem:[#allocation2 + $0x8] sm:$0xff] }
 0x287   : > { %v10309_v59 = vpop.f32.mrf.mxu0  ;;  %v5086_v48 = vpop.f32.mrf.mxu1 }
 0x288   : > { %v5850_v46 = vadd.f32 %v5722_v8, %v5594_v33  ;;  %v5087_v52 = vadd.f32 %v5086_v48, %v4542_v42  ;;  %v10330_v33 = vpop.permute.xlu1 %2981  ;;  %v10332_v13 = vpop.permute.xlu0 %2986 }
 0x289   : > { %v4607_v58 = vpop.f32.mrf.mxu0  ;;  %v5088_v57 = vpop.f32.mrf.mxu1  ;;  %11867 = vst [vmem:[#allocation60_spill] sm:$0xff] %v10330_v33  ;;  %11868 = vst [vmem:[#allocation61_spill] sm:$0xff] %v10332_v13 }
 0x28a   : > { %5979 = vst.msk [vmem:[#allocation2] sm:$0xff] %vm389_vm0, %v5850_v46  ;;  %v5595_v3 = vmax.f32 %v5087_v52, 0.0  ;;  %v7926_v52 = vld [vmem:[%s11747_s5 + $0x440] ss:$16 sps:$4 sm:$0xff]  }
 0x28b   : > { %v10328_v61 = vpop.f32.mrf.mxu0  ;;  %4801 = vmatmul.mubr.bf16.gmra.mxu0 %v7920_v24  ;;  %v5091_v8 = vpop.f32.mrf.mxu1  ;;  %5282 = vmatmul.mubr.bf16.gmra.mxu1 %v7923_v6 }
 0x28c   : > { %v5851_v42 = vadd.f32 %v5723_v4, %v5595_v3  ;;  %v5092_v48 = vadd.f32 %v5091_v8, %v4547_v51  ;;  %4808 = vmatprep.mubr.bf16.mxu0 %v7928_v50  ;;  %5289 = vmatprep.mubr.bf16.mxu1 %v7931_v44  ;;  %v7929_v50 = vld [vmem:[%s11747_s5 + $0x348] ss:$16 sps:$4 sm:$0xff]  }
 0x28d   : > { %v4612_v58 = vpop.f32.mrf.mxu0  ;;  %v5093_v57 = vpop.f32.mrf.mxu1  ;;  %v5725_v51 = vld [vmem:[#allocation2 + $0x18] sm:$0xff] }
 0x28e   : > { %5980 = vst.msk [vmem:[#allocation2 + $0x8] sm:$0xff] %vm389_vm0, %v5851_v42  ;;  %v5596_v46 = vmax.f32 %v5092_v48, 0.0  ;;  %v7937_v48 = vld [vmem:[%s11747_s5 + $0x36c] ss:$16 sps:$4 sm:$0xff]   ;;  %v10351_v58 = vpop.permute.xlu1 %2991  ;;  %v11871_v57 = vld [vmem:[#allocation18_spill] sm:$0xff] }
 0x28f   : > { %v10337_v24 = vpop.f32.mrf.mxu0  ;;  %v5094_v6 = vpop.f32.mrf.mxu1  ;;  %11870 = vst [vmem:[#allocation20_spill] sm:$0xff] %v10351_v58  ;;  %v4555_v1 = vadd.f32 %v10173_v25, %v11871_v57  ;;  %v5726_v58 = vld [vmem:[#allocation2 + $0x20] sm:$0xff] }
 0x290   : > { %v5852_v44 = vadd.f32 %v5724_v18, %v5596_v46  ;;  %v5095_v4 = vadd.f32 %v5094_v6, %v4550_v43 }
 0x291   : > { %v4615_v3 = vpop.f32.mrf.mxu0  ;;  %v5096_v8 = vpop.f32.mrf.mxu1  ;;  %v6110_v42 = vld [vmem:[#allocation2] sm:$0xff] }
 0x292   : > { %5981 = vst.msk [vmem:[#allocation2 + $0x10] sm:$0xff] %vm389_vm0, %v5852_v44  ;;  %v5597_v18 = vmax.f32 %v5095_v4, 0.0  ;;  %v6238_v43 = vsel %vm389_vm0, %v6110_v42, 0.0  ;;  %v10359_v3 = vpop.permute.xlu0 %2996  ;;  %v11873_v44 = vld [vmem:[#allocation21_spill] sm:$0xff] }
 0x293   : > { %v10357_v46 = vpop.f32.mrf.mxu0  ;;  %4809 = vmatmul.mubr.bf16.gmra.mxu0 %v7926_v52  ;;  %v5099_v6 = vpop.f32.mrf.mxu1  ;;  %5290 = vmatmul.mubr.bf16.gmra.mxu1 %v7929_v50  ;;  %11872 = vst [vmem:[#allocation18_spill] sm:$0xff] %v10359_v3  ;;  %v4558_v4 = vadd.f32 %v10177_v9, %v11873_v44 }
 0x294   : > { %v5853_v8 = vadd.f32 %v5725_v51, %v5597_v18  ;;  %v5100_v13 = vadd.f32 %v5099_v6, %v4555_v1  ;;  %6239 = vadd.xlane.f32.xlu0 %v6238_v43  ;;  %4816 = vmatprep.mubr.bf16.mxu0 %v7934_v29  ;;  %v7932_v29 = vld [vmem:[%s11747_s5 + $0x460] ss:$16 sps:$4 sm:$0xff]   ;;  %v7943_v6 = vld [vmem:[%s11747_s5 + $0x38c] ss:$16 sps:$4 sm:$0xff]  }
 0x295   : > { %v4620_v33 = vpop.f32.mrf.mxu0  ;;  %v5101_v38 = vpop.f32.mrf.mxu1  ;;  %v6111_v25 = vld [vmem:[#allocation2 + $0x8] sm:$0xff]  ;;  %5297 = vmatprep.mubr.bf16.mxu1 %v7937_v48 }
 0x296   : > { %5982 = vst.msk [vmem:[#allocation2 + $0x18] sm:$0xff] %vm389_vm0, %v5853_v8  ;;  %v5598_v42 = vmax.f32 %v5100_v13, 0.0  ;;  %v6241_v52 = vsel %vm389_vm0, %v6111_v25, 0.0  ;;  %v7935_v38 = vld [vmem:[%s11747_s5 + $0x368] ss:$16 sps:$4 sm:$0xff]   ;;  %v10373_v33 = vpop.permute.xlu1 %3001  ;;  %v10381_v8 = vpop.permute.xlu0 %3006  ;;  %v11876_v25 = vld [vmem:[#allocation16_spill] sm:$0xff] }
 0x297   : > { %v10365_v50 = vpop.f32.mrf.mxu0  ;;  %v5102_v57 = vpop.f32.mrf.mxu1  ;;  %6242 = vadd.xlane.f32.xlu1 %v6241_v52  ;;  %11874 = vst [vmem:[#allocation21_spill] sm:$0xff] %v10373_v33  ;;  %v7940_v13 = vld [vmem:[%s11747_s5 + $0x484] ss:$16 sps:$4 sm:$0xff]   ;;  %v5727_v48 = vld [vmem:[#allocation2 + $0x28] sm:$0xff]  ;;  %11875 = vst [vmem:[#allocation62_spill] sm:$0xff] %v10381_v8  ;;  %v4563_v44 = vadd.f32 %v10193_v23, %v11876_v25 }
 0x298   : > { %v5854_v9 = vadd.f32 %v5726_v58, %v5598_v42  ;;  %v5103_v51 = vadd.f32 %v5102_v57, %v4558_v4  ;;  %v5729_v25 = vld [vmem:[#allocation2 + $0x38] sm:$0xff] }
 0x299   : > { %v4623_v1 = vpop.f32.mrf.mxu0  ;;  %v5104_v18 = vpop.f32.mrf.mxu1  ;;  %v6112_v43 = vld [vmem:[#allocation2 + $0x10] sm:$0xff] }
 0x29a   : > { %5983 = vst.msk [vmem:[#allocation2 + $0x20] sm:$0xff] %vm389_vm0, %v5854_v9  ;;  %v5599_v58 = vmax.f32 %v5103_v51, 0.0  ;;  %v6244_v4 = vsel %vm389_vm0, %v6112_v43, 0.0  ;;  %v5728_v18 = vld [vmem:[#allocation2 + $0x30] sm:$0xff]  ;;  %v10389_v23 = vpop.permute.xlu1 %3011  ;;  %v11878_v9 = vld [vmem:[#allocation19_spill] sm:$0xff] }
 0x29b   : > { %v10387_v42 = vpop.f32.mrf.mxu0  ;;  %4817 = vmatmul.mubr.bf16.gmra.mxu0 %v7932_v29  ;;  %v5107_v52 = vpop.f32.mrf.mxu1  ;;  %5298 = vmatmul.mubr.bf16.gmra.mxu1 %v7935_v38  ;;  %11877 = vst [vmem:[#allocation16_spill] sm:$0xff] %v10389_v23  ;;  %v4566_v51 = vadd.f32 %v10199_v45, %v11878_v9 }
 0x29c   : > { %v5855_v57 = vadd.f32 %v5727_v48, %v5599_v58  ;;  %v5108_v1 = vadd.f32 %v5107_v52, %v4563_v44  ;;  %6245 = vadd.xlane.f32.xlu0 %v6244_v4  ;;  %4824 = vmatprep.mubr.bf16.mxu0 %v7940_v13  ;;  %v7941_v13 = vld [vmem:[%s11747_s5 + $0x388] ss:$16 sps:$4 sm:$0xff]   ;;  %v7949_v52 = vld [vmem:[%s11747_s5 + $0x3ac] ss:$16 sps:$4 sm:$0xff]  }
 0x29d   : > { %v4628_v33 = vpop.f32.mrf.mxu0  ;;  %v5109_v8 = vpop.f32.mrf.mxu1  ;;  %v6113_v3 = vld [vmem:[#allocation2 + $0x18] sm:$0xff]  ;;  %5305 = vmatprep.mubr.bf16.mxu1 %v7943_v6 }
 0x29e   : > { %5984 = vst.msk [vmem:[#allocation2 + $0x28] sm:$0xff] %vm389_vm0, %v5855_v57  ;;  %v5600_v43 = vmax.f32 %v5108_v1, 0.0  ;;  %v6247_v29 = vsel %vm389_vm0, %v6113_v3, 0.0  ;;  %v7938_v33 = vld [vmem:[%s11747_s5 + $0x480] ss:$16 sps:$4 sm:$0xff]   ;;  %v10403_v6 = vpop.permute.xlu0 %3016 }
 0x29f   : > { %v10395_v38 = vpop.f32.mrf.mxu0  ;;  %v5110_v48 = vpop.f32.mrf.mxu1  ;;  %11879 = vst [vmem:[#allocation19_spill] sm:$0xff] %v10403_v6  ;;  %v7946_v3 = vld [vmem:[%s11747_s5 + $0x4a4] ss:$16 sps:$4 sm:$0xff]  }
 0x2a0   : > { %v5856_v8 = vadd.f32 %v5728_v18, %v5600_v43  ;;  %v5111_v45 = vadd.f32 %v5110_v48, %v4566_v51  ;;  %6248 = vadd.xlane.f32.xlu0 %v6247_v29  ;;  %v11880_v57 = vld [vmem:[#allocation14_spill] sm:$0xff]  ;;  %v10417_v29 = vpop.permute.xlu1 %3021 }
 0x2a1   : > { %v4631_v44 = vpop.f32.mrf.mxu0  ;;  %v5112_v58 = vpop.f32.mrf.mxu1  ;;  %v6114_v4 = vld [vmem:[#allocation2 + $0x20] sm:$0xff]  ;;  %v4571_v1 = vadd.f32 %v10215_v28, %v11880_v57  ;;  %11881 = vst [vmem:[#allocation14_spill] sm:$0xff] %v10417_v29 }
 0x2a2   : > { %5985 = vst.msk [vmem:[#allocation2 + $0x30] sm:$0xff] %vm389_vm0, %v5856_v8  ;;  %v5601_v18 = vmax.f32 %v5111_v45, 0.0  ;;  %v6250_v9 = vsel %vm389_vm0, %v6114_v4, 0.0  ;;  %v5730_v58 = vld [vmem:[#allocation2 + $0x40] sm:$0xff]  ;;  %v10419_v8 = vpop.permute.xlu0 %3026  ;;  %v11883_v45 = vld [vmem:[#allocation17_spill] sm:$0xff] }
 0x2a3   : > { %v10415_v51 = vpop.f32.mrf.mxu0  ;;  %4825 = vmatmul.mubr.bf16.gmra.mxu0 %v7938_v33  ;;  %v5115_v43 = vpop.f32.mrf.mxu1  ;;  %5306 = vmatmul.mubr.bf16.gmra.mxu1 %v7941_v13  ;;  %11882 = vst [vmem:[#allocation63_spill] sm:$0xff] %v10419_v8  ;;  %v4574_v4 = vadd.f32 %v10219_v17, %v11883_v45  ;;  %v7952_v17 = vld [vmem:[%s11747_s5 + $0x4c4] ss:$16 sps:$4 sm:$0xff]  }
 0x2a4   : > { %v5857_v48 = vadd.f32 %v5729_v25, %v5601_v18  ;;  %v5116_v44 = vadd.f32 %v5115_v43, %v4571_v1  ;;  %6251 = vadd.xlane.f32.xlu1 %v6250_v9  ;;  %4832 = vmatprep.mubr.bf16.mxu0 %v7946_v3  ;;  %v5731_v1 = vld [vmem:[#allocation2 + $0x48] sm:$0xff] }
 0x2a5   : > { %v4636_v6 = vpop.f32.mrf.mxu0  ;;  %v5117_v23 = vpop.f32.mrf.mxu1  ;;  %v6115_v28 = vld [vmem:[#allocation2 + $0x28] sm:$0xff]  ;;  %5313 = vmatprep.mubr.bf16.mxu1 %v7949_v52 }
 0x2a6   : > { %5986 = vst.msk [vmem:[#allocation2 + $0x38] sm:$0xff] %vm389_vm0, %v5857_v48  ;;  %v5602_v33 = vmax.f32 %v5116_v44, 0.0  ;;  %v6253_v13 = vsel %vm389_vm0, %v6115_v28, 0.0  ;;  %v7944_v23 = vld [vmem:[%s11747_s5 + $0x4a0] ss:$16 sps:$4 sm:$0xff]   ;;  %v10439_v44 = vpop.permute.xlu1 %3031 }
 0x2a7   : > { %v10425_v57 = vpop.f32.mrf.mxu0  ;;  %v5118_v25 = vpop.f32.mrf.mxu1  ;;  %6254 = vadd.xlane.f32.xlu0 %v6253_v13  ;;  %v7947_v6 = vld [vmem:[%s11747_s5 + $0x3a8] ss:$16 sps:$4 sm:$0xff]   ;;  %v7955_v48 = vld [vmem:[%s11747_s5 + $0x3cc] ss:$16 sps:$4 sm:$0xff]   ;;  %11884 = vst [vmem:[#allocation17_spill] sm:$0xff] %v10439_v44  ;;  %v11885_v28 = vld [vmem:[#allocation12_spill] sm:$0xff] }
 0x2a8   : > { %v5858_v3 = vadd.f32 %v5730_v58, %v5602_v33  ;;  %v5119_v52 = vadd.f32 %v5118_v25, %v4574_v4  ;;  %v4579_v45 = vadd.f32 %v10237_v34, %v11885_v28  ;;  %v10447_v25 = vpop.permute.xlu0 %3036  ;;  %v5732_v44 = vld [vmem:[#allocation2 + $0x50] sm:$0xff] }
 0x2a9   : > { %v4639_v18 = vpop.f32.mrf.mxu0  ;;  %v5120_v9 = vpop.f32.mrf.mxu1  ;;  %v6116_v43 = vld [vmem:[#allocation2 + $0x30] sm:$0xff]  ;;  %11886 = vst [vmem:[#allocation12_spill] sm:$0xff] %v10447_v25 }
 0x2aa   : > { %5987 = vst.msk [vmem:[#allocation2 + $0x40] sm:$0xff] %vm389_vm0, %v5858_v3  ;;  %v5603_v58 = vmax.f32 %v5119_v52, 0.0  ;;  %v6256_v4 = vsel %vm389_vm0, %v6116_v43, 0.0  ;;  %v11887_v3 = vld [vmem:[#allocation15_spill] sm:$0xff] }
 0x2ab   : > { %v10445_v33 = vpop.f32.mrf.mxu0  ;;  %4833 = vmatmul.mubr.bf16.gmra.mxu0 %v7944_v23  ;;  %v5123_v13 = vpop.f32.mrf.mxu1  ;;  %5314 = vmatmul.mubr.bf16.gmra.mxu1 %v7947_v6  ;;  %v4582_v52 = vadd.f32 %v10241_v7, %v11887_v3 }
 0x2ac   : > { %v5859_v18 = vadd.f32 %v5731_v1, %v5603_v58  ;;  %v5124_v9 = vadd.f32 %v5123_v13, %v4579_v45  ;;  %6257 = vadd.xlane.f32.xlu1 %v6256_v4  ;;  %4840 = vmatprep.mubr.bf16.mxu0 %v7952_v17  ;;  %v7950_v17 = vld [vmem:[%s11747_s5 + $0x4c0] ss:$16 sps:$4 sm:$0xff]   ;;  %v5733_v45 = vld [vmem:[#allocation2 + $0x58] sm:$0xff] }
 0x2ad   : > { %v4644_v8 = vpop.f32.mrf.mxu0  ;;  %v5125_v29 = vpop.f32.mrf.mxu1  ;;  %v6117_v34 = vld [vmem:[#allocation2 + $0x38] sm:$0xff]  ;;  %5321 = vmatprep.mubr.bf16.mxu1 %v7955_v48  ;;  %v7958_v48 = vld [vmem:[%s11747_s5 + $0x4e4] ss:$16 sps:$4 sm:$0xff]  }
 0x2ae   : > { %5988 = vst.msk [vmem:[#allocation2 + $0x48] sm:$0xff] %vm389_vm0, %v5859_v18  ;;  %v5604_v43 = vmax.f32 %v5124_v9, 0.0  ;;  %v6259_v23 = vsel %vm389_vm0, %v6117_v34, 0.0  ;;  %v7953_v29 = vld [vmem:[%s11747_s5 + $0x3c8] ss:$16 sps:$4 sm:$0xff]   ;;  %v10461_v8 = vpop.permute.xlu1 %3041  ;;  %v10469_v9 = vpop.permute.xlu0 %3046 }
 0x2af   : > { %v10453_v6 = vpop.f32.mrf.mxu0  ;;  %v5126_v28 = vpop.f32.mrf.mxu1  ;;  %6260 = vadd.xlane.f32.xlu0 %v6259_v23  ;;  %11888 = vst [vmem:[#allocation15_spill] sm:$0xff] %v10461_v8  ;;  %v7961_v18 = vld [vmem:[%s11747_s5 + $0x3ec] ss:$16 sps:$4 sm:$0xff]   ;;  %11889 = vst [vmem:[#allocation64_spill] sm:$0xff] %v10469_v9 }
 0x2b0   : > { %v5860_v7 = vadd.f32 %v5732_v44, %v5604_v43  ;;  %v5127_v1 = vadd.f32 %v5126_v28, %v4582_v52  ;;  %v11890_v34 = vld [vmem:[#allocation23_spill] sm:$0xff] }
 0x2b1   : > { %v4647_v58 = vpop.f32.mrf.mxu0  ;;  %v5128_v4 = vpop.f32.mrf.mxu1  ;;  %v6118_v13 = vld [vmem:[#allocation2 + $0x40] sm:$0xff]  ;;  %v4587_v3 = vadd.f32 %v10257_v55, %v11890_v34  ;;  %v5735_v34 = vld [vmem:[#allocation2 + $0x68] sm:$0xff] }
 0x2b2   : > { %5989 = vst.msk [vmem:[#allocation2 + $0x50] sm:$0xff] %vm389_vm0, %v5860_v7  ;;  %v5605_v44 = vmax.f32 %v5127_v1, 0.0  ;;  %v6262_v52 = vsel %vm389_vm0, %v6118_v13, 0.0  ;;  %v5734_v4 = vld [vmem:[#allocation2 + $0x60] sm:$0xff]  ;;  %v10477_v55 = vpop.permute.xlu1 %3051  ;;  %v11892_v7 = vld [vmem:[#allocation13_spill] sm:$0xff] }
 0x2b3   : > { %v10475_v43 = vpop.f32.mrf.mxu0  ;;  %4841 = vmatmul.mubr.bf16.gmra.mxu0 %v7950_v17  ;;  %v5131_v23 = vpop.f32.mrf.mxu1  ;;  %5322 = vmatmul.mubr.bf16.gmra.mxu1 %v7953_v29  ;;  %11891 = vst [vmem:[#allocation23_spill] sm:$0xff] %v10477_v55  ;;  %v4590_v1 = vadd.f32 %v10263_v36, %v11892_v7 }
 0x2b4   : > { %v5861_v28 = vadd.f32 %v5733_v45, %v5605_v44  ;;  %v5132_v58 = vadd.f32 %v5131_v23, %v4587_v3  ;;  %6263 = vadd.xlane.f32.xlu1 %v6262_v52  ;;  %4848 = vmatprep.mubr.bf16.mxu0 %v7958_v48  ;;  %v7959_v48 = vld [vmem:[%s11747_s5 + $0x3e8] ss:$16 sps:$4 sm:$0xff]   ;;  %v7967_v23 = vld [vmem:[%s11747_s5 + $0x40c] ss:$16 sps:$4 sm:$0xff]  }
 0x2b5   : > { %v4652_v8 = vpop.f32.mrf.mxu0  ;;  %v5133_v9 = vpop.f32.mrf.mxu1  ;;  %v6119_v25 = vld [vmem:[#allocation2 + $0x48] sm:$0xff]  ;;  %5329 = vmatprep.mubr.bf16.mxu1 %v7961_v18 }
 0x2b6   : > { %5990 = vst.msk [vmem:[#allocation2 + $0x58] sm:$0xff] %vm389_vm0, %v5861_v28  ;;  %v5606_v13 = vmax.f32 %v5132_v58, 0.0  ;;  %v6265_v17 = vsel %vm389_vm0, %v6119_v25, 0.0  ;;  %v7956_v8 = vld [vmem:[%s11747_s5 + $0x4e0] ss:$16 sps:$4 sm:$0xff]   ;;  %v10491_v18 = vpop.permute.xlu0 %3056  ;;  %v11894_v28 = vld [vmem:[#allocation25_spill] sm:$0xff] }
 0x2b7   : > { %v10483_v29 = vpop.f32.mrf.mxu0  ;;  %v5134_v45 = vpop.f32.mrf.mxu1  ;;  %6266 = vadd.xlane.f32.xlu0 %v6265_v17  ;;  %11893 = vst [vmem:[#allocation13_spill] sm:$0xff] %v10491_v18  ;;  %v7964_v25 = vld [vmem:[%s11747_s5 + $0x504] ss:$16 sps:$4 sm:$0xff]   ;;  %v4595_v58 = vadd.f32 %v10279_v47, %v11894_v28 }
 0x2b8   : > { %v5862_v36 = vadd.f32 %v5734_v4, %v5606_v13  ;;  %v5135_v9 = vadd.f32 %v5134_v45, %v4590_v1  ;;  %v10505_v17 = vpop.permute.xlu1 %3061 }
 0x2b9   : > { %v4655_v3 = vpop.f32.mrf.mxu0  ;;  %v5136_v44 = vpop.f32.mrf.mxu1  ;;  %v6120_v52 = vld [vmem:[#allocation2 + $0x50] sm:$0xff]  ;;  %11895 = vst [vmem:[#allocation25_spill] sm:$0xff] %v10505_v17 }
 0x2ba   : > { %5991 = vst.msk [vmem:[#allocation2 + $0x60] sm:$0xff] %vm389_vm0, %v5862_v36  ;;  %v5607_v7 = vmax.f32 %v5135_v9, 0.0  ;;  %v6268_v4 = vsel %vm389_vm0, %v6120_v52, 0.0  ;;  %v5736_v44 = vld [vmem:[#allocation2 + $0x70] sm:$0xff]  ;;  %v10507_v36 = vpop.permute.xlu0 %3066 }
 0x2bb   : > { %v10503_v1 = vpop.f32.mrf.mxu0  ;;  %4849 = vmatmul.mubr.bf16.gmra.mxu0 %v7956_v8  ;;  %v5139_v13 = vpop.f32.mrf.mxu1  ;;  %5330 = vmatmul.mubr.bf16.gmra.mxu1 %v7959_v48  ;;  %11896 = vst [vmem:[#allocation65_spill] sm:$0xff] %v10507_v36  ;;  %v11897_v9 = vld [vmem:[#allocation22_spill] sm:$0xff] }
 0x2bc   : > { %v5863_v45 = vadd.f32 %v5735_v34, %v5607_v7  ;;  %v5140_v3 = vadd.f32 %v5139_v13, %v4595_v58  ;;  %6269 = vadd.xlane.f32.xlu1 %v6268_v4  ;;  %4856 = vmatprep.mubr.bf16.mxu0 %v7964_v25  ;;  %v4598_v52 = vadd.f32 %v10283_v5, %v11897_v9  ;;  %v7970_v5 = vld [vmem:[%s11747_s5 + $0x524] ss:$16 sps:$4 sm:$0xff]   ;;  %v5737_v58 = vld [vmem:[#allocation2 + $0x78] sm:$0xff] }
 0x2bd   : > { %v4660_v18 = vpop.f32.mrf.mxu0  ;;  %v5141_v55 = vpop.f32.mrf.mxu1  ;;  %v6121_v47 = vld [vmem:[#allocation2 + $0x58] sm:$0xff]  ;;  %5337 = vmatprep.mubr.bf16.mxu1 %v7967_v23 }
 0x2be   : > { %5992 = vst.msk [vmem:[#allocation2 + $0x68] sm:$0xff] %vm389_vm0, %v5863_v45  ;;  %v5608_v8 = vmax.f32 %v5140_v3, 0.0  ;;  %v6271_v48 = vsel %vm389_vm0, %v6121_v47, 0.0  ;;  %v7962_v55 = vld [vmem:[%s11747_s5 + $0x500] ss:$16 sps:$4 sm:$0xff]   ;;  %v10527_v3 = vpop.permute.xlu1 %3071 }
 0x2bf   : > { %v10513_v28 = vpop.f32.mrf.mxu0  ;;  %v5142_v34 = vpop.f32.mrf.mxu1  ;;  %6272 = vadd.xlane.f32.xlu0 %v6271_v48  ;;  %v7965_v18 = vld [vmem:[%s11747_s5 + $0x408] ss:$16 sps:$4 sm:$0xff]   ;;  %v7973_v45 = vld [vmem:[%s11747_s5 + $0x42c] ss:$16 sps:$4 sm:$0xff]   ;;  %11898 = vst [vmem:[#allocation22_spill] sm:$0xff] %v10527_v3  ;;  %v11899_v47 = vld [vmem:[#allocation26_spill] sm:$0xff] }
 0x2c0   : > { %v5864_v25 = vadd.f32 %v5736_v44, %v5608_v8  ;;  %v5143_v23 = vadd.f32 %v5142_v34, %v4598_v52  ;;  %v4603_v9 = vadd.f32 %v10303_v14, %v11899_v47  ;;  %v10535_v34 = vpop.permute.xlu0 %3076  ;;  %v5738_v3 = vld [vmem:[#allocation2 + $0x80] sm:$0xff] }
 0x2c1   : > { %v4663_v7 = vpop.f32.mrf.mxu0  ;;  %v5144_v4 = vpop.f32.mrf.mxu1  ;;  %v6122_v13 = vld [vmem:[#allocation2 + $0x60] sm:$0xff]  ;;  %11900 = vst [vmem:[#allocation26_spill] sm:$0xff] %v10535_v34 }
 0x2c2   : > { %5993 = vst.msk [vmem:[#allocation2 + $0x70] sm:$0xff] %vm389_vm0, %v5864_v25  ;;  %v5609_v44 = vmax.f32 %v5143_v23, 0.0  ;;  %v6274_v52 = vsel %vm389_vm0, %v6122_v13, 0.0  ;;  %v11901_v25 = vld [vmem:[#allocation24_spill] sm:$0xff] }
 0x2c3   : > { %v10533_v8 = vpop.f32.mrf.mxu0  ;;  %4857 = vmatmul.mubr.bf16.gmra.mxu0 %v7962_v55  ;;  %v5147_v48 = vpop.f32.mrf.mxu1  ;;  %5338 = vmatmul.mubr.bf16.gmra.mxu1 %v7965_v18  ;;  %v4606_v23 = vadd.f32 %v10309_v59, %v11901_v25 }
 0x2c4   : > { %v5865_v7 = vadd.f32 %v5737_v58, %v5609_v44  ;;  %v5148_v4 = vadd.f32 %v5147_v48, %v4603_v9  ;;  %6275 = vadd.xlane.f32.xlu1 %v6274_v52  ;;  %4864 = vmatprep.mubr.bf16.mxu0 %v7970_v5  ;;  %v7968_v5 = vld [vmem:[%s11747_s5 + $0x520] ss:$16 sps:$4 sm:$0xff]   ;;  %v5739_v9 = vld [vmem:[#allocation2 + $0x88] sm:$0xff] }
 0x2c5   : > { %v4668_v36 = vpop.f32.mrf.mxu0  ;;  %v5149_v17 = vpop.f32.mrf.mxu1  ;;  %v6123_v14 = vld [vmem:[#allocation2 + $0x68] sm:$0xff]  ;;  %5345 = vmatprep.mubr.bf16.mxu1 %v7973_v45  ;;  %v7976_v45 = vld [vmem:[%s11747_s5 + $0x544] ss:$16 sps:$4 sm:$0xff]  }
 0x2c6   : > { %5994 = vst.msk [vmem:[#allocation2 + $0x78] sm:$0xff] %vm389_vm0, %v5865_v7  ;;  %v5610_v13 = vmax.f32 %v5148_v4, 0.0  ;;  %v6277_v55 = vsel %vm389_vm0, %v6123_v14, 0.0  ;;  %v7971_v17 = vld [vmem:[%s11747_s5 + $0x428] ss:$16 sps:$4 sm:$0xff]   ;;  %v10549_v36 = vpop.permute.xlu1 %3081  ;;  %v10557_v4 = vpop.permute.xlu0 %3086  ;;  %v11904_v14 = vld [vmem:[#allocation28_spill] sm:$0xff] }
 0x2c7   : > { %v10541_v18 = vpop.f32.mrf.mxu0  ;;  %v5150_v47 = vpop.f32.mrf.mxu1  ;;  %6278 = vadd.xlane.f32.xlu0 %v6277_v55  ;;  %11902 = vst [vmem:[#allocation24_spill] sm:$0xff] %v10549_v36  ;;  %v7979_v7 = vld [vmem:[%s11747_s5 + $0x44c] ss:$16 sps:$4 sm:$0xff]   ;;  %11903 = vst [vmem:[#allocation66_spill] sm:$0xff] %v10557_v4  ;;  %v4611_v25 = vadd.f32 %v10328_v61, %v11904_v14 }
 0x2c8   : > { %v5866_v59 = vadd.f32 %v5738_v3, %v5610_v13  ;;  %v5151_v58 = vadd.f32 %v5150_v47, %v4606_v23  ;;  %v5741_v14 = vld [vmem:[#allocation2 + $0x98] sm:$0xff] }
 0x2c9   : > { %v4671_v44 = vpop.f32.mrf.mxu0  ;;  %v5152_v52 = vpop.f32.mrf.mxu1  ;;  %v6124_v48 = vld [vmem:[#allocation2 + $0x70] sm:$0xff] }
 0x2ca   : > { %5995 = vst.msk [vmem:[#allocation2 + $0x80] sm:$0xff] %vm389_vm0, %v5866_v59  ;;  %v5611_v3 = vmax.f32 %v5151_v58, 0.0  ;;  %v6280_v23 = vsel %vm389_vm0, %v6124_v48, 0.0  ;;  %v5740_v52 = vld [vmem:[#allocation2 + $0x90] sm:$0xff]  ;;  %v10565_v61 = vpop.permute.xlu1 %3091  ;;  %v11905_v59 = vld [vmem:[#allocation27_spill] sm:$0xff] }
 0x2cb   : > { %v10563_v13 = vpop.f32.mrf.mxu0  ;;  %4865 = vmatmul.mubr.bf16.gmra.mxu0 %v7968_v5  ;;  %v5155_v55 = vpop.f32.mrf.mxu1  ;;  %5346 = vmatmul.mubr.bf16.gmra.mxu1 %v7971_v17  ;;  %v4614_v58 = vadd.f32 %v10337_v24, %v11905_v59 }
 0x2cc   : > { %v5867_v47 = vadd.f32 %v5739_v9, %v5611_v3  ;;  %v5156_v44 = vadd.f32 %v5155_v55, %v4611_v25  ;;  %6281 = vadd.xlane.f32.xlu1 %v6280_v23  ;;  %4872 = vmatprep.mubr.bf16.mxu0 %v7976_v45  ;;  %v7977_v45 = vld [vmem:[%s11747_s5 + $0x448] ss:$16 sps:$4 sm:$0xff]   ;;  %v7985_v55 = vld [vmem:[%s11747_s5 + $0x46c] ss:$16 sps:$4 sm:$0xff]  }
 0x2cd   : > { %v4676_v36 = vpop.f32.mrf.mxu0  ;;  %v5157_v4 = vpop.f32.mrf.mxu1  ;;  %v6125_v34 = vld [vmem:[#allocation2 + $0x78] sm:$0xff]  ;;  %5353 = vmatprep.mubr.bf16.mxu1 %v7979_v7 }
 0x2ce   : > { %5996 = vst.msk [vmem:[#allocation2 + $0x88] sm:$0xff] %vm389_vm0, %v5867_v47  ;;  %v5612_v48 = vmax.f32 %v5156_v44, 0.0  ;;  %v6283_v5 = vsel %vm389_vm0, %v6125_v34, 0.0  ;;  %v7974_v36 = vld [vmem:[%s11747_s5 + $0x540] ss:$16 sps:$4 sm:$0xff]   ;;  %v10579_v7 = vpop.permute.xlu0 %3096  ;;  %v4619_v47 = vadd.f32 %v10357_v46, %v9497_v22 }
 0x2cf   : > { %v10571_v17 = vpop.f32.mrf.mxu0  ;;  %v5158_v9 = vpop.f32.mrf.mxu1  ;;  %6284 = vadd.xlane.f32.xlu0 %v6283_v5  ;;  %11906 = vst [vmem:[#allocation28_spill] sm:$0xff] %v10579_v7  ;;  %v7982_v34 = vld [vmem:[%s11747_s5 + $0x564] ss:$16 sps:$4 sm:$0xff]  }
 0x2d0   : > { %v5868_v24 = vadd.f32 %v5740_v52, %v5612_v48  ;;  %v5159_v4 = vadd.f32 %v5158_v9, %v4614_v58  ;;  %v10593_v48 = vpop.permute.xlu1 %3101 }
 0x2d1   : > { %v4679_v25 = vpop.f32.mrf.mxu0  ;;  %v5160_v3 = vpop.f32.mrf.mxu1  ;;  %v6126_v23 = vld [vmem:[#allocation2 + $0x80] sm:$0xff] }
 0x2d2   : > { %5997 = vst.msk [vmem:[#allocation2 + $0x90] sm:$0xff] %vm389_vm0, %v5868_v24  ;;  %v5613_v44 = vmax.f32 %v5159_v4, 0.0  ;;  %v6286_v52 = vsel %vm389_vm0, %v6126_v23, 0.0  ;;  %v5742_v25 = vld [vmem:[#allocation2 + $0xa0] sm:$0xff]  ;;  %v10595_v46 = vpop.permute.xlu0 %3106  ;;  %v4622_v24 = vadd.f32 %v10365_v50, %v9495_v15  ;;  %v5743_v50 = vld [vmem:[#allocation2 + $0xa8] sm:$0xff] }
 0x2d3   : > { %v10591_v59 = vpop.f32.mrf.mxu0  ;;  %4873 = vmatmul.mubr.bf16.gmra.mxu0 %v7974_v36  ;;  %v5163_v58 = vpop.f32.mrf.mxu1  ;;  %5354 = vmatmul.mubr.bf16.gmra.mxu1 %v7977_v45  ;;  %v7988_v15 = vld [vmem:[%s11747_s5 + $0x584] ss:$16 sps:$4 sm:$0xff]  }
 0x2d4   : > { %v5869_v5 = vadd.f32 %v5741_v14, %v5613_v44  ;;  %v5164_v9 = vadd.f32 %v5163_v58, %v4619_v47  ;;  %6287 = vadd.xlane.f32.xlu1 %v6286_v52  ;;  %4880 = vmatprep.mubr.bf16.mxu0 %v7982_v34  ;;  %v7983_v34 = vld [vmem:[%s11747_s5 + $0x468] ss:$16 sps:$4 sm:$0xff]   ;;  %v7991_v58 = vld [vmem:[%s11747_s5 + $0x48c] ss:$16 sps:$4 sm:$0xff]  }
 0x2d5   : > { %v4684_v3 = vpop.f32.mrf.mxu0  ;;  %v5165_v7 = vpop.f32.mrf.mxu1  ;;  %v6127_v22 = vld [vmem:[#allocation2 + $0x88] sm:$0xff]  ;;  %5361 = vmatprep.mubr.bf16.mxu1 %v7985_v55 }
 0x2d6   : > { %5998 = vst.msk [vmem:[#allocation2 + $0x98] sm:$0xff] %vm389_vm0, %v5869_v5  ;;  %v5614_v36 = vmax.f32 %v5164_v9, 0.0  ;;  %v6289_v45 = vsel %vm389_vm0, %v6127_v22, 0.0  ;;  %v7980_v7 = vld [vmem:[%s11747_s5 + $0x560] ss:$16 sps:$4 sm:$0xff]   ;;  %v10615_v5 = vpop.permute.xlu1 %3111  ;;  %v4627_v9 = vadd.f32 %v10387_v42, %v9522_v63  ;;  %v4630_v42 = vadd.f32 %v10395_v38, %v9520_v62 }
 0x2d7   : > { %v10601_v4 = vpop.f32.mrf.mxu0  ;;  %v5166_v14 = vpop.f32.mrf.mxu1  ;;  %6290 = vadd.xlane.f32.xlu0 %v6289_v45  ;;  %11907 = vst [vmem:[#allocation27_spill] sm:$0xff] %v10615_v5 }
 0x2d8   : > { %v5870_v23 = vadd.f32 %v5742_v25, %v5614_v36  ;;  %v5167_v55 = vadd.f32 %v5166_v14, %v4622_v24  ;;  %v10623_v36 = vpop.permute.xlu0 %3116 }
 0x2d9   : > { %v4687_v47 = vpop.f32.mrf.mxu0  ;;  %v5168_v44 = vpop.f32.mrf.mxu1  ;;  %v6128_v52 = vld [vmem:[#allocation2 + $0x90] sm:$0xff] }
 0x2da   : > { %5999 = vst.msk [vmem:[#allocation2 + $0xa0] sm:$0xff] %vm389_vm0, %v5870_v23  ;;  %v5615_v25 = vmax.f32 %v5167_v55, 0.0  ;;  %v6292_v3 = vsel %vm389_vm0, %v6128_v52, 0.0  ;;  %v5744_v47 = vld [vmem:[#allocation2 + $0xb0] sm:$0xff]  ;;  %v10637_v52 = vpop.permute.xlu1 %3121 }
 0x2db   : > { %v10621_v22 = vpop.f32.mrf.mxu0  ;;  %4881 = vmatmul.mubr.bf16.gmra.mxu0 %v7980_v7  ;;  %v5171_v24 = vpop.f32.mrf.mxu1  ;;  %5362 = vmatmul.mubr.bf16.gmra.mxu1 %v7983_v34 }
 0x2dc   : > { %v5871_v45 = vadd.f32 %v5743_v50, %v5615_v25  ;;  %v5172_v14 = vadd.f32 %v5171_v24, %v4627_v9  ;;  %6293 = vadd.xlane.f32.xlu1 %v6292_v3  ;;  %4888 = vmatprep.mubr.bf16.mxu0 %v7988_v15  ;;  %v7986_v15 = vld [vmem:[%s11747_s5 + $0x580] ss:$16 sps:$4 sm:$0xff]   ;;  %v7989_v50 = vld [vmem:[%s11747_s5 + $0x488] ss:$16 sps:$4 sm:$0xff]   ;;  %v7997_v24 = vld [vmem:[%s11747_s5 + $0x4ac] ss:$16 sps:$4 sm:$0xff]  }
 0x2dd   : > { %v4692_v44 = vpop.f32.mrf.mxu0  ;;  %v5173_v5 = vpop.f32.mrf.mxu1  ;;  %v6129_v63 = vld [vmem:[#allocation2 + $0x98] sm:$0xff]  ;;  %5369 = vmatprep.mubr.bf16.mxu1 %v7991_v58  ;;  %v7994_v58 = vld [vmem:[%s11747_s5 + $0x5a4] ss:$16 sps:$4 sm:$0xff]  }
 0x2de   : > { %6000 = vst.msk [vmem:[#allocation2 + $0xa8] sm:$0xff] %vm389_vm0, %v5871_v45  ;;  %v5616_v23 = vmax.f32 %v5172_v14, 0.0  ;;  %v6295_v7 = vsel %vm389_vm0, %v6129_v63, 0.0  ;;  %v5745_v5 = vld [vmem:[#allocation2 + $0xb8] sm:$0xff]  ;;  %v10645_v45 = vpop.permute.xlu0 %3126  ;;  %v4635_v14 = vadd.f32 %v10415_v51, %v9548_v35  ;;  %v10653_v35 = vpop.permute.xlu1 %3131  ;;  %v4638_v51 = vadd.f32 %v10425_v57, %v9546_v37 }
 0x2df   : > { %v10629_v34 = vpop.f32.mrf.mxu0  ;;  %v5174_v55 = vpop.f32.mrf.mxu1  ;;  %6296 = vadd.xlane.f32.xlu0 %v6295_v7  ;;  %11908 = vst [vmem:[#allocation67_spill] sm:$0xff] %v10645_v45 }
 0x2e0   : > { %v5872_v62 = vadd.f32 %v5744_v47, %v5616_v23  ;;  %v5175_v38 = vadd.f32 %v5174_v55, %v4630_v42  ;;  %v5746_v55 = vld [vmem:[#allocation2 + $0xc0] sm:$0xff] }
 0x2e1   : > { %v4695_v9 = vpop.f32.mrf.mxu0  ;;  %v5176_v25 = vpop.f32.mrf.mxu1  ;;  %v6130_v3 = vld [vmem:[#allocation2 + $0xa0] sm:$0xff] }
 0x2e2   : > { %6001 = vst.msk [vmem:[#allocation2 + $0xb0] sm:$0xff] %vm389_vm0, %v5872_v62  ;;  %v5617_v47 = vmax.f32 %v5175_v38, 0.0  ;;  %v6298_v44 = vsel %vm389_vm0, %v6130_v3, 0.0  ;;  %v10667_v3 = vpop.permute.xlu0 %3136 }
 0x2e3   : > { %v10651_v63 = vpop.f32.mrf.mxu0  ;;  %4889 = vmatmul.mubr.bf16.gmra.mxu0 %v7986_v15  ;;  %v5179_v42 = vpop.f32.mrf.mxu1  ;;  %5370 = vmatmul.mubr.bf16.gmra.mxu1 %v7989_v50 }
 0x2e4   : > { %v5873_v23 = vadd.f32 %v5745_v5, %v5617_v47  ;;  %v5180_v7 = vadd.f32 %v5179_v42, %v4635_v14  ;;  %6299 = vadd.xlane.f32.xlu1 %v6298_v44  ;;  %4896 = vmatprep.mubr.bf16.mxu0 %v7994_v58  ;;  %v7992_v58 = vld [vmem:[%s11747_s5 + $0x5a0] ss:$16 sps:$4 sm:$0xff]   ;;  %v7995_v5 = vld [vmem:[%s11747_s5 + $0x4a8] ss:$16 sps:$4 sm:$0xff]   ;;  %v8003_v42 = vld [vmem:[%s11747_s5 + $0x4cc] ss:$16 sps:$4 sm:$0xff]  }
 0x2e5   : > { %v4700_v9 = vpop.f32.mrf.mxu0  ;;  %v5181_v25 = vpop.f32.mrf.mxu1  ;;  %v6131_v45 = vld [vmem:[#allocation2 + $0xa8] sm:$0xff]  ;;  %5377 = vmatprep.mubr.bf16.mxu1 %v7997_v24  ;;  %v8000_v24 = vld [vmem:[%s11747_s5 + $0x5c4] ss:$16 sps:$4 sm:$0xff]  }
 0x2e6   : > { %6002 = vst.msk [vmem:[#allocation2 + $0xb8] sm:$0xff] %vm389_vm0, %v5873_v23  ;;  %v5618_v62 = vmax.f32 %v5180_v7, 0.0  ;;  %v6301_v15 = vsel %vm389_vm0, %v6131_v45, 0.0  ;;  %v5747_v45 = vld [vmem:[#allocation2 + $0xc8] sm:$0xff]  ;;  %v4643_v23 = vadd.f32 %v10445_v33, %v9581_v0  ;;  %v10683_v33 = vpop.permute.xlu0 %3146 }
 0x2e7   : > { %v10659_v50 = vpop.f32.mrf.mxu0  ;;  %v5182_v38 = vpop.f32.mrf.mxu1  ;;  %6302 = vadd.xlane.f32.xlu0 %v6301_v15 }
 0x2e8   : > { %v5874_v37 = vadd.f32 %v5746_v55, %v5618_v62  ;;  %v5183_v57 = vadd.f32 %v5182_v38, %v4638_v51  ;;  %v10681_v51 = vpop.permute.xlu1 %3141  ;;  %v5748_v38 = vld [vmem:[#allocation2 + $0xd0] sm:$0xff] }
 0x2e9   : > { %v4703_v14 = vpop.f32.mrf.mxu0  ;;  %v5184_v47 = vpop.f32.mrf.mxu1  ;;  %v6132_v44 = vld [vmem:[#allocation2 + $0xb0] sm:$0xff] }
 0x2ea   : > { %6003 = vst.msk [vmem:[#allocation2 + $0xc0] sm:$0xff] %vm389_vm0, %v5874_v37  ;;  %v5619_v7 = vmax.f32 %v5183_v57, 0.0  ;;  %v6304_v55 = vsel %vm389_vm0, %v6132_v44, 0.0  ;;  %v4646_v37 = vadd.f32 %v10453_v6, %v9579_v31  ;;  %v8001_v44 = vld [vmem:[%s11747_s5 + $0x4c8] ss:$16 sps:$4 sm:$0xff]  }
 0x2eb   : > { %v10679_v9 = vpop.f32.mrf.mxu0  ;;  %4897 = vmatmul.mubr.bf16.gmra.mxu0 %v7992_v58  ;;  %v5187_v25 = vpop.f32.mrf.mxu1  ;;  %5378 = vmatmul.mubr.bf16.gmra.mxu1 %v7995_v5  ;;  %v8006_v31 = vld [vmem:[%s11747_s5 + $0x5e4] ss:$16 sps:$4 sm:$0xff]   ;;  %v5749_v6 = vld [vmem:[#allocation2 + $0xd8] sm:$0xff] }
 0x2ec   : > { %v5875_v62 = vadd.f32 %v5747_v45, %v5619_v7  ;;  %v5188_v15 = vadd.f32 %v5187_v25, %v4643_v23  ;;  %6305 = vadd.xlane.f32.xlu1 %v6304_v55  ;;  %4904 = vmatprep.mubr.bf16.mxu0 %v8000_v24  ;;  %v7998_v24 = vld [vmem:[%s11747_s5 + $0x5c0] ss:$16 sps:$4 sm:$0xff]  }
 0x2ed   : > { %v4708_v14 = vpop.f32.mrf.mxu0  ;;  %v5189_v47 = vpop.f32.mrf.mxu1  ;;  %v6133_v0 = vld [vmem:[#allocation2 + $0xb8] sm:$0xff]  ;;  %5385 = vmatprep.mubr.bf16.mxu1 %v8003_v42 }
 0x2ee   : > { %6004 = vst.msk [vmem:[#allocation2 + $0xc8] sm:$0xff] %vm389_vm0, %v5875_v62  ;;  %v5620_v58 = vmax.f32 %v5188_v15, 0.0  ;;  %v6307_v5 = vsel %vm389_vm0, %v6133_v0, 0.0  ;;  %v8009_v62 = vld [vmem:[%s11747_s5 + $0x4ec] ss:$16 sps:$4 sm:$0xff]   ;;  %v10703_v15 = vpop.permute.xlu1 %3151  ;;  %v4651_v14 = vadd.f32 %v10475_v43, %v9603_v21  ;;  %v4654_v43 = vadd.f32 %v10483_v29, %v9601_v49 }
 0x2ef   : > { %v10689_v57 = vpop.f32.mrf.mxu0  ;;  %v5190_v45 = vpop.f32.mrf.mxu1  ;;  %6308 = vadd.xlane.f32.xlu0 %v6307_v5  ;;  %11909 = vst [vmem:[#allocation68_spill] sm:$0xff] %v10703_v15 }
 0x2f0   : > { %v5876_v42 = vadd.f32 %v5748_v38, %v5620_v58  ;;  %v5191_v23 = vadd.f32 %v5190_v45, %v4646_v37  ;;  %v10711_v58 = vpop.permute.xlu0 %3156 }
 0x2f1   : > { %v4711_v7 = vpop.f32.mrf.mxu0  ;;  %v5192_v55 = vpop.f32.mrf.mxu1  ;;  %v6134_v25 = vld [vmem:[#allocation2 + $0xc0] sm:$0xff] }
 0x2f2   : > { %6005 = vst.msk [vmem:[#allocation2 + $0xd0] sm:$0xff] %vm389_vm0, %v5876_v42  ;;  %v5621_v38 = vmax.f32 %v5191_v23, 0.0  ;;  %v6310_v47 = vsel %vm389_vm0, %v6134_v25, 0.0  ;;  %v5750_v7 = vld [vmem:[#allocation2 + $0xe0] sm:$0xff]  ;;  %v10725_v25 = vpop.permute.xlu1 %3161 }
 0x2f3   : > { %v10709_v0 = vpop.f32.mrf.mxu0  ;;  %4905 = vmatmul.mubr.bf16.gmra.mxu0 %v7998_v24  ;;  %v5195_v37 = vpop.f32.mrf.mxu1  ;;  %5386 = vmatmul.mubr.bf16.gmra.mxu1 %v8001_v44 }
 0x2f4   : > { %v5877_v5 = vadd.f32 %v5749_v6, %v5621_v38  ;;  %v5196_v45 = vadd.f32 %v5195_v37, %v4651_v14  ;;  %6311 = vadd.xlane.f32.xlu1 %v6310_v47  ;;  %4912 = vmatprep.mubr.bf16.mxu0 %v8006_v31  ;;  %v8004_v31 = vld [vmem:[%s11747_s5 + $0x5e0] ss:$16 sps:$4 sm:$0xff]   ;;  %v8007_v6 = vld [vmem:[%s11747_s5 + $0x4e8] ss:$16 sps:$4 sm:$0xff]   ;;  %v8015_v37 = vld [vmem:[%s11747_s5 + $0x50c] ss:$16 sps:$4 sm:$0xff]  }
 0x2f5   : > { %v4716_v55 = vpop.f32.mrf.mxu0  ;;  %v5197_v15 = vpop.f32.mrf.mxu1  ;;  %v6135_v21 = vld [vmem:[#allocation2 + $0xc8] sm:$0xff]  ;;  %5393 = vmatprep.mubr.bf16.mxu1 %v8009_v62  ;;  %v8012_v62 = vld [vmem:[%s11747_s5 + $0x604] ss:$16 sps:$4 sm:$0xff]  }
 0x2f6   : > { %6006 = vst.msk [vmem:[#allocation2 + $0xd8] sm:$0xff] %vm389_vm0, %v5877_v5  ;;  %v5622_v42 = vmax.f32 %v5196_v45, 0.0  ;;  %v6313_v24 = vsel %vm389_vm0, %v6135_v21, 0.0  ;;  %v5751_v15 = vld [vmem:[#allocation2 + $0xe8] sm:$0xff]  ;;  %v10733_v5 = vpop.permute.xlu0 %3166  ;;  %v4659_v45 = vadd.f32 %v10503_v1, %v9697_v40  ;;  %v10741_v40 = vpop.permute.xlu1 %3171  ;;  %v4662_v1 = vadd.f32 %v10513_v28, %v9705_v39 }
 0x2f7   : > { %v10717_v44 = vpop.f32.mrf.mxu0  ;;  %v5198_v23 = vpop.f32.mrf.mxu1  ;;  %6314 = vadd.xlane.f32.xlu0 %v6313_v24  ;;  %11910 = vst [vmem:[#allocation69_spill] sm:$0xff] %v10733_v5 }
 0x2f8   : > { %v5878_v49 = vadd.f32 %v5750_v7, %v5622_v42  ;;  %v5199_v29 = vadd.f32 %v5198_v23, %v4654_v43  ;;  %v5752_v23 = vld [vmem:[#allocation2 + $0xf0] sm:$0xff] }
 0x2f9   : > { %v4719_v14 = vpop.f32.mrf.mxu0  ;;  %v5200_v38 = vpop.f32.mrf.mxu1  ;;  %v6136_v47 = vld [vmem:[#allocation2 + $0xd0] sm:$0xff] }
 0x2fa   : > { %6007 = vst.msk [vmem:[#allocation2 + $0xe0] sm:$0xff] %vm389_vm0, %v5878_v49  ;;  %v5623_v7 = vmax.f32 %v5199_v29, 0.0  ;;  %v6316_v55 = vsel %vm389_vm0, %v6136_v47, 0.0  ;;  %v10755_v47 = vpop.permute.xlu0 %3176 }
 0x2fb   : > { %v10739_v21 = vpop.f32.mrf.mxu0  ;;  %4913 = vmatmul.mubr.bf16.gmra.mxu0 %v8004_v31  ;;  %v5203_v43 = vpop.f32.mrf.mxu1  ;;  %5394 = vmatmul.mubr.bf16.gmra.mxu1 %v8007_v6 }
 0x2fc   : > { %v5879_v42 = vadd.f32 %v5751_v15, %v5623_v7  ;;  %v5204_v24 = vadd.f32 %v5203_v43, %v4659_v45  ;;  %6317 = vadd.xlane.f32.xlu1 %v6316_v55  ;;  %4920 = vmatprep.mubr.bf16.mxu0 %v8012_v62  ;;  %v8010_v62 = vld [vmem:[%s11747_s5 + $0x600] ss:$16 sps:$4 sm:$0xff]   ;;  %v8013_v15 = vld [vmem:[%s11747_s5 + $0x508] ss:$16 sps:$4 sm:$0xff]   ;;  %v8021_v43 = vld [vmem:[%s11747_s5 + $0x52c] ss:$16 sps:$4 sm:$0xff]  }
 0x2fd   : > { %v4724_v14 = vpop.f32.mrf.mxu0  ;;  %v5205_v38 = vpop.f32.mrf.mxu1  ;;  %v6137_v5 = vld [vmem:[#allocation2 + $0xd8] sm:$0xff]  ;;  %5401 = vmatprep.mubr.bf16.mxu1 %v8015_v37  ;;  %v8018_v37 = vld [vmem:[%s11747_s5 + $0x624] ss:$16 sps:$4 sm:$0xff]  }
 0x2fe   : > { %6008 = vst.msk [vmem:[#allocation2 + $0xe8] sm:$0xff] %vm389_vm0, %v5879_v42  ;;  %v5624_v49 = vmax.f32 %v5204_v24, 0.0  ;;  %v6319_v31 = vsel %vm389_vm0, %v6137_v5, 0.0  ;;  %v5753_v5 = vld [vmem:[#allocation2 + $0xf8] sm:$0xff]  ;;  %v4667_v42 = vadd.f32 %v10533_v8, %v9707_v20  ;;  %v10771_v8 = vpop.permute.xlu0 %3186 }
 0x2ff   : > { %v10747_v6 = vpop.f32.mrf.mxu0  ;;  %v5206_v29 = vpop.f32.mrf.mxu1  ;;  %6320 = vadd.xlane.f32.xlu0 %v6319_v31 }
 0x300   : > { %v5880_v39 = vadd.f32 %v5752_v23, %v5624_v49  ;;  %v5207_v28 = vadd.f32 %v5206_v29, %v4662_v1  ;;  %v10769_v1 = vpop.permute.xlu1 %3181  ;;  %v5754_v29 = vld [vmem:[#allocation2 + $0x100] sm:$0xff] }
 0x301   : > { %v4727_v45 = vpop.f32.mrf.mxu0  ;;  %v5208_v7 = vpop.f32.mrf.mxu1  ;;  %v6138_v55 = vld [vmem:[#allocation2 + $0xe0] sm:$0xff] }
 0x302   : > { %6009 = vst.msk [vmem:[#allocation2 + $0xf0] sm:$0xff] %vm389_vm0, %v5880_v39  ;;  %v5625_v24 = vmax.f32 %v5207_v28, 0.0  ;;  %v6322_v23 = vsel %vm389_vm0, %v6138_v55, 0.0  ;;  %v4670_v39 = vadd.f32 %v10541_v18, %v9985_v56  ;;  %v8019_v55 = vld [vmem:[%s11747_s5 + $0x528] ss:$16 sps:$4 sm:$0xff]  }
 0x303   : > { %v10767_v14 = vpop.f32.mrf.mxu0  ;;  %4921 = vmatmul.mubr.bf16.gmra.mxu0 %v8010_v62  ;;  %v5211_v38 = vpop.f32.mrf.mxu1  ;;  %5402 = vmatmul.mubr.bf16.gmra.mxu1 %v8013_v15  ;;  %v8024_v56 = vld [vmem:[%s11747_s5 + $0x644] ss:$16 sps:$4 sm:$0xff]   ;;  %v5755_v18 = vld [vmem:[#allocation2 + $0x108] sm:$0xff] }
 0x304   : > { %v5881_v49 = vadd.f32 %v5753_v5, %v5625_v24  ;;  %v5212_v31 = vadd.f32 %v5211_v38, %v4667_v42  ;;  %6323 = vadd.xlane.f32.xlu1 %v6322_v23  ;;  %4928 = vmatprep.mubr.bf16.mxu0 %v8018_v37  ;;  %v8016_v37 = vld [vmem:[%s11747_s5 + $0x620] ss:$16 sps:$4 sm:$0xff]  }
 0x305   : > { %v4732_v45 = vpop.f32.mrf.mxu0  ;;  %v5213_v7 = vpop.f32.mrf.mxu1  ;;  %v6139_v20 = vld [vmem:[#allocation2 + $0xe8] sm:$0xff]  ;;  %5409 = vmatprep.mubr.bf16.mxu1 %v8021_v43 }
 0x306   : > { %6010 = vst.msk [vmem:[#allocation2 + $0xf8] sm:$0xff] %vm389_vm0, %v5881_v49  ;;  %v5626_v62 = vmax.f32 %v5212_v31, 0.0  ;;  %v6325_v15 = vsel %vm389_vm0, %v6139_v20, 0.0  ;;  %v8027_v49 = vld [vmem:[%s11747_s5 + $0x54c] ss:$16 sps:$4 sm:$0xff]   ;;  %v10791_v31 = vpop.permute.xlu1 %3191  ;;  %v4675_v45 = vadd.f32 %v10563_v13, %v9989_v19  ;;  %v4678_v13 = vadd.f32 %v10571_v17, %v9999_v32 }
 0x307   : > { %v10777_v28 = vpop.f32.mrf.mxu0  ;;  %v5214_v5 = vpop.f32.mrf.mxu1  ;;  %6326 = vadd.xlane.f32.xlu0 %v6325_v15  ;;  %11911 = vst [vmem:[#allocation70_spill] sm:$0xff] %v10791_v31 }
 0x308   : > { %v5882_v43 = vadd.f32 %v5754_v29, %v5626_v62  ;;  %v5215_v42 = vadd.f32 %v5214_v5, %v4670_v39  ;;  %v10799_v62 = vpop.permute.xlu0 %3196 }
 0x309   : > { %v4735_v24 = vpop.f32.mrf.mxu0  ;;  %v5216_v23 = vpop.f32.mrf.mxu1  ;;  %v6140_v38 = vld [vmem:[#allocation2 + $0xf0] sm:$0xff] }
 0x30a   : > { %6011 = vst.msk [vmem:[#allocation2 + $0x100] sm:$0xff] %vm389_vm0, %v5882_v43  ;;  %v5627_v29 = vmax.f32 %v5215_v42, 0.0  ;;  %v6328_v7 = vsel %vm389_vm0, %v6140_v38, 0.0  ;;  %v5756_v24 = vld [vmem:[#allocation2 + $0x110] sm:$0xff]  ;;  %v10813_v38 = vpop.permute.xlu1 %3201 }
 0x30b   : > { %v10797_v20 = vpop.f32.mrf.mxu0  ;;  %4929 = vmatmul.mubr.bf16.gmra.mxu0 %v8016_v37  ;;  %v5219_v39 = vpop.f32.mrf.mxu1  ;;  %5410 = vmatmul.mubr.bf16.gmra.mxu1 %v8019_v55 }
 0x30c   : > { %v5883_v15 = vadd.f32 %v5755_v18, %v5627_v29  ;;  %v5220_v5 = vadd.f32 %v5219_v39, %v4675_v45  ;;  %6329 = vadd.xlane.f32.xlu1 %v6328_v7  ;;  %4936 = vmatprep.mubr.bf16.mxu0 %v8024_v56  ;;  %v8022_v56 = vld [vmem:[%s11747_s5 + $0x640] ss:$16 sps:$4 sm:$0xff]   ;;  %v8025_v18 = vld [vmem:[%s11747_s5 + $0x548] ss:$16 sps:$4 sm:$0xff]   ;;  %v8033_v39 = vld [vmem:[%s11747_s5 + $0x56c] ss:$16 sps:$4 sm:$0xff]  }
 0x30d   : > { %v4740_v23 = vpop.f32.mrf.mxu0  ;;  %v5221_v31 = vpop.f32.mrf.mxu1  ;;  %v6141_v19 = vld [vmem:[#allocation2 + $0xf8] sm:$0xff]  ;;  %5417 = vmatprep.mubr.bf16.mxu1 %v8027_v49  ;;  %v8030_v49 = vld [vmem:[%s11747_s5 + $0x664] ss:$16 sps:$4 sm:$0xff]  }
 0x30e   : > { %6012 = vst.msk [vmem:[#allocation2 + $0x108] sm:$0xff] %vm389_vm0, %v5883_v15  ;;  %v5628_v43 = vmax.f32 %v5220_v5, 0.0  ;;  %v6331_v37 = vsel %vm389_vm0, %v6141_v19, 0.0  ;;  %v5757_v31 = vld [vmem:[#allocation2 + $0x118] sm:$0xff]  ;;  %v10821_v15 = vpop.permute.xlu0 %3206  ;;  %v4683_v5 = vadd.f32 %v10591_v59, %v10007_v54  ;;  %v10829_v54 = vpop.permute.xlu1 %3211  ;;  %v4686_v59 = vadd.f32 %v10601_v4, %v10009_v27 }
 0x30f   : > { %v10805_v55 = vpop.f32.mrf.mxu0  ;;  %v5222_v42 = vpop.f32.mrf.mxu1  ;;  %6332 = vadd.xlane.f32.xlu0 %v6331_v37  ;;  %11912 = vst [vmem:[#allocation71_spill] sm:$0xff] %v10821_v15 }
 0x310   : > { %v5884_v32 = vadd.f32 %v5756_v24, %v5628_v43  ;;  %v5223_v17 = vadd.f32 %v5222_v42, %v4678_v13  ;;  %v5758_v42 = vld [vmem:[#allocation2 + $0x120] sm:$0xff] }
 0x311   : > { %v4743_v45 = vpop.f32.mrf.mxu0  ;;  %v5224_v29 = vpop.f32.mrf.mxu1  ;;  %v6142_v7 = vld [vmem:[#allocation2 + $0x100] sm:$0xff] }
 0x312   : > { %6013 = vst.msk [vmem:[#allocation2 + $0x110] sm:$0xff] %vm389_vm0, %v5884_v32  ;;  %v5629_v24 = vmax.f32 %v5223_v17, 0.0  ;;  %v6334_v23 = vsel %vm389_vm0, %v6142_v7, 0.0  ;;  %v10844_v27 = vpop.permute.xlu0 %3216 }
 0x313   : > { %v10827_v19 = vpop.f32.mrf.mxu0  ;;  %4937 = vmatmul.mubr.bf16.gmra.mxu0 %v8022_v56  ;;  %v5227_v13 = vpop.f32.mrf.mxu1  ;;  %5418 = vmatmul.mubr.bf16.gmra.mxu1 %v8025_v18 }
 0x314   : > { %v5885_v43 = vadd.f32 %v5757_v31, %v5629_v24  ;;  %v5228_v37 = vadd.f32 %v5227_v13, %v4683_v5  ;;  %6335 = vadd.xlane.f32.xlu1 %v6334_v23  ;;  %4944 = vmatprep.mubr.bf16.mxu0 %v8030_v49  ;;  %v8028_v49 = vld [vmem:[%s11747_s5 + $0x660] ss:$16 sps:$4 sm:$0xff]   ;;  %v8031_v31 = vld [vmem:[%s11747_s5 + $0x568] ss:$16 sps:$4 sm:$0xff]   ;;  %v8039_v13 = vld [vmem:[%s11747_s5 + $0x58c] ss:$16 sps:$4 sm:$0xff]  }
 0x315   : > { %v4748_v45 = vpop.f32.mrf.mxu0  ;;  %v5229_v29 = vpop.f32.mrf.mxu1  ;;  %v6143_v15 = vld [vmem:[#allocation2 + $0x108] sm:$0xff]  ;;  %5425 = vmatprep.mubr.bf16.mxu1 %v8033_v39  ;;  %v8036_v39 = vld [vmem:[%s11747_s5 + $0x684] ss:$16 sps:$4 sm:$0xff]  }
 0x316   : > { %6014 = vst.msk [vmem:[#allocation2 + $0x118] sm:$0xff] %vm389_vm0, %v5885_v43  ;;  %v5630_v56 = vmax.f32 %v5228_v37, 0.0  ;;  %v6337_v18 = vsel %vm389_vm0, %v6143_v15, 0.0  ;;  %v5759_v15 = vld [vmem:[#allocation2 + $0x128] sm:$0xff]  ;;  %v4691_v43 = vadd.f32 %v10621_v22, %v10017_v12 }
 0x317   : > { %v10835_v32 = vpop.f32.mrf.mxu0  ;;  %v5230_v17 = vpop.f32.mrf.mxu1  ;;  %6338 = vadd.xlane.f32.xlu0 %v6337_v18 }
 0x318   : > { %v5886_v4 = vadd.f32 %v5758_v42, %v5630_v56  ;;  %v5231_v7 = vadd.f32 %v5230_v17, %v4686_v59  ;;  %v10860_v59 = vpop.permute.xlu1 %3221  ;;  %v5760_v17 = vld [vmem:[#allocation2 + $0x130] sm:$0xff] }
 0x319   : > { %v4751_v5 = vpop.f32.mrf.mxu0  ;;  %v5232_v24 = vpop.f32.mrf.mxu1  ;;  %v6144_v23 = vld [vmem:[#allocation2 + $0x110] sm:$0xff] }
 0x31a   : > { %6015 = vst.msk [vmem:[#allocation2 + $0x120] sm:$0xff] %vm389_vm0, %v5886_v4  ;;  %v5631_v37 = vmax.f32 %v5231_v7, 0.0  ;;  %v6340_v42 = vsel %vm389_vm0, %v6144_v23, 0.0 }
 0x31b   : > { %v10858_v45 = vpop.f32.mrf.mxu0  ;;  %4945 = vmatmul.mubr.bf16.gmra.mxu0 %v8028_v49  ;;  %v5235_v29 = vpop.f32.mrf.mxu1  ;;  %5426 = vmatmul.mubr.bf16.gmra.mxu1 %v8031_v31  ;;  %v4694_v31 = vadd.f32 %v10629_v34, %v10025_v60  ;;  %v8042_v60 = vld [vmem:[%s11747_s5 + $0x6a4] ss:$16 sps:$4 sm:$0xff]  }
 0x31c   : > { %v5887_v56 = vadd.f32 %v5759_v15, %v5631_v37  ;;  %v5236_v18 = vadd.f32 %v5235_v29, %v4691_v43  ;;  %6341 = vadd.xlane.f32.xlu1 %v6340_v42  ;;  %4952 = vmatprep.mubr.bf16.mxu0 %v8036_v39  ;;  %v8034_v39 = vld [vmem:[%s11747_s5 + $0x680] ss:$16 sps:$4 sm:$0xff]   ;;  %v8037_v15 = vld [vmem:[%s11747_s5 + $0x588] ss:$16 sps:$4 sm:$0xff]  }
 0x31d   : > { %v6240_v12 = vpop.xlane.xlu0 %6239  ;;  %v4756_v22 = vpop.f32.mrf.mxu0  ;;  %v6145_v4 = vld [vmem:[#allocation2 + $0x118] sm:$0xff]  ;;  %5433 = vmatprep.mubr.bf16.mxu1 %v8039_v13 }
 0x31e   : > { %6016 = vst.msk [vmem:[#allocation2 + $0x128] sm:$0xff] %vm389_vm0, %v5887_v56  ;;  %v5632_v7 = vmax.f32 %v5236_v18, 0.0  ;;  %v6622_v5 = vmul.f32 0.0625, %v6240_v12  ;;  %v5237_v24 = vpop.f32.mrf.mxu1  ;;  %v6343_v49 = vsel %vm389_vm0, %v6145_v4, 0.0  ;;  %v8045_v18 = vld [vmem:[%s11747_s5 + $0x5ac] ss:$16 sps:$4 sm:$0xff]   ;;  %v4699_v4 = vadd.f32 %v10651_v63, %v10027_v53 }
 0x31f   : > { %v10866_v23 = vpop.f32.mrf.mxu0  ;;  %6344 = vadd.xlane.f32.xlu0 %v6343_v49  ;;  %v4702_v63 = vadd.f32 %v10659_v50, %v10041_v41  ;;  %v8048_v41 = vld [vmem:[%s11747_s5 + $0x6c4] ss:$16 sps:$4 sm:$0xff]  }
 0x320   : > { %v5888_v13 = vadd.f32 %v5760_v17, %v5632_v7  ;;  %6750 = vst [vmem:[%s10874_s12] sm:$0xff] %v6622_v5  ;;  %v5238_v43 = vpop.f32.mrf.mxu1  ;;  %v6243_v37 = vpop.xlane.xlu1 %6242  ;;  %v5761_v17 = vld [vmem:[#allocation2 + $0x138] sm:$0xff] }
 0x321   : > { %v5239_v34 = vadd.f32 %v5238_v43, %v4694_v31  ;;  %v6623_v42 = vmul.f32 0.0625, %v6243_v37  ;;  %v4759_v29 = vpop.f32.mrf.mxu0  ;;  %v6146_v56 = vld [vmem:[#allocation2 + $0x120] sm:$0xff] }
 0x322   : > { %6017 = vst.msk [vmem:[#allocation2 + $0x130] sm:$0xff] %vm389_vm0, %v5888_v13  ;;  %v5240_v12 = vpop.f32.mrf.mxu1  ;;  %v6346_v22 = vsel %vm389_vm0, %v6146_v56, 0.0  ;;  %v5762_v29 = vld [vmem:[#allocation2 + $0x140] sm:$0xff] }
 0x323   : > { %v5633_v7 = vmax.f32 %v5239_v34, 0.0  ;;  %6751 = vst [vmem:[%s10874_s12 + $0x8] sm:$0xff] %v6623_v42  ;;  %v10888_v5 = vpop.f32.mrf.mxu0  ;;  %4953 = vmatmul.mubr.bf16.gmra.mxu0 %v8034_v39  ;;  %5434 = vmatmul.mubr.bf16.gmra.mxu1 %v8037_v15  ;;  %v8043_v34 = vld [vmem:[%s11747_s5 + $0x5a8] ss:$16 sps:$4 sm:$0xff]  }
 0x324   : > { %v5243_v24 = vpop.f32.mrf.mxu1  ;;  %6347 = vadd.xlane.f32.xlu1 %v6346_v22  ;;  %4960 = vmatprep.mubr.bf16.mxu0 %v8042_v60  ;;  %v8040_v60 = vld [vmem:[%s11747_s5 + $0x6a0] ss:$16 sps:$4 sm:$0xff]  }
 0x325   : > { %v5889_v49 = vadd.f32 %v5761_v17, %v5633_v7  ;;  %v5244_v31 = vadd.f32 %v5243_v24, %v4699_v4  ;;  %v6246_v13 = vpop.xlane.xlu0 %6245  ;;  %v4764_v43 = vpop.f32.mrf.mxu0  ;;  %v6147_v37 = vld [vmem:[#allocation2 + $0x128] sm:$0xff]  ;;  %5441 = vmatprep.mubr.bf16.mxu1 %v8045_v18 }
 0x326   : > { %v6624_v56 = vmul.f32 0.0625, %v6246_v13  ;;  %v5245_v12 = vpop.f32.mrf.mxu1  ;;  %v6349_v53 = vsel %vm389_vm0, %v6147_v37, 0.0  ;;  %v8051_v7 = vld [vmem:[%s11747_s5 + $0x5cc] ss:$16 sps:$4 sm:$0xff]   ;;  %v4707_v43 = vadd.f32 %v10679_v9, %v10043_v11 }
 0x327   : > { %6018 = vst.msk [vmem:[#allocation2 + $0x138] sm:$0xff] %vm389_vm0, %v5889_v49  ;;  %v5634_v39 = vmax.f32 %v5244_v31, 0.0  ;;  %v10894_v15 = vpop.f32.mrf.mxu0  ;;  %6350 = vadd.xlane.f32.xlu0 %v6349_v53  ;;  %v5763_v24 = vld [vmem:[#allocation2 + $0x148] sm:$0xff] }
 0x328   : > { %6752 = vst [vmem:[%s10874_s12 + $0x10] sm:$0xff] %v6624_v56  ;;  %v5246_v42 = vpop.f32.mrf.mxu1 }
 0x329   : > { %v5890_v50 = vadd.f32 %v5762_v29, %v5634_v39  ;;  %v5247_v18 = vadd.f32 %v5246_v42, %v4702_v63  ;;  %v6249_v17 = vpop.xlane.xlu0 %6248  ;;  %v4767_v22 = vpop.f32.mrf.mxu0  ;;  %v6148_v4 = vld [vmem:[#allocation2 + $0x130] sm:$0xff] }
 0x32a   : > { %v6625_v49 = vmul.f32 0.0625, %v6249_v17  ;;  %v5248_v31 = vpop.f32.mrf.mxu1  ;;  %v6352_v13 = vsel %vm389_vm0, %v6148_v4, 0.0  ;;  %v5764_v42 = vld [vmem:[#allocation2 + $0x150] sm:$0xff]  ;;  %v8049_v22 = vld [vmem:[%s11747_s5 + $0x5c8] ss:$16 sps:$4 sm:$0xff]  }
 0x32b   : > { %6019 = vst.msk [vmem:[#allocation2 + $0x140] sm:$0xff] %vm389_vm0, %v5890_v50  ;;  %v5635_v37 = vmax.f32 %v5247_v18, 0.0  ;;  %v10913_v29 = vpop.f32.mrf.mxu0  ;;  %4961 = vmatmul.mubr.bf16.gmra.mxu0 %v8040_v60  ;;  %5442 = vmatmul.mubr.bf16.gmra.mxu1 %v8043_v34  ;;  %v4710_v50 = vadd.f32 %v10689_v57, %v10051_v2  ;;  %v8046_v18 = vld [vmem:[%s11747_s5 + $0x6c0] ss:$16 sps:$4 sm:$0xff]   ;;  %v8054_v57 = vld [vmem:[%s11747_s5 + $0x6e4] ss:$16 sps:$4 sm:$0xff]  }
 0x32c   : > { %6753 = vst [vmem:[%s10874_s12 + $0x18] sm:$0xff] %v6625_v49  ;;  %v5251_v56 = vpop.f32.mrf.mxu1  ;;  %6353 = vadd.xlane.f32.xlu1 %v6352_v13  ;;  %4968 = vmatprep.mubr.bf16.mxu0 %v8048_v41  ;;  %v8057_v13 = vld [vmem:[%s11747_s5 + $0x5ec] ss:$16 sps:$4 sm:$0xff]  }
 0x32d   : > { %v5891_v12 = vadd.f32 %v5763_v24, %v5635_v37  ;;  %v5252_v53 = vadd.f32 %v5251_v56, %v4707_v43  ;;  %v6252_v63 = vpop.xlane.xlu1 %6251  ;;  %v4772_v39 = vpop.f32.mrf.mxu0  ;;  %5449 = vmatprep.mubr.bf16.mxu1 %v8051_v7  ;;  %v5765_v43 = vld [vmem:[#allocation2 + $0x158] sm:$0xff] }
 0x32e   : > { %v6626_v17 = vmul.f32 0.0625, %v6252_v63  ;;  %v5253_v11 = vpop.f32.mrf.mxu1  ;;  %v6149_v9 = vld [vmem:[#allocation2 + $0x138] sm:$0xff] }
 0x32f   : > { %6020 = vst.msk [vmem:[#allocation2 + $0x148] sm:$0xff] %vm389_vm0, %v5891_v12  ;;  %v5636_v60 = vmax.f32 %v5252_v53, 0.0  ;;  %v10919_v34 = vpop.f32.mrf.mxu0  ;;  %v6355_v41 = vsel %vm389_vm0, %v6149_v9, 0.0  ;;  %v4715_v12 = vadd.f32 %v10709_v0, %v10059_v10  ;;  %v5766_v10 = vld [vmem:[#allocation2 + $0x160] sm:$0xff] }
 0x330   : > { %6754 = vst [vmem:[%s10874_s12 + $0x20] sm:$0xff] %v6626_v17  ;;  %v5254_v4 = vpop.f32.mrf.mxu1  ;;  %6356 = vadd.xlane.f32.xlu0 %v6355_v41  ;;  %v6255_v2 = vpop.xlane.xlu0 %6254 }
 0x331   : > { %v5892_v7 = vadd.f32 %v5764_v42, %v5636_v60  ;;  %v5255_v24 = vadd.f32 %v5254_v4, %v4710_v50  ;;  %v6627_v49 = vmul.f32 0.0625, %v6255_v2  ;;  %v4775_v31 = vpop.f32.mrf.mxu0  ;;  %v4718_v4 = vadd.f32 %v10717_v44, %v10061_v30  ;;  %v8060_v44 = vld [vmem:[%s11747_s5 + $0x704] ss:$16 sps:$4 sm:$0xff]  }
 0x332   : > { %v5256_v37 = vpop.f32.mrf.mxu1  ;;  %v6150_v56 = vld [vmem:[#allocation2 + $0x140] sm:$0xff] }
 0x333   : > { %6021 = vst.msk [vmem:[#allocation2 + $0x150] sm:$0xff] %vm389_vm0, %v5892_v7  ;;  %v5637_v53 = vmax.f32 %v5255_v24, 0.0  ;;  %6755 = vst [vmem:[%s10874_s12 + $0x28] sm:$0xff] %v6627_v49  ;;  %v10939_v63 = vpop.f32.mrf.mxu0  ;;  %4969 = vmatmul.mubr.bf16.gmra.mxu0 %v8046_v18  ;;  %5450 = vmatmul.mubr.bf16.gmra.mxu1 %v8049_v22  ;;  %v6358_v39 = vsel %vm389_vm0, %v6150_v56, 0.0  ;;  %v8055_v7 = vld [vmem:[%s11747_s5 + $0x5e8] ss:$16 sps:$4 sm:$0xff]  }
 0x334   : > { %v5259_v42 = vpop.f32.mrf.mxu1  ;;  %6359 = vadd.xlane.f32.xlu1 %v6358_v39  ;;  %4976 = vmatprep.mubr.bf16.mxu0 %v8054_v57  ;;  %v8052_v57 = vld [vmem:[%s11747_s5 + $0x6e0] ss:$16 sps:$4 sm:$0xff]   ;;  %v8063_v37 = vld [vmem:[%s11747_s5 + $0x60c] ss:$16 sps:$4 sm:$0xff]   ;;  %v4723_v39 = vadd.f32 %v10739_v21, %v10069_v26 }
 0x335   : > { %v5893_v17 = vadd.f32 %v5765_v43, %v5637_v53  ;;  %v5260_v11 = vadd.f32 %v5259_v42, %v4715_v12  ;;  %v6258_v9 = vpop.xlane.xlu1 %6257  ;;  %v4780_v50 = vpop.f32.mrf.mxu0  ;;  %5457 = vmatprep.mubr.bf16.mxu1 %v8057_v13  ;;  %v5767_v56 = vld [vmem:[#allocation2 + $0x168] sm:$0xff]  ;;  %v5768_v26 = vld [vmem:[#allocation2 + $0x170] sm:$0xff] }
 0x336   : > { %v6628_v0 = vmul.f32 0.0625, %v6258_v9  ;;  %v5261_v60 = vpop.f32.mrf.mxu1  ;;  %v6151_v41 = vld [vmem:[#allocation2 + $0x148] sm:$0xff] }
 0x337   : > { %6022 = vst.msk [vmem:[#allocation2 + $0x158] sm:$0xff] %vm389_vm0, %v5893_v17  ;;  %v5638_v18 = vmax.f32 %v5260_v11, 0.0  ;;  %v10945_v22 = vpop.f32.mrf.mxu0  ;;  %v6361_v2 = vsel %vm389_vm0, %v6151_v41, 0.0 }
 0x338   : > { %6756 = vst [vmem:[%s10874_s12 + $0x30] sm:$0xff] %v6628_v0  ;;  %v5262_v24 = vpop.f32.mrf.mxu1  ;;  %6362 = vadd.xlane.f32.xlu0 %v6361_v2  ;;  %v6261_v30 = vpop.xlane.xlu0 %6260 }
 0x339   : > { %v5894_v49 = vadd.f32 %v5766_v10, %v5638_v18  ;;  %v5263_v31 = vadd.f32 %v5262_v24, %v4718_v4  ;;  %v6629_v13 = vmul.f32 0.0625, %v6261_v30  ;;  %v4783_v43 = vpop.f32.mrf.mxu0  ;;  %v4726_v18 = vadd.f32 %v10747_v6, %v10077_v16  ;;  %v8058_v24 = vld [vmem:[%s11747_s5 + $0x700] ss:$16 sps:$4 sm:$0xff]   ;;  %v8061_v30 = vld [vmem:[%s11747_s5 + $0x608] ss:$16 sps:$4 sm:$0xff]  }
 0x33a   : > { %v5264_v12 = vpop.f32.mrf.mxu1  ;;  %v6152_v53 = vld [vmem:[#allocation2 + $0x150] sm:$0xff] }
 0x33b   : > { %6023 = vst.msk [vmem:[#allocation2 + $0x160] sm:$0xff] %vm389_vm0, %v5894_v49  ;;  %v5639_v42 = vmax.f32 %v5263_v31, 0.0  ;;  %6757 = vst [vmem:[%s10874_s12 + $0x38] sm:$0xff] %v6629_v13  ;;  %v10965_v17 = vpop.f32.mrf.mxu0  ;;  %4977 = vmatmul.mubr.bf16.gmra.mxu0 %v8052_v57  ;;  %5458 = vmatmul.mubr.bf16.gmra.mxu1 %v8055_v7  ;;  %v6364_v11 = vsel %vm389_vm0, %v6152_v53, 0.0  ;;  %v8066_v6 = vld [vmem:[%s11747_s5 + $0x724] ss:$16 sps:$4 sm:$0xff]  }
 0x33c   : > { %v5267_v9 = vpop.f32.mrf.mxu1  ;;  %6365 = vadd.xlane.f32.xlu1 %v6364_v11  ;;  %4984 = vmatprep.mubr.bf16.mxu0 %v8060_v44 }
 0x33d   : > { %v5895_v50 = vadd.f32 %v5767_v56, %v5639_v42  ;;  %v5268_v10 = vadd.f32 %v5267_v9, %v4723_v39  ;;  %v6264_v0 = vpop.xlane.xlu1 %6263  ;;  %v4788_v60 = vpop.f32.mrf.mxu0  ;;  %5465 = vmatprep.mubr.bf16.mxu1 %v8063_v37  ;;  %v8069_v37 = vld [vmem:[%s11747_s5 + $0x62c] ss:$16 sps:$4 sm:$0xff]  }
 0x33e   : > { %v6630_v21 = vmul.f32 0.0625, %v6264_v0  ;;  %v5269_v41 = vpop.f32.mrf.mxu1  ;;  %v6153_v4 = vld [vmem:[#allocation2 + $0x158] sm:$0xff]  ;;  %v11913_v39 = vld [vmem:[#allocation29_spill] sm:$0xff] }
 0x33f   : > { %6024 = vst.msk [vmem:[#allocation2 + $0x168] sm:$0xff] %vm389_vm0, %v5895_v50  ;;  %v5640_v2 = vmax.f32 %v5268_v10, 0.0  ;;  %v10971_v57 = vpop.f32.mrf.mxu0  ;;  %v6367_v7 = vsel %vm389_vm0, %v6153_v4, 0.0  ;;  %v5769_v56 = vld [vmem:[#allocation2 + $0x178] sm:$0xff]  ;;  %v4731_v42 = vadd.f32 %v10767_v14, %v11913_v39  ;;  %v5770_v14 = vld [vmem:[#allocation2 + $0x180] sm:$0xff] }
 0x340   : > { %6758 = vst [vmem:[%s10874_s12 + $0x40] sm:$0xff] %v6630_v21  ;;  %v5270_v44 = vpop.f32.mrf.mxu1  ;;  %6368 = vadd.xlane.f32.xlu0 %v6367_v7  ;;  %v6267_v16 = vpop.xlane.xlu0 %6266 }
 0x341   : > { %v5896_v49 = vadd.f32 %v5768_v26, %v5640_v2  ;;  %v5271_v31 = vadd.f32 %v5270_v44, %v4726_v18  ;;  %v6631_v13 = vmul.f32 0.0625, %v6267_v16  ;;  %v4791_v43 = vpop.f32.mrf.mxu0  ;;  %v11914_v2 = vld [vmem:[#allocation30_spill] sm:$0xff] }
 0x342   : > { %v5272_v12 = vpop.f32.mrf.mxu1  ;;  %v6154_v53 = vld [vmem:[#allocation2 + $0x160] sm:$0xff]  ;;  %v4734_v7 = vadd.f32 %v10777_v28, %v11914_v2 }
 0x343   : > { %6025 = vst.msk [vmem:[#allocation2 + $0x170] sm:$0xff] %vm389_vm0, %v5896_v49  ;;  %v5641_v11 = vmax.f32 %v5271_v31, 0.0  ;;  %6759 = vst [vmem:[%s10874_s12 + $0x48] sm:$0xff] %v6631_v13  ;;  %v10991_v9 = vpop.f32.mrf.mxu0  ;;  %4985 = vmatmul.mubr.bf16.gmra.mxu0 %v8058_v24  ;;  %5466 = vmatmul.mubr.bf16.gmra.mxu1 %v8061_v30  ;;  %v6370_v50 = vsel %vm389_vm0, %v6154_v53, 0.0  ;;  %v8064_v16 = vld [vmem:[%s11747_s5 + $0x720] ss:$16 sps:$4 sm:$0xff]  }
 0x344   : > { %v5275_v10 = vpop.f32.mrf.mxu1  ;;  %6371 = vadd.xlane.f32.xlu1 %v6370_v50  ;;  %4992 = vmatprep.mubr.bf16.mxu0 %v8066_v6  ;;  %v8067_v6 = vld [vmem:[%s11747_s5 + $0x628] ss:$16 sps:$4 sm:$0xff]   ;;  %v8072_v31 = vld [vmem:[%s11747_s5 + $0x744] ss:$16 sps:$4 sm:$0xff]   ;;  %v8075_v12 = vld [vmem:[%s11747_s5 + $0x64c] ss:$16 sps:$4 sm:$0xff]  }
 0x345   : > { %v5897_v0 = vadd.f32 %v5769_v56, %v5641_v11  ;;  %v5276_v60 = vadd.f32 %v5275_v10, %v4731_v42  ;;  %v6270_v26 = vpop.xlane.xlu1 %6269  ;;  %v4796_v21 = vpop.f32.mrf.mxu0  ;;  %5473 = vmatprep.mubr.bf16.mxu1 %v8069_v37  ;;  %v5771_v53 = vld [vmem:[#allocation2 + $0x188] sm:$0xff]  ;;  %v11915_v11 = vld [vmem:[#allocation31_spill] sm:$0xff] }
 0x346   : > { %v6632_v41 = vmul.f32 0.0625, %v6270_v26  ;;  %v5277_v4 = vpop.f32.mrf.mxu1  ;;  %v6155_v18 = vld [vmem:[#allocation2 + $0x168] sm:$0xff]  ;;  %v4739_v50 = vadd.f32 %v10797_v20, %v11915_v11  ;;  %v5772_v20 = vld [vmem:[#allocation2 + $0x190] sm:$0xff] }
 0x347   : > { %6026 = vst.msk [vmem:[#allocation2 + $0x178] sm:$0xff] %vm389_vm0, %v5897_v0  ;;  %v5642_v24 = vmax.f32 %v5276_v60, 0.0  ;;  %v10997_v30 = vpop.f32.mrf.mxu0  ;;  %v6373_v44 = vsel %vm389_vm0, %v6155_v18, 0.0 }
 0x348   : > { %6760 = vst [vmem:[%s10874_s12 + $0x50] sm:$0xff] %v6632_v41  ;;  %v5278_v49 = vpop.f32.mrf.mxu1  ;;  %6374 = vadd.xlane.f32.xlu0 %v6373_v44  ;;  %v6273_v28 = vpop.xlane.xlu0 %6272 }
 0x349   : > { %v5898_v13 = vadd.f32 %v5770_v14, %v5642_v24  ;;  %v5279_v43 = vadd.f32 %v5278_v49, %v4734_v7  ;;  %v6633_v37 = vmul.f32 0.0625, %v6273_v28  ;;  %v4799_v56 = vpop.f32.mrf.mxu0  ;;  %v11916_v24 = vld [vmem:[#allocation32_spill] sm:$0xff] }
 0x34a   : > { %v5280_v39 = vpop.f32.mrf.mxu1  ;;  %v6156_v42 = vld [vmem:[#allocation2 + $0x170] sm:$0xff]  ;;  %v4742_v44 = vadd.f32 %v10805_v55, %v11916_v24 }
 0x34b   : > { %6027 = vst.msk [vmem:[#allocation2 + $0x180] sm:$0xff] %vm389_vm0, %v5898_v13  ;;  %v5643_v10 = vmax.f32 %v5279_v43, 0.0  ;;  %6761 = vst [vmem:[%s10874_s12 + $0x58] sm:$0xff] %v6633_v37  ;;  %v11017_v0 = vpop.f32.mrf.mxu0  ;;  %4993 = vmatmul.mubr.bf16.gmra.mxu0 %v8064_v16  ;;  %5474 = vmatmul.mubr.bf16.gmra.mxu1 %v8067_v6  ;;  %v6376_v60 = vsel %vm389_vm0, %v6156_v42, 0.0  ;;  %v8070_v28 = vld [vmem:[%s11747_s5 + $0x740] ss:$16 sps:$4 sm:$0xff]  }
 0x34c   : > { %v5283_v26 = vpop.f32.mrf.mxu1  ;;  %6377 = vadd.xlane.f32.xlu1 %v6376_v60  ;;  %5000 = vmatprep.mubr.bf16.mxu0 %v8072_v31  ;;  %v8073_v31 = vld [vmem:[%s11747_s5 + $0x648] ss:$16 sps:$4 sm:$0xff]   ;;  %v8078_v43 = vld [vmem:[%s11747_s5 + $0x764] ss:$16 sps:$4 sm:$0xff]   ;;  %v8081_v39 = vld [vmem:[%s11747_s5 + $0x66c] ss:$16 sps:$4 sm:$0xff]  }
 0x34d   : > { %v5899_v21 = vadd.f32 %v5771_v53, %v5643_v10  ;;  %v5284_v14 = vadd.f32 %v5283_v26, %v4739_v50  ;;  %v6276_v41 = vpop.xlane.xlu1 %6275  ;;  %v4804_v4 = vpop.f32.mrf.mxu0  ;;  %5481 = vmatprep.mubr.bf16.mxu1 %v8075_v12  ;;  %v5773_v42 = vld [vmem:[#allocation2 + $0x198] sm:$0xff]  ;;  %v11917_v10 = vld [vmem:[#allocation33_spill] sm:$0xff] }
 0x34e   : > { %v6634_v18 = vmul.f32 0.0625, %v6276_v41  ;;  %v5285_v2 = vpop.f32.mrf.mxu1  ;;  %v6157_v7 = vld [vmem:[#allocation2 + $0x178] sm:$0xff]  ;;  %v4747_v60 = vadd.f32 %v10827_v19, %v11917_v10  ;;  %v5774_v19 = vld [vmem:[#allocation2 + $0x1a0] sm:$0xff] }
 0x34f   : > { %6028 = vst.msk [vmem:[#allocation2 + $0x188] sm:$0xff] %vm389_vm0, %v5899_v21  ;;  %v5644_v16 = vmax.f32 %v5284_v14, 0.0  ;;  %v11023_v6 = vpop.f32.mrf.mxu0  ;;  %v6379_v49 = vsel %vm389_vm0, %v6157_v7, 0.0 }
 0x350   : > { %6762 = vst [vmem:[%s10874_s12 + $0x60] sm:$0xff] %v6634_v18  ;;  %v5286_v13 = vpop.f32.mrf.mxu1  ;;  %6380 = vadd.xlane.f32.xlu0 %v6379_v49  ;;  %v6279_v55 = vpop.xlane.xlu0 %6278 }
 0x351   : > { %v5900_v37 = vadd.f32 %v5772_v20, %v5644_v16  ;;  %v5287_v56 = vadd.f32 %v5286_v13, %v4742_v44  ;;  %v6635_v12 = vmul.f32 0.0625, %v6279_v55  ;;  %v4807_v53 = vpop.f32.mrf.mxu0  ;;  %v11918_v16 = vld [vmem:[#allocation34_spill] sm:$0xff] }
 0x352   : > { %v5288_v11 = vpop.f32.mrf.mxu1  ;;  %v6158_v50 = vld [vmem:[#allocation2 + $0x180] sm:$0xff]  ;;  %v4750_v49 = vadd.f32 %v10835_v32, %v11918_v16 }
 0x353   : > { %6029 = vst.msk [vmem:[#allocation2 + $0x190] sm:$0xff] %vm389_vm0, %v5900_v37  ;;  %v5645_v26 = vmax.f32 %v5287_v56, 0.0  ;;  %6763 = vst [vmem:[%s10874_s12 + $0x68] sm:$0xff] %v6635_v12  ;;  %v11043_v21 = vpop.f32.mrf.mxu0  ;;  %5001 = vmatmul.mubr.bf16.gmra.mxu0 %v8070_v28  ;;  %5482 = vmatmul.mubr.bf16.gmra.mxu1 %v8073_v31  ;;  %v6382_v14 = vsel %vm389_vm0, %v6158_v50, 0.0  ;;  %v8076_v55 = vld [vmem:[%s11747_s5 + $0x760] ss:$16 sps:$4 sm:$0xff]  }
 0x354   : > { %v5291_v41 = vpop.f32.mrf.mxu1  ;;  %6383 = vadd.xlane.f32.xlu1 %v6382_v14  ;;  %5008 = vmatprep.mubr.bf16.mxu0 %v8078_v43  ;;  %v8079_v43 = vld [vmem:[%s11747_s5 + $0x668] ss:$16 sps:$4 sm:$0xff]   ;;  %v8084_v56 = vld [vmem:[%s11747_s5 + $0x784] ss:$16 sps:$4 sm:$0xff]   ;;  %v8087_v11 = vld [vmem:[%s11747_s5 + $0x68c] ss:$16 sps:$4 sm:$0xff]  }
 0x355   : > { %v5901_v4 = vadd.f32 %v5773_v42, %v5645_v26  ;;  %v5292_v20 = vadd.f32 %v5291_v41, %v4747_v60  ;;  %v6282_v18 = vpop.xlane.xlu1 %6281  ;;  %v4812_v2 = vpop.f32.mrf.mxu0  ;;  %5489 = vmatprep.mubr.bf16.mxu1 %v8081_v39  ;;  %v5775_v50 = vld [vmem:[#allocation2 + $0x1a8] sm:$0xff]  ;;  %v11919_v26 = vld [vmem:[#allocation35_spill] sm:$0xff] }
 0x356   : > { %v6636_v7 = vmul.f32 0.0625, %v6282_v18  ;;  %v5293_v24 = vpop.f32.mrf.mxu1  ;;  %v6159_v44 = vld [vmem:[#allocation2 + $0x188] sm:$0xff]  ;;  %v4755_v14 = vadd.f32 %v10858_v45, %v11919_v26  ;;  %v5776_v45 = vld [vmem:[#allocation2 + $0x1b0] sm:$0xff] }
 0x357   : > { %6030 = vst.msk [vmem:[#allocation2 + $0x198] sm:$0xff] %vm389_vm0, %v5901_v4  ;;  %v5646_v28 = vmax.f32 %v5292_v20, 0.0  ;;  %v11049_v31 = vpop.f32.mrf.mxu0  ;;  %v6385_v13 = vsel %vm389_vm0, %v6159_v44, 0.0 }
 0x358   : > { %6764 = vst [vmem:[%s10874_s12 + $0x70] sm:$0xff] %v6636_v7  ;;  %v5294_v37 = vpop.f32.mrf.mxu1  ;;  %6386 = vadd.xlane.f32.xlu0 %v6385_v13  ;;  %v6285_v32 = vpop.xlane.xlu0 %6284 }
 0x359   : > { %v5902_v12 = vadd.f32 %v5774_v19, %v5646_v28  ;;  %v5295_v53 = vadd.f32 %v5294_v37, %v4750_v49  ;;  %v6637_v39 = vmul.f32 0.0625, %v6285_v32  ;;  %v4815_v42 = vpop.f32.mrf.mxu0  ;;  %v11920_v28 = vld [vmem:[#allocation36_spill] sm:$0xff] }
 0x35a   : > { %v5296_v10 = vpop.f32.mrf.mxu1  ;;  %v6160_v60 = vld [vmem:[#allocation2 + $0x190] sm:$0xff]  ;;  %v4758_v13 = vadd.f32 %v10866_v23, %v11920_v28 }
 0x35b   : > { %6031 = vst.msk [vmem:[#allocation2 + $0x1a0] sm:$0xff] %vm389_vm0, %v5902_v12  ;;  %v5647_v41 = vmax.f32 %v5295_v53, 0.0  ;;  %6765 = vst [vmem:[%s10874_s12 + $0x78] sm:$0xff] %v6637_v39  ;;  %v11069_v4 = vpop.f32.mrf.mxu0  ;;  %5009 = vmatmul.mubr.bf16.gmra.mxu0 %v8076_v55  ;;  %5490 = vmatmul.mubr.bf16.gmra.mxu1 %v8079_v43  ;;  %v6388_v20 = vsel %vm389_vm0, %v6160_v60, 0.0  ;;  %v8082_v32 = vld [vmem:[%s11747_s5 + $0x780] ss:$16 sps:$4 sm:$0xff]  }
 0x35c   : > { %v5299_v18 = vpop.f32.mrf.mxu1  ;;  %6389 = vadd.xlane.f32.xlu1 %v6388_v20  ;;  %5016 = vmatprep.mubr.bf16.mxu0 %v8084_v56  ;;  %v8085_v56 = vld [vmem:[%s11747_s5 + $0x688] ss:$16 sps:$4 sm:$0xff]   ;;  %v8090_v53 = vld [vmem:[%s11747_s5 + $0x7a4] ss:$16 sps:$4 sm:$0xff]   ;;  %v8093_v10 = vld [vmem:[%s11747_s5 + $0x6ac] ss:$16 sps:$4 sm:$0xff]  }
 0x35d   : > { %v5903_v2 = vadd.f32 %v5775_v50, %v5647_v41  ;;  %v5300_v19 = vadd.f32 %v5299_v18, %v4755_v14  ;;  %v6288_v7 = vpop.xlane.xlu1 %6287  ;;  %v4820_v24 = vpop.f32.mrf.mxu0  ;;  %5497 = vmatprep.mubr.bf16.mxu1 %v8087_v11  ;;  %v5777_v60 = vld [vmem:[#allocation2 + $0x1b8] sm:$0xff]  ;;  %v11921_v41 = vld [vmem:[#allocation37_spill] sm:$0xff] }
 0x35e   : > { %v6638_v44 = vmul.f32 0.0625, %v6288_v7  ;;  %v5301_v16 = vpop.f32.mrf.mxu1  ;;  %v6161_v49 = vld [vmem:[#allocation2 + $0x198] sm:$0xff]  ;;  %v4763_v20 = vadd.f32 %v10888_v5, %v11921_v41  ;;  %v5778_v5 = vld [vmem:[#allocation2 + $0x1c0] sm:$0xff] }
 0x35f   : > { %6032 = vst.msk [vmem:[#allocation2 + $0x1a8] sm:$0xff] %vm389_vm0, %v5903_v2  ;;  %v5648_v55 = vmax.f32 %v5300_v19, 0.0  ;;  %v11075_v43 = vpop.f32.mrf.mxu0  ;;  %v6391_v37 = vsel %vm389_vm0, %v6161_v49, 0.0 }
 0x360   : > { %6766 = vst [vmem:[%s10874_s12 + $0x80] sm:$0xff] %v6638_v44  ;;  %v5302_v12 = vpop.f32.mrf.mxu1  ;;  %6392 = vadd.xlane.f32.xlu0 %v6391_v37  ;;  %v6291_v23 = vpop.xlane.xlu0 %6290 }
 0x361   : > { %v5904_v39 = vadd.f32 %v5776_v45, %v5648_v55  ;;  %v5303_v42 = vadd.f32 %v5302_v12, %v4758_v13  ;;  %v6639_v11 = vmul.f32 0.0625, %v6291_v23  ;;  %v4823_v50 = vpop.f32.mrf.mxu0  ;;  %v11922_v55 = vld [vmem:[#allocation39_spill] sm:$0xff]  ;;  %v8088_v23 = vld [vmem:[%s11747_s5 + $0x7a0] ss:$16 sps:$4 sm:$0xff]  }
 0x362   : > { %v5304_v26 = vpop.f32.mrf.mxu1  ;;  %v6162_v14 = vld [vmem:[#allocation2 + $0x1a0] sm:$0xff]  ;;  %v4766_v37 = vadd.f32 %v10894_v15, %v11922_v55 }
 0x363   : > { %6033 = vst.msk [vmem:[#allocation2 + $0x1b0] sm:$0xff] %vm389_vm0, %v5904_v39  ;;  %v5649_v18 = vmax.f32 %v5303_v42, 0.0  ;;  %6767 = vst [vmem:[%s10874_s12 + $0x88] sm:$0xff] %v6639_v11  ;;  %v11095_v2 = vpop.f32.mrf.mxu0  ;;  %5017 = vmatmul.mubr.bf16.gmra.mxu0 %v8082_v32  ;;  %5498 = vmatmul.mubr.bf16.gmra.mxu1 %v8085_v56  ;;  %v6394_v19 = vsel %vm389_vm0, %v6162_v14, 0.0  ;;  %v8096_v42 = vld [vmem:[%s11747_s5 + $0x7c4] ss:$16 sps:$4 sm:$0xff]  }
 0x364   : > { %v5307_v7 = vpop.f32.mrf.mxu1  ;;  %6395 = vadd.xlane.f32.xlu1 %v6394_v19  ;;  %5024 = vmatprep.mubr.bf16.mxu0 %v8090_v53  ;;  %v8091_v53 = vld [vmem:[%s11747_s5 + $0x6a8] ss:$16 sps:$4 sm:$0xff]   ;;  %v8099_v26 = vld [vmem:[%s11747_s5 + $0x6cc] ss:$16 sps:$4 sm:$0xff]  }
 0x365   : > { %v5905_v24 = vadd.f32 %v5777_v60, %v5649_v18  ;;  %v5308_v45 = vadd.f32 %v5307_v7, %v4763_v20  ;;  %v6294_v44 = vpop.xlane.xlu1 %6293  ;;  %v4828_v16 = vpop.f32.mrf.mxu0  ;;  %5505 = vmatprep.mubr.bf16.mxu1 %v8093_v10  ;;  %v5779_v14 = vld [vmem:[#allocation2 + $0x1c8] sm:$0xff]  ;;  %v11923_v18 = vld [vmem:[#allocation38_spill] sm:$0xff] }
 0x366   : > { %v6640_v49 = vmul.f32 0.0625, %v6294_v44  ;;  %v5309_v28 = vpop.f32.mrf.mxu1  ;;  %v6163_v13 = vld [vmem:[#allocation2 + $0x1a8] sm:$0xff]  ;;  %v4771_v19 = vadd.f32 %v10913_v29, %v11923_v18  ;;  %v5780_v29 = vld [vmem:[#allocation2 + $0x1d0] sm:$0xff] }
 0x367   : > { %6034 = vst.msk [vmem:[#allocation2 + $0x1b8] sm:$0xff] %vm389_vm0, %v5905_v24  ;;  %v5650_v32 = vmax.f32 %v5308_v45, 0.0  ;;  %v11101_v56 = vpop.f32.mrf.mxu0  ;;  %v6397_v12 = vsel %vm389_vm0, %v6163_v13, 0.0 }
 0x368   : > { %6768 = vst [vmem:[%s10874_s12 + $0x90] sm:$0xff] %v6640_v49  ;;  %v5310_v39 = vpop.f32.mrf.mxu1  ;;  %6398 = vadd.xlane.f32.xlu0 %v6397_v12  ;;  %v6297_v15 = vpop.xlane.xlu0 %6296 }
 0x369   : > { %v5906_v11 = vadd.f32 %v5778_v5, %v5650_v32  ;;  %v5311_v50 = vadd.f32 %v5310_v39, %v4766_v37  ;;  %v6641_v10 = vmul.f32 0.0625, %v6297_v15  ;;  %v4831_v60 = vpop.f32.mrf.mxu0  ;;  %v11924_v32 = vld [vmem:[#allocation41_spill] sm:$0xff]  ;;  %v8094_v15 = vld [vmem:[%s11747_s5 + $0x7c0] ss:$16 sps:$4 sm:$0xff]  }
 0x36a   : > { %v5312_v41 = vpop.f32.mrf.mxu1  ;;  %v6164_v20 = vld [vmem:[#allocation2 + $0x1b0] sm:$0xff]  ;;  %v4774_v12 = vadd.f32 %v10919_v34, %v11924_v32 }
 0x36b   : > { %6035 = vst.msk [vmem:[#allocation2 + $0x1c0] sm:$0xff] %vm389_vm0, %v5906_v11  ;;  %v5651_v7 = vmax.f32 %v5311_v50, 0.0  ;;  %6769 = vst [vmem:[%s10874_s12 + $0x98] sm:$0xff] %v6641_v10  ;;  %v11121_v24 = vpop.f32.mrf.mxu0  ;;  %5025 = vmatmul.mubr.bf16.gmra.mxu0 %v8088_v23  ;;  %5506 = vmatmul.mubr.bf16.gmra.mxu1 %v8091_v53  ;;  %v6400_v45 = vsel %vm389_vm0, %v6164_v20, 0.0  ;;  %v8102_v50 = vld [vmem:[%s11747_s5 + $0x7e4] ss:$16 sps:$4 sm:$0xff]  }
 0x36c   : > { %v5315_v44 = vpop.f32.mrf.mxu1  ;;  %6401 = vadd.xlane.f32.xlu1 %v6400_v45  ;;  %5032 = vmatprep.mubr.bf16.mxu0 %v8096_v42  ;;  %v8097_v42 = vld [vmem:[%s11747_s5 + $0x6c8] ss:$16 sps:$4 sm:$0xff]   ;;  %v8105_v41 = vld [vmem:[%s11747_s5 + $0x6ec] ss:$16 sps:$4 sm:$0xff]  }
 0x36d   : > { %v5907_v16 = vadd.f32 %v5779_v14, %v5651_v7  ;;  %v5316_v5 = vadd.f32 %v5315_v44, %v4771_v19  ;;  %v6300_v49 = vpop.xlane.xlu1 %6299  ;;  %v4836_v28 = vpop.f32.mrf.mxu0  ;;  %5513 = vmatprep.mubr.bf16.mxu1 %v8099_v26  ;;  %v5781_v20 = vld [vmem:[#allocation2 + $0x1d8] sm:$0xff]  ;;  %v11925_v7 = vld [vmem:[#allocation40_spill] sm:$0xff] }
 0x36e   : > { %v6642_v13 = vmul.f32 0.0625, %v6300_v49  ;;  %v5317_v55 = vpop.f32.mrf.mxu1  ;;  %v6165_v37 = vld [vmem:[#allocation2 + $0x1b8] sm:$0xff]  ;;  %v4779_v45 = vadd.f32 %v10939_v63, %v11925_v7  ;;  %v5782_v63 = vld [vmem:[#allocation2 + $0x1e0] sm:$0xff] }
 0x36f   : > { %6036 = vst.msk [vmem:[#allocation2 + $0x1c8] sm:$0xff] %vm389_vm0, %v5907_v16  ;;  %v5652_v23 = vmax.f32 %v5316_v5, 0.0  ;;  %v11127_v53 = vpop.f32.mrf.mxu0  ;;  %v6403_v39 = vsel %vm389_vm0, %v6165_v37, 0.0 }
 0x370   : > { %6770 = vst [vmem:[%s10874_s12 + $0xa0] sm:$0xff] %v6642_v13  ;;  %v5318_v11 = vpop.f32.mrf.mxu1  ;;  %6404 = vadd.xlane.f32.xlu0 %v6403_v39  ;;  %v6303_v34 = vpop.xlane.xlu0 %6302 }
 0x371   : > { %v5908_v10 = vadd.f32 %v5780_v29, %v5652_v23  ;;  %v5319_v60 = vadd.f32 %v5318_v11, %v4774_v12  ;;  %v6643_v26 = vmul.f32 0.0625, %v6303_v34  ;;  %v4839_v14 = vpop.f32.mrf.mxu0  ;;  %v11926_v23 = vld [vmem:[#allocation42_spill] sm:$0xff] }
 0x372   : > { %v5320_v18 = vpop.f32.mrf.mxu1  ;;  %v6166_v19 = vld [vmem:[#allocation2 + $0x1c0] sm:$0xff]  ;;  %v4782_v39 = vadd.f32 %v10945_v22, %v11926_v23 }
 0x373   : > { %6037 = vst.msk [vmem:[#allocation2 + $0x1d0] sm:$0xff] %vm389_vm0, %v5908_v10  ;;  %v5653_v44 = vmax.f32 %v5319_v60, 0.0  ;;  %6771 = vst [vmem:[%s10874_s12 + $0xa8] sm:$0xff] %v6643_v26  ;;  %v11147_v16 = vpop.f32.mrf.mxu0  ;;  %5033 = vmatmul.mubr.bf16.gmra.mxu0 %v8094_v15  ;;  %5514 = vmatmul.mubr.bf16.gmra.mxu1 %v8097_v42  ;;  %v6406_v5 = vsel %vm389_vm0, %v6166_v19, 0.0  ;;  %v8100_v34 = vld [vmem:[%s11747_s5 + $0x7e0] ss:$16 sps:$4 sm:$0xff]  }
 0x374   : > { %v5323_v49 = vpop.f32.mrf.mxu1  ;;  %6407 = vadd.xlane.f32.xlu1 %v6406_v5  ;;  %5040 = vmatprep.mubr.bf16.mxu0 %v8102_v50  ;;  %v8103_v50 = vld [vmem:[%s11747_s5 + $0x6e8] ss:$16 sps:$4 sm:$0xff]   ;;  %v8108_v60 = vld [vmem:[%s11747_s5 + $0x70c] ss:$16 sps:$4 sm:$0xff]  }
 0x375   : > { %v5909_v28 = vadd.f32 %v5781_v20, %v5653_v44  ;;  %v5324_v29 = vadd.f32 %v5323_v49, %v4779_v45  ;;  %v6306_v13 = vpop.xlane.xlu1 %6305  ;;  %v4844_v55 = vpop.f32.mrf.mxu0  ;;  %5521 = vmatprep.mubr.bf16.mxu1 %v8105_v41  ;;  %v5783_v18 = vld [vmem:[#allocation2 + $0x1e8] sm:$0xff]  ;;  %v11927_v45 = vld [vmem:[#allocation43_spill] sm:$0xff] }
 0x376   : > { %v6644_v37 = vmul.f32 0.0625, %v6306_v13  ;;  %v5325_v32 = vpop.f32.mrf.mxu1  ;;  %v6167_v12 = vld [vmem:[#allocation2 + $0x1c8] sm:$0xff]  ;;  %v4787_v44 = vadd.f32 %v10965_v17, %v11927_v45 }
 0x377   : > { %6038 = vst.msk [vmem:[#allocation2 + $0x1d8] sm:$0xff] %vm389_vm0, %v5909_v28  ;;  %v5654_v15 = vmax.f32 %v5324_v29, 0.0  ;;  %v11153_v42 = vpop.f32.mrf.mxu0  ;;  %v6409_v11 = vsel %vm389_vm0, %v6167_v12, 0.0  ;;  %v5784_v32 = vld [vmem:[#allocation2 + $0x1f0] sm:$0xff]  ;;  %v11929_v45 = vld [vmem:[#allocation45_spill] sm:$0xff] }
 0x378   : > { %6772 = vst [vmem:[%s10874_s12 + $0xb0] sm:$0xff] %v6644_v37  ;;  %v5326_v10 = vpop.f32.mrf.mxu1  ;;  %6410 = vadd.xlane.f32.xlu0 %v6409_v11  ;;  %v6309_v22 = vpop.xlane.xlu0 %6308 }
 0x379   : > { %v5910_v26 = vadd.f32 %v5782_v63, %v5654_v15  ;;  %v5327_v14 = vadd.f32 %v5326_v10, %v4782_v39  ;;  %v6645_v41 = vmul.f32 0.0625, %v6309_v22  ;;  %v4847_v20 = vpop.f32.mrf.mxu0  ;;  %v11928_v39 = vld [vmem:[#allocation44_spill] sm:$0xff]  ;;  %v8106_v10 = vld [vmem:[%s11747_s5 + $0x708] ss:$16 sps:$4 sm:$0xff]  }
 0x37a   : > { %v5328_v19 = vpop.f32.mrf.mxu1  ;;  %v6168_v7 = vld [vmem:[#allocation2 + $0x1d0] sm:$0xff]  ;;  %v4790_v15 = vadd.f32 %v10971_v57, %v11928_v39  ;;  %v8111_v57 = vld [vmem:[%s11747_s5 + $0x72c] ss:$16 sps:$4 sm:$0xff]  }
 0x37b   : > { %6039 = vst.msk [vmem:[#allocation2 + $0x1e0] sm:$0xff] %vm389_vm0, %v5910_v26  ;;  %v5655_v5 = vmax.f32 %v5327_v14, 0.0  ;;  %6773 = vst [vmem:[%s10874_s12 + $0xb8] sm:$0xff] %v6645_v41  ;;  %v11170_v49 = vpop.f32.mrf.mxu0  ;;  %5041 = vmatmul.mubr.bf16.gmra.mxu0 %v8100_v34  ;;  %5522 = vmatmul.mubr.bf16.gmra.mxu1 %v8103_v50  ;;  %v6412_v28 = vsel %vm389_vm0, %v6168_v7, 0.0  ;;  %v11930_v39 = vld [vmem:[#allocation46_spill] sm:$0xff] }
 0x37c   : > { %v5331_v29 = vpop.f32.mrf.mxu1  ;;  %6413 = vadd.xlane.f32.xlu1 %v6412_v28  ;;  %5529 = vmatprep.mubr.bf16.mxu1 %v8108_v60 }
 0x37d   : > { %v5911_v13 = vadd.f32 %v5783_v18, %v5655_v5  ;;  %v5332_v55 = vadd.f32 %v5331_v29, %v4787_v44  ;;  %v6312_v63 = vpop.xlane.xlu1 %6311  ;;  %v4852_v37 = vpop.f32.mrf.mxu0  ;;  %v5785_v18 = vld [vmem:[#allocation2 + $0x1f8] sm:$0xff]  ;;  %v4795_v44 = vadd.f32 %v10991_v9, %v11929_v45 }
 0x37e   : > { %v6646_v17 = vmul.f32 0.0625, %v6312_v63  ;;  %v5333_v12 = vpop.f32.mrf.mxu1  ;;  %v6169_v23 = vld [vmem:[#allocation2 + $0x1d8] sm:$0xff] }
 0x37f   : > { %6040 = vst.msk [vmem:[#allocation2 + $0x1e8] sm:$0xff] %vm389_vm0, %v5911_v13  ;;  %v5656_v11 = vmax.f32 %v5332_v55, 0.0  ;;  %v11176_v34 = vpop.f32.mrf.mxu0  ;;  %v6415_v50 = vsel %vm389_vm0, %v6169_v23, 0.0  ;;  %v11931_v45 = vld [vmem:[#allocation47_spill] sm:$0xff] }
 0x380   : > { %6774 = vst [vmem:[%s10874_s12 + $0xc0] sm:$0xff] %v6646_v17  ;;  %v5334_v22 = vpop.f32.mrf.mxu1  ;;  %6416 = vadd.xlane.f32.xlu0 %v6415_v50  ;;  %v6315_v60 = vpop.xlane.xlu0 %6314  ;;  %v5786_v17 = vld [vmem:[#allocation2 + $0x200] sm:$0xff] }
 0x381   : > { %v5912_v26 = vadd.f32 %v5784_v32, %v5656_v11  ;;  %v5335_v14 = vadd.f32 %v5334_v22, %v4790_v15  ;;  %v6647_v41 = vmul.f32 0.0625, %v6315_v60  ;;  %v4855_v20 = vpop.f32.mrf.mxu0  ;;  %v4798_v15 = vadd.f32 %v10997_v30, %v11930_v39  ;;  %v8109_v22 = vld [vmem:[%s11747_s5 + $0x728] ss:$16 sps:$4 sm:$0xff]   ;;  %v8114_v30 = vld [vmem:[%s11747_s5 + $0x74c] ss:$16 sps:$4 sm:$0xff]   ;;  %v11932_v39 = vld [vmem:[#allocation48_spill] sm:$0xff] }
 0x382   : > { %v5336_v19 = vpop.f32.mrf.mxu1  ;;  %v6170_v7 = vld [vmem:[#allocation2 + $0x1e0] sm:$0xff] }
 0x383   : > { %6041 = vst.msk [vmem:[#allocation2 + $0x1f0] sm:$0xff] %vm389_vm0, %v5912_v26  ;;  %v5657_v5 = vmax.f32 %v5335_v14, 0.0  ;;  %6775 = vst [vmem:[%s10874_s12 + $0xc8] sm:$0xff] %v6647_v41  ;;  %v11190_v28 = vpop.f32.mrf.mxu0  ;;  %5530 = vmatmul.mubr.bf16.gmra.mxu1 %v8106_v10  ;;  %v6418_v29 = vsel %vm389_vm0, %v6170_v7, 0.0 }
 0x384   : > { %v5339_v13 = vpop.f32.mrf.mxu1  ;;  %6419 = vadd.xlane.f32.xlu1 %v6418_v29  ;;  %5537 = vmatprep.mubr.bf16.mxu1 %v8111_v57 }
 0x385   : > { %v5913_v55 = vadd.f32 %v5785_v18, %v5657_v5  ;;  %v5340_v63 = vadd.f32 %v5339_v13, %v4795_v44  ;;  %v6318_v37 = vpop.xlane.xlu1 %6317  ;;  %v4860_v32 = vpop.f32.mrf.mxu0  ;;  %v5787_v18 = vld [vmem:[#allocation2 + $0x208] sm:$0xff]  ;;  %v4803_v44 = vadd.f32 %v11017_v0, %v11931_v45 }
 0x386   : > { %v6648_v12 = vmul.f32 0.0625, %v6318_v37  ;;  %v5341_v9 = vpop.f32.mrf.mxu1  ;;  %v6171_v23 = vld [vmem:[#allocation2 + $0x1e8] sm:$0xff] }
 0x387   : > { %6042 = vst.msk [vmem:[#allocation2 + $0x1f8] sm:$0xff] %vm389_vm0, %v5913_v55  ;;  %v5658_v11 = vmax.f32 %v5340_v63, 0.0  ;;  %v11196_v50 = vpop.f32.mrf.mxu0  ;;  %v6421_v10 = vsel %vm389_vm0, %v6171_v23, 0.0  ;;  %v11933_v45 = vld [vmem:[#allocation49_spill] sm:$0xff] }
 0x388   : > { %6776 = vst [vmem:[%s10874_s12 + $0xd0] sm:$0xff] %v6648_v12  ;;  %v5342_v60 = vpop.f32.mrf.mxu1  ;;  %6422 = vadd.xlane.f32.xlu0 %v6421_v10  ;;  %v6321_v57 = vpop.xlane.xlu0 %6320  ;;  %v5788_v12 = vld [vmem:[#allocation2 + $0x210] sm:$0xff] }
 0x389   : > { %v5914_v26 = vadd.f32 %v5786_v17, %v5658_v11  ;;  %v5343_v14 = vadd.f32 %v5342_v60, %v4798_v15  ;;  %v6649_v41 = vmul.f32 0.0625, %v6321_v57  ;;  %v4863_v20 = vpop.f32.mrf.mxu0  ;;  %v4806_v15 = vadd.f32 %v11023_v6, %v11932_v39  ;;  %v8112_v60 = vld [vmem:[%s11747_s5 + $0x748] ss:$16 sps:$4 sm:$0xff]   ;;  %v8117_v6 = vld [vmem:[%s11747_s5 + $0x76c] ss:$16 sps:$4 sm:$0xff]   ;;  %v11934_v39 = vld [vmem:[#allocation50_spill] sm:$0xff] }
 0x38a   : > { %v5344_v19 = vpop.f32.mrf.mxu1  ;;  %v6172_v7 = vld [vmem:[#allocation2 + $0x1f0] sm:$0xff] }
 0x38b   : > { %6043 = vst.msk [vmem:[#allocation2 + $0x200] sm:$0xff] %vm389_vm0, %v5914_v26  ;;  %v5659_v5 = vmax.f32 %v5343_v14, 0.0  ;;  %6777 = vst [vmem:[%s10874_s12 + $0xd8] sm:$0xff] %v6649_v41  ;;  %v11210_v29 = vpop.f32.mrf.mxu0  ;;  %5538 = vmatmul.mubr.bf16.gmra.mxu1 %v8109_v22  ;;  %v6424_v13 = vsel %vm389_vm0, %v6172_v7, 0.0 }
 0x38c   : > { %v5347_v55 = vpop.f32.mrf.mxu1  ;;  %6425 = vadd.xlane.f32.xlu1 %v6424_v13  ;;  %5545 = vmatprep.mubr.bf16.mxu1 %v8114_v30 }
 0x38d   : > { %v5915_v63 = vadd.f32 %v5787_v18, %v5659_v5  ;;  %v5348_v37 = vadd.f32 %v5347_v55, %v4803_v44  ;;  %v6324_v32 = vpop.xlane.xlu1 %6323  ;;  %v4868_v17 = vpop.f32.mrf.mxu0  ;;  %v5789_v18 = vld [vmem:[#allocation2 + $0x218] sm:$0xff]  ;;  %v4811_v44 = vadd.f32 %v11043_v21, %v11933_v45 }
 0x38e   : > { %v6650_v9 = vmul.f32 0.0625, %v6324_v32  ;;  %v5349_v0 = vpop.f32.mrf.mxu1  ;;  %v6173_v23 = vld [vmem:[#allocation2 + $0x1f8] sm:$0xff] }
 0x38f   : > { %6044 = vst.msk [vmem:[#allocation2 + $0x208] sm:$0xff] %vm389_vm0, %v5915_v63  ;;  %v5660_v11 = vmax.f32 %v5348_v37, 0.0  ;;  %v11216_v10 = vpop.f32.mrf.mxu0  ;;  %v6427_v22 = vsel %vm389_vm0, %v6173_v23, 0.0  ;;  %v11935_v45 = vld [vmem:[#allocation51_spill] sm:$0xff] }
 0x390   : > { %6778 = vst [vmem:[%s10874_s12 + $0xe0] sm:$0xff] %v6650_v9  ;;  %v5350_v57 = vpop.f32.mrf.mxu1  ;;  %6428 = vadd.xlane.f32.xlu0 %v6427_v22  ;;  %v6327_v30 = vpop.xlane.xlu0 %6326  ;;  %v5790_v9 = vld [vmem:[#allocation2 + $0x220] sm:$0xff] }
 0x391   : > { %v5916_v26 = vadd.f32 %v5788_v12, %v5660_v11  ;;  %v5351_v14 = vadd.f32 %v5350_v57, %v4806_v15  ;;  %v6651_v41 = vmul.f32 0.0625, %v6327_v30  ;;  %v4871_v20 = vpop.f32.mrf.mxu0  ;;  %v4814_v15 = vadd.f32 %v11049_v31, %v11934_v39  ;;  %v8115_v57 = vld [vmem:[%s11747_s5 + $0x768] ss:$16 sps:$4 sm:$0xff]   ;;  %v8120_v31 = vld [vmem:[%s11747_s5 + $0x78c] ss:$16 sps:$4 sm:$0xff]   ;;  %v11936_v39 = vld [vmem:[#allocation52_spill] sm:$0xff] }
 0x392   : > { %v5352_v19 = vpop.f32.mrf.mxu1  ;;  %v6174_v7 = vld [vmem:[#allocation2 + $0x200] sm:$0xff] }
 0x393   : > { %6045 = vst.msk [vmem:[#allocation2 + $0x210] sm:$0xff] %vm389_vm0, %v5916_v26  ;;  %v5661_v5 = vmax.f32 %v5351_v14, 0.0  ;;  %6779 = vst [vmem:[%s10874_s12 + $0xe8] sm:$0xff] %v6651_v41  ;;  %v11230_v13 = vpop.f32.mrf.mxu0  ;;  %5546 = vmatmul.mubr.bf16.gmra.mxu1 %v8112_v60  ;;  %v6430_v55 = vsel %vm389_vm0, %v6174_v7, 0.0 }
 0x394   : > { %v5355_v63 = vpop.f32.mrf.mxu1  ;;  %6431 = vadd.xlane.f32.xlu1 %v6430_v55  ;;  %5553 = vmatprep.mubr.bf16.mxu1 %v8117_v6 }
 0x395   : > { %v5917_v37 = vadd.f32 %v5789_v18, %v5661_v5  ;;  %v5356_v32 = vadd.f32 %v5355_v63, %v4811_v44  ;;  %v6330_v17 = vpop.xlane.xlu1 %6329  ;;  %v4876_v12 = vpop.f32.mrf.mxu0  ;;  %v5791_v18 = vld [vmem:[#allocation2 + $0x228] sm:$0xff]  ;;  %v4819_v44 = vadd.f32 %v11069_v4, %v11935_v45 }
 0x396   : > { %v6652_v0 = vmul.f32 0.0625, %v6330_v17  ;;  %v5357_v21 = vpop.f32.mrf.mxu1  ;;  %v6175_v23 = vld [vmem:[#allocation2 + $0x208] sm:$0xff] }
 0x397   : > { %6046 = vst.msk [vmem:[#allocation2 + $0x218] sm:$0xff] %vm389_vm0, %v5917_v37  ;;  %v5662_v11 = vmax.f32 %v5356_v32, 0.0  ;;  %v11236_v22 = vpop.f32.mrf.mxu0  ;;  %v6433_v60 = vsel %vm389_vm0, %v6175_v23, 0.0  ;;  %v11937_v45 = vld [vmem:[#allocation53_spill] sm:$0xff] }
 0x398   : > { %6780 = vst [vmem:[%s10874_s12 + $0xf0] sm:$0xff] %v6652_v0  ;;  %v5358_v30 = vpop.f32.mrf.mxu1  ;;  %6434 = vadd.xlane.f32.xlu0 %v6433_v60  ;;  %v6333_v6 = vpop.xlane.xlu0 %6332  ;;  %v5792_v0 = vld [vmem:[#allocation2 + $0x230] sm:$0xff] }
 0x399   : > { %v5918_v26 = vadd.f32 %v5790_v9, %v5662_v11  ;;  %v5359_v14 = vadd.f32 %v5358_v30, %v4814_v15  ;;  %v6653_v41 = vmul.f32 0.0625, %v6333_v6  ;;  %v4879_v20 = vpop.f32.mrf.mxu0  ;;  %v4822_v15 = vadd.f32 %v11075_v43, %v11936_v39  ;;  %v8118_v30 = vld [vmem:[%s11747_s5 + $0x788] ss:$16 sps:$4 sm:$0xff]   ;;  %v8123_v43 = vld [vmem:[%s11747_s5 + $0x7ac] ss:$16 sps:$4 sm:$0xff]   ;;  %v11938_v39 = vld [vmem:[#allocation54_spill] sm:$0xff] }
 0x39a   : > { %v5360_v19 = vpop.f32.mrf.mxu1  ;;  %v6176_v7 = vld [vmem:[#allocation2 + $0x210] sm:$0xff] }
 0x39b   : > { %6047 = vst.msk [vmem:[#allocation2 + $0x220] sm:$0xff] %vm389_vm0, %v5918_v26  ;;  %v5663_v5 = vmax.f32 %v5359_v14, 0.0  ;;  %6781 = vst [vmem:[%s10874_s12 + $0xf8] sm:$0xff] %v6653_v41  ;;  %v11250_v55 = vpop.f32.mrf.mxu0  ;;  %5554 = vmatmul.mubr.bf16.gmra.mxu1 %v8115_v57  ;;  %v6436_v63 = vsel %vm389_vm0, %v6176_v7, 0.0 }
 0x39c   : > { %v5363_v37 = vpop.f32.mrf.mxu1  ;;  %6437 = vadd.xlane.f32.xlu1 %v6436_v63  ;;  %5561 = vmatprep.mubr.bf16.mxu1 %v8120_v31 }
 0x39d   : > { %v5919_v32 = vadd.f32 %v5791_v18, %v5663_v5  ;;  %v5364_v17 = vadd.f32 %v5363_v37, %v4819_v44  ;;  %v6336_v12 = vpop.xlane.xlu1 %6335  ;;  %v4884_v9 = vpop.f32.mrf.mxu0  ;;  %v5793_v18 = vld [vmem:[#allocation2 + $0x238] sm:$0xff]  ;;  %v4827_v44 = vadd.f32 %v11095_v2, %v11937_v45 }
 0x39e   : > { %v6654_v21 = vmul.f32 0.0625, %v6336_v12  ;;  %v5365_v4 = vpop.f32.mrf.mxu1  ;;  %v6177_v23 = vld [vmem:[#allocation2 + $0x218] sm:$0xff] }
 0x39f   : > { %6048 = vst.msk [vmem:[#allocation2 + $0x228] sm:$0xff] %vm389_vm0, %v5919_v32  ;;  %v5664_v11 = vmax.f32 %v5364_v17, 0.0  ;;  %v11256_v60 = vpop.f32.mrf.mxu0  ;;  %v6439_v57 = vsel %vm389_vm0, %v6177_v23, 0.0  ;;  %v11939_v45 = vld [vmem:[#allocation55_spill] sm:$0xff] }
 0x3a0   : > { %6782 = vst [vmem:[%s10874_s12 + $0x100] sm:$0xff] %v6654_v21  ;;  %v5366_v6 = vpop.f32.mrf.mxu1  ;;  %6440 = vadd.xlane.f32.xlu0 %v6439_v57  ;;  %v6339_v31 = vpop.xlane.xlu0 %6338  ;;  %v5794_v21 = vld [vmem:[#allocation2 + $0x240] sm:$0xff] }
 0x3a1   : > { %v5920_v26 = vadd.f32 %v5792_v0, %v5664_v11  ;;  %v5367_v14 = vadd.f32 %v5366_v6, %v4822_v15  ;;  %v6655_v41 = vmul.f32 0.0625, %v6339_v31  ;;  %v4887_v20 = vpop.f32.mrf.mxu0  ;;  %v4830_v15 = vadd.f32 %v11101_v56, %v11938_v39  ;;  %v8121_v6 = vld [vmem:[%s11747_s5 + $0x7a8] ss:$16 sps:$4 sm:$0xff]   ;;  %v8126_v56 = vld [vmem:[%s11747_s5 + $0x7cc] ss:$16 sps:$4 sm:$0xff]   ;;  %v11940_v39 = vld [vmem:[#allocation56_spill] sm:$0xff] }
 0x3a2   : > { %v5368_v19 = vpop.f32.mrf.mxu1  ;;  %v6178_v7 = vld [vmem:[#allocation2 + $0x220] sm:$0xff] }
 0x3a3   : > { %6049 = vst.msk [vmem:[#allocation2 + $0x230] sm:$0xff] %vm389_vm0, %v5920_v26  ;;  %v5665_v5 = vmax.f32 %v5367_v14, 0.0  ;;  %6783 = vst [vmem:[%s10874_s12 + $0x108] sm:$0xff] %v6655_v41  ;;  %v11270_v63 = vpop.f32.mrf.mxu0  ;;  %5562 = vmatmul.mubr.bf16.gmra.mxu1 %v8118_v30  ;;  %v6442_v37 = vsel %vm389_vm0, %v6178_v7, 0.0 }
 0x3a4   : > { %v5371_v32 = vpop.f32.mrf.mxu1  ;;  %6443 = vadd.xlane.f32.xlu1 %v6442_v37  ;;  %5569 = vmatprep.mubr.bf16.mxu1 %v8123_v43 }
 0x3a5   : > { %v5921_v17 = vadd.f32 %v5793_v18, %v5665_v5  ;;  %v5372_v12 = vadd.f32 %v5371_v32, %v4827_v44  ;;  %v6342_v9 = vpop.xlane.xlu1 %6341  ;;  %v4892_v0 = vpop.f32.mrf.mxu0  ;;  %v5795_v18 = vld [vmem:[#allocation2 + $0x248] sm:$0xff]  ;;  %v4835_v44 = vadd.f32 %v11121_v24, %v11939_v45 }
 0x3a6   : > { %v6656_v4 = vmul.f32 0.0625, %v6342_v9  ;;  %v5373_v2 = vpop.f32.mrf.mxu1  ;;  %v6179_v23 = vld [vmem:[#allocation2 + $0x228] sm:$0xff] }
 0x3a7   : > { %6050 = vst.msk [vmem:[#allocation2 + $0x238] sm:$0xff] %vm389_vm0, %v5921_v17  ;;  %v5666_v11 = vmax.f32 %v5372_v12, 0.0  ;;  %v11276_v57 = vpop.f32.mrf.mxu0  ;;  %v6445_v30 = vsel %vm389_vm0, %v6179_v23, 0.0  ;;  %v11941_v45 = vld [vmem:[#allocation57_spill] sm:$0xff] }
 0x3a8   : > { %6784 = vst [vmem:[%s10874_s12 + $0x110] sm:$0xff] %v6656_v4  ;;  %v5374_v31 = vpop.f32.mrf.mxu1  ;;  %6446 = vadd.xlane.f32.xlu0 %v6445_v30  ;;  %v6345_v43 = vpop.xlane.xlu0 %6344  ;;  %v5796_v4 = vld [vmem:[#allocation2 + $0x250] sm:$0xff] }
 0x3a9   : > { %v5922_v26 = vadd.f32 %v5794_v21, %v5666_v11  ;;  %v5375_v14 = vadd.f32 %v5374_v31, %v4830_v15  ;;  %v6657_v41 = vmul.f32 0.0625, %v6345_v43  ;;  %v4895_v20 = vpop.f32.mrf.mxu0  ;;  %v4838_v15 = vadd.f32 %v11127_v53, %v11940_v39  ;;  %v8124_v31 = vld [vmem:[%s11747_s5 + $0x7c8] ss:$16 sps:$4 sm:$0xff]   ;;  %v8129_v53 = vld [vmem:[%s11747_s5 + $0x7ec] ss:$16 sps:$4 sm:$0xff]   ;;  %v11942_v39 = vld [vmem:[#allocation58_spill] sm:$0xff] }
 0x3aa   : > { %v5376_v19 = vpop.f32.mrf.mxu1  ;;  %v6180_v7 = vld [vmem:[#allocation2 + $0x230] sm:$0xff] }
 0x3ab   : > { %6051 = vst.msk [vmem:[#allocation2 + $0x240] sm:$0xff] %vm389_vm0, %v5922_v26  ;;  %v5667_v5 = vmax.f32 %v5375_v14, 0.0  ;;  %6785 = vst [vmem:[%s10874_s12 + $0x118] sm:$0xff] %v6657_v41  ;;  %v11290_v37 = vpop.f32.mrf.mxu0  ;;  %5570 = vmatmul.mubr.bf16.gmra.mxu1 %v8121_v6  ;;  %v6448_v32 = vsel %vm389_vm0, %v6180_v7, 0.0 }
 0x3ac   : > { %v5379_v17 = vpop.f32.mrf.mxu1  ;;  %6449 = vadd.xlane.f32.xlu1 %v6448_v32  ;;  %5577 = vmatprep.mubr.bf16.mxu1 %v8126_v56 }
 0x3ad   : > { %v5923_v12 = vadd.f32 %v5795_v18, %v5667_v5  ;;  %v5380_v9 = vadd.f32 %v5379_v17, %v4835_v44  ;;  %v6348_v0 = vpop.xlane.xlu1 %6347  ;;  %v4900_v21 = vpop.f32.mrf.mxu0  ;;  %v5797_v18 = vld [vmem:[#allocation2 + $0x258] sm:$0xff]  ;;  %v4843_v44 = vadd.f32 %v11147_v16, %v11941_v45 }
 0x3ae   : > { %v6658_v2 = vmul.f32 0.0625, %v6348_v0  ;;  %v5381_v24 = vpop.f32.mrf.mxu1  ;;  %v6181_v23 = vld [vmem:[#allocation2 + $0x238] sm:$0xff] }
 0x3af   : > { %6052 = vst.msk [vmem:[#allocation2 + $0x248] sm:$0xff] %vm389_vm0, %v5923_v12  ;;  %v5668_v11 = vmax.f32 %v5380_v9, 0.0  ;;  %v11296_v30 = vpop.f32.mrf.mxu0  ;;  %v6451_v6 = vsel %vm389_vm0, %v6181_v23, 0.0 }
 0x3b0   : > { %6786 = vst [vmem:[%s10874_s12 + $0x120] sm:$0xff] %v6658_v2  ;;  %v5382_v43 = vpop.f32.mrf.mxu1  ;;  %6452 = vadd.xlane.f32.xlu0 %v6451_v6  ;;  %v6351_v56 = vpop.xlane.xlu0 %6350  ;;  %v5798_v2 = vld [vmem:[#allocation2 + $0x260] sm:$0xff] }
 0x3b1   : > { %v5924_v26 = vadd.f32 %v5796_v4, %v5668_v11  ;;  %v5383_v14 = vadd.f32 %v5382_v43, %v4838_v15  ;;  %v6659_v41 = vmul.f32 0.0625, %v6351_v56  ;;  %v4903_v20 = vpop.f32.mrf.mxu0  ;;  %v4846_v15 = vadd.f32 %v11153_v42, %v11942_v39  ;;  %v8127_v43 = vld [vmem:[%s11747_s5 + $0x7e8] ss:$16 sps:$4 sm:$0xff]  }
 0x3b2   : > { %v5384_v19 = vpop.f32.mrf.mxu1  ;;  %v6182_v7 = vld [vmem:[#allocation2 + $0x240] sm:$0xff]  ;;  %v5799_v42 = vld [vmem:[#allocation2 + $0x268] sm:$0xff] }
 0x3b3   : > { %6053 = vst.msk [vmem:[#allocation2 + $0x250] sm:$0xff] %vm389_vm0, %v5924_v26  ;;  %v5669_v5 = vmax.f32 %v5383_v14, 0.0  ;;  %6787 = vst [vmem:[%s10874_s12 + $0x128] sm:$0xff] %v6659_v41  ;;  %v11310_v32 = vpop.f32.mrf.mxu0  ;;  %5578 = vmatmul.mubr.bf16.gmra.mxu1 %v8124_v31  ;;  %v6454_v17 = vsel %vm389_vm0, %v6182_v7, 0.0  ;;  %v11943_v7 = vld [vmem:[#allocation59_spill] sm:$0xff] }
 0x3b4   : > { %v5387_v12 = vpop.f32.mrf.mxu1  ;;  %6455 = vadd.xlane.f32.xlu1 %v6454_v17  ;;  %5585 = vmatprep.mubr.bf16.mxu1 %v8129_v53  ;;  %v4851_v45 = vadd.f32 %v11170_v49, %v11943_v7 }
 0x3b5   : > { %v5925_v9 = vadd.f32 %v5797_v18, %v5669_v5  ;;  %v5388_v0 = vadd.f32 %v5387_v12, %v4843_v44  ;;  %v6354_v21 = vpop.xlane.xlu1 %6353  ;;  %v4908_v4 = vpop.f32.mrf.mxu0 }
 0x3b6   : > { %v6660_v24 = vmul.f32 0.0625, %v6354_v21  ;;  %v5389_v16 = vpop.f32.mrf.mxu1  ;;  %v6183_v23 = vld [vmem:[#allocation2 + $0x248] sm:$0xff] }
 0x3b7   : > { %6054 = vst.msk [vmem:[#allocation2 + $0x258] sm:$0xff] %vm389_vm0, %v5925_v9  ;;  %v5670_v11 = vmax.f32 %v5388_v0, 0.0  ;;  %v11316_v6 = vpop.f32.mrf.mxu0  ;;  %v6457_v31 = vsel %vm389_vm0, %v6183_v23, 0.0  ;;  %v11944_v23 = vld [vmem:[#allocation60_spill] sm:$0xff] }
 0x3b8   : > { %6788 = vst [vmem:[%s10874_s12 + $0x130] sm:$0xff] %v6660_v24  ;;  %v5390_v56 = vpop.f32.mrf.mxu1  ;;  %6458 = vadd.xlane.f32.xlu0 %v6457_v31  ;;  %v4854_v39 = vadd.f32 %v11176_v34, %v11944_v23  ;;  %v11945_v34 = vld [vmem:[#allocation61_spill] sm:$0xff] }
 0x3b9   : > { %v5926_v53 = vadd.f32 %v5798_v2, %v5670_v11  ;;  %v5391_v26 = vadd.f32 %v5390_v56, %v4846_v15  ;;  %v6357_v14 = vpop.xlane.xlu0 %6356  ;;  %v4911_v41 = vpop.f32.mrf.mxu0  ;;  %v5800_v2 = vld [vmem:[#allocation2 + $0x270] sm:$0xff] }
 0x3ba   : > { %v6661_v20 = vmul.f32 0.0625, %v6357_v14  ;;  %v5392_v18 = vpop.f32.mrf.mxu1  ;;  %v6184_v19 = vld [vmem:[#allocation2 + $0x250] sm:$0xff]  ;;  %v5801_v41 = vld [vmem:[#allocation2 + $0x278] sm:$0xff] }
 0x3bb   : > { %6055 = vst.msk [vmem:[#allocation2 + $0x260] sm:$0xff] %vm389_vm0, %v5926_v53  ;;  %v5671_v44 = vmax.f32 %v5391_v26, 0.0  ;;  %v11326_v5 = vpop.f32.mrf.mxu0  ;;  %5586 = vmatmul.mubr.bf16.gmra.mxu1 %v8127_v43  ;;  %v6460_v17 = vsel %vm389_vm0, %v6184_v19, 0.0  ;;  %v4859_v19 = vadd.f32 %v11190_v28, %v11945_v34  ;;  %v11946_v28 = vld [vmem:[#allocation20_spill] sm:$0xff] }
 0x3bc   : > { %6789 = vst [vmem:[%s10874_s12 + $0x138] sm:$0xff] %v6661_v20  ;;  %v5395_v12 = vpop.f32.mrf.mxu1  ;;  %6461 = vadd.xlane.f32.xlu1 %v6460_v17 }
 0x3bd   : > { %v5927_v9 = vadd.f32 %v5799_v42, %v5671_v44  ;;  %v5396_v0 = vadd.f32 %v5395_v12, %v4851_v45  ;;  %v6360_v21 = vpop.xlane.xlu1 %6359  ;;  %v4916_v4 = vpop.f32.mrf.mxu0 }
 0x3be   : > { %v6662_v24 = vmul.f32 0.0625, %v6360_v21  ;;  %v5397_v16 = vpop.f32.mrf.mxu1  ;;  %v6185_v49 = vld [vmem:[#allocation2 + $0x258] sm:$0xff]  ;;  %v5802_v4 = vld [vmem:[#allocation2 + $0x280] sm:$0xff] }
 0x3bf   : > { %6056 = vst.msk [vmem:[#allocation2 + $0x268] sm:$0xff] %vm389_vm0, %v5927_v9  ;;  %v5672_v15 = vmax.f32 %v5396_v0, 0.0  ;;  %v11333_v11 = vpop.f32.mrf.mxu0  ;;  %v6463_v31 = vsel %vm389_vm0, %v6185_v49, 0.0  ;;  %v4862_v49 = vadd.f32 %v11196_v50, %v11946_v28  ;;  %v11947_v50 = vld [vmem:[#allocation18_spill] sm:$0xff] }
 0x3c0   : > { %6790 = vst [vmem:[%s10874_s12 + $0x140] sm:$0xff] %v6662_v24  ;;  %v5398_v43 = vpop.f32.mrf.mxu1  ;;  %6464 = vadd.xlane.f32.xlu0 %v6463_v31 }
 0x3c1   : > { %v5928_v56 = vadd.f32 %v5800_v2, %v5672_v15  ;;  %v5399_v53 = vadd.f32 %v5398_v43, %v4854_v39  ;;  %v6363_v26 = vpop.xlane.xlu0 %6362  ;;  %v4919_v14 = vpop.f32.mrf.mxu0 }
 0x3c2   : > { %v6663_v42 = vmul.f32 0.0625, %v6363_v26  ;;  %v5400_v20 = vpop.f32.mrf.mxu1  ;;  %v6186_v18 = vld [vmem:[#allocation2 + $0x260] sm:$0xff]  ;;  %v5803_v14 = vld [vmem:[#allocation2 + $0x288] sm:$0xff] }
 0x3c3   : > { %6057 = vst.msk [vmem:[#allocation2 + $0x270] sm:$0xff] %vm389_vm0, %v5928_v56  ;;  %v5673_v7 = vmax.f32 %v5399_v53, 0.0  ;;  %v11340_v45 = vpop.f32.mrf.mxu0  ;;  %v6466_v44 = vsel %vm389_vm0, %v6186_v18, 0.0  ;;  %v4867_v18 = vadd.f32 %v11210_v29, %v11947_v50  ;;  %v11948_v29 = vld [vmem:[#allocation21_spill] sm:$0xff] }
 0x3c4   : > { %6791 = vst [vmem:[%s10874_s12 + $0x148] sm:$0xff] %v6663_v42  ;;  %v5403_v17 = vpop.f32.mrf.mxu1  ;;  %6467 = vadd.xlane.f32.xlu1 %v6466_v44 }
 0x3c5   : > { %v5929_v12 = vadd.f32 %v5801_v41, %v5673_v7  ;;  %v5404_v9 = vadd.f32 %v5403_v17, %v4859_v19  ;;  %v6366_v0 = vpop.xlane.xlu1 %6365  ;;  %v4924_v21 = vpop.f32.mrf.mxu0 }
 0x3c6   : > { %v6664_v2 = vmul.f32 0.0625, %v6366_v0  ;;  %v5405_v24 = vpop.f32.mrf.mxu1  ;;  %v6187_v16 = vld [vmem:[#allocation2 + $0x268] sm:$0xff]  ;;  %v5804_v21 = vld [vmem:[#allocation2 + $0x290] sm:$0xff] }
 0x3c7   : > { %6058 = vst.msk [vmem:[#allocation2 + $0x278] sm:$0xff] %vm389_vm0, %v5929_v12  ;;  %v5674_v23 = vmax.f32 %v5404_v9, 0.0  ;;  %v11347_v39 = vpop.f32.mrf.mxu0  ;;  %v6469_v15 = vsel %vm389_vm0, %v6187_v16, 0.0  ;;  %v4870_v16 = vadd.f32 %v11216_v10, %v11948_v29  ;;  %v11949_v10 = vld [vmem:[#allocation62_spill] sm:$0xff] }
 0x3c8   : > { %6792 = vst [vmem:[%s10874_s12 + $0x150] sm:$0xff] %v6664_v2  ;;  %v5406_v31 = vpop.f32.mrf.mxu1  ;;  %6470 = vadd.xlane.f32.xlu0 %v6469_v15 }
 0x3c9   : > { %v5930_v43 = vadd.f32 %v5802_v4, %v5674_v23  ;;  %v5407_v56 = vadd.f32 %v5406_v31, %v4862_v49  ;;  %v6369_v53 = vpop.xlane.xlu0 %6368  ;;  %v4927_v26 = vpop.f32.mrf.mxu0 }
 0x3ca   : > { %v6665_v41 = vmul.f32 0.0625, %v6369_v53  ;;  %v5408_v42 = vpop.f32.mrf.mxu1  ;;  %v6188_v20 = vld [vmem:[#allocation2 + $0x270] sm:$0xff]  ;;  %v5805_v26 = vld [vmem:[#allocation2 + $0x298] sm:$0xff] }
 0x3cb   : > { %6059 = vst.msk [vmem:[#allocation2 + $0x280] sm:$0xff] %vm389_vm0, %v5930_v43  ;;  %v5675_v34 = vmax.f32 %v5407_v56, 0.0  ;;  %v11354_v19 = vpop.f32.mrf.mxu0  ;;  %v6472_v7 = vsel %vm389_vm0, %v6188_v20, 0.0  ;;  %v4875_v20 = vadd.f32 %v11230_v13, %v11949_v10  ;;  %v11950_v13 = vld [vmem:[#allocation16_spill] sm:$0xff] }
 0x3cc   : > { %6793 = vst [vmem:[%s10874_s12 + $0x158] sm:$0xff] %v6665_v41  ;;  %v5411_v44 = vpop.f32.mrf.mxu1  ;;  %6473 = vadd.xlane.f32.xlu1 %v6472_v7 }
 0x3cd   : > { %v5931_v17 = vadd.f32 %v5803_v14, %v5675_v34  ;;  %v5412_v12 = vadd.f32 %v5411_v44, %v4867_v18  ;;  %v6372_v9 = vpop.xlane.xlu1 %6371  ;;  %v4932_v0 = vpop.f32.mrf.mxu0 }
 0x3ce   : > { %v6666_v4 = vmul.f32 0.0625, %v6372_v9  ;;  %v5413_v2 = vpop.f32.mrf.mxu1  ;;  %v6189_v24 = vld [vmem:[#allocation2 + $0x278] sm:$0xff]  ;;  %v5806_v0 = vld [vmem:[#allocation2 + $0x2a0] sm:$0xff] }
 0x3cf   : > { %6060 = vst.msk [vmem:[#allocation2 + $0x288] sm:$0xff] %vm389_vm0, %v5931_v17  ;;  %v5676_v28 = vmax.f32 %v5412_v12, 0.0  ;;  %v11361_v49 = vpop.f32.mrf.mxu0  ;;  %v6475_v23 = vsel %vm389_vm0, %v6189_v24, 0.0  ;;  %v4878_v24 = vadd.f32 %v11236_v22, %v11950_v13  ;;  %v11951_v22 = vld [vmem:[#allocation19_spill] sm:$0xff] }
 0x3d0   : > { %6794 = vst [vmem:[%s10874_s12 + $0x160] sm:$0xff] %v6666_v4  ;;  %v5414_v15 = vpop.f32.mrf.mxu1  ;;  %6476 = vadd.xlane.f32.xlu0 %v6475_v23 }
 0x3d1   : > { %v5932_v31 = vadd.f32 %v5804_v21, %v5676_v28  ;;  %v5415_v43 = vadd.f32 %v5414_v15, %v4870_v16  ;;  %v6375_v56 = vpop.xlane.xlu0 %6374  ;;  %v4935_v53 = vpop.f32.mrf.mxu0 }
 0x3d2   : > { %v6667_v14 = vmul.f32 0.0625, %v6375_v56  ;;  %v5416_v41 = vpop.f32.mrf.mxu1  ;;  %v6190_v42 = vld [vmem:[#allocation2 + $0x280] sm:$0xff]  ;;  %v5807_v53 = vld [vmem:[#allocation2 + $0x2a8] sm:$0xff] }
 0x3d3   : > { %6061 = vst.msk [vmem:[#allocation2 + $0x290] sm:$0xff] %vm389_vm0, %v5932_v31  ;;  %v5677_v50 = vmax.f32 %v5415_v43, 0.0  ;;  %v11368_v18 = vpop.f32.mrf.mxu0  ;;  %v6478_v34 = vsel %vm389_vm0, %v6190_v42, 0.0  ;;  %v4883_v42 = vadd.f32 %v11250_v55, %v11951_v22  ;;  %v11952_v55 = vld [vmem:[#allocation14_spill] sm:$0xff] }
 0x3d4   : > { %6795 = vst [vmem:[%s10874_s12 + $0x168] sm:$0xff] %v6667_v14  ;;  %v5419_v7 = vpop.f32.mrf.mxu1  ;;  %6479 = vadd.xlane.f32.xlu1 %v6478_v34 }
 0x3d5   : > { %v5933_v44 = vadd.f32 %v5805_v26, %v5677_v50  ;;  %v5420_v17 = vadd.f32 %v5419_v7, %v4875_v20  ;;  %v6378_v12 = vpop.xlane.xlu1 %6377  ;;  %v4940_v9 = vpop.f32.mrf.mxu0 }
 0x3d6   : > { %v6668_v21 = vmul.f32 0.0625, %v6378_v12  ;;  %v5421_v4 = vpop.f32.mrf.mxu1  ;;  %v6191_v2 = vld [vmem:[#allocation2 + $0x288] sm:$0xff]  ;;  %v5808_v9 = vld [vmem:[#allocation2 + $0x2b0] sm:$0xff] }
 0x3d7   : > { %6062 = vst.msk [vmem:[#allocation2 + $0x298] sm:$0xff] %vm389_vm0, %v5933_v44  ;;  %v5678_v29 = vmax.f32 %v5420_v17, 0.0  ;;  %v11375_v16 = vpop.f32.mrf.mxu0  ;;  %v6481_v28 = vsel %vm389_vm0, %v6191_v2, 0.0  ;;  %v4886_v2 = vadd.f32 %v11256_v60, %v11952_v55  ;;  %v11953_v60 = vld [vmem:[#allocation63_spill] sm:$0xff] }
 0x3d8   : > { %6796 = vst [vmem:[%s10874_s12 + $0x170] sm:$0xff] %v6668_v21  ;;  %v5422_v23 = vpop.f32.mrf.mxu1  ;;  %6482 = vadd.xlane.f32.xlu0 %v6481_v28 }
 0x3d9   : > { %v5934_v15 = vadd.f32 %v5806_v0, %v5678_v29  ;;  %v5423_v31 = vadd.f32 %v5422_v23, %v4878_v24  ;;  %v6381_v43 = vpop.xlane.xlu0 %6380  ;;  %v4943_v56 = vpop.f32.mrf.mxu0 }
 0x3da   : > { %v6669_v26 = vmul.f32 0.0625, %v6381_v43  ;;  %v5424_v14 = vpop.f32.mrf.mxu1  ;;  %v6192_v41 = vld [vmem:[#allocation2 + $0x290] sm:$0xff]  ;;  %v5809_v56 = vld [vmem:[#allocation2 + $0x2b8] sm:$0xff] }
 0x3db   : > { %6063 = vst.msk [vmem:[#allocation2 + $0x2a0] sm:$0xff] %vm389_vm0, %v5934_v15  ;;  %v5679_v10 = vmax.f32 %v5423_v31, 0.0  ;;  %v11382_v20 = vpop.f32.mrf.mxu0  ;;  %v6484_v50 = vsel %vm389_vm0, %v6192_v41, 0.0  ;;  %v4891_v41 = vadd.f32 %v11270_v63, %v11953_v60  ;;  %v11954_v63 = vld [vmem:[#allocation17_spill] sm:$0xff] }
 0x3dc   : > { %6797 = vst [vmem:[%s10874_s12 + $0x178] sm:$0xff] %v6669_v26  ;;  %v5427_v34 = vpop.f32.mrf.mxu1  ;;  %6485 = vadd.xlane.f32.xlu1 %v6484_v50 }
 0x3dd   : > { %v5935_v7 = vadd.f32 %v5807_v53, %v5679_v10  ;;  %v5428_v44 = vadd.f32 %v5427_v34, %v4883_v42  ;;  %v6384_v17 = vpop.xlane.xlu1 %6383  ;;  %v4948_v12 = vpop.f32.mrf.mxu0 }
 0x3de   : > { %v6670_v0 = vmul.f32 0.0625, %v6384_v17  ;;  %v5429_v21 = vpop.f32.mrf.mxu1  ;;  %v6193_v4 = vld [vmem:[#allocation2 + $0x298] sm:$0xff]  ;;  %v5810_v12 = vld [vmem:[#allocation2 + $0x2c0] sm:$0xff] }
 0x3df   : > { %6064 = vst.msk [vmem:[#allocation2 + $0x2a8] sm:$0xff] %vm389_vm0, %v5935_v7  ;;  %v5680_v13 = vmax.f32 %v5428_v44, 0.0  ;;  %v11389_v24 = vpop.f32.mrf.mxu0  ;;  %v6487_v29 = vsel %vm389_vm0, %v6193_v4, 0.0  ;;  %v4894_v4 = vadd.f32 %v11276_v57, %v11954_v63  ;;  %v11955_v57 = vld [vmem:[#allocation12_spill] sm:$0xff] }
 0x3e0   : > { %6798 = vst [vmem:[%s10874_s12 + $0x180] sm:$0xff] %v6670_v0  ;;  %v5430_v28 = vpop.f32.mrf.mxu1  ;;  %6488 = vadd.xlane.f32.xlu0 %v6487_v29 }
 0x3e1   : > { %v5936_v23 = vadd.f32 %v5808_v9, %v5680_v13  ;;  %v5431_v15 = vadd.f32 %v5430_v28, %v4886_v2  ;;  %v6387_v31 = vpop.xlane.xlu0 %6386  ;;  %v4951_v43 = vpop.f32.mrf.mxu0 }
 0x3e2   : > { %v6671_v53 = vmul.f32 0.0625, %v6387_v31  ;;  %v5432_v26 = vpop.f32.mrf.mxu1  ;;  %v6194_v14 = vld [vmem:[#allocation2 + $0x2a0] sm:$0xff]  ;;  %v5811_v43 = vld [vmem:[#allocation2 + $0x2c8] sm:$0xff] }
 0x3e3   : > { %6065 = vst.msk [vmem:[#allocation2 + $0x2b0] sm:$0xff] %vm389_vm0, %v5936_v23  ;;  %v5681_v22 = vmax.f32 %v5431_v15, 0.0  ;;  %v11396_v42 = vpop.f32.mrf.mxu0  ;;  %v6490_v10 = vsel %vm389_vm0, %v6194_v14, 0.0  ;;  %v4899_v14 = vadd.f32 %v11290_v37, %v11955_v57  ;;  %v11956_v37 = vld [vmem:[#allocation15_spill] sm:$0xff] }
 0x3e4   : > { %6799 = vst [vmem:[%s10874_s12 + $0x188] sm:$0xff] %v6671_v53  ;;  %v5435_v50 = vpop.f32.mrf.mxu1  ;;  %6491 = vadd.xlane.f32.xlu1 %v6490_v10 }
 0x3e5   : > { %v5937_v34 = vadd.f32 %v5809_v56, %v5681_v22  ;;  %v5436_v7 = vadd.f32 %v5435_v50, %v4891_v41  ;;  %v6390_v44 = vpop.xlane.xlu1 %6389  ;;  %v4956_v17 = vpop.f32.mrf.mxu0 }
 0x3e6   : > { %v6672_v9 = vmul.f32 0.0625, %v6390_v44  ;;  %v5437_v0 = vpop.f32.mrf.mxu1  ;;  %v6195_v21 = vld [vmem:[#allocation2 + $0x2a8] sm:$0xff]  ;;  %v5812_v17 = vld [vmem:[#allocation2 + $0x2d0] sm:$0xff] }
 0x3e7   : > { %6066 = vst.msk [vmem:[#allocation2 + $0x2b8] sm:$0xff] %vm389_vm0, %v5937_v34  ;;  %v5682_v55 = vmax.f32 %v5436_v7, 0.0  ;;  %v11403_v2 = vpop.f32.mrf.mxu0  ;;  %v6493_v13 = vsel %vm389_vm0, %v6195_v21, 0.0  ;;  %v4902_v21 = vadd.f32 %v11296_v30, %v11956_v37  ;;  %v11957_v30 = vld [vmem:[#allocation64_spill] sm:$0xff] }
 0x3e8   : > { %6800 = vst [vmem:[%s10874_s12 + $0x190] sm:$0xff] %v6672_v9  ;;  %v5438_v29 = vpop.f32.mrf.mxu1  ;;  %6494 = vadd.xlane.f32.xlu0 %v6493_v13 }
 0x3e9   : > { %v5938_v28 = vadd.f32 %v5810_v12, %v5682_v55  ;;  %v5439_v23 = vadd.f32 %v5438_v29, %v4894_v4  ;;  %v6393_v15 = vpop.xlane.xlu0 %6392  ;;  %v4959_v31 = vpop.f32.mrf.mxu0 }
 0x3ea   : > { %v6673_v56 = vmul.f32 0.0625, %v6393_v15  ;;  %v5440_v53 = vpop.f32.mrf.mxu1  ;;  %v6196_v26 = vld [vmem:[#allocation2 + $0x2b0] sm:$0xff]  ;;  %v5813_v31 = vld [vmem:[#allocation2 + $0x2d8] sm:$0xff] }
 0x3eb   : > { %6067 = vst.msk [vmem:[#allocation2 + $0x2c0] sm:$0xff] %vm389_vm0, %v5938_v28  ;;  %v5683_v60 = vmax.f32 %v5439_v23, 0.0  ;;  %v11410_v41 = vpop.f32.mrf.mxu0  ;;  %v6496_v22 = vsel %vm389_vm0, %v6196_v26, 0.0  ;;  %v4907_v26 = vadd.f32 %v11310_v32, %v11957_v30  ;;  %v11958_v32 = vld [vmem:[#allocation23_spill] sm:$0xff] }
 0x3ec   : > { %6801 = vst [vmem:[%s10874_s12 + $0x198] sm:$0xff] %v6673_v56  ;;  %v5443_v10 = vpop.f32.mrf.mxu1  ;;  %6497 = vadd.xlane.f32.xlu1 %v6496_v22 }
 0x3ed   : > { %v5939_v50 = vadd.f32 %v5811_v43, %v5683_v60  ;;  %v5444_v34 = vadd.f32 %v5443_v10, %v4899_v14  ;;  %v6396_v7 = vpop.xlane.xlu1 %6395  ;;  %v4964_v44 = vpop.f32.mrf.mxu0 }
 0x3ee   : > { %v6674_v12 = vmul.f32 0.0625, %v6396_v7  ;;  %v5445_v9 = vpop.f32.mrf.mxu1  ;;  %v6197_v0 = vld [vmem:[#allocation2 + $0x2b8] sm:$0xff]  ;;  %v5814_v44 = vld [vmem:[#allocation2 + $0x2e0] sm:$0xff] }
 0x3ef   : > { %6068 = vst.msk [vmem:[#allocation2 + $0x2c8] sm:$0xff] %vm389_vm0, %v5939_v50  ;;  %v5684_v63 = vmax.f32 %v5444_v34, 0.0  ;;  %v11417_v4 = vpop.f32.mrf.mxu0  ;;  %v6499_v55 = vsel %vm389_vm0, %v6197_v0, 0.0  ;;  %v4910_v0 = vadd.f32 %v11316_v6, %v11958_v32  ;;  %v11959_v6 = vld [vmem:[#allocation13_spill] sm:$0xff] }
 0x3f0   : > { %6802 = vst [vmem:[%s10874_s12 + $0x1a0] sm:$0xff] %v6674_v12  ;;  %v5446_v13 = vpop.f32.mrf.mxu1  ;;  %6500 = vadd.xlane.f32.xlu0 %v6499_v55 }
 0x3f1   : > { %v5940_v29 = vadd.f32 %v5812_v17, %v5684_v63  ;;  %v5447_v28 = vadd.f32 %v5446_v13, %v4902_v21  ;;  %v6399_v23 = vpop.xlane.xlu0 %6398  ;;  %v4967_v15 = vpop.f32.mrf.mxu0 }
 0x3f2   : > { %v6675_v43 = vmul.f32 0.0625, %v6399_v23  ;;  %v5448_v56 = vpop.f32.mrf.mxu1  ;;  %v6198_v53 = vld [vmem:[#allocation2 + $0x2c0] sm:$0xff]  ;;  %v5815_v15 = vld [vmem:[#allocation2 + $0x2e8] sm:$0xff] }
 0x3f3   : > { %6069 = vst.msk [vmem:[#allocation2 + $0x2d0] sm:$0xff] %vm389_vm0, %v5940_v29  ;;  %v5685_v57 = vmax.f32 %v5447_v28, 0.0  ;;  %v11424_v14 = vpop.f32.mrf.mxu0  ;;  %v6502_v60 = vsel %vm389_vm0, %v6198_v53, 0.0  ;;  %v4915_v53 = vadd.f32 %v11326_v5, %v11959_v6  ;;  %v11960_v5 = vld [vmem:[#allocation25_spill] sm:$0xff] }
 0x3f4   : > { %6803 = vst [vmem:[%s10874_s12 + $0x1a8] sm:$0xff] %v6675_v43  ;;  %v5451_v22 = vpop.f32.mrf.mxu1  ;;  %6503 = vadd.xlane.f32.xlu1 %v6502_v60 }
 0x3f5   : > { %v5941_v10 = vadd.f32 %v5813_v31, %v5685_v57  ;;  %v5452_v50 = vadd.f32 %v5451_v22, %v4907_v26  ;;  %v6402_v34 = vpop.xlane.xlu1 %6401  ;;  %v4972_v7 = vpop.f32.mrf.mxu0 }
 0x3f6   : > { %v6676_v17 = vmul.f32 0.0625, %v6402_v34  ;;  %v5453_v12 = vpop.f32.mrf.mxu1  ;;  %v6199_v9 = vld [vmem:[#allocation2 + $0x2c8] sm:$0xff]  ;;  %v5816_v7 = vld [vmem:[#allocation2 + $0x2f0] sm:$0xff] }
 0x3f7   : > { %6070 = vst.msk [vmem:[#allocation2 + $0x2d8] sm:$0xff] %vm389_vm0, %v5941_v10  ;;  %v5686_v37 = vmax.f32 %v5452_v50, 0.0  ;;  %v11431_v21 = vpop.f32.mrf.mxu0  ;;  %v6505_v63 = vsel %vm389_vm0, %v6199_v9, 0.0  ;;  %v4918_v9 = vadd.f32 %v11333_v11, %v11960_v5  ;;  %v11961_v11 = vld [vmem:[#allocation65_spill] sm:$0xff] }
 0x3f8   : > { %6804 = vst [vmem:[%s10874_s12 + $0x1b0] sm:$0xff] %v6676_v17  ;;  %v5454_v55 = vpop.f32.mrf.mxu1  ;;  %6506 = vadd.xlane.f32.xlu0 %v6505_v63 }
 0x3f9   : > { %v5942_v13 = vadd.f32 %v5814_v44, %v5686_v37  ;;  %v5455_v29 = vadd.f32 %v5454_v55, %v4910_v0  ;;  %v6405_v28 = vpop.xlane.xlu0 %6404  ;;  %v4975_v23 = vpop.f32.mrf.mxu0 }
 0x3fa   : > { %v6677_v31 = vmul.f32 0.0625, %v6405_v28  ;;  %v5456_v43 = vpop.f32.mrf.mxu1  ;;  %v6200_v56 = vld [vmem:[#allocation2 + $0x2d0] sm:$0xff]  ;;  %v5817_v23 = vld [vmem:[#allocation2 + $0x2f8] sm:$0xff] }
 0x3fb   : > { %6071 = vst.msk [vmem:[#allocation2 + $0x2e0] sm:$0xff] %vm389_vm0, %v5942_v13  ;;  %v5687_v30 = vmax.f32 %v5455_v29, 0.0  ;;  %v11438_v26 = vpop.f32.mrf.mxu0  ;;  %v6508_v57 = vsel %vm389_vm0, %v6200_v56, 0.0  ;;  %v4923_v56 = vadd.f32 %v11340_v45, %v11961_v11  ;;  %v11962_v45 = vld [vmem:[#allocation22_spill] sm:$0xff] }
 0x3fc   : > { %6805 = vst [vmem:[%s10874_s12 + $0x1b8] sm:$0xff] %v6677_v31  ;;  %v5459_v60 = vpop.f32.mrf.mxu1  ;;  %6509 = vadd.xlane.f32.xlu1 %v6508_v57 }
 0x3fd   : > { %v5943_v22 = vadd.f32 %v5815_v15, %v5687_v30  ;;  %v5460_v10 = vadd.f32 %v5459_v60, %v4915_v53  ;;  %v6408_v50 = vpop.xlane.xlu1 %6407  ;;  %v4980_v34 = vpop.f32.mrf.mxu0 }
 0x3fe   : > { %v6678_v44 = vmul.f32 0.0625, %v6408_v50  ;;  %v5461_v17 = vpop.f32.mrf.mxu1  ;;  %v6201_v12 = vld [vmem:[#allocation2 + $0x2d8] sm:$0xff]  ;;  %v5818_v34 = vld [vmem:[#allocation2 + $0x300] sm:$0xff] }
 0x3ff   : > { %6072 = vst.msk [vmem:[#allocation2 + $0x2e8] sm:$0xff] %vm389_vm0, %v5943_v22  ;;  %v5688_v32 = vmax.f32 %v5460_v10, 0.0  ;;  %v11445_v0 = vpop.f32.mrf.mxu0  ;;  %v6511_v37 = vsel %vm389_vm0, %v6201_v12, 0.0  ;;  %v4926_v12 = vadd.f32 %v11347_v39, %v11962_v45  ;;  %v11963_v39 = vld [vmem:[#allocation26_spill] sm:$0xff] }
 0x400   : > { %6806 = vst [vmem:[%s10874_s12 + $0x1c0] sm:$0xff] %v6678_v44  ;;  %v5462_v63 = vpop.f32.mrf.mxu1  ;;  %6512 = vadd.xlane.f32.xlu0 %v6511_v37 }
 0x401   : > { %v5944_v55 = vadd.f32 %v5816_v7, %v5688_v32  ;;  %v5463_v13 = vadd.f32 %v5462_v63, %v4918_v9  ;;  %v6411_v29 = vpop.xlane.xlu0 %6410  ;;  %v4983_v28 = vpop.f32.mrf.mxu0 }
 0x402   : > { %v6679_v15 = vmul.f32 0.0625, %v6411_v29  ;;  %v5464_v31 = vpop.f32.mrf.mxu1  ;;  %v6202_v43 = vld [vmem:[#allocation2 + $0x2e0] sm:$0xff]  ;;  %v5819_v28 = vld [vmem:[#allocation2 + $0x308] sm:$0xff] }
 0x403   : > { %6073 = vst.msk [vmem:[#allocation2 + $0x2f0] sm:$0xff] %vm389_vm0, %v5944_v55  ;;  %v5689_v6 = vmax.f32 %v5463_v13, 0.0  ;;  %v11452_v53 = vpop.f32.mrf.mxu0  ;;  %v6514_v30 = vsel %vm389_vm0, %v6202_v43, 0.0  ;;  %v4931_v43 = vadd.f32 %v11354_v19, %v11963_v39  ;;  %v11964_v19 = vld [vmem:[#allocation24_spill] sm:$0xff] }
 0x404   : > { %6807 = vst [vmem:[%s10874_s12 + $0x1c8] sm:$0xff] %v6679_v15  ;;  %v5467_v57 = vpop.f32.mrf.mxu1  ;;  %6515 = vadd.xlane.f32.xlu1 %v6514_v30 }
 0x405   : > { %v5945_v60 = vadd.f32 %v5817_v23, %v5689_v6  ;;  %v5468_v22 = vadd.f32 %v5467_v57, %v4923_v56  ;;  %v6414_v10 = vpop.xlane.xlu1 %6413  ;;  %v4988_v50 = vpop.f32.mrf.mxu0 }
 0x406   : > { %v6680_v7 = vmul.f32 0.0625, %v6414_v10  ;;  %v5469_v44 = vpop.f32.mrf.mxu1  ;;  %v6203_v17 = vld [vmem:[#allocation2 + $0x2e8] sm:$0xff]  ;;  %v5820_v50 = vld [vmem:[#allocation2 + $0x310] sm:$0xff] }
 0x407   : > { %6074 = vst.msk [vmem:[#allocation2 + $0x2f8] sm:$0xff] %vm389_vm0, %v5945_v60  ;;  %v5690_v5 = vmax.f32 %v5468_v22, 0.0  ;;  %v11459_v9 = vpop.f32.mrf.mxu0  ;;  %v6517_v32 = vsel %vm389_vm0, %v6203_v17, 0.0  ;;  %v4934_v17 = vadd.f32 %v11361_v49, %v11964_v19  ;;  %v11965_v49 = vld [vmem:[#allocation66_spill] sm:$0xff] }
 0x408   : > { %6808 = vst [vmem:[%s10874_s12 + $0x1d0] sm:$0xff] %v6680_v7  ;;  %v5470_v37 = vpop.f32.mrf.mxu1  ;;  %6518 = vadd.xlane.f32.xlu0 %v6517_v32 }
 0x409   : > { %v5946_v63 = vadd.f32 %v5818_v34, %v5690_v5  ;;  %v5471_v55 = vadd.f32 %v5470_v37, %v4926_v12  ;;  %v6417_v13 = vpop.xlane.xlu0 %6416  ;;  %v4991_v29 = vpop.f32.mrf.mxu0 }
 0x40a   : > { %v6681_v23 = vmul.f32 0.0625, %v6417_v13  ;;  %v5472_v15 = vpop.f32.mrf.mxu1  ;;  %v6204_v31 = vld [vmem:[#allocation2 + $0x2f0] sm:$0xff]  ;;  %v5821_v29 = vld [vmem:[#allocation2 + $0x318] sm:$0xff] }
 0x40b   : > { %6075 = vst.msk [vmem:[#allocation2 + $0x300] sm:$0xff] %vm389_vm0, %v5946_v63  ;;  %v5691_v11 = vmax.f32 %v5471_v55, 0.0  ;;  %v11466_v56 = vpop.f32.mrf.mxu0  ;;  %v6520_v6 = vsel %vm389_vm0, %v6204_v31, 0.0  ;;  %v4939_v31 = vadd.f32 %v11368_v18, %v11965_v49  ;;  %v4942_v18 = vadd.f32 %v11375_v16, %v10565_v61  ;;  %v11966_v61 = vld [vmem:[#allocation28_spill] sm:$0xff] }
 0x40c   : > { %6809 = vst [vmem:[%s10874_s12 + $0x1d8] sm:$0xff] %v6681_v23  ;;  %v5475_v30 = vpop.f32.mrf.mxu1  ;;  %6521 = vadd.xlane.f32.xlu1 %v6520_v6  ;;  %v4947_v16 = vadd.f32 %v11382_v20, %v11966_v61  ;;  %v4950_v20 = vadd.f32 %v11389_v24, %v10593_v48  ;;  %v4955_v48 = vadd.f32 %v11396_v42, %v10595_v46  ;;  %v11967_v46 = vld [vmem:[#allocation27_spill] sm:$0xff] }
 0x40d   : > { %v5947_v57 = vadd.f32 %v5819_v28, %v5691_v11  ;;  %v5476_v60 = vadd.f32 %v5475_v30, %v4931_v43  ;;  %v6420_v22 = vpop.xlane.xlu1 %6419  ;;  %v4996_v10 = vpop.f32.mrf.mxu0  ;;  %v4958_v42 = vadd.f32 %v11403_v2, %v11967_v46  ;;  %v4963_v2 = vadd.f32 %v11410_v41, %v10623_v36 }
 0x40e   : > { %v6682_v34 = vmul.f32 0.0625, %v6420_v22  ;;  %v5477_v7 = vpop.f32.mrf.mxu1  ;;  %v6205_v44 = vld [vmem:[#allocation2 + $0x2f8] sm:$0xff]  ;;  %v5822_v10 = vld [vmem:[#allocation2 + $0x320] sm:$0xff]  ;;  %v4966_v36 = vadd.f32 %v11417_v4, %v10637_v52 }
 0x40f   : > { %6076 = vst.msk [vmem:[#allocation2 + $0x308] sm:$0xff] %vm389_vm0, %v5947_v57  ;;  %v5692_v45 = vmax.f32 %v5476_v60, 0.0  ;;  %v11473_v12 = vpop.f32.mrf.mxu0  ;;  %v6523_v5 = vsel %vm389_vm0, %v6205_v44, 0.0  ;;  %v11968_v52 = vld [vmem:[#allocation67_spill] sm:$0xff] }
 0x410   : > { %6810 = vst [vmem:[%s10874_s12 + $0x1e0] sm:$0xff] %v6682_v34  ;;  %v5478_v32 = vpop.f32.mrf.mxu1  ;;  %6524 = vadd.xlane.f32.xlu0 %v6523_v5  ;;  %v4971_v4 = vadd.f32 %v11424_v14, %v11968_v52  ;;  %v4974_v14 = vadd.f32 %v11431_v21, %v10653_v35  ;;  %v4979_v35 = vadd.f32 %v11438_v26, %v10667_v3  ;;  %v5832_v52 = vld [vmem:[#allocation2 + $0x370] sm:$0xff] }
 0x411   : > { %v5948_v37 = vadd.f32 %v5820_v50, %v5692_v45  ;;  %v5479_v63 = vadd.f32 %v5478_v32, %v4934_v17  ;;  %v6423_v55 = vpop.xlane.xlu0 %6422  ;;  %v4999_v13 = vpop.f32.mrf.mxu0  ;;  %v4982_v3 = vadd.f32 %v11445_v0, %v10681_v51  ;;  %v4987_v51 = vadd.f32 %v11452_v53, %v10683_v33 }
 0x412   : > { %v6683_v28 = vmul.f32 0.0625, %v6423_v55  ;;  %v5480_v23 = vpop.f32.mrf.mxu1  ;;  %v6206_v15 = vld [vmem:[#allocation2 + $0x300] sm:$0xff]  ;;  %v5823_v55 = vld [vmem:[#allocation2 + $0x328] sm:$0xff] }
 0x413   : > { %6077 = vst.msk [vmem:[#allocation2 + $0x310] sm:$0xff] %vm389_vm0, %v5948_v37  ;;  %v5693_v39 = vmax.f32 %v5479_v63, 0.0  ;;  %v11480_v43 = vpop.f32.mrf.mxu0  ;;  %v6526_v11 = vsel %vm389_vm0, %v6206_v15, 0.0 }
 0x414   : > { %6811 = vst [vmem:[%s10874_s12 + $0x1e8] sm:$0xff] %v6683_v28  ;;  %v5483_v6 = vpop.f32.mrf.mxu1  ;;  %6527 = vadd.xlane.f32.xlu1 %v6526_v11 }
 0x415   : > { %v5949_v30 = vadd.f32 %v5821_v29, %v5693_v39  ;;  %v5484_v57 = vadd.f32 %v5483_v6, %v4939_v31  ;;  %v6426_v60 = vpop.xlane.xlu1 %6425  ;;  %v5004_v22 = vpop.f32.mrf.mxu0 }
 0x416   : > { %v6684_v50 = vmul.f32 0.0625, %v6426_v60  ;;  %v5485_v34 = vpop.f32.mrf.mxu1  ;;  %v6207_v7 = vld [vmem:[#allocation2 + $0x308] sm:$0xff] }
 0x417   : > { %6078 = vst.msk [vmem:[#allocation2 + $0x318] sm:$0xff] %vm389_vm0, %v5949_v30  ;;  %v5694_v44 = vmax.f32 %v5484_v57, 0.0  ;;  %v11487_v19 = vpop.f32.mrf.mxu0  ;;  %v6529_v17 = vsel %vm389_vm0, %v6207_v7, 0.0  ;;  %v5824_v57 = vld [vmem:[#allocation2 + $0x330] sm:$0xff] }
 0x418   : > { %6812 = vst [vmem:[%s10874_s12 + $0x1f0] sm:$0xff] %v6684_v50  ;;  %v5486_v45 = vpop.f32.mrf.mxu1  ;;  %6530 = vadd.xlane.f32.xlu0 %v6529_v17 }
 0x419   : > { %v5950_v5 = vadd.f32 %v5822_v10, %v5694_v44  ;;  %v5487_v32 = vadd.f32 %v5486_v45, %v4942_v18  ;;  %v6429_v37 = vpop.xlane.xlu0 %6428  ;;  %v5007_v63 = vpop.f32.mrf.mxu0 }
 0x41a   : > { %v6685_v13 = vmul.f32 0.0625, %v6429_v37  ;;  %v5488_v29 = vpop.f32.mrf.mxu1  ;;  %v6208_v28 = vld [vmem:[#allocation2 + $0x310] sm:$0xff] }
 0x41b   : > { %6079 = vst.msk [vmem:[#allocation2 + $0x320] sm:$0xff] %vm389_vm0, %v5950_v5  ;;  %v5695_v23 = vmax.f32 %v5487_v32, 0.0  ;;  %v11494_v15 = vpop.f32.mrf.mxu0  ;;  %v6532_v49 = vsel %vm389_vm0, %v6208_v28, 0.0  ;;  %v5825_v32 = vld [vmem:[#allocation2 + $0x338] sm:$0xff] }
 0x41c   : > { %6813 = vst [vmem:[%s10874_s12 + $0x1f8] sm:$0xff] %v6685_v13  ;;  %v5491_v31 = vpop.f32.mrf.mxu1  ;;  %6533 = vadd.xlane.f32.xlu1 %v6532_v49 }
 0x41d   : > { %v5951_v39 = vadd.f32 %v5823_v55, %v5695_v23  ;;  %v5492_v11 = vadd.f32 %v5491_v31, %v4947_v16  ;;  %v6432_v6 = vpop.xlane.xlu1 %6431  ;;  %v5012_v30 = vpop.f32.mrf.mxu0  ;;  %v5826_v31 = vld [vmem:[#allocation2 + $0x340] sm:$0xff] }
 0x41e   : > { %v6686_v60 = vmul.f32 0.0625, %v6432_v6  ;;  %v5493_v22 = vpop.f32.mrf.mxu1  ;;  %v6209_v10 = vld [vmem:[#allocation2 + $0x318] sm:$0xff] }
 0x41f   : > { %6080 = vst.msk [vmem:[#allocation2 + $0x328] sm:$0xff] %vm389_vm0, %v5951_v39  ;;  %v5696_v50 = vmax.f32 %v5492_v11, 0.0  ;;  %v11501_v34 = vpop.f32.mrf.mxu0  ;;  %v6535_v7 = vsel %vm389_vm0, %v6209_v10, 0.0 }
 0x420   : > { %6814 = vst [vmem:[%s10874_s12 + $0x200] sm:$0xff] %v6686_v60  ;;  %v5494_v18 = vpop.f32.mrf.mxu1  ;;  %6536 = vadd.xlane.f32.xlu0 %v6535_v7 }
 0x421   : > { %v5952_v44 = vadd.f32 %v5824_v57, %v5696_v50  ;;  %v5495_v17 = vadd.f32 %v5494_v18, %v4950_v20  ;;  %v6435_v45 = vpop.xlane.xlu0 %6434  ;;  %v5015_v5 = vpop.f32.mrf.mxu0  ;;  %v5827_v18 = vld [vmem:[#allocation2 + $0x348] sm:$0xff] }
 0x422   : > { %v6687_v37 = vmul.f32 0.0625, %v6435_v45  ;;  %v5496_v63 = vpop.f32.mrf.mxu1  ;;  %v6210_v55 = vld [vmem:[#allocation2 + $0x320] sm:$0xff] }
 0x423   : > { %6081 = vst.msk [vmem:[#allocation2 + $0x330] sm:$0xff] %vm389_vm0, %v5952_v44  ;;  %v5697_v24 = vmax.f32 %v5495_v17, 0.0  ;;  %v11508_v13 = vpop.f32.mrf.mxu0  ;;  %v6538_v29 = vsel %vm389_vm0, %v6210_v55, 0.0 }
 0x424   : > { %6815 = vst [vmem:[%s10874_s12 + $0x208] sm:$0xff] %v6687_v37  ;;  %v5499_v28 = vpop.f32.mrf.mxu1  ;;  %6539 = vadd.xlane.f32.xlu1 %v6538_v29 }
 0x425   : > { %v5953_v61 = vadd.f32 %v5825_v32, %v5697_v24  ;;  %v5500_v16 = vadd.f32 %v5499_v28, %v4955_v48  ;;  %v6438_v23 = vpop.xlane.xlu1 %6437  ;;  %v5020_v49 = vpop.f32.mrf.mxu0  ;;  %v5828_v28 = vld [vmem:[#allocation2 + $0x350] sm:$0xff] }
 0x426   : > { %v6688_v39 = vmul.f32 0.0625, %v6438_v23  ;;  %v5501_v11 = vpop.f32.mrf.mxu1  ;;  %v6211_v6 = vld [vmem:[#allocation2 + $0x328] sm:$0xff] }
 0x427   : > { %6082 = vst.msk [vmem:[#allocation2 + $0x338] sm:$0xff] %vm389_vm0, %v5953_v61  ;;  %v5698_v30 = vmax.f32 %v5500_v16, 0.0  ;;  %v11515_v57 = vpop.f32.mrf.mxu0  ;;  %v6541_v60 = vsel %vm389_vm0, %v6211_v6, 0.0 }
 0x428   : > { %6816 = vst [vmem:[%s10874_s12 + $0x210] sm:$0xff] %v6688_v39  ;;  %v5502_v22 = vpop.f32.mrf.mxu1  ;;  %6542 = vadd.xlane.f32.xlu0 %v6541_v60 }
 0x429   : > { %v5954_v10 = vadd.f32 %v5826_v31, %v5698_v30  ;;  %v5503_v20 = vadd.f32 %v5502_v22, %v4958_v42  ;;  %v6441_v50 = vpop.xlane.xlu0 %6440  ;;  %v5023_v7 = vpop.f32.mrf.mxu0  ;;  %v5829_v30 = vld [vmem:[#allocation2 + $0x358] sm:$0xff] }
 0x42a   : > { %v6689_v44 = vmul.f32 0.0625, %v6441_v50  ;;  %v5504_v17 = vpop.f32.mrf.mxu1  ;;  %v6212_v45 = vld [vmem:[#allocation2 + $0x330] sm:$0xff] }
 0x42b   : > { %6083 = vst.msk [vmem:[#allocation2 + $0x340] sm:$0xff] %vm389_vm0, %v5954_v10  ;;  %v5699_v5 = vmax.f32 %v5503_v20, 0.0  ;;  %v11522_v32 = vpop.f32.mrf.mxu0  ;;  %v6544_v37 = vsel %vm389_vm0, %v6212_v45, 0.0 }
 0x42c   : > { %6817 = vst [vmem:[%s10874_s12 + $0x218] sm:$0xff] %v6689_v44  ;;  %v5507_v63 = vpop.f32.mrf.mxu1  ;;  %6545 = vadd.xlane.f32.xlu1 %v6544_v37 }
 0x42d   : > { %v5955_v55 = vadd.f32 %v5827_v18, %v5699_v5  ;;  %v5508_v48 = vadd.f32 %v5507_v63, %v4963_v2  ;;  %v6444_v24 = vpop.xlane.xlu1 %6443  ;;  %v5028_v29 = vpop.f32.mrf.mxu0  ;;  %v5830_v5 = vld [vmem:[#allocation2 + $0x360] sm:$0xff] }
 0x42e   : > { %v6690_v61 = vmul.f32 0.0625, %v6444_v24  ;;  %v5509_v16 = vpop.f32.mrf.mxu1  ;;  %v6213_v23 = vld [vmem:[#allocation2 + $0x338] sm:$0xff] }
 0x42f   : > { %6084 = vst.msk [vmem:[#allocation2 + $0x348] sm:$0xff] %vm389_vm0, %v5955_v55  ;;  %v5700_v41 = vmax.f32 %v5508_v48, 0.0  ;;  %v11529_v49 = vpop.f32.mrf.mxu0  ;;  %v6547_v31 = vsel %vm389_vm0, %v6213_v23, 0.0 }
 0x430   : > { %6818 = vst [vmem:[%s10874_s12 + $0x220] sm:$0xff] %v6690_v61  ;;  %v5510_v39 = vpop.f32.mrf.mxu1  ;;  %6548 = vadd.xlane.f32.xlu0 %v6547_v31 }
 0x431   : > { %v5956_v11 = vadd.f32 %v5828_v28, %v5700_v41  ;;  %v5511_v6 = vadd.f32 %v5510_v39, %v4966_v36  ;;  %v6447_v46 = vpop.xlane.xlu0 %6446  ;;  %v5031_v42 = vpop.f32.mrf.mxu0  ;;  %v5831_v41 = vld [vmem:[#allocation2 + $0x368] sm:$0xff] }
 0x432   : > { %v6691_v60 = vmul.f32 0.0625, %v6447_v46  ;;  %v5512_v22 = vpop.f32.mrf.mxu1  ;;  %v6214_v10 = vld [vmem:[#allocation2 + $0x340] sm:$0xff] }
 0x433   : > { %6085 = vst.msk [vmem:[#allocation2 + $0x350] sm:$0xff] %vm389_vm0, %v5956_v11  ;;  %v5701_v20 = vmax.f32 %v5511_v6, 0.0  ;;  %v11536_v50 = vpop.f32.mrf.mxu0  ;;  %v6550_v7 = vsel %vm389_vm0, %v6214_v10, 0.0 }
 0x434   : > { %6819 = vst [vmem:[%s10874_s12 + $0x228] sm:$0xff] %v6691_v60  ;;  %v5515_v18 = vpop.f32.mrf.mxu1  ;;  %6551 = vadd.xlane.f32.xlu1 %v6550_v7 }
 0x435   : > { %v5957_v44 = vadd.f32 %v5829_v30, %v5701_v20  ;;  %v5516_v17 = vadd.f32 %v5515_v18, %v4971_v4  ;;  %v6450_v45 = vpop.xlane.xlu1 %6449  ;;  %v5036_v2 = vpop.f32.mrf.mxu0 }
 0x436   : > { %v6692_v37 = vmul.f32 0.0625, %v6450_v45  ;;  %v5517_v63 = vpop.f32.mrf.mxu1  ;;  %v6215_v55 = vld [vmem:[#allocation2 + $0x348] sm:$0xff] }
 0x437   : > { %6086 = vst.msk [vmem:[#allocation2 + $0x358] sm:$0xff] %vm389_vm0, %v5957_v44  ;;  %v5702_v48 = vmax.f32 %v5516_v17, 0.0  ;;  %v11543_v24 = vpop.f32.mrf.mxu0  ;;  %v6553_v29 = vsel %vm389_vm0, %v6215_v55, 0.0  ;;  %v5833_v63 = vld [vmem:[#allocation2 + $0x378] sm:$0xff] }
 0x438   : > { %6820 = vst [vmem:[%s10874_s12 + $0x230] sm:$0xff] %v6692_v37  ;;  %v5518_v28 = vpop.f32.mrf.mxu1  ;;  %6554 = vadd.xlane.f32.xlu0 %v6553_v29 }
 0x439   : > { %v5958_v61 = vadd.f32 %v5830_v5, %v5702_v48  ;;  %v5519_v16 = vadd.f32 %v5518_v28, %v4974_v14  ;;  %v6453_v23 = vpop.xlane.xlu0 %6452  ;;  %v5039_v36 = vpop.f32.mrf.mxu0 }
 0x43a   : > { %v6693_v31 = vmul.f32 0.0625, %v6453_v23  ;;  %v5520_v39 = vpop.f32.mrf.mxu1  ;;  %v6216_v11 = vld [vmem:[#allocation2 + $0x350] sm:$0xff]  ;;  %v5834_v36 = vld [vmem:[#allocation2 + $0x380] sm:$0xff] }
 0x43b   : > { %6087 = vst.msk [vmem:[#allocation2 + $0x360] sm:$0xff] %vm389_vm0, %v5958_v61  ;;  %v5703_v21 = vmax.f32 %v5519_v16, 0.0  ;;  %v11550_v6 = vpop.f32.mrf.mxu0  ;;  %v6556_v46 = vsel %vm389_vm0, %v6216_v11, 0.0  ;;  %v11969_v11 = vld [vmem:[#allocation68_spill] sm:$0xff] }
 0x43c   : > { %6821 = vst [vmem:[%s10874_s12 + $0x238] sm:$0xff] %v6693_v31  ;;  %v5523_v42 = vpop.f32.mrf.mxu1  ;;  %6557 = vadd.xlane.f32.xlu1 %v6556_v46 }
 0x43d   : > { %v5959_v30 = vadd.f32 %v5831_v41, %v5703_v21  ;;  %v5524_v60 = vadd.f32 %v5523_v42, %v4979_v35  ;;  %v6456_v22 = vpop.xlane.xlu1 %6455  ;;  %v5044_v10 = vpop.f32.mrf.mxu0  ;;  %v4990_v35 = vadd.f32 %v11459_v9, %v11969_v11 }
 0x43e   : > { %v6694_v4 = vmul.f32 0.0625, %v6456_v22  ;;  %v5525_v20 = vpop.f32.mrf.mxu1  ;;  %v6217_v7 = vld [vmem:[#allocation2 + $0x358] sm:$0xff] }
 0x43f   : > { %6088 = vst.msk [vmem:[#allocation2 + $0x368] sm:$0xff] %vm389_vm0, %v5959_v30  ;;  %v5704_v26 = vmax.f32 %v5524_v60, 0.0  ;;  %v11557_v18 = vpop.f32.mrf.mxu0  ;;  %v6559_v44 = vsel %vm389_vm0, %v6217_v7, 0.0  ;;  %v5835_v60 = vld [vmem:[#allocation2 + $0x388] sm:$0xff] }
 0x440   : > { %6822 = vst [vmem:[%s10874_s12 + $0x240] sm:$0xff] %v6694_v4  ;;  %v5526_v17 = vpop.f32.mrf.mxu1  ;;  %6560 = vadd.xlane.f32.xlu0 %v6559_v44  ;;  %v4995_v4 = vadd.f32 %v11466_v56, %v10711_v58 }
 0x441   : > { %v5960_v45 = vadd.f32 %v5832_v52, %v5704_v26  ;;  %v5527_v2 = vadd.f32 %v5526_v17, %v4982_v3  ;;  %v6459_v5 = vpop.xlane.xlu0 %6458  ;;  %v5047_v37 = vpop.f32.mrf.mxu0  ;;  %v5836_v17 = vld [vmem:[#allocation2 + $0x390] sm:$0xff] }
 0x442   : > { %v6695_v55 = vmul.f32 0.0625, %v6459_v5  ;;  %v5528_v14 = vpop.f32.mrf.mxu1  ;;  %v6218_v48 = vld [vmem:[#allocation2 + $0x360] sm:$0xff]  ;;  %v4998_v37 = vadd.f32 %v11473_v12, %v10725_v25 }
 0x443   : > { %6089 = vst.msk [vmem:[#allocation2 + $0x370] sm:$0xff] %vm389_vm0, %v5960_v45  ;;  %v5705_v0 = vmax.f32 %v5527_v2, 0.0  ;;  %v6562_v29 = vsel %vm389_vm0, %v6218_v48, 0.0 }
 0x444   : > { %6823 = vst [vmem:[%s10874_s12 + $0x248] sm:$0xff] %v6695_v55  ;;  %v5531_v28 = vpop.f32.mrf.mxu1  ;;  %6563 = vadd.xlane.f32.xlu1 %v6562_v29 }
 0x445   : > { %v5961_v61 = vadd.f32 %v5833_v63, %v5705_v0  ;;  %v5532_v16 = vadd.f32 %v5531_v28, %v4987_v51  ;;  %v6462_v23 = vpop.xlane.xlu1 %6461  ;;  %v5837_v51 = vld [vmem:[#allocation2 + $0x398] sm:$0xff] }
 0x446   : > { %v6696_v41 = vmul.f32 0.0625, %v6462_v23  ;;  %v5533_v31 = vpop.f32.mrf.mxu1  ;;  %v6219_v39 = vld [vmem:[#allocation2 + $0x368] sm:$0xff] }
 0x447   : > { %6090 = vst.msk [vmem:[#allocation2 + $0x378] sm:$0xff] %vm389_vm0, %v5961_v61  ;;  %v5706_v33 = vmax.f32 %v5532_v16, 0.0  ;;  %v6565_v53 = vsel %vm389_vm0, %v6219_v39, 0.0  ;;  %v11970_v61 = vld [vmem:[#allocation69_spill] sm:$0xff]  ;;  %v5838_v39 = vld [vmem:[#allocation2 + $0x3a0] sm:$0xff] }
 0x448   : > { %6824 = vst [vmem:[%s10874_s12 + $0x250] sm:$0xff] %v6696_v41  ;;  %v5534_v21 = vpop.f32.mrf.mxu1  ;;  %6566 = vadd.xlane.f32.xlu0 %v6565_v53  ;;  %v5003_v16 = vadd.f32 %v11480_v43, %v11970_v61  ;;  %v5006_v53 = vadd.f32 %v11487_v19, %v10741_v40 }
 0x449   : > { %v5962_v46 = vadd.f32 %v5834_v36, %v5706_v33  ;;  %v5535_v42 = vadd.f32 %v5534_v21, %v4990_v35  ;;  %v6465_v30 = vpop.xlane.xlu0 %6464 }
 0x44a   : > { %v6697_v22 = vmul.f32 0.0625, %v6465_v30  ;;  %v5536_v10 = vpop.f32.mrf.mxu1  ;;  %v6220_v52 = vld [vmem:[#allocation2 + $0x370] sm:$0xff] }
 0x44b   : > { %6091 = vst.msk [vmem:[#allocation2 + $0x380] sm:$0xff] %vm389_vm0, %v5962_v46  ;;  %v5707_v9 = vmax.f32 %v5535_v42, 0.0  ;;  %v6568_v20 = vsel %vm389_vm0, %v6220_v52, 0.0 }
 0x44c   : > { %6825 = vst [vmem:[%s10874_s12 + $0x258] sm:$0xff] %v6697_v22  ;;  %v5539_v7 = vpop.f32.mrf.mxu1  ;;  %6569 = vadd.xlane.f32.xlu1 %v6568_v20  ;;  %v5839_v22 = vld [vmem:[#allocation2 + $0x3a8] sm:$0xff] }
 0x44d   : > { %v5963_v3 = vadd.f32 %v5835_v60, %v5707_v9  ;;  %v5540_v26 = vadd.f32 %v5539_v7, %v4995_v4  ;;  %v6468_v44 = vpop.xlane.xlu1 %6467  ;;  %v5011_v9 = vadd.f32 %v11494_v15, %v10755_v47 }
 0x44e   : > { %v6698_v45 = vmul.f32 0.0625, %v6468_v44  ;;  %v5541_v2 = vpop.f32.mrf.mxu1  ;;  %v6221_v5 = vld [vmem:[#allocation2 + $0x378] sm:$0xff]  ;;  %v5840_v44 = vld [vmem:[#allocation2 + $0x3b0] sm:$0xff] }
 0x44f   : > { %6092 = vst.msk [vmem:[#allocation2 + $0x388] sm:$0xff] %vm389_vm0, %v5963_v3  ;;  %v5708_v58 = vmax.f32 %v5540_v26, 0.0  ;;  %v6571_v56 = vsel %vm389_vm0, %v6221_v5, 0.0  ;;  %v5014_v5 = vadd.f32 %v11501_v34, %v10769_v1 }
 0x450   : > { %6826 = vst [vmem:[%s10874_s12 + $0x260] sm:$0xff] %v6698_v45  ;;  %v5542_v63 = vpop.f32.mrf.mxu1  ;;  %6572 = vadd.xlane.f32.xlu0 %v6571_v56 }
 0x451   : > { %v5964_v55 = vadd.f32 %v5836_v17, %v5708_v58  ;;  %v5543_v14 = vadd.f32 %v5542_v63, %v4998_v37  ;;  %v6471_v48 = vpop.xlane.xlu0 %6470 }
 0x452   : > { %v6699_v0 = vmul.f32 0.0625, %v6471_v48  ;;  %v5544_v29 = vpop.f32.mrf.mxu1  ;;  %v6222_v28 = vld [vmem:[#allocation2 + $0x380] sm:$0xff] }
 0x453   : > { %6093 = vst.msk [vmem:[#allocation2 + $0x390] sm:$0xff] %vm389_vm0, %v5964_v55  ;;  %v5709_v25 = vmax.f32 %v5543_v14, 0.0  ;;  %v6574_v12 = vsel %vm389_vm0, %v6222_v28, 0.0  ;;  %v5841_v55 = vld [vmem:[#allocation2 + $0x3b8] sm:$0xff] }
 0x454   : > { %6827 = vst [vmem:[%s10874_s12 + $0x268] sm:$0xff] %v6699_v0  ;;  %v5547_v23 = vpop.f32.mrf.mxu1  ;;  %6575 = vadd.xlane.f32.xlu1 %v6574_v12  ;;  %v5019_v0 = vadd.f32 %v11508_v13, %v10771_v8 }
 0x455   : > { %v5965_v36 = vadd.f32 %v5837_v51, %v5709_v25  ;;  %v5548_v41 = vadd.f32 %v5547_v23, %v5003_v16  ;;  %v6474_v31 = vpop.xlane.xlu1 %6473  ;;  %v5842_v25 = vld [vmem:[#allocation2 + $0x3c0] sm:$0xff] }
 0x456   : > { %v6700_v11 = vmul.f32 0.0625, %v6474_v31  ;;  %v5549_v35 = vpop.f32.mrf.mxu1  ;;  %v6223_v33 = vld [vmem:[#allocation2 + $0x388] sm:$0xff] }
 0x457   : > { %6094 = vst.msk [vmem:[#allocation2 + $0x398] sm:$0xff] %vm389_vm0, %v5965_v36  ;;  %v5710_v43 = vmax.f32 %v5548_v41, 0.0  ;;  %v6577_v21 = vsel %vm389_vm0, %v6223_v33, 0.0  ;;  %v11971_v41 = vld [vmem:[#allocation70_spill] sm:$0xff] }
 0x458   : > { %6828 = vst [vmem:[%s10874_s12 + $0x270] sm:$0xff] %v6700_v11  ;;  %v5550_v46 = vpop.f32.mrf.mxu1  ;;  %6578 = vadd.xlane.f32.xlu0 %v6577_v21  ;;  %v5022_v31 = vadd.f32 %v11515_v57, %v11971_v41 }
 0x459   : > { %v5966_v42 = vadd.f32 %v5838_v39, %v5710_v43  ;;  %v5551_v30 = vadd.f32 %v5550_v46, %v5006_v53  ;;  %v6477_v60 = vpop.xlane.xlu0 %6476  ;;  %v5843_v53 = vld [vmem:[#allocation2 + $0x3c8] sm:$0xff] }
 0x45a   : > { %v6701_v10 = vmul.f32 0.0625, %v6477_v60  ;;  %v5552_v52 = vpop.f32.mrf.mxu1  ;;  %v6224_v4 = vld [vmem:[#allocation2 + $0x390] sm:$0xff] }
 0x45b   : > { %6095 = vst.msk [vmem:[#allocation2 + $0x3a0] sm:$0xff] %vm389_vm0, %v5966_v42  ;;  %v5711_v40 = vmax.f32 %v5551_v30, 0.0  ;;  %v6580_v19 = vsel %vm389_vm0, %v6224_v4, 0.0  ;;  %v5027_v42 = vadd.f32 %v11522_v32, %v10799_v62  ;;  %v5844_v4 = vld [vmem:[#allocation2 + $0x3d0] sm:$0xff] }
 0x45c   : > { %6829 = vst [vmem:[%s10874_s12 + $0x278] sm:$0xff] %v6701_v10  ;;  %v5555_v20 = vpop.f32.mrf.mxu1  ;;  %6581 = vadd.xlane.f32.xlu1 %v6580_v19 }
 0x45d   : > { %v5967_v7 = vadd.f32 %v5839_v22, %v5711_v40  ;;  %v5556_v3 = vadd.f32 %v5555_v20, %v5011_v9  ;;  %v6480_v26 = vpop.xlane.xlu1 %6479  ;;  %v5030_v20 = vadd.f32 %v11529_v49, %v10813_v38 }
 0x45e   : > { %v6702_v17 = vmul.f32 0.0625, %v6480_v26  ;;  %v5557_v45 = vpop.f32.mrf.mxu1  ;;  %v6225_v2 = vld [vmem:[#allocation2 + $0x398] sm:$0xff] }
 0x45f   : > { %6096 = vst.msk [vmem:[#allocation2 + $0x3a8] sm:$0xff] %vm389_vm0, %v5967_v7  ;;  %v5712_v47 = vmax.f32 %v5556_v3, 0.0  ;;  %v6583_v15 = vsel %vm389_vm0, %v6225_v2, 0.0 }
 0x460   : > { %6830 = vst [vmem:[%s10874_s12 + $0x280] sm:$0xff] %v6702_v17  ;;  %v5558_v37 = vpop.f32.mrf.mxu1  ;;  %6584 = vadd.xlane.f32.xlu0 %v6583_v15  ;;  %v5845_v17 = vld [vmem:[#allocation2 + $0x3d8] sm:$0xff] }
 0x461   : > { %v5968_v58 = vadd.f32 %v5840_v44, %v5712_v47  ;;  %v5559_v56 = vadd.f32 %v5558_v37, %v5014_v5  ;;  %v6483_v63 = vpop.xlane.xlu0 %6482  ;;  %v11972_v47 = vld [vmem:[#allocation71_spill] sm:$0xff] }
 0x462   : > { %v6703_v14 = vmul.f32 0.0625, %v6483_v63  ;;  %v5560_v48 = vpop.f32.mrf.mxu1  ;;  %v6226_v51 = vld [vmem:[#allocation2 + $0x3a0] sm:$0xff]  ;;  %v5035_v15 = vadd.f32 %v11536_v50, %v11972_v47 }
 0x463   : > { %6097 = vst.msk [vmem:[#allocation2 + $0x3b0] sm:$0xff] %vm389_vm0, %v5968_v58  ;;  %v5713_v1 = vmax.f32 %v5559_v56, 0.0  ;;  %v6586_v34 = vsel %vm389_vm0, %v6226_v51, 0.0 }
 0x464   : > { %6831 = vst [vmem:[%s10874_s12 + $0x288] sm:$0xff] %v6703_v14  ;;  %v5563_v29 = vpop.f32.mrf.mxu1  ;;  %6587 = vadd.xlane.f32.xlu1 %v6586_v34 }
 0x465   : > { %v5969_v28 = vadd.f32 %v5841_v55, %v5713_v1  ;;  %v5564_v61 = vadd.f32 %v5563_v29, %v5019_v0  ;;  %v6486_v16 = vpop.xlane.xlu1 %6485  ;;  %v5846_v55 = vld [vmem:[#allocation2 + $0x3e0] sm:$0xff]  ;;  %v5038_v0 = vadd.f32 %v11543_v24, %v10829_v54 }
 0x466   : > { %v6704_v12 = vmul.f32 0.0625, %v6486_v16  ;;  %v5565_v23 = vpop.f32.mrf.mxu1  ;;  %v6227_v36 = vld [vmem:[#allocation2 + $0x3a8] sm:$0xff] }
 0x467   : > { %6098 = vst.msk [vmem:[#allocation2 + $0x3b8] sm:$0xff] %vm389_vm0, %v5969_v28  ;;  %v5714_v8 = vmax.f32 %v5564_v61, 0.0  ;;  %v6589_v13 = vsel %vm389_vm0, %v6227_v36, 0.0  ;;  %v5847_v16 = vld [vmem:[#allocation2 + $0x3e8] sm:$0xff]  ;;  %v5043_v36 = vadd.f32 %v11550_v6, %v10844_v27 }
 0x468   : > { %6832 = vst [vmem:[%s10874_s12 + $0x290] sm:$0xff] %v6704_v12  ;;  %v5566_v39 = vpop.f32.mrf.mxu1  ;;  %6590 = vadd.xlane.f32.xlu0 %v6589_v13 }
 0x469   : > { %v5970_v11 = vadd.f32 %v5842_v25, %v5714_v8  ;;  %v5567_v35 = vadd.f32 %v5566_v39, %v5022_v31  ;;  %v6489_v33 = vpop.xlane.xlu0 %6488  ;;  %v5848_v39 = vld [vmem:[#allocation2 + $0x3f0] sm:$0xff] }
 0x46a   : > { %v6705_v43 = vmul.f32 0.0625, %v6489_v33  ;;  %v5568_v21 = vpop.f32.mrf.mxu1  ;;  %v6228_v46 = vld [vmem:[#allocation2 + $0x3b0] sm:$0xff] }
 0x46b   : > { %6099 = vst.msk [vmem:[#allocation2 + $0x3c0] sm:$0xff] %vm389_vm0, %v5970_v11  ;;  %v5715_v57 = vmax.f32 %v5567_v35, 0.0  ;;  %v6592_v30 = vsel %vm389_vm0, %v6228_v46, 0.0 }
 0x46c   : > { %6833 = vst [vmem:[%s10874_s12 + $0x298] sm:$0xff] %v6705_v43  ;;  %v5571_v60 = vpop.f32.mrf.mxu1  ;;  %6593 = vadd.xlane.f32.xlu1 %v6592_v30 }
 0x46d   : > { %v5971_v22 = vadd.f32 %v5843_v53, %v5715_v57  ;;  %v5572_v10 = vadd.f32 %v5571_v60, %v5027_v42  ;;  %v6492_v52 = vpop.xlane.xlu1 %6491  ;;  %v5046_v53 = vadd.f32 %v11557_v18, %v10860_v59  ;;  %v5849_v57 = vld [vmem:[#allocation2 + $0x3f8] sm:$0xff] }
 0x46e   : > { %v6706_v9 = vmul.f32 0.0625, %v6492_v52  ;;  %v5573_v40 = vpop.f32.mrf.mxu1  ;;  %v6229_v19 = vld [vmem:[#allocation2 + $0x3b8] sm:$0xff] }
 0x46f   : > { %6100 = vst.msk [vmem:[#allocation2 + $0x3c8] sm:$0xff] %vm389_vm0, %v5971_v22  ;;  %v5716_v62 = vmax.f32 %v5572_v10, 0.0  ;;  %v6595_v32 = vsel %vm389_vm0, %v6229_v19, 0.0 }
 0x470   : > { %6834 = vst [vmem:[%s10874_s12 + $0x2a0] sm:$0xff] %v6706_v9  ;;  %v5574_v7 = vpop.f32.mrf.mxu1  ;;  %6596 = vadd.xlane.f32.xlu0 %v6595_v32 }
 0x471   : > { %v5972_v3 = vadd.f32 %v5844_v4, %v5716_v62  ;;  %v5575_v26 = vadd.f32 %v5574_v7, %v5030_v20  ;;  %v6495_v44 = vpop.xlane.xlu0 %6494 }
 0x472   : > { %v6707_v45 = vmul.f32 0.0625, %v6495_v44  ;;  %v5576_v2 = vpop.f32.mrf.mxu1  ;;  %v6230_v5 = vld [vmem:[#allocation2 + $0x3c0] sm:$0xff] }
 0x473   : > { %6101 = vst.msk [vmem:[#allocation2 + $0x3d0] sm:$0xff] %vm389_vm0, %v5972_v3  ;;  %v5717_v38 = vmax.f32 %v5575_v26, 0.0  ;;  %v6598_v49 = vsel %vm389_vm0, %v6230_v5, 0.0 }
 0x474   : > { %6835 = vst [vmem:[%s10874_s12 + $0x2a8] sm:$0xff] %v6707_v45  ;;  %v5579_v37 = vpop.f32.mrf.mxu1  ;;  %6599 = vadd.xlane.f32.xlu1 %v6598_v49 }
 0x475   : > { %v5973_v58 = vadd.f32 %v5845_v17, %v5717_v38  ;;  %v5580_v56 = vadd.f32 %v5579_v37, %v5035_v15  ;;  %v6498_v63 = vpop.xlane.xlu1 %6497 }
 0x476   : > { %v6708_v14 = vmul.f32 0.0625, %v6498_v63  ;;  %v5581_v48 = vpop.f32.mrf.mxu1  ;;  %v6231_v51 = vld [vmem:[#allocation2 + $0x3c8] sm:$0xff] }
 0x477   : > { %6102 = vst.msk [vmem:[#allocation2 + $0x3d8] sm:$0xff] %vm389_vm0, %v5973_v58  ;;  %v5718_v50 = vmax.f32 %v5580_v56, 0.0  ;;  %v6601_v1 = vsel %vm389_vm0, %v6231_v51, 0.0 }
 0x478   : > { %6836 = vst [vmem:[%s10874_s12 + $0x2b0] sm:$0xff] %v6708_v14  ;;  %v5582_v34 = vpop.f32.mrf.mxu1  ;;  %6602 = vadd.xlane.f32.xlu0 %v6601_v1 }
 0x479   : > { %v5974_v29 = vadd.f32 %v5846_v55, %v5718_v50  ;;  %v5583_v28 = vadd.f32 %v5582_v34, %v5038_v0  ;;  %v6501_v61 = vpop.xlane.xlu0 %6500 }
 0x47a   : > { %v6709_v25 = vmul.f32 0.0625, %v6501_v61  ;;  %v5584_v12 = vpop.f32.mrf.mxu1  ;;  %v6232_v23 = vld [vmem:[#allocation2 + $0x3d0] sm:$0xff] }
 0x47b   : > { %6103 = vst.msk [vmem:[#allocation2 + $0x3e0] sm:$0xff] %vm389_vm0, %v5974_v29  ;;  %v5719_v54 = vmax.f32 %v5583_v28, 0.0  ;;  %v6604_v24 = vsel %vm389_vm0, %v6232_v23, 0.0 }
 0x47c   : > { %6837 = vst [vmem:[%s10874_s12 + $0x2b8] sm:$0xff] %v6709_v25  ;;  %v5587_v41 = vpop.f32.mrf.mxu1  ;;  %6605 = vadd.xlane.f32.xlu1 %v6604_v24 }
 0x47d   : > { %v5975_v31 = vadd.f32 %v5847_v16, %v5719_v54  ;;  %v5588_v8 = vadd.f32 %v5587_v41, %v5043_v36  ;;  %v6504_v13 = vpop.xlane.xlu1 %6503 }
 0x47e   : > { %v6710_v11 = vmul.f32 0.0625, %v6504_v13  ;;  %v5589_v35 = vpop.f32.mrf.mxu1  ;;  %v6233_v33 = vld [vmem:[#allocation2 + $0x3d8] sm:$0xff] }
 0x47f   : > { %6104 = vst.msk [vmem:[#allocation2 + $0x3e8] sm:$0xff] %vm389_vm0, %v5975_v31  ;;  %v5720_v27 = vmax.f32 %v5588_v8, 0.0  ;;  %v6607_v6 = vsel %vm389_vm0, %v6233_v33, 0.0 }
 0x480   : > { %6838 = vst [vmem:[%s10874_s12 + $0x2c0] sm:$0xff] %v6710_v11  ;;  %v5590_v43 = vpop.f32.mrf.mxu1  ;;  %6608 = vadd.xlane.f32.xlu0 %v6607_v6 }
 0x481   : > { %v5976_v21 = vadd.f32 %v5848_v39, %v5720_v27  ;;  %v5591_v46 = vadd.f32 %v5590_v43, %v5046_v53  ;;  %v6507_v42 = vpop.xlane.xlu0 %6506 }
 0x482   : > { %v6711_v30 = vmul.f32 0.0625, %v6507_v42  ;;  %v6234_v60 = vld [vmem:[#allocation2 + $0x3e0] sm:$0xff]  ;;  %v5592_v22 = vpop.f32.mrf.mxu1 }
 0x483   : > { %6105 = vst.msk [vmem:[#allocation2 + $0x3f0] sm:$0xff] %vm389_vm0, %v5976_v21  ;;  %v5721_v59 = vmax.f32 %v5591_v46, 0.0  ;;  %v6610_v18 = vsel %vm389_vm0, %v6234_v60, 0.0 }
 0x484   : > { %6839 = vst [vmem:[%s10874_s12 + $0x2c8] sm:$0xff] %v6711_v30  ;;  %6611 = vadd.xlane.f32.xlu1 %v6610_v18 }
 0x485   : > { %v5977_v10 = vadd.f32 %v5849_v57, %v5721_v59  ;;  %v6510_v52 = vpop.xlane.xlu1 %6509 }
 0x486   : > { %v6712_v4 = vmul.f32 0.0625, %v6510_v52  ;;  %v6235_v9 = vld [vmem:[#allocation2 + $0x3e8] sm:$0xff] }
 0x487   : > { %6106 = vst.msk [vmem:[#allocation2 + $0x3f8] sm:$0xff] %vm389_vm0, %v5977_v10  ;;  %v6613_v40 = vsel %vm389_vm0, %v6235_v9, 0.0 }
 0x488   : > { %6840 = vst [vmem:[%s10874_s12 + $0x2d0] sm:$0xff] %v6712_v4  ;;  %6614 = vadd.xlane.f32.xlu0 %v6613_v40 }
 0x489   : > { %v6513_v19 = vpop.xlane.xlu0 %6512 }
 0x48a   : > { %v6713_v20 = vmul.f32 0.0625, %v6513_v19  ;;  %v6236_v62 = vld [vmem:[#allocation2 + $0x3f0] sm:$0xff] }
 0x48b   : > { %v6616_v32 = vsel %vm389_vm0, %v6236_v62, 0.0 }
 0x48c   : > { %6841 = vst [vmem:[%s10874_s12 + $0x2d8] sm:$0xff] %v6713_v20  ;;  %6617 = vadd.xlane.f32.xlu1 %v6616_v32 }
 0x48d   : > { %v6516_v7 = vpop.xlane.xlu1 %6515 }
 0x48e   : > { %v6714_v3 = vmul.f32 0.0625, %v6516_v7  ;;  %v6237_v26 = vld [vmem:[#allocation2 + $0x3f8] sm:$0xff] }
 0x48f   : > { %v6619_v44 = vsel %vm389_vm0, %v6237_v26, 0.0 }
 0x490   : > { %6842 = vst [vmem:[%s10874_s12 + $0x2e0] sm:$0xff] %v6714_v3  ;;  %6620 = vadd.xlane.f32.xlu0 %v6619_v44 }
 0x491   : > { %v6519_v17 = vpop.xlane.xlu0 %6518 }
 0x492   : > { %v6715_v45 = vmul.f32 0.0625, %v6519_v17 }
 0x494   : > { %6843 = vst [vmem:[%s10874_s12 + $0x2e8] sm:$0xff] %v6715_v45 }
 0x495   : > { %v6522_v2 = vpop.xlane.xlu1 %6521 }
 0x496   : > { %v6716_v5 = vmul.f32 0.0625, %v6522_v2 }
 0x498   : > { %6844 = vst [vmem:[%s10874_s12 + $0x2f0] sm:$0xff] %v6716_v5 }
 0x499   : > { %v6525_v47 = vpop.xlane.xlu0 %6524 }
 0x49a   : > { %v6717_v15 = vmul.f32 0.0625, %v6525_v47 }
 0x49c   : > { %6845 = vst [vmem:[%s10874_s12 + $0x2f8] sm:$0xff] %v6717_v15 }
 0x49d   : > { %v6528_v38 = vpop.xlane.xlu1 %6527 }
 0x49e   : > { %v6718_v49 = vmul.f32 0.0625, %v6528_v38 }
 0x4a0   : > { %6846 = vst [vmem:[%s10874_s12 + $0x300] sm:$0xff] %v6718_v49 }
 0x4a1   : > { %v6531_v37 = vpop.xlane.xlu0 %6530 }
 0x4a2   : > { %v6719_v58 = vmul.f32 0.0625, %v6531_v37 }
 0x4a4   : > { %6847 = vst [vmem:[%s10874_s12 + $0x308] sm:$0xff] %v6719_v58 }
 0x4a5   : > { %v6534_v56 = vpop.xlane.xlu1 %6533 }
 0x4a6   : > { %v6720_v63 = vmul.f32 0.0625, %v6534_v56 }
 0x4a8   : > { %6848 = vst [vmem:[%s10874_s12 + $0x310] sm:$0xff] %v6720_v63 }
 0x4a9   : > { %v6537_v55 = vpop.xlane.xlu0 %6536 }
 0x4aa   : > { %v6721_v14 = vmul.f32 0.0625, %v6537_v55 }
 0x4ac   : > { %6849 = vst [vmem:[%s10874_s12 + $0x318] sm:$0xff] %v6721_v14 }
 0x4ad   : > { %v6540_v48 = vpop.xlane.xlu1 %6539 }
 0x4ae   : > { %v6722_v51 = vmul.f32 0.0625, %v6540_v48 }
 0x4b0   : > { %6850 = vst [vmem:[%s10874_s12 + $0x320] sm:$0xff] %v6722_v51 }
 0x4b1   : > { %v6543_v0 = vpop.xlane.xlu0 %6542 }
 0x4b2   : > { %v6723_v50 = vmul.f32 0.0625, %v6543_v0 }
 0x4b4   : > { %6851 = vst [vmem:[%s10874_s12 + $0x328] sm:$0xff] %v6723_v50 }
 0x4b5   : > { %v6546_v1 = vpop.xlane.xlu1 %6545 }
 0x4b6   : > { %v6724_v34 = vmul.f32 0.0625, %v6546_v1 }
 0x4b8   : > { %6852 = vst [vmem:[%s10874_s12 + $0x330] sm:$0xff] %v6724_v34 }
 0x4b9   : > { %v6549_v29 = vpop.xlane.xlu0 %6548 }
 0x4ba   : > { %v6725_v28 = vmul.f32 0.0625, %v6549_v29 }
 0x4bc   : > { %6853 = vst [vmem:[%s10874_s12 + $0x338] sm:$0xff] %v6725_v28 }
 0x4bd   : > { %v6552_v61 = vpop.xlane.xlu1 %6551 }
 0x4be   : > { %v6726_v16 = vmul.f32 0.0625, %v6552_v61 }
 0x4c0   : > { %6854 = vst [vmem:[%s10874_s12 + $0x340] sm:$0xff] %v6726_v16 }
 0x4c1   : > { %v6555_v25 = vpop.xlane.xlu0 %6554 }
 0x4c2   : > { %v6727_v12 = vmul.f32 0.0625, %v6555_v25 }
 0x4c4   : > { %6855 = vst [vmem:[%s10874_s12 + $0x348] sm:$0xff] %v6727_v12 }
 0x4c5   : > { %v6558_v23 = vpop.xlane.xlu1 %6557 }
 0x4c6   : > { %v6728_v36 = vmul.f32 0.0625, %v6558_v23 }
 0x4c8   : > { %6856 = vst [vmem:[%s10874_s12 + $0x350] sm:$0xff] %v6728_v36 }
 0x4c9   : > { %v6561_v54 = vpop.xlane.xlu0 %6560 }
 0x4ca   : > { %v6729_v24 = vmul.f32 0.0625, %v6561_v54 }
 0x4cc   : > { %6857 = vst [vmem:[%s10874_s12 + $0x358] sm:$0xff] %v6729_v24 }
 0x4cd   : > { %v6564_v41 = vpop.xlane.xlu1 %6563 }
 0x4ce   : > { %v6730_v31 = vmul.f32 0.0625, %v6564_v41 }
 0x4d0   : > { %6858 = vst [vmem:[%s10874_s12 + $0x360] sm:$0xff] %v6730_v31 }
 0x4d1   : > { %v6567_v8 = vpop.xlane.xlu0 %6566 }
 0x4d2   : > { %v6731_v13 = vmul.f32 0.0625, %v6567_v8 }
 0x4d4   : > { %6859 = vst [vmem:[%s10874_s12 + $0x368] sm:$0xff] %v6731_v13 }
 0x4d5   : > { %v6570_v39 = vpop.xlane.xlu1 %6569 }
 0x4d6   : > { %v6732_v11 = vmul.f32 0.0625, %v6570_v39 }
 0x4d8   : > { %6860 = vst [vmem:[%s10874_s12 + $0x370] sm:$0xff] %v6732_v11 }
 0x4d9   : > { %v6573_v35 = vpop.xlane.xlu0 %6572 }
 0x4da   : > { %v6733_v33 = vmul.f32 0.0625, %v6573_v35 }
 0x4dc   : > { %6861 = vst [vmem:[%s10874_s12 + $0x378] sm:$0xff] %v6733_v33 }
 0x4dd   : > { %v6576_v53 = vpop.xlane.xlu1 %6575 }
 0x4de   : > { %v6734_v27 = vmul.f32 0.0625, %v6576_v53 }
 0x4e0   : > { %6862 = vst [vmem:[%s10874_s12 + $0x380] sm:$0xff] %v6734_v27 }
 0x4e1   : > { %v6579_v6 = vpop.xlane.xlu0 %6578 }
 0x4e2   : > { %v6735_v43 = vmul.f32 0.0625, %v6579_v6 }
 0x4e4   : > { %6863 = vst [vmem:[%s10874_s12 + $0x388] sm:$0xff] %v6735_v43 }
 0x4e5   : > { %v6582_v21 = vpop.xlane.xlu1 %6581 }
 0x4e6   : > { %v6736_v46 = vmul.f32 0.0625, %v6582_v21 }
 0x4e8   : > { %6864 = vst [vmem:[%s10874_s12 + $0x390] sm:$0xff] %v6736_v46 }
 0x4e9   : > { %v6585_v42 = vpop.xlane.xlu0 %6584 }
 0x4ea   : > { %v6737_v57 = vmul.f32 0.0625, %v6585_v42 }
 0x4ec   : > { %6865 = vst [vmem:[%s10874_s12 + $0x398] sm:$0xff] %v6737_v57 }
 0x4ed   : > { %v6588_v30 = vpop.xlane.xlu1 %6587 }
 0x4ee   : > { %v6738_v60 = vmul.f32 0.0625, %v6588_v30 }
 0x4f0   : > { %6866 = vst [vmem:[%s10874_s12 + $0x3a0] sm:$0xff] %v6738_v60 }
 0x4f1   : > { %v6591_v22 = vpop.xlane.xlu0 %6590 }
 0x4f2   : > { %v6739_v59 = vmul.f32 0.0625, %v6591_v22 }
 0x4f4   : > { %6867 = vst [vmem:[%s10874_s12 + $0x3a8] sm:$0xff] %v6739_v59 }
 0x4f5   : > { %v6594_v18 = vpop.xlane.xlu1 %6593 }
 0x4f6   : > { %v6740_v10 = vmul.f32 0.0625, %v6594_v18 }
 0x4f8   : > { %6868 = vst [vmem:[%s10874_s12 + $0x3b0] sm:$0xff] %v6740_v10 }
 0x4f9   : > { %v6597_v52 = vpop.xlane.xlu0 %6596 }
 0x4fa   : > { %v6741_v4 = vmul.f32 0.0625, %v6597_v52 }
 0x4fc   : > { %6869 = vst [vmem:[%s10874_s12 + $0x3b8] sm:$0xff] %v6741_v4 }
 0x4fd   : > { %v6600_v9 = vpop.xlane.xlu1 %6599 }
 0x4fe   : > { %v6742_v40 = vmul.f32 0.0625, %v6600_v9 }
 0x500   : > { %6870 = vst [vmem:[%s10874_s12 + $0x3c0] sm:$0xff] %v6742_v40 }
 0x501   : > { %v6603_v19 = vpop.xlane.xlu0 %6602 }
 0x502   : > { %v6743_v20 = vmul.f32 0.0625, %v6603_v19 }
 0x504   : > { %6871 = vst [vmem:[%s10874_s12 + $0x3c8] sm:$0xff] %v6743_v20 }
 0x505   : > { %v6606_v62 = vpop.xlane.xlu1 %6605 }
 0x506   : > { %v6744_v32 = vmul.f32 0.0625, %v6606_v62 }
 0x508   : > { %6872 = vst [vmem:[%s10874_s12 + $0x3d0] sm:$0xff] %v6744_v32 }
 0x509   : > { %v6609_v7 = vpop.xlane.xlu0 %6608 }
 0x50a   : > { %v6745_v3 = vmul.f32 0.0625, %v6609_v7 }
 0x50c   : > { %6873 = vst [vmem:[%s10874_s12 + $0x3d8] sm:$0xff] %v6745_v3 }
 0x50d   : > { %v6612_v26 = vpop.xlane.xlu1 %6611 }
 0x50e   : > { %v6746_v44 = vmul.f32 0.0625, %v6612_v26 }
 0x510   : > { %6874 = vst [vmem:[%s10874_s12 + $0x3e0] sm:$0xff] %v6746_v44 }
 0x511   : > { %v6615_v17 = vpop.xlane.xlu0 %6614 }
 0x512   : > { %v6747_v45 = vmul.f32 0.0625, %v6615_v17 }
 0x514   : > { %6875 = vst [vmem:[%s10874_s12 + $0x3e8] sm:$0xff] %v6747_v45 }
 0x515   : > { %v6618_v2 = vpop.xlane.xlu1 %6617 }
 0x516   : > { %v6748_v5 = vmul.f32 0.0625, %v6618_v2 }
 0x518   : > { %6876 = vst [vmem:[%s10874_s12 + $0x3f0] sm:$0xff] %v6748_v5 }
 0x519   : > { %v6621_v47 = vpop.xlane.xlu0 %6620 }
 0x51a   : > { %v6749_v15 = vmul.f32 0.0625, %v6621_v47 }
 0x51c   : > { %6877 = vst [vmem:[%s10874_s12 + $0x3f8] sm:$0xff] %v6749_v15 }
 0x51d   : > { %8195 = shalt.err (!%p8192_p9)
}
 0x51e   : > { %s8196_s15 = scalar_lea.hbm %s11690_s19, 16384  ;;  %s8200_s8 = scalar_lea.hbm %s11749_s7, 32768 }
 0x51f   : > { %p8197_p12 = scmp.ne.s32.totalorder %s11690_s19, %s8196_s15  ;;  %p8201_p5 = scmp.lt.s32.totalorder %s11690_s19, %s11749_s7 }
 0x520   : > { %p8202_p3 = scmp.lt.s32.totalorder %s8200_s8, %s8196_s15 }
 0x521   : > { %p8198_p1 = pnand %p8197_p12, %p11973_p10 }
 0x522   : > { %p8203_p4 = por %p8202_p3, %p8201_p5 }
 0x523   : > { %p8199_p2 = pneg %p8198_p1 }
 0x525   : > { %p8204_p8 = pnand %p8203_p4, %p8199_p2 }
 0x527   : > { %8207 = shalt.err (!%p8204_p8)
}
 0x528   : > { %s8275_s18 = smov 128   ;;  %s8276_s23 = smov 8  }
 0x529   : > { %7606 = dma.vmem_to_hbm [thread:$0]  (%p11973_p10), %s11692_s17, 16384, %s11690_s19, %s11697_s21, %s8275_s18, %s8275_s18, %s8276_s23  }
 0x52a PF: > { %p7623_p11 = scmp.ge.s32.totalorder %s8266_s29, 2  ;;  %s6909_s27 = sand.u32 1, %s8246_s24  }
 0x52b   : > { %p11974_p13 = scmp.ne.s32.totalorder %s11754_s13, 0  ;;  %s6910_s22 = scalar_lea.sflag [#allocation5], %s6909_s27 }
 0x52d   : > { %p7616_p0 = pnand %p7623_p11, %p11974_p13 }
 0x52f   : > { %p7617_p6 = pneg %p7616_p0 }
 0x531   : > { %8241 = dma.done.wait (%p7617_p6), %s6910_s22, 16384  }
 0x532   : > { %8243 = vsyncadd (%p7617_p6), %s6910_s22, 4294950912  ;;  %s22_s29 = sadd.s32 1, %s8266_s29   ;;  %s11975_s24 = smov %s8250_s25 }
 0x533   : > { %p19_p7 = scmp.ge.s32.totalorder %s22_s29, 4   ;;  %s11976_s25 = smov %s8254_s26 }
 0x534   : > { %s11977_s26 = smov %s8370_s14  ;;  %s11978_s27 = smov %s8262_s28 }
 0x535   : > { %s11979_s28 = smov %s11981_s9  ;;  %21 = sbr.rel (!%p19_p7) target bundleno = 6 (0x6), region = 103 }
 0x53a   :  { %6915 = vsyncpa [#allocation4], 1 }
 0x53b   :  { %6917 = vsyncpa [#allocation4 + $0x1], 1 }
 0x53c   :  { %6918 = vsyncpa [#allocation7], 1 }
 0x53d   :  { %6919 = vsyncpa [#allocation5], 1 }
 0x53e   :  { %6921 = vsyncpa [#allocation5 + $0x1], 1 }

</bundles_post_ra>
